<compile_context>
chip_gen: v7x
topology: tpu7x:2x2x1
jax: 0.10.0
libtpu: 0.0.40
codegen_flags: <defaults>
</compile_context>

<pallas_src>
import jax
import jax.numpy as jnp
from jax.experimental import pallas as pl
from jax.experimental.pallas import tpu as pltpu

# ---- model hyperparameters (consistent with KalmanNetNN.__init__) -----------
N_STATES = 2
N_OBS = 2

D_IN = N_STATES + N_OBS                      # 4
H1 = (N_STATES + N_OBS) * 10 * 8             # 320   (KG_l1 width)
H2 = (N_STATES + N_OBS) * 10 * 1             # 40    (KG_l2 width)
HIDDEN = (N_STATES ** 2 + N_OBS ** 2) * 10   # 80    (GRU hidden)
D_OUT = N_OBS * N_STATES                     # 4     (flattened Kalman gain)
EPS = 1e-12

GATE_PAD = 128                               # per-gate lane padding for fused GRU
BATCH = 16                                   # total independent sequences
T_STEPS = 8                                  # sequence length


def _pick_shards():
  """Use the 'parallel' shard axis only where there are 2 TensorCores (v7x);
  on single-TC v5e/v6e it would just double grid-step overhead."""
  try:
    kind = jax.devices()[0].device_kind.lower()
  except Exception:
    return 1
  return 2 if "v7" in kind else 1


# ----------------------------- Pallas kernel ---------------------------------
def _knet_seq_kernel(
    # inputs
    y_ref,                                   # (T, B, N_OBS)    full sequence slab
    xpost0_ref, xprior0_ref, h0_ref,         # initial state per shard
    prior_ref,                               # (S, O + S) packed [F.T@H.T | F.T]
    w1y_ref, w1x_ref, b1_ref,                # KG_l1 split over [dy_norm, dx_norm]
    wih_ref, bih_ref, whh_ref, bhhn_ref,     # fused/padded GRU, gate order [r,z,n]
    w2_ref, b2_ref, w3_ref, b3_ref,          # KG_l2 / KG_l3 (W3 cols obs-major)
    # outputs (full-T blocks, one HBM writeback per shard)
    xpost_out_ref, m1y_out_ref):
  f32 = jnp.float32
  t_len = y_ref.shape[0]
  b = y_ref.shape[1]

  # Hoist weight loads and bias broadcasts out of the time loop (JAX does not
  # CSE broadcast_in_dim; re-materializing it every step wastes VALU slots).
  prior_w = prior_ref[...]
  w1y, w1x = w1y_ref[...], w1x_ref[...]
  wih, whh = wih_ref[...], whh_ref[...]
  w2, w3 = w2_ref[...], w3_ref[...]
  b1 = jnp.broadcast_to(b1_ref[...], (b, H1))
  bih = jnp.broadcast_to(bih_ref[...], (b, 3 * GATE_PAD))     # r/z hh-biases folded in
  bhhn = jnp.broadcast_to(bhhn_ref[...], (b, HIDDEN))
  b2 = jnp.broadcast_to(b2_ref[...], (b, H2))
  b3 = jnp.broadcast_to(b3_ref[...], (b, D_OUT))

  def step(t, carry):
    x_post, x_prior_prev, h = carry
    y = y_ref[t]

    # --- step_prior: one fused MXU dot gives [m1y | x_prior].
    pri = jnp.dot(x_post, prior_w, preferred_element_type=f32)
    m1y = pri[:, 0:N_OBS]
    x_prior = pri[:, N_OBS:N_OBS + N_STATES]

    # --- F.normalize(p=2, dim=0) on column-major state == per-row L2 here.
    dm1x = x_post - x_prior_prev
    dm1x_n = dm1x * jax.lax.rsqrt(
        jnp.maximum(jnp.sum(dm1x * dm1x, axis=-1, keepdims=True), EPS * EPS))
    dy = y - m1y
    dy_n = dy * jax.lax.rsqrt(
        jnp.maximum(jnp.sum(dy * dy, axis=-1, keepdims=True), EPS * EPS))

    # --- KG_l1 + ReLU  (concat([dy_norm, dx_norm]) @ W1 as two K=2 dots).
    l1 = jnp.maximum(
        jnp.dot(dy_n, w1y, preferred_element_type=f32)
        + jnp.dot(dm1x_n, w1x, preferred_element_type=f32) + b1, 0.0)

    # --- GRU cell (1 layer, seq_len 1), PyTorch gate order [r, z, n].
    #     Two fused matmuls; gates live at 128-aligned lane offsets.
    gi = jnp.dot(l1, wih, preferred_element_type=f32) + bih
    gh = jnp.dot(h, whh, preferred_element_type=f32)
    r = jax.nn.sigmoid(gi[:, 0:HIDDEN] + gh[:, 0:HIDDEN])
    z = jax.nn.sigmoid(gi[:, GATE_PAD:GATE_PAD + HIDDEN]
                       + gh[:, GATE_PAD:GATE_PAD + HIDDEN])
    n = jnp.tanh(gi[:, 2 * GATE_PAD:2 * GATE_PAD + HIDDEN]
                 + r * (gh[:, 2 * GATE_PAD:2 * GATE_PAD + HIDDEN] + bhhn))
    h_new = (1.0 - z) * n + z * h

    # --- KG_l2 + ReLU, KG_l3 (columns permuted obs-major in the wrapper).
    l2 = jnp.maximum(jnp.dot(h_new, w2, preferred_element_type=f32) + b2, 0.0)
    kgt = jnp.dot(l2, w3, preferred_element_type=f32) + b3

    # --- innovation: INOV[b] = KGain[b] @ dy_n[b]  (the PyTorch module
    #     normalizes dy before the matmul), pure VPU lane-broadcast MACs.
    inov = dy_n[:, 0:1] * kgt[:, 0:N_STATES]
    for o in range(1, N_OBS):
      inov = inov + dy_n[:, o:o + 1] * kgt[:, o * N_STATES:(o + 1) * N_STATES]
    x_post_new = x_prior + inov

    # --- per-step stores land in the resident VMEM output blocks.
    xpost_out_ref[t] = x_post_new
    m1y_out_ref[t] = m1y
    return x_post_new, x_prior, h_new

  jax.lax.fori_loop(
      0, t_len, step,
      (xpost0_ref[...], xprior0_ref[...], h0_ref[...]),
      unroll=True)


def knet_seq_pallas(y_seq, x_post0, x_prior0, h0, kparams, n_shards):
  """Run the whole T-step KalmanNet recurrence in one pallas_call.

  Returns (x_posterior_seq (T,B,S), m1y_seq (T,B,O)).
  """
  t_len, batch, _ = y_seq.shape
  assert batch % n_shards == 0
  b_shard = batch // n_shards
  assert b_shard % 8 == 0
  f32 = jnp.float32

  in_specs = [
      pl.BlockSpec((t_len, b_shard, N_OBS), lambda p: (0, p, 0)),   # y slab
      pl.BlockSpec((b_shard, N_STATES), lambda p: (p, 0)),          # x_post init
      pl.BlockSpec((b_shard, N_STATES), lambda p: (p, 0)),          # x_prior init
      pl.BlockSpec((b_shard, HIDDEN), lambda p: (p, 0)),            # h init
  ] + [pl.BlockSpec(tuple(w.shape), lambda p: (0, 0)) for w in kparams]

  out_specs = (
      pl.BlockSpec((t_len, b_shard, N_STATES), lambda p: (0, p, 0)),
      pl.BlockSpec((t_len, b_shard, N_OBS), lambda p: (0, p, 0)),
  )
  out_shape = (
      jax.ShapeDtypeStruct((t_len, batch, N_STATES), f32),
      jax.ShapeDtypeStruct((t_len, batch, N_OBS), f32),
  )
  grid_spec = pltpu.PrefetchScalarGridSpec(
      num_scalar_prefetch=0,
      grid=(n_shards,),
      in_specs=in_specs,
      out_specs=out_specs)
  return pl.pallas_call(
      _knet_seq_kernel,
      out_shape=out_shape,
      grid_spec=grid_spec,
      compiler_params=pltpu.CompilerParams(
          dimension_semantics=("parallel",)),
  )(y_seq, x_post0, x_prior0, h0, *kparams)


# ----------------------------- parameter setup --------------------------------
def init_params(key):
  ks = jax.random.split(key, 10)

  def uni(k, shape, fan_in):
    bnd = 1.0 / jnp.sqrt(jnp.float32(fan_in))
    return jax.random.uniform(k, shape, jnp.float32, -bnd, bnd)

  # KG_l1: Linear(d_in -> h1)  (stored transposed: (d_in, h1))
  W1 = uni(ks[0], (D_IN, H1), D_IN)
  b1 = uni(ks[1], (1, H1), D_IN)
  # GRU(input=H1, hidden=HIDDEN), gate order [r, z, n], PyTorch init 1/sqrt(hidden)
  Wih = uni(ks[2], (H1, 3 * HIDDEN), HIDDEN)
  bih = uni(ks[3], (1, 3 * HIDDEN), HIDDEN)
  Whh = uni(ks[4], (HIDDEN, 3 * HIDDEN), HIDDEN)
  bhh = uni(ks[5], (1, 3 * HIDDEN), HIDDEN)
  # KG_l2, KG_l3
  W2 = uni(ks[6], (HIDDEN, H2), HIDDEN)
  b2 = uni(ks[7], (1, H2), HIDDEN)
  W3 = uni(ks[8], (H2, D_OUT), H2)
  b3 = uni(ks[9], (1, D_OUT), H2)

  # TODO(synk): f_k / h_k are arbitrary user callables passed to Build(); they
  # are modeled here as deterministic linear state/observation maps F, H.
  F = jnp.array([[0.95, 0.10], [-0.05, 0.90]], dtype=jnp.float32)
  Hm = jnp.array([[1.00, 0.20], [0.00, 0.80]], dtype=jnp.float32)

  ref_params = dict(F=F, H=Hm, W1=W1, b1=b1, Wih=Wih, bih=bih,
                    Whh=Whh, bhh=bhh, W2=W2, b2=b2, W3=W3, b3=b3)

  # ---- kernel-side packing ----
  def pack_gates(w):
    rows = w.shape[0]
    out = jnp.zeros((rows, 3 * GATE_PAD), jnp.float32)
    for g in range(3):
      out = out.at[:, g * GATE_PAD:g * GATE_PAD + HIDDEN].set(
          w[:, g * HIDDEN:(g + 1) * HIDDEN])
    return out

  Wih_p = pack_gates(Wih)
  Whh_p = pack_gates(Whh)
  # Fold r/z hidden-side biases into the input-side bias; keep b_hh_n separate
  # (it sits inside the r * (gh_n + b_hh_n) term of the GRU).
  bih_fold = jnp.concatenate(
      [bih[:, 0:HIDDEN] + bhh[:, 0:HIDDEN],
       bih[:, HIDDEN:2 * HIDDEN] + bhh[:, HIDDEN:2 * HIDDEN],
       bih[:, 2 * HIDDEN:3 * HIDDEN]], axis=1)
  bih_p = pack_gates(bih_fold)
  bhh_n = bhh[:, 2 * HIDDEN:3 * HIDDEN]

  W1y, W1x = W1[:N_OBS], W1[N_OBS:]            # features are [dm1y_norm, dm1x_norm]
  prior_packed = jnp.concatenate([F.T @ Hm.T, F.T], axis=1)   # (S, O + S)

  # Permute KG_l3 output columns to obs-major so the kernel's innovation is
  # two lane-broadcast multiply-adds:  new col (o*S + s) = old col (s*O + o).
  perm = [s * N_OBS + o for o in range(N_OBS) for s in range(N_STATES)]
  W3p = W3[:, perm]
  b3p = b3[:, perm]

  kernel_params = (prior_packed, W1y, W1x, b1,
                   Wih_p, bih_p, Whh_p, bhh_n,
                   W2, b2, W3p, b3p)
  return kernel_params, ref_params


# -------------------------- pure-JAX reference ---------------------------------
def knet_seq_ref(ys, x_post0, x_prior0, h0, P):
  Wir, Wiz, Win = jnp.split(P['Wih'], 3, axis=1)
  bir, biz, bin_ = jnp.split(P['bih'], 3, axis=1)
  Whr, Whz, Whn = jnp.split(P['Whh'], 3, axis=1)
  bhr, bhz, bhn = jnp.split(P['bhh'], 3, axis=1)

  def nrm(x):
    return x / jnp.maximum(jnp.sqrt(jnp.sum(x * x, axis=-1, keepdims=True)), EPS)

  x_post, x_prior_prev, h = x_post0, x_prior0, h0
  xs, ms = [], []
  for t in range(ys.shape[0]):
    y = ys[t]
    x_prior = x_post @ P['F'].T
    m1y = x_prior @ P['H'].T
    dm1x_n = nrm(x_post - x_prior_prev)
    dy_n = nrm(y - m1y)
    xin = jnp.concatenate([dy_n, dm1x_n], axis=1)
    l1 = jax.nn.relu(xin @ P['W1'] + P['b1'])
    r = jax.nn.sigmoid(l1 @ Wir + bir + h @ Whr + bhr)
    z = jax.nn.sigmoid(l1 @ Wiz + biz + h @ Whz + bhz)
    n = jnp.tanh(l1 @ Win + bin_ + r * (h @ Whn + bhn))
    h = (1.0 - z) * n + z * h
    l2 = jax.nn.relu(h @ P['W2'] + P['b2'])
    kg = (l2 @ P['W3'] + P['b3']).reshape(-1, N_STATES, N_OBS)
    inov = jnp.einsum('bso,bo->bs', kg, dy_n)
    x_post_new = x_prior + inov
    x_prior_prev, x_post = x_prior, x_post_new
    xs.append(x_post); ms.append(m1y)
  return jnp.stack(xs), jnp.stack(ms)


# ------------------------------------ main -------------------------------------
if __name__ == "__main__":
  n_shards = _pick_shards()
  key = jax.random.PRNGKey(0)
  k_param, k_m10, k_hn, k_y = jax.random.split(key, 4)
  kernel_params, ref_params = init_params(k_param)

  # InitSequence(M1_0): replicate M1_0 across batch; prior == posterior at init.
  m1_0 = jax.random.normal(k_m10, (1, N_STATES), jnp.float32)
  x_post0 = jnp.tile(m1_0, (BATCH, 1))
  x_prior0 = jnp.tile(m1_0, (BATCH, 1))
  h0 = jax.random.normal(k_hn, (BATCH, HIDDEN), jnp.float32)      # self.hn (randn)
  ys = jax.random.normal(k_y, (T_STEPS, BATCH, N_OBS), jnp.float32)

  x_seq, m1y_seq = knet_seq_pallas(ys, x_post0, x_prior0, h0,
                                   kernel_params, n_shards)
  x_seq = jax.block_until_ready(x_seq)

  x_ref, m_ref = knet_seq_ref(ys, x_post0, x_prior0, h0, ref_params)

  assert jnp.all(jnp.isfinite(x_seq)), "NaNs/Infs in posterior output"
  assert jnp.all(jnp.isfinite(m1y_seq)), "NaNs/Infs in m1y output"
  assert jnp.allclose(x_seq, x_ref, rtol=1e-3, atol=1e-3), "posterior mismatch"
  assert jnp.allclose(m1y_seq, m_ref, rtol=1e-3, atol=1e-3), "m1y mismatch"

  print("KERNEL_OK")
</pallas_src>

<mosaic_0001>
module attributes {stable_mosaic.version = 11 : i64} {
  func.func @_knet_seq_kernel(%arg0: i32, %arg1: memref<8x16x2xf32, #tpu.memory_space<vmem>>, %arg2: memref<16x2xf32, #tpu.memory_space<vmem>>, %arg3: memref<16x2xf32, #tpu.memory_space<vmem>>, %arg4: memref<16x80xf32, #tpu.memory_space<vmem>>, %arg5: memref<2x4xf32, #tpu.memory_space<vmem>>, %arg6: memref<2x320xf32, #tpu.memory_space<vmem>>, %arg7: memref<2x320xf32, #tpu.memory_space<vmem>>, %arg8: memref<1x320xf32, #tpu.memory_space<vmem>>, %arg9: memref<320x384xf32, #tpu.memory_space<vmem>>, %arg10: memref<1x384xf32, #tpu.memory_space<vmem>>, %arg11: memref<80x384xf32, #tpu.memory_space<vmem>>, %arg12: memref<1x80xf32, #tpu.memory_space<vmem>>, %arg13: memref<80x40xf32, #tpu.memory_space<vmem>>, %arg14: memref<1x40xf32, #tpu.memory_space<vmem>>, %arg15: memref<40x4xf32, #tpu.memory_space<vmem>>, %arg16: memref<1x4xf32, #tpu.memory_space<vmem>>, %arg17: memref<8x16x2xf32, #tpu.memory_space<vmem>>, %arg18: memref<8x16x2xf32, #tpu.memory_space<vmem>>) attributes {dimension_semantics = [#tpu.dimension_semantics<parallel>], iteration_bounds = array<i64: 1>, scalar_prefetch = 0 : i64, scratch_operands = 0 : i64, tpu.core_type = #tpu.core_type<tc>, window_params = [{transform_indices = @transform_0, window_bounds = array<i64: 8, 16, 2>}, {transform_indices = @transform_1, window_bounds = array<i64: 16, 2>}, {transform_indices = @transform_2, window_bounds = array<i64: 16, 2>}, {transform_indices = @transform_3, window_bounds = array<i64: 16, 80>}, {pipeline_mode = #tpu.pipeline_mode<synchronous>, transform_indices = @transform_4, window_bounds = array<i64: 2, 4>}, {pipeline_mode = #tpu.pipeline_mode<synchronous>, transform_indices = @transform_5, window_bounds = array<i64: 2, 320>}, {pipeline_mode = #tpu.pipeline_mode<synchronous>, transform_indices = @transform_6, window_bounds = array<i64: 2, 320>}, {pipeline_mode = #tpu.pipeline_mode<synchronous>, transform_indices = @transform_7, window_bounds = array<i64: 1, 320>}, {pipeline_mode = #tpu.pipeline_mode<synchronous>, transform_indices = @transform_8, window_bounds = array<i64: 320, 384>}, {pipeline_mode = #tpu.pipeline_mode<synchronous>, transform_indices = @transform_9, window_bounds = array<i64: 1, 384>}, {pipeline_mode = #tpu.pipeline_mode<synchronous>, transform_indices = @transform_10, window_bounds = array<i64: 80, 384>}, {pipeline_mode = #tpu.pipeline_mode<synchronous>, transform_indices = @transform_11, window_bounds = array<i64: 1, 80>}, {pipeline_mode = #tpu.pipeline_mode<synchronous>, transform_indices = @transform_12, window_bounds = array<i64: 80, 40>}, {pipeline_mode = #tpu.pipeline_mode<synchronous>, transform_indices = @transform_13, window_bounds = array<i64: 1, 40>}, {pipeline_mode = #tpu.pipeline_mode<synchronous>, transform_indices = @transform_14, window_bounds = array<i64: 40, 4>}, {pipeline_mode = #tpu.pipeline_mode<synchronous>, transform_indices = @transform_15, window_bounds = array<i64: 1, 4>}, {transform_indices = @transform_16, window_bounds = array<i64: 8, 16, 2>}, {transform_indices = @transform_17, window_bounds = array<i64: 8, 16, 2>}]} {
    %c0 = arith.constant 0 : index
    %c0_0 = arith.constant 0 : index
    %0 = vector.load %arg5[%c0, %c0_0] : memref<2x4xf32, #tpu.memory_space<vmem>>, vector<2x4xf32>
    %c0_1 = arith.constant 0 : index
    %c0_2 = arith.constant 0 : index
    %1 = vector.load %arg6[%c0_1, %c0_2] : memref<2x320xf32, #tpu.memory_space<vmem>>, vector<2x320xf32>
    %c0_3 = arith.constant 0 : index
    %c0_4 = arith.constant 0 : index
    %2 = vector.load %arg7[%c0_3, %c0_4] : memref<2x320xf32, #tpu.memory_space<vmem>>, vector<2x320xf32>
    %c0_5 = arith.constant 0 : index
    %c0_6 = arith.constant 0 : index
    %3 = vector.load %arg9[%c0_5, %c0_6] : memref<320x384xf32, #tpu.memory_space<vmem>>, vector<320x384xf32>
    %c0_7 = arith.constant 0 : index
    %c0_8 = arith.constant 0 : index
    %4 = vector.load %arg11[%c0_7, %c0_8] : memref<80x384xf32, #tpu.memory_space<vmem>>, vector<80x384xf32>
    %c0_9 = arith.constant 0 : index
    %c0_10 = arith.constant 0 : index
    %5 = vector.load %arg13[%c0_9, %c0_10] : memref<80x40xf32, #tpu.memory_space<vmem>>, vector<80x40xf32>
    %c0_11 = arith.constant 0 : index
    %c0_12 = arith.constant 0 : index
    %6 = vector.load %arg15[%c0_11, %c0_12] : memref<40x4xf32, #tpu.memory_space<vmem>>, vector<40x4xf32>
    %c0_13 = arith.constant 0 : index
    %c0_14 = arith.constant 0 : index
    %7 = vector.load %arg8[%c0_13, %c0_14] : memref<1x320xf32, #tpu.memory_space<vmem>>, vector<1x320xf32>
    %8 = vector.shape_cast %7 : vector<1x320xf32> to vector<1x320xf32>
    %9 = vector.broadcast %8 : vector<1x320xf32> to vector<16x320xf32>
    %c0_15 = arith.constant 0 : index
    %c0_16 = arith.constant 0 : index
    %10 = vector.load %arg10[%c0_15, %c0_16] : memref<1x384xf32, #tpu.memory_space<vmem>>, vector<1x384xf32>
    %11 = vector.shape_cast %10 : vector<1x384xf32> to vector<1x384xf32>
    %12 = vector.broadcast %11 : vector<1x384xf32> to vector<16x384xf32>
    %c0_17 = arith.constant 0 : index
    %c0_18 = arith.constant 0 : index
    %13 = vector.load %arg12[%c0_17, %c0_18] : memref<1x80xf32, #tpu.memory_space<vmem>>, vector<1x80xf32>
    %14 = vector.shape_cast %13 : vector<1x80xf32> to vector<1x80xf32>
    %15 = vector.broadcast %14 : vector<1x80xf32> to vector<16x80xf32>
    %c0_19 = arith.constant 0 : index
    %c0_20 = arith.constant 0 : index
    %16 = vector.load %arg14[%c0_19, %c0_20] : memref<1x40xf32, #tpu.memory_space<vmem>>, vector<1x40xf32>
    %17 = vector.shape_cast %16 : vector<1x40xf32> to vector<1x40xf32>
    %18 = vector.broadcast %17 : vector<1x40xf32> to vector<16x40xf32>
    %c0_21 = arith.constant 0 : index
    %c0_22 = arith.constant 0 : index
    %19 = vector.load %arg16[%c0_21, %c0_22] : memref<1x4xf32, #tpu.memory_space<vmem>>, vector<1x4xf32>
    %20 = vector.shape_cast %19 : vector<1x4xf32> to vector<1x4xf32>
    %21 = vector.broadcast %20 : vector<1x4xf32> to vector<16x4xf32>
    %c0_23 = arith.constant 0 : index
    %c0_24 = arith.constant 0 : index
    %22 = vector.load %arg2[%c0_23, %c0_24] : memref<16x2xf32, #tpu.memory_space<vmem>>, vector<16x2xf32>
    %c0_25 = arith.constant 0 : index
    %c0_26 = arith.constant 0 : index
    %23 = vector.load %arg3[%c0_25, %c0_26] : memref<16x2xf32, #tpu.memory_space<vmem>>, vector<16x2xf32>
    %c0_27 = arith.constant 0 : index
    %c0_28 = arith.constant 0 : index
    %24 = vector.load %arg4[%c0_27, %c0_28] : memref<16x80xf32, #tpu.memory_space<vmem>>, vector<16x80xf32>
    %c0_i32 = arith.constant 0 : i32
    %25 = arith.index_cast %c0_i32 : i32 to index
    %c0_29 = arith.constant 0 : index
    %c0_30 = arith.constant 0 : index
    %26 = vector.load %arg1[%25, %c0_29, %c0_30] : memref<8x16x2xf32, #tpu.memory_space<vmem>>, vector<1x16x2xf32>
    %27 = vector.shape_cast %26 : vector<1x16x2xf32> to vector<16x2xf32>
    %cst = arith.constant dense<0.000000e+00> : vector<16x4xf32>
    %28 = tpu.matmul %22, %0, %cst {dimension_numbers = #tpu.dot_dimension_numbers<[1], [0], [0], [1], [0, 0, 1, 1], [], []>} : vector<16x2xf32>, vector<2x4xf32>, vector<16x4xf32> -> vector<16x4xf32>
    %29 = vector.extract_strided_slice %28 {offsets = [0, 0], sizes = [16, 2], strides = [1, 1]} : vector<16x4xf32> to vector<16x2xf32>
    %30 = vector.extract_strided_slice %28 {offsets = [0, 2], sizes = [16, 2], strides = [1, 1]} : vector<16x4xf32> to vector<16x2xf32>
    %31 = arith.subf %22, %23 : vector<16x2xf32>
    %32 = arith.mulf %31, %31 : vector<16x2xf32>
    %cst_31 = arith.constant dense<0.000000e+00> : vector<16xf32>
    %33 = vector.multi_reduction <add>, %32, %cst_31 [1] : vector<16x2xf32> to vector<16xf32>
    %34 = vector.shape_cast %33 : vector<16xf32> to vector<16x1xf32>
    %cst_32 = arith.constant 1.000000e-24 : f32
    %35 = vector.broadcast %cst_32 : f32 to vector<16x1xf32>
    %36 = arith.maximumf %34, %35 : vector<16x1xf32>
    %37 = math.rsqrt %36 : vector<16x1xf32>
    %38 = vector.broadcast %37 : vector<16x1xf32> to vector<16x2xf32>
    %39 = arith.mulf %31, %38 : vector<16x2xf32>
    %40 = arith.subf %27, %29 : vector<16x2xf32>
    %41 = arith.mulf %40, %40 : vector<16x2xf32>
    %cst_33 = arith.constant dense<0.000000e+00> : vector<16xf32>
    %42 = vector.multi_reduction <add>, %41, %cst_33 [1] : vector<16x2xf32> to vector<16xf32>
    %43 = vector.shape_cast %42 : vector<16xf32> to vector<16x1xf32>
    %cst_34 = arith.constant 1.000000e-24 : f32
    %44 = vector.broadcast %cst_34 : f32 to vector<16x1xf32>
    %45 = arith.maximumf %43, %44 : vector<16x1xf32>
    %46 = math.rsqrt %45 : vector<16x1xf32>
    %47 = vector.broadcast %46 : vector<16x1xf32> to vector<16x2xf32>
    %48 = arith.mulf %40, %47 : vector<16x2xf32>
    %cst_35 = arith.constant dense<0.000000e+00> : vector<16x320xf32>
    %49 = tpu.matmul %48, %1, %cst_35 {dimension_numbers = #tpu.dot_dimension_numbers<[1], [0], [0], [1], [0, 0, 1, 1], [], []>} : vector<16x2xf32>, vector<2x320xf32>, vector<16x320xf32> -> vector<16x320xf32>
    %cst_36 = arith.constant dense<0.000000e+00> : vector<16x320xf32>
    %50 = tpu.matmul %39, %2, %cst_36 {dimension_numbers = #tpu.dot_dimension_numbers<[1], [0], [0], [1], [0, 0, 1, 1], [], []>} : vector<16x2xf32>, vector<2x320xf32>, vector<16x320xf32> -> vector<16x320xf32>
    %51 = arith.addf %49, %50 : vector<16x320xf32>
    %52 = arith.addf %51, %9 : vector<16x320xf32>
    %cst_37 = arith.constant 0.000000e+00 : f32
    %53 = vector.broadcast %cst_37 : f32 to vector<16x320xf32>
    %54 = arith.maximumf %52, %53 : vector<16x320xf32>
    %cst_38 = arith.constant dense<0.000000e+00> : vector<16x384xf32>
    %55 = tpu.matmul %54, %3, %cst_38 {dimension_numbers = #tpu.dot_dimension_numbers<[1], [0], [0], [1], [0, 0, 1, 1], [], []>} : vector<16x320xf32>, vector<320x384xf32>, vector<16x384xf32> -> vector<16x384xf32>
    %56 = arith.addf %55, %12 : vector<16x384xf32>
    %cst_39 = arith.constant dense<0.000000e+00> : vector<16x384xf32>
    %57 = tpu.matmul %24, %4, %cst_39 {dimension_numbers = #tpu.dot_dimension_numbers<[1], [0], [0], [1], [0, 0, 1, 1], [], []>} : vector<16x80xf32>, vector<80x384xf32>, vector<16x384xf32> -> vector<16x384xf32>
    %58 = vector.extract_strided_slice %56 {offsets = [0, 0], sizes = [16, 80], strides = [1, 1]} : vector<16x384xf32> to vector<16x80xf32>
    %59 = vector.extract_strided_slice %57 {offsets = [0, 0], sizes = [16, 80], strides = [1, 1]} : vector<16x384xf32> to vector<16x80xf32>
    %60 = arith.addf %58, %59 : vector<16x80xf32>
    %61 = arith.negf %60 : vector<16x80xf32>
    %62 = math.exp %61 : vector<16x80xf32>
    %cst_40 = arith.constant 1.000000e+00 : f32
    %63 = vector.broadcast %cst_40 : f32 to vector<16x80xf32>
    %64 = arith.addf %63, %62 : vector<16x80xf32>
    %65 = arith.divf %63, %64 : vector<16x80xf32>
    %66 = vector.extract_strided_slice %56 {offsets = [0, 128], sizes = [16, 80], strides = [1, 1]} : vector<16x384xf32> to vector<16x80xf32>
    %67 = vector.extract_strided_slice %57 {offsets = [0, 128], sizes = [16, 80], strides = [1, 1]} : vector<16x384xf32> to vector<16x80xf32>
    %68 = arith.addf %66, %67 : vector<16x80xf32>
    %69 = arith.negf %68 : vector<16x80xf32>
    %70 = math.exp %69 : vector<16x80xf32>
    %cst_41 = arith.constant 1.000000e+00 : f32
    %71 = vector.broadcast %cst_41 : f32 to vector<16x80xf32>
    %72 = arith.addf %71, %70 : vector<16x80xf32>
    %73 = arith.divf %71, %72 : vector<16x80xf32>
    %74 = vector.extract_strided_slice %56 {offsets = [0, 256], sizes = [16, 80], strides = [1, 1]} : vector<16x384xf32> to vector<16x80xf32>
    %75 = vector.extract_strided_slice %57 {offsets = [0, 256], sizes = [16, 80], strides = [1, 1]} : vector<16x384xf32> to vector<16x80xf32>
    %76 = arith.addf %75, %15 : vector<16x80xf32>
    %77 = arith.mulf %65, %76 : vector<16x80xf32>
    %78 = arith.addf %74, %77 : vector<16x80xf32>
    %79 = math.tanh %78 : vector<16x80xf32>
    %cst_42 = arith.constant 1.000000e+00 : f32
    %80 = vector.broadcast %cst_42 : f32 to vector<16x80xf32>
    %81 = arith.subf %80, %73 : vector<16x80xf32>
    %82 = arith.mulf %81, %79 : vector<16x80xf32>
    %83 = arith.mulf %73, %24 : vector<16x80xf32>
    %84 = arith.addf %82, %83 : vector<16x80xf32>
    %cst_43 = arith.constant dense<0.000000e+00> : vector<16x40xf32>
    %85 = tpu.matmul %84, %5, %cst_43 {dimension_numbers = #tpu.dot_dimension_numbers<[1], [0], [0], [1], [0, 0, 1, 1], [], []>} : vector<16x80xf32>, vector<80x40xf32>, vector<16x40xf32> -> vector<16x40xf32>
    %86 = arith.addf %85, %18 : vector<16x40xf32>
    %cst_44 = arith.constant 0.000000e+00 : f32
    %87 = vector.broadcast %cst_44 : f32 to vector<16x40xf32>
    %88 = arith.maximumf %86, %87 : vector<16x40xf32>
    %cst_45 = arith.constant dense<0.000000e+00> : vector<16x4xf32>
    %89 = tpu.matmul %88, %6, %cst_45 {dimension_numbers = #tpu.dot_dimension_numbers<[1], [0], [0], [1], [0, 0, 1, 1], [], []>} : vector<16x40xf32>, vector<40x4xf32>, vector<16x4xf32> -> vector<16x4xf32>
    %90 = arith.addf %89, %21 : vector<16x4xf32>
    %91 = vector.extract_strided_slice %48 {offsets = [0, 0], sizes = [16, 1], strides = [1, 1]} : vector<16x2xf32> to vector<16x1xf32>
    %92 = vector.extract_strided_slice %90 {offsets = [0, 0], sizes = [16, 2], strides = [1, 1]} : vector<16x4xf32> to vector<16x2xf32>
    %93 = vector.broadcast %91 : vector<16x1xf32> to vector<16x2xf32>
    %94 = arith.mulf %93, %92 : vector<16x2xf32>
    %95 = vector.extract_strided_slice %48 {offsets = [0, 1], sizes = [16, 1], strides = [1, 1]} : vector<16x2xf32> to vector<16x1xf32>
    %96 = vector.extract_strided_slice %90 {offsets = [0, 2], sizes = [16, 2], strides = [1, 1]} : vector<16x4xf32> to vector<16x2xf32>
    %97 = vector.broadcast %95 : vector<16x1xf32> to vector<16x2xf32>
    %98 = arith.mulf %97, %96 : vector<16x2xf32>
    %99 = arith.addf %94, %98 : vector<16x2xf32>
    %100 = arith.addf %30, %99 : vector<16x2xf32>
    %101 = arith.index_cast %c0_i32 : i32 to index
    %c0_46 = arith.constant 0 : index
    %c0_47 = arith.constant 0 : index
    %102 = vector.load %arg17[%101, %c0_46, %c0_47] : memref<8x16x2xf32, #tpu.memory_space<vmem>>, vector<1x16x2xf32>
    %103 = vector.shape_cast %102 : vector<1x16x2xf32> to vector<16x2xf32>
    %104 = vector.shape_cast %100 : vector<16x2xf32> to vector<1x16x2xf32>
    tpu.vector_store %arg17[%101, %c0_46, %c0_47], %104 {strides = array<i32>} : memref<8x16x2xf32, #tpu.memory_space<vmem>>, vector<1x16x2xf32>,
    %105 = arith.index_cast %c0_i32 : i32 to index
    %c0_48 = arith.constant 0 : index
    %c0_49 = arith.constant 0 : index
    %106 = vector.load %arg18[%105, %c0_48, %c0_49] : memref<8x16x2xf32, #tpu.memory_space<vmem>>, vector<1x16x2xf32>
    %107 = vector.shape_cast %106 : vector<1x16x2xf32> to vector<16x2xf32>
    %108 = vector.shape_cast %29 : vector<16x2xf32> to vector<1x16x2xf32>
    tpu.vector_store %arg18[%105, %c0_48, %c0_49], %108 {strides = array<i32>} : memref<8x16x2xf32, #tpu.memory_space<vmem>>, vector<1x16x2xf32>,
    %c1_i32 = arith.constant 1 : i32
    %109 = arith.index_cast %c1_i32 : i32 to index
    %c0_50 = arith.constant 0 : index
    %c0_51 = arith.constant 0 : index
    %110 = vector.load %arg1[%109, %c0_50, %c0_51] : memref<8x16x2xf32, #tpu.memory_space<vmem>>, vector<1x16x2xf32>
    %111 = vector.shape_cast %110 : vector<1x16x2xf32> to vector<16x2xf32>
    %cst_52 = arith.constant dense<0.000000e+00> : vector<16x4xf32>
    %112 = tpu.matmul %100, %0, %cst_52 {dimension_numbers = #tpu.dot_dimension_numbers<[1], [0], [0], [1], [0, 0, 1, 1], [], []>} : vector<16x2xf32>, vector<2x4xf32>, vector<16x4xf32> -> vector<16x4xf32>
    %113 = vector.extract_strided_slice %112 {offsets = [0, 0], sizes = [16, 2], strides = [1, 1]} : vector<16x4xf32> to vector<16x2xf32>
    %114 = vector.extract_strided_slice %112 {offsets = [0, 2], sizes = [16, 2], strides = [1, 1]} : vector<16x4xf32> to vector<16x2xf32>
    %115 = arith.subf %100, %30 : vector<16x2xf32>
    %116 = arith.mulf %115, %115 : vector<16x2xf32>
    %cst_53 = arith.constant dense<0.000000e+00> : vector<16xf32>
    %117 = vector.multi_reduction <add>, %116, %cst_53 [1] : vector<16x2xf32> to vector<16xf32>
    %118 = vector.shape_cast %117 : vector<16xf32> to vector<16x1xf32>
    %cst_54 = arith.constant 1.000000e-24 : f32
    %119 = vector.broadcast %cst_54 : f32 to vector<16x1xf32>
    %120 = arith.maximumf %118, %119 : vector<16x1xf32>
    %121 = math.rsqrt %120 : vector<16x1xf32>
    %122 = vector.broadcast %121 : vector<16x1xf32> to vector<16x2xf32>
    %123 = arith.mulf %115, %122 : vector<16x2xf32>
    %124 = arith.subf %111, %113 : vector<16x2xf32>
    %125 = arith.mulf %124, %124 : vector<16x2xf32>
    %cst_55 = arith.constant dense<0.000000e+00> : vector<16xf32>
    %126 = vector.multi_reduction <add>, %125, %cst_55 [1] : vector<16x2xf32> to vector<16xf32>
    %127 = vector.shape_cast %126 : vector<16xf32> to vector<16x1xf32>
    %cst_56 = arith.constant 1.000000e-24 : f32
    %128 = vector.broadcast %cst_56 : f32 to vector<16x1xf32>
    %129 = arith.maximumf %127, %128 : vector<16x1xf32>
    %130 = math.rsqrt %129 : vector<16x1xf32>
    %131 = vector.broadcast %130 : vector<16x1xf32> to vector<16x2xf32>
    %132 = arith.mulf %124, %131 : vector<16x2xf32>
    %cst_57 = arith.constant dense<0.000000e+00> : vector<16x320xf32>
    %133 = tpu.matmul %132, %1, %cst_57 {dimension_numbers = #tpu.dot_dimension_numbers<[1], [0], [0], [1], [0, 0, 1, 1], [], []>} : vector<16x2xf32>, vector<2x320xf32>, vector<16x320xf32> -> vector<16x320xf32>
    %cst_58 = arith.constant dense<0.000000e+00> : vector<16x320xf32>
    %134 = tpu.matmul %123, %2, %cst_58 {dimension_numbers = #tpu.dot_dimension_numbers<[1], [0], [0], [1], [0, 0, 1, 1], [], []>} : vector<16x2xf32>, vector<2x320xf32>, vector<16x320xf32> -> vector<16x320xf32>
    %135 = arith.addf %133, %134 : vector<16x320xf32>
    %136 = arith.addf %135, %9 : vector<16x320xf32>
    %cst_59 = arith.constant 0.000000e+00 : f32
    %137 = vector.broadcast %cst_59 : f32 to vector<16x320xf32>
    %138 = arith.maximumf %136, %137 : vector<16x320xf32>
    %cst_60 = arith.constant dense<0.000000e+00> : vector<16x384xf32>
    %139 = tpu.matmul %138, %3, %cst_60 {dimension_numbers = #tpu.dot_dimension_numbers<[1], [0], [0], [1], [0, 0, 1, 1], [], []>} : vector<16x320xf32>, vector<320x384xf32>, vector<16x384xf32> -> vector<16x384xf32>
    %140 = arith.addf %139, %12 : vector<16x384xf32>
    %cst_61 = arith.constant dense<0.000000e+00> : vector<16x384xf32>
    %141 = tpu.matmul %84, %4, %cst_61 {dimension_numbers = #tpu.dot_dimension_numbers<[1], [0], [0], [1], [0, 0, 1, 1], [], []>} : vector<16x80xf32>, vector<80x384xf32>, vector<16x384xf32> -> vector<16x384xf32>
    %142 = vector.extract_strided_slice %140 {offsets = [0, 0], sizes = [16, 80], strides = [1, 1]} : vector<16x384xf32> to vector<16x80xf32>
    %143 = vector.extract_strided_slice %141 {offsets = [0, 0], sizes = [16, 80], strides = [1, 1]} : vector<16x384xf32> to vector<16x80xf32>
    %144 = arith.addf %142, %143 : vector<16x80xf32>
    %145 = arith.negf %144 : vector<16x80xf32>
    %146 = math.exp %145 : vector<16x80xf32>
    %cst_62 = arith.constant 1.000000e+00 : f32
    %147 = vector.broadcast %cst_62 : f32 to vector<16x80xf32>
    %148 = arith.addf %147, %146 : vector<16x80xf32>
    %149 = arith.divf %147, %148 : vector<16x80xf32>
    %150 = vector.extract_strided_slice %140 {offsets = [0, 128], sizes = [16, 80], strides = [1, 1]} : vector<16x384xf32> to vector<16x80xf32>
    %151 = vector.extract_strided_slice %141 {offsets = [0, 128], sizes = [16, 80], strides = [1, 1]} : vector<16x384xf32> to vector<16x80xf32>
    %152 = arith.addf %150, %151 : vector<16x80xf32>
    %153 = arith.negf %152 : vector<16x80xf32>
    %154 = math.exp %153 : vector<16x80xf32>
    %cst_63 = arith.constant 1.000000e+00 : f32
    %155 = vector.broadcast %cst_63 : f32 to vector<16x80xf32>
    %156 = arith.addf %155, %154 : vector<16x80xf32>
    %157 = arith.divf %155, %156 : vector<16x80xf32>
    %158 = vector.extract_strided_slice %140 {offsets = [0, 256], sizes = [16, 80], strides = [1, 1]} : vector<16x384xf32> to vector<16x80xf32>
    %159 = vector.extract_strided_slice %141 {offsets = [0, 256], sizes = [16, 80], strides = [1, 1]} : vector<16x384xf32> to vector<16x80xf32>
    %160 = arith.addf %159, %15 : vector<16x80xf32>
    %161 = arith.mulf %149, %160 : vector<16x80xf32>
    %162 = arith.addf %158, %161 : vector<16x80xf32>
    %163 = math.tanh %162 : vector<16x80xf32>
    %cst_64 = arith.constant 1.000000e+00 : f32
    %164 = vector.broadcast %cst_64 : f32 to vector<16x80xf32>
    %165 = arith.subf %164, %157 : vector<16x80xf32>
    %166 = arith.mulf %165, %163 : vector<16x80xf32>
    %167 = arith.mulf %157, %84 : vector<16x80xf32>
    %168 = arith.addf %166, %167 : vector<16x80xf32>
    %cst_65 = arith.constant dense<0.000000e+00> : vector<16x40xf32>
    %169 = tpu.matmul %168, %5, %cst_65 {dimension_numbers = #tpu.dot_dimension_numbers<[1], [0], [0], [1], [0, 0, 1, 1], [], []>} : vector<16x80xf32>, vector<80x40xf32>, vector<16x40xf32> -> vector<16x40xf32>
    %170 = arith.addf %169, %18 : vector<16x40xf32>
    %cst_66 = arith.constant 0.000000e+00 : f32
    %171 = vector.broadcast %cst_66 : f32 to vector<16x40xf32>
    %172 = arith.maximumf %170, %171 : vector<16x40xf32>
    %cst_67 = arith.constant dense<0.000000e+00> : vector<16x4xf32>
    %173 = tpu.matmul %172, %6, %cst_67 {dimension_numbers = #tpu.dot_dimension_numbers<[1], [0], [0], [1], [0, 0, 1, 1], [], []>} : vector<16x40xf32>, vector<40x4xf32>, vector<16x4xf32> -> vector<16x4xf32>
    %174 = arith.addf %173, %21 : vector<16x4xf32>
    %175 = vector.extract_strided_slice %132 {offsets = [0, 0], sizes = [16, 1], strides = [1, 1]} : vector<16x2xf32> to vector<16x1xf32>
    %176 = vector.extract_strided_slice %174 {offsets = [0, 0], sizes = [16, 2], strides = [1, 1]} : vector<16x4xf32> to vector<16x2xf32>
    %177 = vector.broadcast %175 : vector<16x1xf32> to vector<16x2xf32>
    %178 = arith.mulf %177, %176 : vector<16x2xf32>
    %179 = vector.extract_strided_slice %132 {offsets = [0, 1], sizes = [16, 1], strides = [1, 1]} : vector<16x2xf32> to vector<16x1xf32>
    %180 = vector.extract_strided_slice %174 {offsets = [0, 2], sizes = [16, 2], strides = [1, 1]} : vector<16x4xf32> to vector<16x2xf32>
    %181 = vector.broadcast %179 : vector<16x1xf32> to vector<16x2xf32>
    %182 = arith.mulf %181, %180 : vector<16x2xf32>
    %183 = arith.addf %178, %182 : vector<16x2xf32>
    %184 = arith.addf %114, %183 : vector<16x2xf32>
    %185 = arith.index_cast %c1_i32 : i32 to index
    %c0_68 = arith.constant 0 : index
    %c0_69 = arith.constant 0 : index
    %186 = vector.load %arg17[%185, %c0_68, %c0_69] : memref<8x16x2xf32, #tpu.memory_space<vmem>>, vector<1x16x2xf32>
    %187 = vector.shape_cast %186 : vector<1x16x2xf32> to vector<16x2xf32>
    %188 = vector.shape_cast %184 : vector<16x2xf32> to vector<1x16x2xf32>
    tpu.vector_store %arg17[%185, %c0_68, %c0_69], %188 {strides = array<i32>} : memref<8x16x2xf32, #tpu.memory_space<vmem>>, vector<1x16x2xf32>,
    %189 = arith.index_cast %c1_i32 : i32 to index
    %c0_70 = arith.constant 0 : index
    %c0_71 = arith.constant 0 : index
    %190 = vector.load %arg18[%189, %c0_70, %c0_71] : memref<8x16x2xf32, #tpu.memory_space<vmem>>, vector<1x16x2xf32>
    %191 = vector.shape_cast %190 : vector<1x16x2xf32> to vector<16x2xf32>
    %192 = vector.shape_cast %113 : vector<16x2xf32> to vector<1x16x2xf32>
    tpu.vector_store %arg18[%189, %c0_70, %c0_71], %192 {strides = array<i32>} : memref<8x16x2xf32, #tpu.memory_space<vmem>>, vector<1x16x2xf32>,
    %c2_i32 = arith.constant 2 : i32
    %193 = arith.index_cast %c2_i32 : i32 to index
    %c0_72 = arith.constant 0 : index
    %c0_73 = arith.constant 0 : index
    %194 = vector.load %arg1[%193, %c0_72, %c0_73] : memref<8x16x2xf32, #tpu.memory_space<vmem>>, vector<1x16x2xf32>
    %195 = vector.shape_cast %194 : vector<1x16x2xf32> to vector<16x2xf32>
    %cst_74 = arith.constant dense<0.000000e+00> : vector<16x4xf32>
    %196 = tpu.matmul %184, %0, %cst_74 {dimension_numbers = #tpu.dot_dimension_numbers<[1], [0], [0], [1], [0, 0, 1, 1], [], []>} : vector<16x2xf32>, vector<2x4xf32>, vector<16x4xf32> -> vector<16x4xf32>
    %197 = vector.extract_strided_slice %196 {offsets = [0, 0], sizes = [16, 2], strides = [1, 1]} : vector<16x4xf32> to vector<16x2xf32>
    %198 = vector.extract_strided_slice %196 {offsets = [0, 2], sizes = [16, 2], strides = [1, 1]} : vector<16x4xf32> to vector<16x2xf32>
    %199 = arith.subf %184, %114 : vector<16x2xf32>
    %200 = arith.mulf %199, %199 : vector<16x2xf32>
    %cst_75 = arith.constant dense<0.000000e+00> : vector<16xf32>
    %201 = vector.multi_reduction <add>, %200, %cst_75 [1] : vector<16x2xf32> to vector<16xf32>
    %202 = vector.shape_cast %201 : vector<16xf32> to vector<16x1xf32>
    %cst_76 = arith.constant 1.000000e-24 : f32
    %203 = vector.broadcast %cst_76 : f32 to vector<16x1xf32>
    %204 = arith.maximumf %202, %203 : vector<16x1xf32>
    %205 = math.rsqrt %204 : vector<16x1xf32>
    %206 = vector.broadcast %205 : vector<16x1xf32> to vector<16x2xf32>
    %207 = arith.mulf %199, %206 : vector<16x2xf32>
    %208 = arith.subf %195, %197 : vector<16x2xf32>
    %209 = arith.mulf %208, %208 : vector<16x2xf32>
    %cst_77 = arith.constant dense<0.000000e+00> : vector<16xf32>
    %210 = vector.multi_reduction <add>, %209, %cst_77 [1] : vector<16x2xf32> to vector<16xf32>
    %211 = vector.shape_cast %210 : vector<16xf32> to vector<16x1xf32>
    %cst_78 = arith.constant 1.000000e-24 : f32
    %212 = vector.broadcast %cst_78 : f32 to vector<16x1xf32>
    %213 = arith.maximumf %211, %212 : vector<16x1xf32>
    %214 = math.rsqrt %213 : vector<16x1xf32>
    %215 = vector.broadcast %214 : vector<16x1xf32> to vector<16x2xf32>
    %216 = arith.mulf %208, %215 : vector<16x2xf32>
    %cst_79 = arith.constant dense<0.000000e+00> : vector<16x320xf32>
    %217 = tpu.matmul %216, %1, %cst_79 {dimension_numbers = #tpu.dot_dimension_numbers<[1], [0], [0], [1], [0, 0, 1, 1], [], []>} : vector<16x2xf32>, vector<2x320xf32>, vector<16x320xf32> -> vector<16x320xf32>
    %cst_80 = arith.constant dense<0.000000e+00> : vector<16x320xf32>
    %218 = tpu.matmul %207, %2, %cst_80 {dimension_numbers = #tpu.dot_dimension_numbers<[1], [0], [0], [1], [0, 0, 1, 1], [], []>} : vector<16x2xf32>, vector<2x320xf32>, vector<16x320xf32> -> vector<16x320xf32>
    %219 = arith.addf %217, %218 : vector<16x320xf32>
    %220 = arith.addf %219, %9 : vector<16x320xf32>
    %cst_81 = arith.constant 0.000000e+00 : f32
    %221 = vector.broadcast %cst_81 : f32 to vector<16x320xf32>
    %222 = arith.maximumf %220, %221 : vector<16x320xf32>
    %cst_82 = arith.constant dense<0.000000e+00> : vector<16x384xf32>
    %223 = tpu.matmul %222, %3, %cst_82 {dimension_numbers = #tpu.dot_dimension_numbers<[1], [0], [0], [1], [0, 0, 1, 1], [], []>} : vector<16x320xf32>, vector<320x384xf32>, vector<16x384xf32> -> vector<16x384xf32>
    %224 = arith.addf %223, %12 : vector<16x384xf32>
    %cst_83 = arith.constant dense<0.000000e+00> : vector<16x384xf32>
    %225 = tpu.matmul %168, %4, %cst_83 {dimension_numbers = #tpu.dot_dimension_numbers<[1], [0], [0], [1], [0, 0, 1, 1], [], []>} : vector<16x80xf32>, vector<80x384xf32>, vector<16x384xf32> -> vector<16x384xf32>
    %226 = vector.extract_strided_slice %224 {offsets = [0, 0], sizes = [16, 80], strides = [1, 1]} : vector<16x384xf32> to vector<16x80xf32>
    %227 = vector.extract_strided_slice %225 {offsets = [0, 0], sizes = [16, 80], strides = [1, 1]} : vector<16x384xf32> to vector<16x80xf32>
    %228 = arith.addf %226, %227 : vector<16x80xf32>
    %229 = arith.negf %228 : vector<16x80xf32>
    %230 = math.exp %229 : vector<16x80xf32>
    %cst_84 = arith.constant 1.000000e+00 : f32
    %231 = vector.broadcast %cst_84 : f32 to vector<16x80xf32>
    %232 = arith.addf %231, %230 : vector<16x80xf32>
    %233 = arith.divf %231, %232 : vector<16x80xf32>
    %234 = vector.extract_strided_slice %224 {offsets = [0, 128], sizes = [16, 80], strides = [1, 1]} : vector<16x384xf32> to vector<16x80xf32>
    %235 = vector.extract_strided_slice %225 {offsets = [0, 128], sizes = [16, 80], strides = [1, 1]} : vector<16x384xf32> to vector<16x80xf32>
    %236 = arith.addf %234, %235 : vector<16x80xf32>
    %237 = arith.negf %236 : vector<16x80xf32>
    %238 = math.exp %237 : vector<16x80xf32>
    %cst_85 = arith.constant 1.000000e+00 : f32
    %239 = vector.broadcast %cst_85 : f32 to vector<16x80xf32>
    %240 = arith.addf %239, %238 : vector<16x80xf32>
    %241 = arith.divf %239, %240 : vector<16x80xf32>
    %242 = vector.extract_strided_slice %224 {offsets = [0, 256], sizes = [16, 80], strides = [1, 1]} : vector<16x384xf32> to vector<16x80xf32>
    %243 = vector.extract_strided_slice %225 {offsets = [0, 256], sizes = [16, 80], strides = [1, 1]} : vector<16x384xf32> to vector<16x80xf32>
    %244 = arith.addf %243, %15 : vector<16x80xf32>
    %245 = arith.mulf %233, %244 : vector<16x80xf32>
    %246 = arith.addf %242, %245 : vector<16x80xf32>
    %247 = math.tanh %246 : vector<16x80xf32>
    %cst_86 = arith.constant 1.000000e+00 : f32
    %248 = vector.broadcast %cst_86 : f32 to vector<16x80xf32>
    %249 = arith.subf %248, %241 : vector<16x80xf32>
    %250 = arith.mulf %249, %247 : vector<16x80xf32>
    %251 = arith.mulf %241, %168 : vector<16x80xf32>
    %252 = arith.addf %250, %251 : vector<16x80xf32>
    %cst_87 = arith.constant dense<0.000000e+00> : vector<16x40xf32>
    %253 = tpu.matmul %252, %5, %cst_87 {dimension_numbers = #tpu.dot_dimension_numbers<[1], [0], [0], [1], [0, 0, 1, 1], [], []>} : vector<16x80xf32>, vector<80x40xf32>, vector<16x40xf32> -> vector<16x40xf32>
    %254 = arith.addf %253, %18 : vector<16x40xf32>
    %cst_88 = arith.constant 0.000000e+00 : f32
    %255 = vector.broadcast %cst_88 : f32 to vector<16x40xf32>
    %256 = arith.maximumf %254, %255 : vector<16x40xf32>
    %cst_89 = arith.constant dense<0.000000e+00> : vector<16x4xf32>
    %257 = tpu.matmul %256, %6, %cst_89 {dimension_numbers = #tpu.dot_dimension_numbers<[1], [0], [0], [1], [0, 0, 1, 1], [], []>} : vector<16x40xf32>, vector<40x4xf32>, vector<16x4xf32> -> vector<16x4xf32>
    %258 = arith.addf %257, %21 : vector<16x4xf32>
    %259 = vector.extract_strided_slice %216 {offsets = [0, 0], sizes = [16, 1], strides = [1, 1]} : vector<16x2xf32> to vector<16x1xf32>
    %260 = vector.extract_strided_slice %258 {offsets = [0, 0], sizes = [16, 2], strides = [1, 1]} : vector<16x4xf32> to vector<16x2xf32>
    %261 = vector.broadcast %259 : vector<16x1xf32> to vector<16x2xf32>
    %262 = arith.mulf %261, %260 : vector<16x2xf32>
    %263 = vector.extract_strided_slice %216 {offsets = [0, 1], sizes = [16, 1], strides = [1, 1]} : vector<16x2xf32> to vector<16x1xf32>
    %264 = vector.extract_strided_slice %258 {offsets = [0, 2], sizes = [16, 2], strides = [1, 1]} : vector<16x4xf32> to vector<16x2xf32>
    %265 = vector.broadcast %263 : vector<16x1xf32> to vector<16x2xf32>
    %266 = arith.mulf %265, %264 : vector<16x2xf32>
    %267 = arith.addf %262, %266 : vector<16x2xf32>
    %268 = arith.addf %198, %267 : vector<16x2xf32>
    %269 = arith.index_cast %c2_i32 : i32 to index
    %c0_90 = arith.constant 0 : index
    %c0_91 = arith.constant 0 : index
    %270 = vector.load %arg17[%269, %c0_90, %c0_91] : memref<8x16x2xf32, #tpu.memory_space<vmem>>, vector<1x16x2xf32>
    %271 = vector.shape_cast %270 : vector<1x16x2xf32> to vector<16x2xf32>
    %272 = vector.shape_cast %268 : vector<16x2xf32> to vector<1x16x2xf32>
    tpu.vector_store %arg17[%269, %c0_90, %c0_91], %272 {strides = array<i32>} : memref<8x16x2xf32, #tpu.memory_space<vmem>>, vector<1x16x2xf32>,
    %273 = arith.index_cast %c2_i32 : i32 to index
    %c0_92 = arith.constant 0 : index
    %c0_93 = arith.constant 0 : index
    %274 = vector.load %arg18[%273, %c0_92, %c0_93] : memref<8x16x2xf32, #tpu.memory_space<vmem>>, vector<1x16x2xf32>
    %275 = vector.shape_cast %274 : vector<1x16x2xf32> to vector<16x2xf32>
    %276 = vector.shape_cast %197 : vector<16x2xf32> to vector<1x16x2xf32>
    tpu.vector_store %arg18[%273, %c0_92, %c0_93], %276 {strides = array<i32>} : memref<8x16x2xf32, #tpu.memory_space<vmem>>, vector<1x16x2xf32>,
    %c3_i32 = arith.constant 3 : i32
    %277 = arith.index_cast %c3_i32 : i32 to index
    %c0_94 = arith.constant 0 : index
    %c0_95 = arith.constant 0 : index
    %278 = vector.load %arg1[%277, %c0_94, %c0_95] : memref<8x16x2xf32, #tpu.memory_space<vmem>>, vector<1x16x2xf32>
    %279 = vector.shape_cast %278 : vector<1x16x2xf32> to vector<16x2xf32>
    %cst_96 = arith.constant dense<0.000000e+00> : vector<16x4xf32>
    %280 = tpu.matmul %268, %0, %cst_96 {dimension_numbers = #tpu.dot_dimension_numbers<[1], [0], [0], [1], [0, 0, 1, 1], [], []>} : vector<16x2xf32>, vector<2x4xf32>, vector<16x4xf32> -> vector<16x4xf32>
    %281 = vector.extract_strided_slice %280 {offsets = [0, 0], sizes = [16, 2], strides = [1, 1]} : vector<16x4xf32> to vector<16x2xf32>
    %282 = vector.extract_strided_slice %280 {offsets = [0, 2], sizes = [16, 2], strides = [1, 1]} : vector<16x4xf32> to vector<16x2xf32>
    %283 = arith.subf %268, %198 : vector<16x2xf32>
    %284 = arith.mulf %283, %283 : vector<16x2xf32>
    %cst_97 = arith.constant dense<0.000000e+00> : vector<16xf32>
    %285 = vector.multi_reduction <add>, %284, %cst_97 [1] : vector<16x2xf32> to vector<16xf32>
    %286 = vector.shape_cast %285 : vector<16xf32> to vector<16x1xf32>
    %cst_98 = arith.constant 1.000000e-24 : f32
    %287 = vector.broadcast %cst_98 : f32 to vector<16x1xf32>
    %288 = arith.maximumf %286, %287 : vector<16x1xf32>
    %289 = math.rsqrt %288 : vector<16x1xf32>
    %290 = vector.broadcast %289 : vector<16x1xf32> to vector<16x2xf32>
    %291 = arith.mulf %283, %290 : vector<16x2xf32>
    %292 = arith.subf %279, %281 : vector<16x2xf32>
    %293 = arith.mulf %292, %292 : vector<16x2xf32>
    %cst_99 = arith.constant dense<0.000000e+00> : vector<16xf32>
    %294 = vector.multi_reduction <add>, %293, %cst_99 [1] : vector<16x2xf32> to vector<16xf32>
    %295 = vector.shape_cast %294 : vector<16xf32> to vector<16x1xf32>
    %cst_100 = arith.constant 1.000000e-24 : f32
    %296 = vector.broadcast %cst_100 : f32 to vector<16x1xf32>
    %297 = arith.maximumf %295, %296 : vector<16x1xf32>
    %298 = math.rsqrt %297 : vector<16x1xf32>
    %299 = vector.broadcast %298 : vector<16x1xf32> to vector<16x2xf32>
    %300 = arith.mulf %292, %299 : vector<16x2xf32>
    %cst_101 = arith.constant dense<0.000000e+00> : vector<16x320xf32>
    %301 = tpu.matmul %300, %1, %cst_101 {dimension_numbers = #tpu.dot_dimension_numbers<[1], [0], [0], [1], [0, 0, 1, 1], [], []>} : vector<16x2xf32>, vector<2x320xf32>, vector<16x320xf32> -> vector<16x320xf32>
    %cst_102 = arith.constant dense<0.000000e+00> : vector<16x320xf32>
    %302 = tpu.matmul %291, %2, %cst_102 {dimension_numbers = #tpu.dot_dimension_numbers<[1], [0], [0], [1], [0, 0, 1, 1], [], []>} : vector<16x2xf32>, vector<2x320xf32>, vector<16x320xf32> -> vector<16x320xf32>
    %303 = arith.addf %301, %302 : vector<16x320xf32>
    %304 = arith.addf %303, %9 : vector<16x320xf32>
    %cst_103 = arith.constant 0.000000e+00 : f32
    %305 = vector.broadcast %cst_103 : f32 to vector<16x320xf32>
    %306 = arith.maximumf %304, %305 : vector<16x320xf32>
    %cst_104 = arith.constant dense<0.000000e+00> : vector<16x384xf32>
    %307 = tpu.matmul %306, %3, %cst_104 {dimension_numbers = #tpu.dot_dimension_numbers<[1], [0], [0], [1], [0, 0, 1, 1], [], []>} : vector<16x320xf32>, vector<320x384xf32>, vector<16x384xf32> -> vector<16x384xf32>
    %308 = arith.addf %307, %12 : vector<16x384xf32>
    %cst_105 = arith.constant dense<0.000000e+00> : vector<16x384xf32>
    %309 = tpu.matmul %252, %4, %cst_105 {dimension_numbers = #tpu.dot_dimension_numbers<[1], [0], [0], [1], [0, 0, 1, 1], [], []>} : vector<16x80xf32>, vector<80x384xf32>, vector<16x384xf32> -> vector<16x384xf32>
    %310 = vector.extract_strided_slice %308 {offsets = [0, 0], sizes = [16, 80], strides = [1, 1]} : vector<16x384xf32> to vector<16x80xf32>
    %311 = vector.extract_strided_slice %309 {offsets = [0, 0], sizes = [16, 80], strides = [1, 1]} : vector<16x384xf32> to vector<16x80xf32>
    %312 = arith.addf %310, %311 : vector<16x80xf32>
    %313 = arith.negf %312 : vector<16x80xf32>
    %314 = math.exp %313 : vector<16x80xf32>
    %cst_106 = arith.constant 1.000000e+00 : f32
    %315 = vector.broadcast %cst_106 : f32 to vector<16x80xf32>
    %316 = arith.addf %315, %314 : vector<16x80xf32>
    %317 = arith.divf %315, %316 : vector<16x80xf32>
    %318 = vector.extract_strided_slice %308 {offsets = [0, 128], sizes = [16, 80], strides = [1, 1]} : vector<16x384xf32> to vector<16x80xf32>
    %319 = vector.extract_strided_slice %309 {offsets = [0, 128], sizes = [16, 80], strides = [1, 1]} : vector<16x384xf32> to vector<16x80xf32>
    %320 = arith.addf %318, %319 : vector<16x80xf32>
    %321 = arith.negf %320 : vector<16x80xf32>
    %322 = math.exp %321 : vector<16x80xf32>
    %cst_107 = arith.constant 1.000000e+00 : f32
    %323 = vector.broadcast %cst_107 : f32 to vector<16x80xf32>
    %324 = arith.addf %323, %322 : vector<16x80xf32>
    %325 = arith.divf %323, %324 : vector<16x80xf32>
    %326 = vector.extract_strided_slice %308 {offsets = [0, 256], sizes = [16, 80], strides = [1, 1]} : vector<16x384xf32> to vector<16x80xf32>
    %327 = vector.extract_strided_slice %309 {offsets = [0, 256], sizes = [16, 80], strides = [1, 1]} : vector<16x384xf32> to vector<16x80xf32>
    %328 = arith.addf %327, %15 : vector<16x80xf32>
    %329 = arith.mulf %317, %328 : vector<16x80xf32>
    %330 = arith.addf %326, %329 : vector<16x80xf32>
    %331 = math.tanh %330 : vector<16x80xf32>
    %cst_108 = arith.constant 1.000000e+00 : f32
    %332 = vector.broadcast %cst_108 : f32 to vector<16x80xf32>
    %333 = arith.subf %332, %325 : vector<16x80xf32>
    %334 = arith.mulf %333, %331 : vector<16x80xf32>
    %335 = arith.mulf %325, %252 : vector<16x80xf32>
    %336 = arith.addf %334, %335 : vector<16x80xf32>
    %cst_109 = arith.constant dense<0.000000e+00> : vector<16x40xf32>
    %337 = tpu.matmul %336, %5, %cst_109 {dimension_numbers = #tpu.dot_dimension_numbers<[1], [0], [0], [1], [0, 0, 1, 1], [], []>} : vector<16x80xf32>, vector<80x40xf32>, vector<16x40xf32> -> vector<16x40xf32>
    %338 = arith.addf %337, %18 : vector<16x40xf32>
    %cst_110 = arith.constant 0.000000e+00 : f32
    %339 = vector.broadcast %cst_110 : f32 to vector<16x40xf32>
    %340 = arith.maximumf %338, %339 : vector<16x40xf32>
    %cst_111 = arith.constant dense<0.000000e+00> : vector<16x4xf32>
    %341 = tpu.matmul %340, %6, %cst_111 {dimension_numbers = #tpu.dot_dimension_numbers<[1], [0], [0], [1], [0, 0, 1, 1], [], []>} : vector<16x40xf32>, vector<40x4xf32>, vector<16x4xf32> -> vector<16x4xf32>
    %342 = arith.addf %341, %21 : vector<16x4xf32>
    %343 = vector.extract_strided_slice %300 {offsets = [0, 0], sizes = [16, 1], strides = [1, 1]} : vector<16x2xf32> to vector<16x1xf32>
    %344 = vector.extract_strided_slice %342 {offsets = [0, 0], sizes = [16, 2], strides = [1, 1]} : vector<16x4xf32> to vector<16x2xf32>
    %345 = vector.broadcast %343 : vector<16x1xf32> to vector<16x2xf32>
    %346 = arith.mulf %345, %344 : vector<16x2xf32>
    %347 = vector.extract_strided_slice %300 {offsets = [0, 1], sizes = [16, 1], strides = [1, 1]} : vector<16x2xf32> to vector<16x1xf32>
    %348 = vector.extract_strided_slice %342 {offsets = [0, 2], sizes = [16, 2], strides = [1, 1]} : vector<16x4xf32> to vector<16x2xf32>
    %349 = vector.broadcast %347 : vector<16x1xf32> to vector<16x2xf32>
    %350 = arith.mulf %349, %348 : vector<16x2xf32>
    %351 = arith.addf %346, %350 : vector<16x2xf32>
    %352 = arith.addf %282, %351 : vector<16x2xf32>
    %353 = arith.index_cast %c3_i32 : i32 to index
    %c0_112 = arith.constant 0 : index
    %c0_113 = arith.constant 0 : index
    %354 = vector.load %arg17[%353, %c0_112, %c0_113] : memref<8x16x2xf32, #tpu.memory_space<vmem>>, vector<1x16x2xf32>
    %355 = vector.shape_cast %354 : vector<1x16x2xf32> to vector<16x2xf32>
    %356 = vector.shape_cast %352 : vector<16x2xf32> to vector<1x16x2xf32>
    tpu.vector_store %arg17[%353, %c0_112, %c0_113], %356 {strides = array<i32>} : memref<8x16x2xf32, #tpu.memory_space<vmem>>, vector<1x16x2xf32>,
    %357 = arith.index_cast %c3_i32 : i32 to index
    %c0_114 = arith.constant 0 : index
    %c0_115 = arith.constant 0 : index
    %358 = vector.load %arg18[%357, %c0_114, %c0_115] : memref<8x16x2xf32, #tpu.memory_space<vmem>>, vector<1x16x2xf32>
    %359 = vector.shape_cast %358 : vector<1x16x2xf32> to vector<16x2xf32>
    %360 = vector.shape_cast %281 : vector<16x2xf32> to vector<1x16x2xf32>
    tpu.vector_store %arg18[%357, %c0_114, %c0_115], %360 {strides = array<i32>} : memref<8x16x2xf32, #tpu.memory_space<vmem>>, vector<1x16x2xf32>,
    %c4_i32 = arith.constant 4 : i32
    %361 = arith.index_cast %c4_i32 : i32 to index
    %c0_116 = arith.constant 0 : index
    %c0_117 = arith.constant 0 : index
    %362 = vector.load %arg1[%361, %c0_116, %c0_117] : memref<8x16x2xf32, #tpu.memory_space<vmem>>, vector<1x16x2xf32>
    %363 = vector.shape_cast %362 : vector<1x16x2xf32> to vector<16x2xf32>
    %cst_118 = arith.constant dense<0.000000e+00> : vector<16x4xf32>
    %364 = tpu.matmul %352, %0, %cst_118 {dimension_numbers = #tpu.dot_dimension_numbers<[1], [0], [0], [1], [0, 0, 1, 1], [], []>} : vector<16x2xf32>, vector<2x4xf32>, vector<16x4xf32> -> vector<16x4xf32>
    %365 = vector.extract_strided_slice %364 {offsets = [0, 0], sizes = [16, 2], strides = [1, 1]} : vector<16x4xf32> to vector<16x2xf32>
    %366 = vector.extract_strided_slice %364 {offsets = [0, 2], sizes = [16, 2], strides = [1, 1]} : vector<16x4xf32> to vector<16x2xf32>
    %367 = arith.subf %352, %282 : vector<16x2xf32>
    %368 = arith.mulf %367, %367 : vector<16x2xf32>
    %cst_119 = arith.constant dense<0.000000e+00> : vector<16xf32>
    %369 = vector.multi_reduction <add>, %368, %cst_119 [1] : vector<16x2xf32> to vector<16xf32>
    %370 = vector.shape_cast %369 : vector<16xf32> to vector<16x1xf32>
    %cst_120 = arith.constant 1.000000e-24 : f32
    %371 = vector.broadcast %cst_120 : f32 to vector<16x1xf32>
    %372 = arith.maximumf %370, %371 : vector<16x1xf32>
    %373 = math.rsqrt %372 : vector<16x1xf32>
    %374 = vector.broadcast %373 : vector<16x1xf32> to vector<16x2xf32>
    %375 = arith.mulf %367, %374 : vector<16x2xf32>
    %376 = arith.subf %363, %365 : vector<16x2xf32>
    %377 = arith.mulf %376, %376 : vector<16x2xf32>
    %cst_121 = arith.constant dense<0.000000e+00> : vector<16xf32>
    %378 = vector.multi_reduction <add>, %377, %cst_121 [1] : vector<16x2xf32> to vector<16xf32>
    %379 = vector.shape_cast %378 : vector<16xf32> to vector<16x1xf32>
    %cst_122 = arith.constant 1.000000e-24 : f32
    %380 = vector.broadcast %cst_122 : f32 to vector<16x1xf32>
    %381 = arith.maximumf %379, %380 : vector<16x1xf32>
    %382 = math.rsqrt %381 : vector<16x1xf32>
    %383 = vector.broadcast %382 : vector<16x1xf32> to vector<16x2xf32>
    %384 = arith.mulf %376, %383 : vector<16x2xf32>
    %cst_123 = arith.constant dense<0.000000e+00> : vector<16x320xf32>
    %385 = tpu.matmul %384, %1, %cst_123 {dimension_numbers = #tpu.dot_dimension_numbers<[1], [0], [0], [1], [0, 0, 1, 1], [], []>} : vector<16x2xf32>, vector<2x320xf32>, vector<16x320xf32> -> vector<16x320xf32>
    %cst_124 = arith.constant dense<0.000000e+00> : vector<16x320xf32>
    %386 = tpu.matmul %375, %2, %cst_124 {dimension_numbers = #tpu.dot_dimension_numbers<[1], [0], [0], [1], [0, 0, 1, 1], [], []>} : vector<16x2xf32>, vector<2x320xf32>, vector<16x320xf32> -> vector<16x320xf32>
    %387 = arith.addf %385, %386 : vector<16x320xf32>
    %388 = arith.addf %387, %9 : vector<16x320xf32>
    %cst_125 = arith.constant 0.000000e+00 : f32
    %389 = vector.broadcast %cst_125 : f32 to vector<16x320xf32>
    %390 = arith.maximumf %388, %389 : vector<16x320xf32>
    %cst_126 = arith.constant dense<0.000000e+00> : vector<16x384xf32>
    %391 = tpu.matmul %390, %3, %cst_126 {dimension_numbers = #tpu.dot_dimension_numbers<[1], [0], [0], [1], [0, 0, 1, 1], [], []>} : vector<16x320xf32>, vector<320x384xf32>, vector<16x384xf32> -> vector<16x384xf32>
    %392 = arith.addf %391, %12 : vector<16x384xf32>
    %cst_127 = arith.constant dense<0.000000e+00> : vector<16x384xf32>
    %393 = tpu.matmul %336, %4, %cst_127 {dimension_numbers = #tpu.dot_dimension_numbers<[1], [0], [0], [1], [0, 0, 1, 1], [], []>} : vector<16x80xf32>, vector<80x384xf32>, vector<16x384xf32> -> vector<16x384xf32>
    %394 = vector.extract_strided_slice %392 {offsets = [0, 0], sizes = [16, 80], strides = [1, 1]} : vector<16x384xf32> to vector<16x80xf32>
    %395 = vector.extract_strided_slice %393 {offsets = [0, 0], sizes = [16, 80], strides = [1, 1]} : vector<16x384xf32> to vector<16x80xf32>
    %396 = arith.addf %394, %395 : vector<16x80xf32>
    %397 = arith.negf %396 : vector<16x80xf32>
    %398 = math.exp %397 : vector<16x80xf32>
    %cst_128 = arith.constant 1.000000e+00 : f32
    %399 = vector.broadcast %cst_128 : f32 to vector<16x80xf32>
    %400 = arith.addf %399, %398 : vector<16x80xf32>
    %401 = arith.divf %399, %400 : vector<16x80xf32>
    %402 = vector.extract_strided_slice %392 {offsets = [0, 128], sizes = [16, 80], strides = [1, 1]} : vector<16x384xf32> to vector<16x80xf32>
    %403 = vector.extract_strided_slice %393 {offsets = [0, 128], sizes = [16, 80], strides = [1, 1]} : vector<16x384xf32> to vector<16x80xf32>
    %404 = arith.addf %402, %403 : vector<16x80xf32>
    %405 = arith.negf %404 : vector<16x80xf32>
    %406 = math.exp %405 : vector<16x80xf32>
    %cst_129 = arith.constant 1.000000e+00 : f32
    %407 = vector.broadcast %cst_129 : f32 to vector<16x80xf32>
    %408 = arith.addf %407, %406 : vector<16x80xf32>
    %409 = arith.divf %407, %408 : vector<16x80xf32>
    %410 = vector.extract_strided_slice %392 {offsets = [0, 256], sizes = [16, 80], strides = [1, 1]} : vector<16x384xf32> to vector<16x80xf32>
    %411 = vector.extract_strided_slice %393 {offsets = [0, 256], sizes = [16, 80], strides = [1, 1]} : vector<16x384xf32> to vector<16x80xf32>
    %412 = arith.addf %411, %15 : vector<16x80xf32>
    %413 = arith.mulf %401, %412 : vector<16x80xf32>
    %414 = arith.addf %410, %413 : vector<16x80xf32>
    %415 = math.tanh %414 : vector<16x80xf32>
    %cst_130 = arith.constant 1.000000e+00 : f32
    %416 = vector.broadcast %cst_130 : f32 to vector<16x80xf32>
    %417 = arith.subf %416, %409 : vector<16x80xf32>
    %418 = arith.mulf %417, %415 : vector<16x80xf32>
    %419 = arith.mulf %409, %336 : vector<16x80xf32>
    %420 = arith.addf %418, %419 : vector<16x80xf32>
    %cst_131 = arith.constant dense<0.000000e+00> : vector<16x40xf32>
    %421 = tpu.matmul %420, %5, %cst_131 {dimension_numbers = #tpu.dot_dimension_numbers<[1], [0], [0], [1], [0, 0, 1, 1], [], []>} : vector<16x80xf32>, vector<80x40xf32>, vector<16x40xf32> -> vector<16x40xf32>
    %422 = arith.addf %421, %18 : vector<16x40xf32>
    %cst_132 = arith.constant 0.000000e+00 : f32
    %423 = vector.broadcast %cst_132 : f32 to vector<16x40xf32>
    %424 = arith.maximumf %422, %423 : vector<16x40xf32>
    %cst_133 = arith.constant dense<0.000000e+00> : vector<16x4xf32>
    %425 = tpu.matmul %424, %6, %cst_133 {dimension_numbers = #tpu.dot_dimension_numbers<[1], [0], [0], [1], [0, 0, 1, 1], [], []>} : vector<16x40xf32>, vector<40x4xf32>, vector<16x4xf32> -> vector<16x4xf32>
    %426 = arith.addf %425, %21 : vector<16x4xf32>
    %427 = vector.extract_strided_slice %384 {offsets = [0, 0], sizes = [16, 1], strides = [1, 1]} : vector<16x2xf32> to vector<16x1xf32>
    %428 = vector.extract_strided_slice %426 {offsets = [0, 0], sizes = [16, 2], strides = [1, 1]} : vector<16x4xf32> to vector<16x2xf32>
    %429 = vector.broadcast %427 : vector<16x1xf32> to vector<16x2xf32>
    %430 = arith.mulf %429, %428 : vector<16x2xf32>
    %431 = vector.extract_strided_slice %384 {offsets = [0, 1], sizes = [16, 1], strides = [1, 1]} : vector<16x2xf32> to vector<16x1xf32>
    %432 = vector.extract_strided_slice %426 {offsets = [0, 2], sizes = [16, 2], strides = [1, 1]} : vector<16x4xf32> to vector<16x2xf32>
    %433 = vector.broadcast %431 : vector<16x1xf32> to vector<16x2xf32>
    %434 = arith.mulf %433, %432 : vector<16x2xf32>
    %435 = arith.addf %430, %434 : vector<16x2xf32>
    %436 = arith.addf %366, %435 : vector<16x2xf32>
    %437 = arith.index_cast %c4_i32 : i32 to index
    %c0_134 = arith.constant 0 : index
    %c0_135 = arith.constant 0 : index
    %438 = vector.load %arg17[%437, %c0_134, %c0_135] : memref<8x16x2xf32, #tpu.memory_space<vmem>>, vector<1x16x2xf32>
    %439 = vector.shape_cast %438 : vector<1x16x2xf32> to vector<16x2xf32>
    %440 = vector.shape_cast %436 : vector<16x2xf32> to vector<1x16x2xf32>
    tpu.vector_store %arg17[%437, %c0_134, %c0_135], %440 {strides = array<i32>} : memref<8x16x2xf32, #tpu.memory_space<vmem>>, vector<1x16x2xf32>,
    %441 = arith.index_cast %c4_i32 : i32 to index
    %c0_136 = arith.constant 0 : index
    %c0_137 = arith.constant 0 : index
    %442 = vector.load %arg18[%441, %c0_136, %c0_137] : memref<8x16x2xf32, #tpu.memory_space<vmem>>, vector<1x16x2xf32>
    %443 = vector.shape_cast %442 : vector<1x16x2xf32> to vector<16x2xf32>
    %444 = vector.shape_cast %365 : vector<16x2xf32> to vector<1x16x2xf32>
    tpu.vector_store %arg18[%441, %c0_136, %c0_137], %444 {strides = array<i32>} : memref<8x16x2xf32, #tpu.memory_space<vmem>>, vector<1x16x2xf32>,
    %c5_i32 = arith.constant 5 : i32
    %445 = arith.index_cast %c5_i32 : i32 to index
    %c0_138 = arith.constant 0 : index
    %c0_139 = arith.constant 0 : index
    %446 = vector.load %arg1[%445, %c0_138, %c0_139] : memref<8x16x2xf32, #tpu.memory_space<vmem>>, vector<1x16x2xf32>
    %447 = vector.shape_cast %446 : vector<1x16x2xf32> to vector<16x2xf32>
    %cst_140 = arith.constant dense<0.000000e+00> : vector<16x4xf32>
    %448 = tpu.matmul %436, %0, %cst_140 {dimension_numbers = #tpu.dot_dimension_numbers<[1], [0], [0], [1], [0, 0, 1, 1], [], []>} : vector<16x2xf32>, vector<2x4xf32>, vector<16x4xf32> -> vector<16x4xf32>
    %449 = vector.extract_strided_slice %448 {offsets = [0, 0], sizes = [16, 2], strides = [1, 1]} : vector<16x4xf32> to vector<16x2xf32>
    %450 = vector.extract_strided_slice %448 {offsets = [0, 2], sizes = [16, 2], strides = [1, 1]} : vector<16x4xf32> to vector<16x2xf32>
    %451 = arith.subf %436, %366 : vector<16x2xf32>
    %452 = arith.mulf %451, %451 : vector<16x2xf32>
    %cst_141 = arith.constant dense<0.000000e+00> : vector<16xf32>
    %453 = vector.multi_reduction <add>, %452, %cst_141 [1] : vector<16x2xf32> to vector<16xf32>
    %454 = vector.shape_cast %453 : vector<16xf32> to vector<16x1xf32>
    %cst_142 = arith.constant 1.000000e-24 : f32
    %455 = vector.broadcast %cst_142 : f32 to vector<16x1xf32>
    %456 = arith.maximumf %454, %455 : vector<16x1xf32>
    %457 = math.rsqrt %456 : vector<16x1xf32>
    %458 = vector.broadcast %457 : vector<16x1xf32> to vector<16x2xf32>
    %459 = arith.mulf %451, %458 : vector<16x2xf32>
    %460 = arith.subf %447, %449 : vector<16x2xf32>
    %461 = arith.mulf %460, %460 : vector<16x2xf32>
    %cst_143 = arith.constant dense<0.000000e+00> : vector<16xf32>
    %462 = vector.multi_reduction <add>, %461, %cst_143 [1] : vector<16x2xf32> to vector<16xf32>
    %463 = vector.shape_cast %462 : vector<16xf32> to vector<16x1xf32>
    %cst_144 = arith.constant 1.000000e-24 : f32
    %464 = vector.broadcast %cst_144 : f32 to vector<16x1xf32>
    %465 = arith.maximumf %463, %464 : vector<16x1xf32>
    %466 = math.rsqrt %465 : vector<16x1xf32>
    %467 = vector.broadcast %466 : vector<16x1xf32> to vector<16x2xf32>
    %468 = arith.mulf %460, %467 : vector<16x2xf32>
    %cst_145 = arith.constant dense<0.000000e+00> : vector<16x320xf32>
    %469 = tpu.matmul %468, %1, %cst_145 {dimension_numbers = #tpu.dot_dimension_numbers<[1], [0], [0], [1], [0, 0, 1, 1], [], []>} : vector<16x2xf32>, vector<2x320xf32>, vector<16x320xf32> -> vector<16x320xf32>
    %cst_146 = arith.constant dense<0.000000e+00> : vector<16x320xf32>
    %470 = tpu.matmul %459, %2, %cst_146 {dimension_numbers = #tpu.dot_dimension_numbers<[1], [0], [0], [1], [0, 0, 1, 1], [], []>} : vector<16x2xf32>, vector<2x320xf32>, vector<16x320xf32> -> vector<16x320xf32>
    %471 = arith.addf %469, %470 : vector<16x320xf32>
    %472 = arith.addf %471, %9 : vector<16x320xf32>
    %cst_147 = arith.constant 0.000000e+00 : f32
    %473 = vector.broadcast %cst_147 : f32 to vector<16x320xf32>
    %474 = arith.maximumf %472, %473 : vector<16x320xf32>
    %cst_148 = arith.constant dense<0.000000e+00> : vector<16x384xf32>
    %475 = tpu.matmul %474, %3, %cst_148 {dimension_numbers = #tpu.dot_dimension_numbers<[1], [0], [0], [1], [0, 0, 1, 1], [], []>} : vector<16x320xf32>, vector<320x384xf32>, vector<16x384xf32> -> vector<16x384xf32>
    %476 = arith.addf %475, %12 : vector<16x384xf32>
    %cst_149 = arith.constant dense<0.000000e+00> : vector<16x384xf32>
    %477 = tpu.matmul %420, %4, %cst_149 {dimension_numbers = #tpu.dot_dimension_numbers<[1], [0], [0], [1], [0, 0, 1, 1], [], []>} : vector<16x80xf32>, vector<80x384xf32>, vector<16x384xf32> -> vector<16x384xf32>
    %478 = vector.extract_strided_slice %476 {offsets = [0, 0], sizes = [16, 80], strides = [1, 1]} : vector<16x384xf32> to vector<16x80xf32>
    %479 = vector.extract_strided_slice %477 {offsets = [0, 0], sizes = [16, 80], strides = [1, 1]} : vector<16x384xf32> to vector<16x80xf32>
    %480 = arith.addf %478, %479 : vector<16x80xf32>
    %481 = arith.negf %480 : vector<16x80xf32>
    %482 = math.exp %481 : vector<16x80xf32>
    %cst_150 = arith.constant 1.000000e+00 : f32
    %483 = vector.broadcast %cst_150 : f32 to vector<16x80xf32>
    %484 = arith.addf %483, %482 : vector<16x80xf32>
    %485 = arith.divf %483, %484 : vector<16x80xf32>
    %486 = vector.extract_strided_slice %476 {offsets = [0, 128], sizes = [16, 80], strides = [1, 1]} : vector<16x384xf32> to vector<16x80xf32>
    %487 = vector.extract_strided_slice %477 {offsets = [0, 128], sizes = [16, 80], strides = [1, 1]} : vector<16x384xf32> to vector<16x80xf32>
    %488 = arith.addf %486, %487 : vector<16x80xf32>
    %489 = arith.negf %488 : vector<16x80xf32>
    %490 = math.exp %489 : vector<16x80xf32>
    %cst_151 = arith.constant 1.000000e+00 : f32
    %491 = vector.broadcast %cst_151 : f32 to vector<16x80xf32>
    %492 = arith.addf %491, %490 : vector<16x80xf32>
    %493 = arith.divf %491, %492 : vector<16x80xf32>
    %494 = vector.extract_strided_slice %476 {offsets = [0, 256], sizes = [16, 80], strides = [1, 1]} : vector<16x384xf32> to vector<16x80xf32>
    %495 = vector.extract_strided_slice %477 {offsets = [0, 256], sizes = [16, 80], strides = [1, 1]} : vector<16x384xf32> to vector<16x80xf32>
    %496 = arith.addf %495, %15 : vector<16x80xf32>
    %497 = arith.mulf %485, %496 : vector<16x80xf32>
    %498 = arith.addf %494, %497 : vector<16x80xf32>
    %499 = math.tanh %498 : vector<16x80xf32>
    %cst_152 = arith.constant 1.000000e+00 : f32
    %500 = vector.broadcast %cst_152 : f32 to vector<16x80xf32>
    %501 = arith.subf %500, %493 : vector<16x80xf32>
    %502 = arith.mulf %501, %499 : vector<16x80xf32>
    %503 = arith.mulf %493, %420 : vector<16x80xf32>
    %504 = arith.addf %502, %503 : vector<16x80xf32>
    %cst_153 = arith.constant dense<0.000000e+00> : vector<16x40xf32>
    %505 = tpu.matmul %504, %5, %cst_153 {dimension_numbers = #tpu.dot_dimension_numbers<[1], [0], [0], [1], [0, 0, 1, 1], [], []>} : vector<16x80xf32>, vector<80x40xf32>, vector<16x40xf32> -> vector<16x40xf32>
    %506 = arith.addf %505, %18 : vector<16x40xf32>
    %cst_154 = arith.constant 0.000000e+00 : f32
    %507 = vector.broadcast %cst_154 : f32 to vector<16x40xf32>
    %508 = arith.maximumf %506, %507 : vector<16x40xf32>
    %cst_155 = arith.constant dense<0.000000e+00> : vector<16x4xf32>
    %509 = tpu.matmul %508, %6, %cst_155 {dimension_numbers = #tpu.dot_dimension_numbers<[1], [0], [0], [1], [0, 0, 1, 1], [], []>} : vector<16x40xf32>, vector<40x4xf32>, vector<16x4xf32> -> vector<16x4xf32>
    %510 = arith.addf %509, %21 : vector<16x4xf32>
    %511 = vector.extract_strided_slice %468 {offsets = [0, 0], sizes = [16, 1], strides = [1, 1]} : vector<16x2xf32> to vector<16x1xf32>
    %512 = vector.extract_strided_slice %510 {offsets = [0, 0], sizes = [16, 2], strides = [1, 1]} : vector<16x4xf32> to vector<16x2xf32>
    %513 = vector.broadcast %511 : vector<16x1xf32> to vector<16x2xf32>
    %514 = arith.mulf %513, %512 : vector<16x2xf32>
    %515 = vector.extract_strided_slice %468 {offsets = [0, 1], sizes = [16, 1], strides = [1, 1]} : vector<16x2xf32> to vector<16x1xf32>
    %516 = vector.extract_strided_slice %510 {offsets = [0, 2], sizes = [16, 2], strides = [1, 1]} : vector<16x4xf32> to vector<16x2xf32>
    %517 = vector.broadcast %515 : vector<16x1xf32> to vector<16x2xf32>
    %518 = arith.mulf %517, %516 : vector<16x2xf32>
    %519 = arith.addf %514, %518 : vector<16x2xf32>
    %520 = arith.addf %450, %519 : vector<16x2xf32>
    %521 = arith.index_cast %c5_i32 : i32 to index
    %c0_156 = arith.constant 0 : index
    %c0_157 = arith.constant 0 : index
    %522 = vector.load %arg17[%521, %c0_156, %c0_157] : memref<8x16x2xf32, #tpu.memory_space<vmem>>, vector<1x16x2xf32>
    %523 = vector.shape_cast %522 : vector<1x16x2xf32> to vector<16x2xf32>
    %524 = vector.shape_cast %520 : vector<16x2xf32> to vector<1x16x2xf32>
    tpu.vector_store %arg17[%521, %c0_156, %c0_157], %524 {strides = array<i32>} : memref<8x16x2xf32, #tpu.memory_space<vmem>>, vector<1x16x2xf32>,
    %525 = arith.index_cast %c5_i32 : i32 to index
    %c0_158 = arith.constant 0 : index
    %c0_159 = arith.constant 0 : index
    %526 = vector.load %arg18[%525, %c0_158, %c0_159] : memref<8x16x2xf32, #tpu.memory_space<vmem>>, vector<1x16x2xf32>
    %527 = vector.shape_cast %526 : vector<1x16x2xf32> to vector<16x2xf32>
    %528 = vector.shape_cast %449 : vector<16x2xf32> to vector<1x16x2xf32>
    tpu.vector_store %arg18[%525, %c0_158, %c0_159], %528 {strides = array<i32>} : memref<8x16x2xf32, #tpu.memory_space<vmem>>, vector<1x16x2xf32>,
    %c6_i32 = arith.constant 6 : i32
    %529 = arith.index_cast %c6_i32 : i32 to index
    %c0_160 = arith.constant 0 : index
    %c0_161 = arith.constant 0 : index
    %530 = vector.load %arg1[%529, %c0_160, %c0_161] : memref<8x16x2xf32, #tpu.memory_space<vmem>>, vector<1x16x2xf32>
    %531 = vector.shape_cast %530 : vector<1x16x2xf32> to vector<16x2xf32>
    %cst_162 = arith.constant dense<0.000000e+00> : vector<16x4xf32>
    %532 = tpu.matmul %520, %0, %cst_162 {dimension_numbers = #tpu.dot_dimension_numbers<[1], [0], [0], [1], [0, 0, 1, 1], [], []>} : vector<16x2xf32>, vector<2x4xf32>, vector<16x4xf32> -> vector<16x4xf32>
    %533 = vector.extract_strided_slice %532 {offsets = [0, 0], sizes = [16, 2], strides = [1, 1]} : vector<16x4xf32> to vector<16x2xf32>
    %534 = vector.extract_strided_slice %532 {offsets = [0, 2], sizes = [16, 2], strides = [1, 1]} : vector<16x4xf32> to vector<16x2xf32>
    %535 = arith.subf %520, %450 : vector<16x2xf32>
    %536 = arith.mulf %535, %535 : vector<16x2xf32>
    %cst_163 = arith.constant dense<0.000000e+00> : vector<16xf32>
    %537 = vector.multi_reduction <add>, %536, %cst_163 [1] : vector<16x2xf32> to vector<16xf32>
    %538 = vector.shape_cast %537 : vector<16xf32> to vector<16x1xf32>
    %cst_164 = arith.constant 1.000000e-24 : f32
    %539 = vector.broadcast %cst_164 : f32 to vector<16x1xf32>
    %540 = arith.maximumf %538, %539 : vector<16x1xf32>
    %541 = math.rsqrt %540 : vector<16x1xf32>
    %542 = vector.broadcast %541 : vector<16x1xf32> to vector<16x2xf32>
    %543 = arith.mulf %535, %542 : vector<16x2xf32>
    %544 = arith.subf %531, %533 : vector<16x2xf32>
    %545 = arith.mulf %544, %544 : vector<16x2xf32>
    %cst_165 = arith.constant dense<0.000000e+00> : vector<16xf32>
    %546 = vector.multi_reduction <add>, %545, %cst_165 [1] : vector<16x2xf32> to vector<16xf32>
    %547 = vector.shape_cast %546 : vector<16xf32> to vector<16x1xf32>
    %cst_166 = arith.constant 1.000000e-24 : f32
    %548 = vector.broadcast %cst_166 : f32 to vector<16x1xf32>
    %549 = arith.maximumf %547, %548 : vector<16x1xf32>
    %550 = math.rsqrt %549 : vector<16x1xf32>
    %551 = vector.broadcast %550 : vector<16x1xf32> to vector<16x2xf32>
    %552 = arith.mulf %544, %551 : vector<16x2xf32>
    %cst_167 = arith.constant dense<0.000000e+00> : vector<16x320xf32>
    %553 = tpu.matmul %552, %1, %cst_167 {dimension_numbers = #tpu.dot_dimension_numbers<[1], [0], [0], [1], [0, 0, 1, 1], [], []>} : vector<16x2xf32>, vector<2x320xf32>, vector<16x320xf32> -> vector<16x320xf32>
    %cst_168 = arith.constant dense<0.000000e+00> : vector<16x320xf32>
    %554 = tpu.matmul %543, %2, %cst_168 {dimension_numbers = #tpu.dot_dimension_numbers<[1], [0], [0], [1], [0, 0, 1, 1], [], []>} : vector<16x2xf32>, vector<2x320xf32>, vector<16x320xf32> -> vector<16x320xf32>
    %555 = arith.addf %553, %554 : vector<16x320xf32>
    %556 = arith.addf %555, %9 : vector<16x320xf32>
    %cst_169 = arith.constant 0.000000e+00 : f32
    %557 = vector.broadcast %cst_169 : f32 to vector<16x320xf32>
    %558 = arith.maximumf %556, %557 : vector<16x320xf32>
    %cst_170 = arith.constant dense<0.000000e+00> : vector<16x384xf32>
    %559 = tpu.matmul %558, %3, %cst_170 {dimension_numbers = #tpu.dot_dimension_numbers<[1], [0], [0], [1], [0, 0, 1, 1], [], []>} : vector<16x320xf32>, vector<320x384xf32>, vector<16x384xf32> -> vector<16x384xf32>
    %560 = arith.addf %559, %12 : vector<16x384xf32>
    %cst_171 = arith.constant dense<0.000000e+00> : vector<16x384xf32>
    %561 = tpu.matmul %504, %4, %cst_171 {dimension_numbers = #tpu.dot_dimension_numbers<[1], [0], [0], [1], [0, 0, 1, 1], [], []>} : vector<16x80xf32>, vector<80x384xf32>, vector<16x384xf32> -> vector<16x384xf32>
    %562 = vector.extract_strided_slice %560 {offsets = [0, 0], sizes = [16, 80], strides = [1, 1]} : vector<16x384xf32> to vector<16x80xf32>
    %563 = vector.extract_strided_slice %561 {offsets = [0, 0], sizes = [16, 80], strides = [1, 1]} : vector<16x384xf32> to vector<16x80xf32>
    %564 = arith.addf %562, %563 : vector<16x80xf32>
    %565 = arith.negf %564 : vector<16x80xf32>
    %566 = math.exp %565 : vector<16x80xf32>
    %cst_172 = arith.constant 1.000000e+00 : f32
    %567 = vector.broadcast %cst_172 : f32 to vector<16x80xf32>
    %568 = arith.addf %567, %566 : vector<16x80xf32>
    %569 = arith.divf %567, %568 : vector<16x80xf32>
    %570 = vector.extract_strided_slice %560 {offsets = [0, 128], sizes = [16, 80], strides = [1, 1]} : vector<16x384xf32> to vector<16x80xf32>
    %571 = vector.extract_strided_slice %561 {offsets = [0, 128], sizes = [16, 80], strides = [1, 1]} : vector<16x384xf32> to vector<16x80xf32>
    %572 = arith.addf %570, %571 : vector<16x80xf32>
    %573 = arith.negf %572 : vector<16x80xf32>
    %574 = math.exp %573 : vector<16x80xf32>
    %cst_173 = arith.constant 1.000000e+00 : f32
    %575 = vector.broadcast %cst_173 : f32 to vector<16x80xf32>
    %576 = arith.addf %575, %574 : vector<16x80xf32>
    %577 = arith.divf %575, %576 : vector<16x80xf32>
    %578 = vector.extract_strided_slice %560 {offsets = [0, 256], sizes = [16, 80], strides = [1, 1]} : vector<16x384xf32> to vector<16x80xf32>
    %579 = vector.extract_strided_slice %561 {offsets = [0, 256], sizes = [16, 80], strides = [1, 1]} : vector<16x384xf32> to vector<16x80xf32>
    %580 = arith.addf %579, %15 : vector<16x80xf32>
    %581 = arith.mulf %569, %580 : vector<16x80xf32>
    %582 = arith.addf %578, %581 : vector<16x80xf32>
    %583 = math.tanh %582 : vector<16x80xf32>
    %cst_174 = arith.constant 1.000000e+00 : f32
    %584 = vector.broadcast %cst_174 : f32 to vector<16x80xf32>
    %585 = arith.subf %584, %577 : vector<16x80xf32>
    %586 = arith.mulf %585, %583 : vector<16x80xf32>
    %587 = arith.mulf %577, %504 : vector<16x80xf32>
    %588 = arith.addf %586, %587 : vector<16x80xf32>
    %cst_175 = arith.constant dense<0.000000e+00> : vector<16x40xf32>
    %589 = tpu.matmul %588, %5, %cst_175 {dimension_numbers = #tpu.dot_dimension_numbers<[1], [0], [0], [1], [0, 0, 1, 1], [], []>} : vector<16x80xf32>, vector<80x40xf32>, vector<16x40xf32> -> vector<16x40xf32>
    %590 = arith.addf %589, %18 : vector<16x40xf32>
    %cst_176 = arith.constant 0.000000e+00 : f32
    %591 = vector.broadcast %cst_176 : f32 to vector<16x40xf32>
    %592 = arith.maximumf %590, %591 : vector<16x40xf32>
    %cst_177 = arith.constant dense<0.000000e+00> : vector<16x4xf32>
    %593 = tpu.matmul %592, %6, %cst_177 {dimension_numbers = #tpu.dot_dimension_numbers<[1], [0], [0], [1], [0, 0, 1, 1], [], []>} : vector<16x40xf32>, vector<40x4xf32>, vector<16x4xf32> -> vector<16x4xf32>
    %594 = arith.addf %593, %21 : vector<16x4xf32>
    %595 = vector.extract_strided_slice %552 {offsets = [0, 0], sizes = [16, 1], strides = [1, 1]} : vector<16x2xf32> to vector<16x1xf32>
    %596 = vector.extract_strided_slice %594 {offsets = [0, 0], sizes = [16, 2], strides = [1, 1]} : vector<16x4xf32> to vector<16x2xf32>
    %597 = vector.broadcast %595 : vector<16x1xf32> to vector<16x2xf32>
    %598 = arith.mulf %597, %596 : vector<16x2xf32>
    %599 = vector.extract_strided_slice %552 {offsets = [0, 1], sizes = [16, 1], strides = [1, 1]} : vector<16x2xf32> to vector<16x1xf32>
    %600 = vector.extract_strided_slice %594 {offsets = [0, 2], sizes = [16, 2], strides = [1, 1]} : vector<16x4xf32> to vector<16x2xf32>
    %601 = vector.broadcast %599 : vector<16x1xf32> to vector<16x2xf32>
    %602 = arith.mulf %601, %600 : vector<16x2xf32>
    %603 = arith.addf %598, %602 : vector<16x2xf32>
    %604 = arith.addf %534, %603 : vector<16x2xf32>
    %605 = arith.index_cast %c6_i32 : i32 to index
    %c0_178 = arith.constant 0 : index
    %c0_179 = arith.constant 0 : index
    %606 = vector.load %arg17[%605, %c0_178, %c0_179] : memref<8x16x2xf32, #tpu.memory_space<vmem>>, vector<1x16x2xf32>
    %607 = vector.shape_cast %606 : vector<1x16x2xf32> to vector<16x2xf32>
    %608 = vector.shape_cast %604 : vector<16x2xf32> to vector<1x16x2xf32>
    tpu.vector_store %arg17[%605, %c0_178, %c0_179], %608 {strides = array<i32>} : memref<8x16x2xf32, #tpu.memory_space<vmem>>, vector<1x16x2xf32>,
    %609 = arith.index_cast %c6_i32 : i32 to index
    %c0_180 = arith.constant 0 : index
    %c0_181 = arith.constant 0 : index
    %610 = vector.load %arg18[%609, %c0_180, %c0_181] : memref<8x16x2xf32, #tpu.memory_space<vmem>>, vector<1x16x2xf32>
    %611 = vector.shape_cast %610 : vector<1x16x2xf32> to vector<16x2xf32>
    %612 = vector.shape_cast %533 : vector<16x2xf32> to vector<1x16x2xf32>
    tpu.vector_store %arg18[%609, %c0_180, %c0_181], %612 {strides = array<i32>} : memref<8x16x2xf32, #tpu.memory_space<vmem>>, vector<1x16x2xf32>,
    %c7_i32 = arith.constant 7 : i32
    %613 = arith.index_cast %c7_i32 : i32 to index
    %c0_182 = arith.constant 0 : index
    %c0_183 = arith.constant 0 : index
    %614 = vector.load %arg1[%613, %c0_182, %c0_183] : memref<8x16x2xf32, #tpu.memory_space<vmem>>, vector<1x16x2xf32>
    %615 = vector.shape_cast %614 : vector<1x16x2xf32> to vector<16x2xf32>
    %cst_184 = arith.constant dense<0.000000e+00> : vector<16x4xf32>
    %616 = tpu.matmul %604, %0, %cst_184 {dimension_numbers = #tpu.dot_dimension_numbers<[1], [0], [0], [1], [0, 0, 1, 1], [], []>} : vector<16x2xf32>, vector<2x4xf32>, vector<16x4xf32> -> vector<16x4xf32>
    %617 = vector.extract_strided_slice %616 {offsets = [0, 0], sizes = [16, 2], strides = [1, 1]} : vector<16x4xf32> to vector<16x2xf32>
    %618 = vector.extract_strided_slice %616 {offsets = [0, 2], sizes = [16, 2], strides = [1, 1]} : vector<16x4xf32> to vector<16x2xf32>
    %619 = arith.subf %604, %534 : vector<16x2xf32>
    %620 = arith.mulf %619, %619 : vector<16x2xf32>
    %cst_185 = arith.constant dense<0.000000e+00> : vector<16xf32>
    %621 = vector.multi_reduction <add>, %620, %cst_185 [1] : vector<16x2xf32> to vector<16xf32>
    %622 = vector.shape_cast %621 : vector<16xf32> to vector<16x1xf32>
    %cst_186 = arith.constant 1.000000e-24 : f32
    %623 = vector.broadcast %cst_186 : f32 to vector<16x1xf32>
    %624 = arith.maximumf %622, %623 : vector<16x1xf32>
    %625 = math.rsqrt %624 : vector<16x1xf32>
    %626 = vector.broadcast %625 : vector<16x1xf32> to vector<16x2xf32>
    %627 = arith.mulf %619, %626 : vector<16x2xf32>
    %628 = arith.subf %615, %617 : vector<16x2xf32>
    %629 = arith.mulf %628, %628 : vector<16x2xf32>
    %cst_187 = arith.constant dense<0.000000e+00> : vector<16xf32>
    %630 = vector.multi_reduction <add>, %629, %cst_187 [1] : vector<16x2xf32> to vector<16xf32>
    %631 = vector.shape_cast %630 : vector<16xf32> to vector<16x1xf32>
    %cst_188 = arith.constant 1.000000e-24 : f32
    %632 = vector.broadcast %cst_188 : f32 to vector<16x1xf32>
    %633 = arith.maximumf %631, %632 : vector<16x1xf32>
    %634 = math.rsqrt %633 : vector<16x1xf32>
    %635 = vector.broadcast %634 : vector<16x1xf32> to vector<16x2xf32>
    %636 = arith.mulf %628, %635 : vector<16x2xf32>
    %cst_189 = arith.constant dense<0.000000e+00> : vector<16x320xf32>
    %637 = tpu.matmul %636, %1, %cst_189 {dimension_numbers = #tpu.dot_dimension_numbers<[1], [0], [0], [1], [0, 0, 1, 1], [], []>} : vector<16x2xf32>, vector<2x320xf32>, vector<16x320xf32> -> vector<16x320xf32>
    %cst_190 = arith.constant dense<0.000000e+00> : vector<16x320xf32>
    %638 = tpu.matmul %627, %2, %cst_190 {dimension_numbers = #tpu.dot_dimension_numbers<[1], [0], [0], [1], [0, 0, 1, 1], [], []>} : vector<16x2xf32>, vector<2x320xf32>, vector<16x320xf32> -> vector<16x320xf32>
    %639 = arith.addf %637, %638 : vector<16x320xf32>
    %640 = arith.addf %639, %9 : vector<16x320xf32>
    %cst_191 = arith.constant 0.000000e+00 : f32
    %641 = vector.broadcast %cst_191 : f32 to vector<16x320xf32>
    %642 = arith.maximumf %640, %641 : vector<16x320xf32>
    %cst_192 = arith.constant dense<0.000000e+00> : vector<16x384xf32>
    %643 = tpu.matmul %642, %3, %cst_192 {dimension_numbers = #tpu.dot_dimension_numbers<[1], [0], [0], [1], [0, 0, 1, 1], [], []>} : vector<16x320xf32>, vector<320x384xf32>, vector<16x384xf32> -> vector<16x384xf32>
    %644 = arith.addf %643, %12 : vector<16x384xf32>
    %cst_193 = arith.constant dense<0.000000e+00> : vector<16x384xf32>
    %645 = tpu.matmul %588, %4, %cst_193 {dimension_numbers = #tpu.dot_dimension_numbers<[1], [0], [0], [1], [0, 0, 1, 1], [], []>} : vector<16x80xf32>, vector<80x384xf32>, vector<16x384xf32> -> vector<16x384xf32>
    %646 = vector.extract_strided_slice %644 {offsets = [0, 0], sizes = [16, 80], strides = [1, 1]} : vector<16x384xf32> to vector<16x80xf32>
    %647 = vector.extract_strided_slice %645 {offsets = [0, 0], sizes = [16, 80], strides = [1, 1]} : vector<16x384xf32> to vector<16x80xf32>
    %648 = arith.addf %646, %647 : vector<16x80xf32>
    %649 = arith.negf %648 : vector<16x80xf32>
    %650 = math.exp %649 : vector<16x80xf32>
    %cst_194 = arith.constant 1.000000e+00 : f32
    %651 = vector.broadcast %cst_194 : f32 to vector<16x80xf32>
    %652 = arith.addf %651, %650 : vector<16x80xf32>
    %653 = arith.divf %651, %652 : vector<16x80xf32>
    %654 = vector.extract_strided_slice %644 {offsets = [0, 128], sizes = [16, 80], strides = [1, 1]} : vector<16x384xf32> to vector<16x80xf32>
    %655 = vector.extract_strided_slice %645 {offsets = [0, 128], sizes = [16, 80], strides = [1, 1]} : vector<16x384xf32> to vector<16x80xf32>
    %656 = arith.addf %654, %655 : vector<16x80xf32>
    %657 = arith.negf %656 : vector<16x80xf32>
    %658 = math.exp %657 : vector<16x80xf32>
    %cst_195 = arith.constant 1.000000e+00 : f32
    %659 = vector.broadcast %cst_195 : f32 to vector<16x80xf32>
    %660 = arith.addf %659, %658 : vector<16x80xf32>
    %661 = arith.divf %659, %660 : vector<16x80xf32>
    %662 = vector.extract_strided_slice %644 {offsets = [0, 256], sizes = [16, 80], strides = [1, 1]} : vector<16x384xf32> to vector<16x80xf32>
    %663 = vector.extract_strided_slice %645 {offsets = [0, 256], sizes = [16, 80], strides = [1, 1]} : vector<16x384xf32> to vector<16x80xf32>
    %664 = arith.addf %663, %15 : vector<16x80xf32>
    %665 = arith.mulf %653, %664 : vector<16x80xf32>
    %666 = arith.addf %662, %665 : vector<16x80xf32>
    %667 = math.tanh %666 : vector<16x80xf32>
    %cst_196 = arith.constant 1.000000e+00 : f32
    %668 = vector.broadcast %cst_196 : f32 to vector<16x80xf32>
    %669 = arith.subf %668, %661 : vector<16x80xf32>
    %670 = arith.mulf %669, %667 : vector<16x80xf32>
    %671 = arith.mulf %661, %588 : vector<16x80xf32>
    %672 = arith.addf %670, %671 : vector<16x80xf32>
    %cst_197 = arith.constant dense<0.000000e+00> : vector<16x40xf32>
    %673 = tpu.matmul %672, %5, %cst_197 {dimension_numbers = #tpu.dot_dimension_numbers<[1], [0], [0], [1], [0, 0, 1, 1], [], []>} : vector<16x80xf32>, vector<80x40xf32>, vector<16x40xf32> -> vector<16x40xf32>
    %674 = arith.addf %673, %18 : vector<16x40xf32>
    %cst_198 = arith.constant 0.000000e+00 : f32
    %675 = vector.broadcast %cst_198 : f32 to vector<16x40xf32>
    %676 = arith.maximumf %674, %675 : vector<16x40xf32>
    %cst_199 = arith.constant dense<0.000000e+00> : vector<16x4xf32>
    %677 = tpu.matmul %676, %6, %cst_199 {dimension_numbers = #tpu.dot_dimension_numbers<[1], [0], [0], [1], [0, 0, 1, 1], [], []>} : vector<16x40xf32>, vector<40x4xf32>, vector<16x4xf32> -> vector<16x4xf32>
    %678 = arith.addf %677, %21 : vector<16x4xf32>
    %679 = vector.extract_strided_slice %636 {offsets = [0, 0], sizes = [16, 1], strides = [1, 1]} : vector<16x2xf32> to vector<16x1xf32>
    %680 = vector.extract_strided_slice %678 {offsets = [0, 0], sizes = [16, 2], strides = [1, 1]} : vector<16x4xf32> to vector<16x2xf32>
    %681 = vector.broadcast %679 : vector<16x1xf32> to vector<16x2xf32>
    %682 = arith.mulf %681, %680 : vector<16x2xf32>
    %683 = vector.extract_strided_slice %636 {offsets = [0, 1], sizes = [16, 1], strides = [1, 1]} : vector<16x2xf32> to vector<16x1xf32>
    %684 = vector.extract_strided_slice %678 {offsets = [0, 2], sizes = [16, 2], strides = [1, 1]} : vector<16x4xf32> to vector<16x2xf32>
    %685 = vector.broadcast %683 : vector<16x1xf32> to vector<16x2xf32>
    %686 = arith.mulf %685, %684 : vector<16x2xf32>
    %687 = arith.addf %682, %686 : vector<16x2xf32>
    %688 = arith.addf %618, %687 : vector<16x2xf32>
    %689 = arith.index_cast %c7_i32 : i32 to index
    %c0_200 = arith.constant 0 : index
    %c0_201 = arith.constant 0 : index
    %690 = vector.load %arg17[%689, %c0_200, %c0_201] : memref<8x16x2xf32, #tpu.memory_space<vmem>>, vector<1x16x2xf32>
    %691 = vector.shape_cast %690 : vector<1x16x2xf32> to vector<16x2xf32>
    %692 = vector.shape_cast %688 : vector<16x2xf32> to vector<1x16x2xf32>
    tpu.vector_store %arg17[%689, %c0_200, %c0_201], %692 {strides = array<i32>} : memref<8x16x2xf32, #tpu.memory_space<vmem>>, vector<1x16x2xf32>,
    %693 = arith.index_cast %c7_i32 : i32 to index
    %c0_202 = arith.constant 0 : index
    %c0_203 = arith.constant 0 : index
    %694 = vector.load %arg18[%693, %c0_202, %c0_203] : memref<8x16x2xf32, #tpu.memory_space<vmem>>, vector<1x16x2xf32>
    %695 = vector.shape_cast %694 : vector<1x16x2xf32> to vector<16x2xf32>
    %696 = vector.shape_cast %617 : vector<16x2xf32> to vector<1x16x2xf32>
    tpu.vector_store %arg18[%693, %c0_202, %c0_203], %696 {strides = array<i32>} : memref<8x16x2xf32, #tpu.memory_space<vmem>>, vector<1x16x2xf32>,
    %c8_i32 = arith.constant 8 : i32
    return
  }
  func.func @transform_0(%arg0: i32) -> (i32, i32, i32) {
    %c0_i32 = arith.constant 0 : i32
    %c0_i32_0 = arith.constant 0 : i32
    %c0_i32_1 = arith.constant 0 : i32
    return %c0_i32, %arg0, %c0_i32_0 : i32, i32, i32
  }
  func.func @transform_1(%arg0: i32) -> (i32, i32) {
    %c0_i32 = arith.constant 0 : i32
    %c0_i32_0 = arith.constant 0 : i32
    return %arg0, %c0_i32 : i32, i32
  }
  func.func @transform_2(%arg0: i32) -> (i32, i32) {
    %c0_i32 = arith.constant 0 : i32
    %c0_i32_0 = arith.constant 0 : i32
    return %arg0, %c0_i32 : i32, i32
  }
  func.func @transform_3(%arg0: i32) -> (i32, i32) {
    %c0_i32 = arith.constant 0 : i32
    %c0_i32_0 = arith.constant 0 : i32
    return %arg0, %c0_i32 : i32, i32
  }
  func.func @transform_4(%arg0: i32) -> (i32, i32) {
    %c0_i32 = arith.constant 0 : i32
    %c0_i32_0 = arith.constant 0 : i32
    %c0_i32_1 = arith.constant 0 : i32
    return %c0_i32, %c0_i32_0 : i32, i32
  }
  func.func @transform_5(%arg0: i32) -> (i32, i32) {
    %c0_i32 = arith.constant 0 : i32
    %c0_i32_0 = arith.constant 0 : i32
    %c0_i32_1 = arith.constant 0 : i32
    return %c0_i32, %c0_i32_0 : i32, i32
  }
  func.func @transform_6(%arg0: i32) -> (i32, i32) {
    %c0_i32 = arith.constant 0 : i32
    %c0_i32_0 = arith.constant 0 : i32
    %c0_i32_1 = arith.constant 0 : i32
    return %c0_i32, %c0_i32_0 : i32, i32
  }
  func.func @transform_7(%arg0: i32) -> (i32, i32) {
    %c0_i32 = arith.constant 0 : i32
    %c0_i32_0 = arith.constant 0 : i32
    %c0_i32_1 = arith.constant 0 : i32
    return %c0_i32, %c0_i32_0 : i32, i32
  }
  func.func @transform_8(%arg0: i32) -> (i32, i32) {
    %c0_i32 = arith.constant 0 : i32
    %c0_i32_0 = arith.constant 0 : i32
    %c0_i32_1 = arith.constant 0 : i32
    return %c0_i32, %c0_i32_0 : i32, i32
  }
  func.func @transform_9(%arg0: i32) -> (i32, i32) {
    %c0_i32 = arith.constant 0 : i32
    %c0_i32_0 = arith.constant 0 : i32
    %c0_i32_1 = arith.constant 0 : i32
    return %c0_i32, %c0_i32_0 : i32, i32
  }
  func.func @transform_10(%arg0: i32) -> (i32, i32) {
    %c0_i32 = arith.constant 0 : i32
    %c0_i32_0 = arith.constant 0 : i32
    %c0_i32_1 = arith.constant 0 : i32
    return %c0_i32, %c0_i32_0 : i32, i32
  }
  func.func @transform_11(%arg0: i32) -> (i32, i32) {
    %c0_i32 = arith.constant 0 : i32
    %c0_i32_0 = arith.constant 0 : i32
    %c0_i32_1 = arith.constant 0 : i32
    return %c0_i32, %c0_i32_0 : i32, i32
  }
  func.func @transform_12(%arg0: i32) -> (i32, i32) {
    %c0_i32 = arith.constant 0 : i32
    %c0_i32_0 = arith.constant 0 : i32
    %c0_i32_1 = arith.constant 0 : i32
    return %c0_i32, %c0_i32_0 : i32, i32
  }
  func.func @transform_13(%arg0: i32) -> (i32, i32) {
    %c0_i32 = arith.constant 0 : i32
    %c0_i32_0 = arith.constant 0 : i32
    %c0_i32_1 = arith.constant 0 : i32
    return %c0_i32, %c0_i32_0 : i32, i32
  }
  func.func @transform_14(%arg0: i32) -> (i32, i32) {
    %c0_i32 = arith.constant 0 : i32
    %c0_i32_0 = arith.constant 0 : i32
    %c0_i32_1 = arith.constant 0 : i32
    return %c0_i32, %c0_i32_0 : i32, i32
  }
  func.func @transform_15(%arg0: i32) -> (i32, i32) {
    %c0_i32 = arith.constant 0 : i32
    %c0_i32_0 = arith.constant 0 : i32
    %c0_i32_1 = arith.constant 0 : i32
    return %c0_i32, %c0_i32_0 : i32, i32
  }
  func.func @transform_16(%arg0: i32) -> (i32, i32, i32) {
    %c0_i32 = arith.constant 0 : i32
    %c0_i32_0 = arith.constant 0 : i32
    %c0_i32_1 = arith.constant 0 : i32
    return %c0_i32, %arg0, %c0_i32_0 : i32, i32, i32
  }
  func.func @transform_17(%arg0: i32) -> (i32, i32, i32) {
    %c0_i32 = arith.constant 0 : i32
    %c0_i32_0 = arith.constant 0 : i32
    %c0_i32_1 = arith.constant 0 : i32
    return %c0_i32, %arg0, %c0_i32_0 : i32, i32, i32
  }
}

</mosaic_0001>

<bundles_post_ra>
// kernel: tpu_custom_call.1
= control target key start
LH: loop header
LB: loop body
LE: loop exit
PB: predicated region body
PF: predicated region fallthrough
CT: control target
= control target key end

     0   :  { %s15964_s0 = inlined_call_operand.vmem [shape: f32[8,16,2], index: 0, kind: input, shape index: {}]   ;;  %s15965_s1 = inlined_call_operand.vmem [shape: f32[16,2], index: 1, kind: input, shape index: {}]   ;;  %s15966_s2 = inlined_call_operand.vmem [shape: f32[16,2], index: 2, kind: input, shape index: {}]   ;;  %s15967_s3 = inlined_call_operand.vmem [shape: f32[16,80], index: 3, kind: input, shape index: {}]   ;;  %s15968_s4 = inlined_call_operand.vmem [shape: f32[2,4], index: 4, kind: input, shape index: {}]   ;;  %s15969_s5 = inlined_call_operand.vmem [shape: f32[2,320], index: 5, kind: input, shape index: {}]   ;;  %s15970_s6 = inlined_call_operand.vmem [shape: f32[2,320], index: 6, kind: input, shape index: {}]   ;;  %s15971_s7 = inlined_call_operand.vmem [shape: f32[1,320], index: 7, kind: input, shape index: {}]   ;;  %s15972_s8 = inlined_call_operand.hbm [shape: f32[320,384], index: 8, kind: input, shape index: {}]   ;;  %s15973_s9 = inlined_call_operand.vmem [shape: f32[1,384], index: 9, kind: input, shape index: {}]   ;;  %s15974_s10 = inlined_call_operand.vmem [shape: f32[80,384], index: 10, kind: input, shape index: {}]   ;;  %s15975_s11 = inlined_call_operand.vmem [shape: f32[1,80], index: 11, kind: input, shape index: {}]   ;;  %s15976_s12 = inlined_call_operand.vmem [shape: f32[80,40], index: 12, kind: input, shape index: {}]   ;;  %s15977_s13 = inlined_call_operand.vmem [shape: f32[1,40], index: 13, kind: input, shape index: {}]   ;;  %s15978_s14 = inlined_call_operand.vmem [shape: f32[40,4], index: 14, kind: input, shape index: {}]   ;;  %s15979_s15 = inlined_call_operand.vmem [shape: f32[1,4], index: 15, kind: input, shape index: {}]   ;;  %s15980_s16 = inlined_call_operand.vmem [shape: f32[8,16,2], index: 16, kind: output, shape index: {0}]   ;;  %s15981_s17 = inlined_call_operand.vmem [shape: f32[8,16,2], index: 17, kind: output, shape index: {1}]  }
   0x1   :  { %16248 = sst [smem:[#allocation71_spill]] %s15964_s0 }
   0x2   :  { %16249 = sst [smem:[#allocation72_spill]] %s15965_s1 }
   0x3   :  { %23 = vsyncpa [#allocation3], 0  ;;  %s13541_s24 = smov [#allocation2]   ;;  %s13517_s28 = scalar_lea.hbm %s15972_s8, 15360 }
   0x4   :  { %s45_s25 = sshll.u32 %s13541_s24, 4  ;;  %p13518_p0 = scmp.ne.s32.totalorder %s15972_s8, %s13517_s28  ;;  %s46_s25 = int_to_ptr.vmem [resolvable:$true] %s45_s25 }
   0x5   :  { %p13521_p1 = scmp.lt.u32.totalorder %s13517_s28, %s15972_s8 }
   0x7   :  { %p13523_p2 = pnand %p13521_p1, %p13518_p0 }
   0x9   :  { %13526 = shalt.err (!%p13523_p2)
}
   0xa   :  { %s13527_s19 = scalar_lea.vmem %s46_s25, 15360  ;;  %p13532_p4 = scmp.lt.s32.totalorder %s46_s25, %s46_s25 }
   0xb   :  { %p13528_p3 = scmp.ne.s32.totalorder %s46_s25, %s13527_s19  ;;  %p13533_p5 = scmp.lt.s32.totalorder %s13527_s19, %s13527_s19 }
   0xd   :  { %p13534_p6 = por %p13533_p5, %p13532_p4 }
   0xf   :  { %p13535_p7 = pnand %p13534_p6, %p13528_p3 }
  0x11   :  { %13538 = shalt.err (!%p13535_p7)
}
  0x12   :  { %s13542_s1 = smov 384   ;;  %s13543_s20 = smov 24  }
  0x13   :  { %51 = dma.hbm_to_vmem [thread:$0]  %s15972_s8, 15360, %s46_s25, [#allocation3], %s13542_s1, %s13542_s1, %s13543_s20  }
  0x14   :  { %13539 = dma.done.wait [#allocation3], 15360  }
  0x15   :  { %13540 = vsyncadd [#allocation3], 4294951936  ;;  %vm307_vm0 = vcmask 1041408   ;;  %vm300_vm1 = vcmask 15360   ;;  %v69_v0 = vld [vmem:[%s15968_s4] sm:$0x3]  ;;  %v239_v24 = vlaneseq }
  0x16   :  { %s16250_s28 = sld [smem:[#allocation72_spill]]  ;;  %v294_v2 = vld [vmem:[%s15966_s2] sm:$0xff]  ;;  %10791 = vmatprep.subr.msk.mxu0 %vm307_vm0, %v69_v0  ;;  %v295_v7 = vld [vmem:[%s15966_s2 + $0x8] sm:$0xff]  ;;  %s16251_s20 = sld [smem:[#allocation71_spill]]  ;;  %v13544_v25 = vmov 1983009808  }
  0x17   :  { %10792 = vmatpush3.msk.msra.mxu0 %vm307_vm0, %v69_v0  ;;  %v421_v26 = vunpack.c.l.s4 %v13544_v25  ;;  %v13701_v28 = vshrl.u32 %v239_v24, 7  ;;  %v71_v31 = vld [vmem:[%s15970_s6] sm:$0x3f]  ;;  %v15988_v37 = vmov 0.0   ;;  %v15984_v44 = vmov 1   ;;  %v73_v56 = vld [vmem:[#allocation2 + $0x8] sm:$0xff] }
  0x18   :  { %v419_v35 = vcombine.high %v71_v31, %v71_v31  ;;  %511 = vmatprep.mubr.f32.mxu1 %v15988_v37  ;;  %v70_v39 = vld [vmem:[%s15969_s5] sm:$0x3f]  ;;  %13256 = vset.pattern.permute.xlu0 %v15984_v44  ;;  %v15986_v55 = vmov 0   ;;  %v75_v60 = vld [vmem:[#allocation2 + $0x18] sm:$0xff]  ;;  %v82_v62 = vld [vmem:[#allocation2 + $0x50] sm:$0xff]  ;;  %vm792_vm2 = vcmask 523264  }
  0x19   :  { %v422_v29 = vunpack.c.0.s8 %v421_v26  ;;  %v600_v41 = vcombine.high %v70_v39, %v70_v39  ;;  %13257 = vset.pattern.permute.xlu1 %v15984_v44  ;;  %v76_v57 = vld [vmem:[#allocation2 + $0x20] sm:$0xff]  ;;  %v79_v61 = vld [vmem:[#allocation2 + $0x38] sm:$0xff]  ;;  %v74_v24 = vld [vmem:[#allocation2 + $0x10] sm:$0xff]  ;;  %vm1103_vm3 = vcmask 654336   ;;  %vm1389_vm4 = vcmask 326656   ;;  %s13548_s30 = smov 126  }
  0x1a   :  { %v72_v58 = vld [vmem:[#allocation2] sm:$0xff]  ;;  %v13758_v59 = vpack.c.bf16 %v76_v57, %v73_v56  ;;  %v13762_v0 = vpack.c.bf16 %v82_v62, %v79_v61  ;;  %v99_v26 = vld [vmem:[#allocation2 + $0xd8] sm:$0xff]  ;;  %v86_v56 = vld [vmem:[#allocation2 + $0x70] sm:$0xff]  ;;  %s13549_s18 = smov 2  }
  0x1b   :  { %v425_v30 = vsub.s32 %v422_v29, %v13701_v28  ;;  %v13760_v63 = vpack.c.bf16 %v75_v60, %v72_v58  ;;  %v77_v29 = vld [vmem:[#allocation2 + $0x28] sm:$0xff]  ;;  %v140_v58 = vld [vmem:[#allocation2 + $0x220] sm:$0xff]  ;;  %v143_v60 = vld [vmem:[#allocation2 + $0x238] sm:$0xff] }
  0x1c   :  { %v292_v1 = vld [vmem:[%s16250_s28] sm:$0xff]  ;;  %v293_v4 = vld [vmem:[%s16250_s28 + $0x8] sm:$0xff] }
  0x1d   :  { %10793 = vmatprep.mubr.msk.f32.mxu0 %vm300_vm1, %v292_v1  ;;  %v386_v3 = vsub.f32 %v292_v1, %v294_v2  ;;  %v387_v8 = vsub.f32 %v293_v4, %v295_v7  ;;  %v298_v11 = vld [vmem:[%s16251_s20] sm:$0xff]  ;;  %v299_v12 = vld [vmem:[%s16251_s20 + $0x8] sm:$0xff]  ;;  %v13707_v32 = vrot.slane %v71_v31, %v425_v30  ;;  %v13718_v38 = vrot.slane %v419_v35, %v425_v30  ;;  %v78_v1 = vld [vmem:[#allocation2 + $0x30] sm:$0xff] }
  0x1e   :  { %10794 = vmatmul.mubr.msk.f32.vlgmr.msra.gmra.mrb[0].mxu0 %vm300_vm1, %v293_v4  ;;  %v13726_v42 = vrot.slane %v70_v39, %v425_v30  ;;  %v13733_v45 = vrot.slane %v600_v41, %v425_v30  ;;  %v81_v2 = vld [vmem:[#allocation2 + $0x48] sm:$0xff]  ;;  %v88_v4 = vld [vmem:[#allocation2 + $0x80] sm:$0xff]  ;;  %v106_v30 = vld [vmem:[#allocation2 + $0x110] sm:$0xff]  ;;  %v13787_v31 = vpack.c.bf16 %v77_v29, %v74_v24 }
  0x1f   :  { %v388_v5 = vmul.f32 %v386_v3, %v386_v3  ;;  %v389_v9 = vmul.f32 %v387_v8, %v387_v8  ;;  %16252 = vst [vmem:[#allocation5_spill] sm:$0xff] %v13707_v32  ;;  %v13711_v34 = vcombine.high %v13707_v32, %v13707_v32  ;;  %16254 = vst [vmem:[#allocation7_spill] sm:$0xff] %v13718_v38  ;;  %10796 = vmatprep.subr.msk.mxu0 %vm307_vm0, %v13718_v38  ;;  %v84_v7 = vld [vmem:[#allocation2 + $0x60] sm:$0xff]  ;;  %v131_v35 = vld [vmem:[#allocation2 + $0x1d8] sm:$0xff] }
  0x20   :  { %10797 = vmatpush3.msk.msra.mxu0 %vm307_vm0, %v13718_v38  ;;  %v13737_v46 = vcombine.high %v13726_v42, %v13726_v42  ;;  %v80_v39 = vld [vmem:[#allocation2 + $0x40] sm:$0xff]  ;;  %v89_v57 = vld [vmem:[#allocation2 + $0x88] sm:$0xff] }
  0x21   :  { %v390_v6 = vsel %vm300_vm1, %v388_v5, 0.0  ;;  %v393_v10 = vsel %vm300_vm1, %v389_v9, 0.0  ;;  %16253 = vst [vmem:[#allocation6_spill] sm:$0xff] %v13711_v34  ;;  %9784 = vmatprep.subr.msk.mxu1 %vm307_vm0, %v13711_v34  ;;  %10801 = vmatprep.subr.msk.mxu0 %vm307_vm0, %v13733_v45  ;;  %v13766_v5 = vpack.c.bf16 %v81_v2, %v78_v1  ;;  %v91_v9 = vld [vmem:[#allocation2 + $0x98] sm:$0xff]  ;;  %v108_v62 = vld [vmem:[#allocation2 + $0x120] sm:$0xff]  ;;  %v13807_v2 = vpack.c.bf16 %v89_v57, %v86_v56  ;;  %v121_v24 = vld [vmem:[#allocation2 + $0x188] sm:$0xff] }
  0x22   :  { %391 = vadd.xlane.f32.xlu0 %v390_v6  ;;  %9785 = vmatpush1.msk.msra.mxu1 %vm307_vm0, %v13707_v32  ;;  %16255 = vst [vmem:[#allocation8_spill] sm:$0xff] %v13737_v46  ;;  %v111_v1 = vld [vmem:[#allocation2 + $0x138] sm:$0xff]  ;;  %v101_v29 = vld [vmem:[#allocation2 + $0xe8] sm:$0xff]  ;;  %v130_v57 = vld [vmem:[#allocation2 + $0x1d0] sm:$0xff] }
  0x23   :  { %9791 = vmatprep.subr.msk.mxu1 %vm307_vm0, %v13737_v46  ;;  %v107_v56 = vld [vmem:[#allocation2 + $0x118] sm:$0xff] }
  0x26   :  { %394 = vadd.xlane.f32.xlu0 %v393_v10  ;;  %v94_v10 = vld [vmem:[#allocation2 + $0xb0] sm:$0xff] }
  0xaf   :  { %v392_v20 = vpop.xlane.xlu0 %391 }
  0xb0   :  { %v396_v21 = vmax.f32 %v392_v20, 1e-24  ;;  %v125_v20 = vld [vmem:[#allocation2 + $0x1a8] sm:$0xff] }
  0xb2   :  { %13277 = vrsqrt.f32 %v396_v21 }
  0xb3   :  { %v395_v23 = vpop.xlane.xlu0 %394 }
  0xb4   :  { %v397_v27 = vmax.f32 %v395_v23, 1e-24 }
  0xb6   :  { %13279 = vrsqrt.f32 %v397_v27  ;;  %v103_v27 = vld [vmem:[#allocation2 + $0xf8] sm:$0xff] }
  0xbc   :  { %v13278_v33 = vpop.eup %13277 }
  0xbd   :  { %v400_v36 = vmul.f32 %v13278_v33, %v386_v3  ;;  %v85_v3 = vld [vmem:[#allocation2 + $0x68] sm:$0xff]  ;;  %v128_v33 = vld [vmem:[#allocation2 + $0x1c0] sm:$0xff] }
  0xbe   :  { %v13769_v6 = vpack.c.bf16 %v88_v4, %v85_v3  ;;  %v115_v4 = vld [vmem:[#allocation2 + $0x158] sm:$0xff] }
  0xbf   :  { %9786 = vmatmul.mubr.msk.f32.vlgmr.msra.gmra.mrb[0].mxu1 %vm300_vm1, %v400_v36  ;;  %10798 = vmatprep.mubr.msk.f32.mxu0 %vm300_vm1, %v400_v36  ;;  %v13789_v36 = vpack.c.bf16 %v131_v35, %v128_v33  ;;  %v152_v33 = vld [vmem:[#allocation2 + $0x280] sm:$0xff]  ;;  %v155_v35 = vld [vmem:[#allocation2 + $0x298] sm:$0xff] }
  0xc0   :  { %v13280_v40 = vpop.eup %13279  ;;  %517 = vmatprep.mubr.f32.mxu1 %v15988_v37  ;;  %9792 = vmatpush1.msk.msra.mxu1 %vm307_vm0, %v13726_v42 }
  0xc1   :  { %v401_v43 = vmul.f32 %v13280_v40, %v387_v8  ;;  %v87_v8 = vld [vmem:[#allocation2 + $0x78] sm:$0xff] }
  0xc2   :  { %v83_v40 = vld [vmem:[#allocation2 + $0x58] sm:$0xff] }
  0xc3   :  { %9787 = vmatmul.mubr.msk.f32.gmra.mrb[2].mxu1 %vm300_vm1, %v401_v43  ;;  %10799 = vmatmul.mubr.msk.f32.vlgmr.msra.gmra.mrb[2].mxu0 %vm300_vm1, %v401_v43  ;;  %v102_v43 = vld [vmem:[#allocation2 + $0xf0] sm:$0xff] }
  0xc4   :  { %692 = vmatprep.mubr.f32.mxu1 %v15988_v37  ;;  %10802 = vmatpush3.msk.msra.mxu0 %vm307_vm0, %v13733_v45 }
  0xc5   :  { %11536 = vmatprep.subr.bf16.mxu0 %v13758_v59 }
  0xf1   :  { %v13679_v13 = vpop.f32.mrb[0].mxu0 }
  0xf2   :  { %1522 = vst.msk [vmem:[%s15981_s17 + $0x8] sm:$0xff] %vm300_vm1, %v13679_v13  ;;  %v13686_v14 = vpop.f32.mrb[1].mxu0  ;;  %v13695_v16 = vsub.f32 %v299_v12, %v13679_v13  ;;  %v13776_v12 = vpack.c.bf16 %v94_v10, %v91_v9  ;;  %v95_v9 = vld [vmem:[#allocation2 + $0xb8] sm:$0xff]  ;;  %v118_v10 = vld [vmem:[#allocation2 + $0x170] sm:$0xff] }
  0xf3   :  { %1521 = vst.msk [vmem:[%s15981_s17] sm:$0xff] %vm300_vm1, %v13686_v14  ;;  %v402_v15 = vsub.f32 %v298_v11, %v13686_v14  ;;  %v13773_v11 = vpack.c.bf16 %v87_v8, %v84_v7  ;;  %v13813_v7 = vpack.c.bf16 %v143_v60, %v140_v58  ;;  %v92_v8 = vld [vmem:[#allocation2 + $0xa0] sm:$0xff]  ;;  %v158_v58 = vld [vmem:[#allocation2 + $0x2b0] sm:$0xff]  ;;  %v161_v60 = vld [vmem:[#allocation2 + $0x2c8] sm:$0xff] }
  0xf4   :  { %v405_v19 = vmul.f32 %v13695_v16, %v13695_v16 }
  0xf5   :  { %v404_v17 = vmul.f32 %v402_v15, %v402_v15 }
  0xf6   :  { %v409_v22 = vsel %vm300_vm1, %v405_v19, 0.0  ;;  %v122_v19 = vld [vmem:[#allocation2 + $0x190] sm:$0xff] }
  0xf7   :  { %v406_v18 = vsel %vm300_vm1, %v404_v17, 0.0  ;;  %v97_v17 = vld [vmem:[#allocation2 + $0xc8] sm:$0xff]  ;;  %v13781_v23 = vpack.c.bf16 %v125_v20, %v122_v19  ;;  %v13819_v20 = vpack.c.bf16 %v95_v9, %v92_v8 }
  0xf8   :  { %407 = vadd.xlane.f32.xlu1 %v406_v18  ;;  %v100_v18 = vld [vmem:[#allocation2 + $0xe0] sm:$0xff]  ;;  %v117_v19 = vld [vmem:[#allocation2 + $0x168] sm:$0xff] }
  0xf9   :  { %v13784_v25 = vpack.c.bf16 %v100_v18, %v97_v17  ;;  %11616 = vmatprep.subr.bf16.mxu1 %v13781_v23  ;;  %v13816_v17 = vpack.c.bf16 %v111_v1, %v108_v62  ;;  %v114_v18 = vld [vmem:[#allocation2 + $0x150] sm:$0xff]  ;;  %v129_v9 = vld [vmem:[#allocation2 + $0x1c8] sm:$0xff] }
  0xfa   :  { %v126_v1 = vld [vmem:[#allocation2 + $0x1b0] sm:$0xff] }
  0xfb   :  { %16256 = vst [vmem:[#allocation9_spill] sm:$0xff] %v13816_v17 }
  0xfc   :  { %410 = vadd.xlane.f32.xlu1 %v409_v22  ;;  %v96_v22 = vld [vmem:[#allocation2 + $0xc0] sm:$0xff] }
  0xfd   :  { %v13792_v41 = vpack.c.bf16 %v99_v26, %v96_v22  ;;  %v13822_v22 = vpack.c.bf16 %v118_v10, %v115_v4  ;;  %v13849_v10 = vpack.c.bf16 %v161_v60, %v158_v58  ;;  %v148_v58 = vld [vmem:[#allocation2 + $0x260] sm:$0xff] }
  0xff   :  { %16257 = vst [vmem:[#allocation10_spill] sm:$0xff] %v13822_v22 }
 0x185   :  { %v408_v47 = vpop.xlane.xlu1 %407 }
 0x186   :  { %v412_v48 = vmax.f32 %v408_v47, 1e-24  ;;  %v13795_v47 = vpack.c.bf16 %v83_v40, %v80_v39  ;;  %v13828_v39 = vpack.c.bf16 %v117_v19, %v114_v18  ;;  %v120_v40 = vld [vmem:[#allocation2 + $0x180] sm:$0xff]  ;;  %v133_v18 = vld [vmem:[#allocation2 + $0x1e8] sm:$0xff] }
 0x187   :  { %v136_v19 = vld [vmem:[#allocation2 + $0x200] sm:$0xff] }
 0x188   :  { %13281 = vrsqrt.f32 %v412_v48  ;;  %v134_v48 = vld [vmem:[#allocation2 + $0x1f0] sm:$0xff]  ;;  %16258 = vst [vmem:[#allocation11_spill] sm:$0xff] %v13828_v39 }
 0x189   :  { %v411_v49 = vpop.xlane.xlu1 %410 }
 0x18a   :  { %v413_v50 = vmax.f32 %v411_v49, 1e-24  ;;  %v13798_v49 = vpack.c.bf16 %v106_v30, %v103_v27  ;;  %v98_v27 = vld [vmem:[#allocation2 + $0xd0] sm:$0xff]  ;;  %v124_v30 = vld [vmem:[#allocation2 + $0x1a0] sm:$0xff] }
 0x18c   :  { %13283 = vrsqrt.f32 %v413_v50  ;;  %v105_v50 = vld [vmem:[#allocation2 + $0x108] sm:$0xff] }
 0x18d   :  { %v13804_v61 = vpack.c.bf16 %v105_v50, %v102_v43  ;;  %v123_v43 = vld [vmem:[#allocation2 + $0x198] sm:$0xff]  ;;  %v13834_v50 = vpack.c.bf16 %v124_v30, %v121_v24  ;;  %v13852_v24 = vpack.c.bf16 %v129_v9, %v126_v1  ;;  %v132_v30 = vld [vmem:[#allocation2 + $0x1e0] sm:$0xff] }
 0x18e   :  { %v13840_v62 = vpack.c.bf16 %v123_v43, %v120_v40  ;;  %v142_v40 = vld [vmem:[#allocation2 + $0x230] sm:$0xff]  ;;  %v144_v9 = vld [vmem:[#allocation2 + $0x240] sm:$0xff] }
 0x18f   :  { %16259 = vst [vmem:[#allocation12_spill] sm:$0xff] %v13834_v50  ;;  %16262 = vst [vmem:[#allocation15_spill] sm:$0xff] %v13852_v24 }
 0x190   :  { %16260 = vst [vmem:[#allocation13_spill] sm:$0xff] %v13840_v62 }
 0x192   :  { %v13282_v51 = vpop.eup %13281 }
 0x193   :  { %v416_v52 = vmul.f32 %v13282_v51, %v402_v15  ;;  %v90_v15 = vld [vmem:[#allocation2 + $0x90] sm:$0xff]  ;;  %v109_v51 = vld [vmem:[#allocation2 + $0x128] sm:$0xff] }
 0x195   :  { %1482 = vperm.xlu0 %13256, %v416_v52   ;;  %9793 = vmatmul.mubr.msk.f32.vlgmr.msra.gmra.mrb[0].mxu1 %vm300_vm1, %v416_v52 }
 0x196   :  { %v13284_v53 = vpop.eup %13283  ;;  %10803 = vmatprep.mubr.msk.f32.mxu0 %vm300_vm1, %v416_v52  ;;  %698 = vmatprep.mubr.f32.mxu1 %v15988_v37  ;;  %v165_v37 = vld [vmem:[#allocation2 + $0x2e8] sm:$0xff] }
 0x197   :  { %v417_v54 = vmul.f32 %v13284_v53, %v13695_v16  ;;  %v93_v16 = vld [vmem:[#allocation2 + $0xa8] sm:$0xff]  ;;  %11618 = vmatpush3.bf16.msra.mxu1 %v13787_v31  ;;  %v112_v53 = vld [vmem:[#allocation2 + $0x140] sm:$0xff] }
 0x198   :  { %v13779_v21 = vpack.c.bf16 %v93_v16, %v90_v15  ;;  %11620 = vmatprep.subr.bf16.mxu1 %v13789_v36  ;;  %v13810_v3 = vpack.c.bf16 %v112_v53, %v109_v51  ;;  %v146_v15 = vld [vmem:[#allocation2 + $0x250] sm:$0xff]  ;;  %v149_v16 = vld [vmem:[#allocation2 + $0x268] sm:$0xff]  ;;  %v127_v51 = vld [vmem:[#allocation2 + $0x1b8] sm:$0xff] }
 0x199   :  { %1486 = vperm.xlu1 %13257, %v417_v54   ;;  %9794 = vmatmul.mubr.msk.f32.gmra.mrb[2].mxu1 %vm300_vm1, %v417_v54  ;;  %v13825_v26 = vpack.c.bf16 %v149_v16, %v146_v15  ;;  %v104_v53 = vld [vmem:[#allocation2 + $0x100] sm:$0xff]  ;;  %v13846_v8 = vpack.c.bf16 %v130_v57, %v127_v51  ;;  %v110_v15 = vld [vmem:[#allocation2 + $0x130] sm:$0xff]  ;;  %v113_v16 = vld [vmem:[#allocation2 + $0x148] sm:$0xff] }
 0x19a   :  { %10804 = vmatmul.mubr.msk.f32.vlgmr.msra.gmra.mrb[2].mxu0 %vm300_vm1, %v417_v54  ;;  %v13843_v4 = vpack.c.bf16 %v107_v56, %v104_v53  ;;  %v138_v53 = vld [vmem:[#allocation2 + $0x210] sm:$0xff]  ;;  %v141_v56 = vld [vmem:[#allocation2 + $0x228] sm:$0xff] }
 0x19b   :  { %11538 = vmatpush1.bf16.msra.mxu0 %v13760_v63  ;;  %11622 = vmatpush3.bf16.msra.mxu1 %v13795_v47  ;;  %16261 = vst [vmem:[#allocation14_spill] sm:$0xff] %v13846_v8  ;;  %v145_v57 = vld [vmem:[#allocation2 + $0x248] sm:$0xff]  ;;  %v13869_v60 = vpack.c.bf16 %v141_v56, %v138_v53  ;;  %v160_v53 = vld [vmem:[#allocation2 + $0x2c0] sm:$0xff] }
 0x19c   :  { %11540 = vmatprep.subr.bf16.mxu0 %v13762_v0  ;;  %v13872_v1 = vpack.c.bf16 %v148_v58, %v145_v57  ;;  %v156_v58 = vld [vmem:[#allocation2 + $0x2a0] sm:$0xff] }
 0x19d   :  { %13258 = vset.pattern.permute.xlu1 %v15986_v55  ;;  %16267 = vst [vmem:[#allocation20_spill] sm:$0xff] %v13869_v60 }
 0x19e   :  { %1472 = vperm.xlu1 %13258, %v416_v52   ;;  %v137_v52 = vld [vmem:[#allocation2 + $0x208] sm:$0xff]  ;;  %16268 = vst [vmem:[#allocation21_spill] sm:$0xff] %v13872_v1 }
 0x19f   :  { %11542 = vmatpush1.bf16.msra.mxu0 %v13766_v5 }
 0x1a0   :  { %11544 = vmatprep.subr.bf16.mxu0 %v13769_v6 }
 0x1a2   :  { %1476 = vperm.xlu1 %13258, %v417_v54   ;;  %v13801_v54 = vpack.c.bf16 %v137_v52, %v134_v48  ;;  %v13831_v48 = vpack.c.bf16 %v101_v29, %v98_v27  ;;  %v13837_v52 = vpack.c.bf16 %v155_v35, %v152_v33  ;;  %v13855_v27 = vpack.c.bf16 %v113_v16, %v110_v15  ;;  %v135_v33 = vld [vmem:[#allocation2 + $0x1f8] sm:$0xff] }
 0x1a3   :  { %11546 = vmatpush1.bf16.msra.mxu0 %v13773_v11  ;;  %v13858_v29 = vpack.c.bf16 %v136_v19, %v133_v18  ;;  %v139_v35 = vld [vmem:[#allocation2 + $0x218] sm:$0xff]  ;;  %v13862_v43 = vpack.c.bf16 %v135_v33, %v132_v30  ;;  %v154_v18 = vld [vmem:[#allocation2 + $0x290] sm:$0xff] }
 0x1a4   :  { %11548 = vmatprep.subr.bf16.mxu0 %v13776_v12  ;;  %11624 = vmatprep.subr.bf16.mxu1 %v13801_v54  ;;  %16263 = vst [vmem:[#allocation16_spill] sm:$0xff] %v13855_v27  ;;  %v13866_v51 = vpack.c.bf16 %v142_v40, %v139_v35  ;;  %v147_v15 = vld [vmem:[#allocation2 + $0x258] sm:$0xff]  ;;  %v150_v33 = vld [vmem:[#allocation2 + $0x270] sm:$0xff]  ;;  %v153_v35 = vld [vmem:[#allocation2 + $0x288] sm:$0xff] }
 0x1a5   :  { %11626 = vmatpush3.bf16.msra.mxu1 %v13807_v2  ;;  %16264 = vst [vmem:[#allocation17_spill] sm:$0xff] %v13858_v29  ;;  %16265 = vst [vmem:[#allocation18_spill] sm:$0xff] %v13862_v43  ;;  %v151_v16 = vld [vmem:[#allocation2 + $0x278] sm:$0xff]  ;;  %v13875_v19 = vpack.c.bf16 %v147_v15, %v144_v9  ;;  %v157_v40 = vld [vmem:[#allocation2 + $0x2a8] sm:$0xff]  ;;  %v13881_v56 = vpack.c.bf16 %v153_v35, %v150_v33 }
 0x1a6   :  { %13259 = vset.pattern.permute.xlu1 %v15984_v44  ;;  %11628 = vmatprep.subr.bf16.mxu1 %v13813_v7  ;;  %16266 = vst [vmem:[#allocation19_spill] sm:$0xff] %v13866_v51  ;;  %v13878_v30 = vpack.c.bf16 %v154_v18, %v151_v16  ;;  %v13884_v57 = vpack.c.bf16 %v160_v53, %v157_v40  ;;  %v159_v44 = vld [vmem:[#allocation2 + $0x2b8] sm:$0xff]  ;;  %v166_v16 = vld [vmem:[#allocation2 + $0x2f0] sm:$0xff]  ;;  %v164_v18 = vld [vmem:[#allocation2 + $0x2e0] sm:$0xff] }
 0x1a7   :  { %11550 = vmatpush1.bf16.msra.mxu0 %v13779_v21  ;;  %16269 = vst [vmem:[#allocation22_spill] sm:$0xff] %v13875_v19  ;;  %16271 = vst [vmem:[#allocation24_spill] sm:$0xff] %v13881_v56  ;;  %v13887_v9 = vpack.c.bf16 %v159_v44, %v156_v58  ;;  %v163_v15 = vld [vmem:[#allocation2 + $0x2d8] sm:$0xff]  ;;  %v162_v35 = vld [vmem:[#allocation2 + $0x2d0] sm:$0xff] }
 0x1a8   :  { %11552 = vmatprep.subr.bf16.mxu0 %v13784_v25  ;;  %16270 = vst [vmem:[#allocation23_spill] sm:$0xff] %v13878_v30  ;;  %16272 = vst [vmem:[#allocation25_spill] sm:$0xff] %v13884_v57  ;;  %v13891_v55 = vpack.c.bf16 %v166_v16, %v163_v15  ;;  %v167_v33 = vld [vmem:[#allocation2 + $0x2f8] sm:$0xff]  ;;  %v13895_v53 = vpack.c.bf16 %v165_v37, %v162_v35  ;;  %v169_v58 = vld [vmem:[#allocation2 + $0x308] sm:$0xff] }
 0x1a9   :  { %11630 = vmatpush3.bf16.msra.mxu1 %v13819_v20  ;;  %16273 = vst [vmem:[#allocation26_spill] sm:$0xff] %v13887_v9  ;;  %v13893_v40 = vpack.c.bf16 %v167_v33, %v164_v18  ;;  %v172_v15 = vld [vmem:[#allocation2 + $0x320] sm:$0xff]  ;;  %v170_v16 = vld [vmem:[#allocation2 + $0x310] sm:$0xff]  ;;  %v173_v18 = vld [vmem:[#allocation2 + $0x328] sm:$0xff]  ;;  %v16013_v33 = vsub.s32 1, %v13701_v28 }
 0x1aa   :  { %11632 = vmatprep.subr.bf16.mxu1 %v13825_v26  ;;  %16274 = vst [vmem:[#allocation27_spill] sm:$0xff] %v13891_v55  ;;  %16276 = vst [vmem:[#allocation29_spill] sm:$0xff] %v13895_v53  ;;  %v13905_v37 = vpack.c.bf16 %v173_v18, %v170_v16 }
 0x1ab   :  { %11554 = vmatpush1.bf16.msra.mxu0 %v13792_v41  ;;  %16275 = vst [vmem:[#allocation28_spill] sm:$0xff] %v13893_v40 }
 0x1ac   :  { %11556 = vmatprep.subr.bf16.mxu0 %v13798_v49  ;;  %16279 = vst [vmem:[#allocation32_spill] sm:$0xff] %v13905_v37 }
 0x1ad   :  { %11634 = vmatpush3.bf16.msra.mxu1 %v13831_v48 }
 0x1ae   :  { %11636 = vmatprep.subr.bf16.mxu1 %v13837_v52 }
 0x1af   :  { %11558 = vmatpush1.bf16.msra.mxu0 %v13804_v61 }
 0x1b0   :  { %11560 = vmatprep.subr.bf16.mxu0 %v13810_v3 }
 0x1b1   :  { %11638 = vmatpush3.bf16.msra.mxu1 %v13843_v4 }
 0x1b2   :  { %11640 = vmatprep.subr.bf16.mxu1 %v13849_v10 }
 0x1b3   :  { %11562 = vmatpush1.bf16.msra.mxu0 %v13816_v17 }
 0x1b4   :  { %11564 = vmatprep.subr.bf16.mxu0 %v13822_v22 }
 0x1b5   :  { %11642 = vmatpush3.bf16.msra.mxu1 %v13855_v27 }
 0x1b6   :  { %11644 = vmatprep.subr.bf16.mxu1 %v13893_v40 }
 0x1b7   :  { %11566 = vmatpush1.bf16.msra.mxu0 %v13828_v39  ;;  %v177_v39 = vld [vmem:[#allocation2 + $0x348] sm:$0xff] }
 0x1b8   :  { %11568 = vmatprep.subr.bf16.mxu0 %v13834_v50 }
 0x1bb   :  { %11570 = vmatpush1.bf16.msra.mxu0 %v13840_v62 }
 0x1bc   :  { %11572 = vmatprep.subr.bf16.mxu0 %v13846_v8 }
 0x1bf   :  { %11574 = vmatpush1.bf16.msra.mxu0 %v13852_v24 }
 0x1c0   :  { %11576 = vmatprep.subr.bf16.mxu0 %v13858_v29 }
 0x1c3   :  { %11578 = vmatpush1.bf16.msra.mxu0 %v13862_v43 }
 0x1c4   :  { %11580 = vmatprep.subr.bf16.mxu0 %v13866_v51  ;;  %v179_v51 = vld [vmem:[#allocation2 + $0x358] sm:$0xff] }
 0x1c7   :  { %11582 = vmatpush1.bf16.msra.mxu0 %v13869_v60  ;;  %v176_v60 = vld [vmem:[#allocation2 + $0x340] sm:$0xff] }
 0x1c8   :  { %11584 = vmatprep.subr.bf16.mxu0 %v13872_v1  ;;  %v178_v1 = vld [vmem:[#allocation2 + $0x350] sm:$0xff] }
 0x1cb   :  { %11586 = vmatpush1.bf16.msra.mxu0 %v13875_v19 }
 0x1cc   :  { %11588 = vmatprep.subr.bf16.mxu0 %v13878_v30  ;;  %v116_v30 = vld [vmem:[#allocation2 + $0x160] sm:$0xff] }
 0x1cf   :  { %11590 = vmatpush1.bf16.msra.mxu0 %v13881_v56  ;;  %v119_v56 = vld [vmem:[#allocation2 + $0x178] sm:$0xff] }
 0x1d0   :  { %11592 = vmatprep.subr.bf16.mxu0 %v13884_v57  ;;  %v13898_v44 = vpack.c.bf16 %v119_v56, %v116_v30  ;;  %v16012_v30 = vsub.s32 0, %v13701_v28  ;;  %v237_v56 = vld [vmem:[%s15971_s7] sm:$0x7]  ;;  %v175_v57 = vld [vmem:[#allocation2 + $0x338] sm:$0xff] }
 0x1d1   :  { %v13932_v50 = vpack.c.bf16 %v178_v1, %v175_v57  ;;  %v183_v57 = vld [vmem:[#allocation2 + $0x378] sm:$0xff] }
 0x1d2   :  { %16277 = vst [vmem:[#allocation30_spill] sm:$0xff] %v13898_v44  ;;  %11646 = vmatpush3.bf16.msra.mxu1 %v13898_v44  ;;  %v13916_v35 = vrot.slane %v237_v56, %v16012_v30  ;;  %v13934_v44 = vpack.c.bf16 %v179_v51, %v176_v60 }
 0x1d3   :  { %11594 = vmatpush1.bf16.msra.mxu0 %v13887_v9  ;;  %v13903_v9 = vpack.c.bf16 %v172_v15, %v169_v58  ;;  %11648 = vmatprep.subr.bf16.mxu1 %v13905_v37  ;;  %v13920_v58 = vrot.slane %v237_v56, %v16013_v33  ;;  %v16034_v15 = vsub.s32 2, %v13701_v28  ;;  %16284 = vst [vmem:[#allocation37_spill] sm:$0xff] %v13932_v50 }
 0x1d4   :  { %11596 = vmatprep.subr.bf16.mxu0 %v13891_v55  ;;  %16280 = vst [vmem:[#allocation33_spill] sm:$0xff] %v13916_v35  ;;  %v171_v55 = vld [vmem:[#allocation2 + $0x318] sm:$0xff]  ;;  %16285 = vst [vmem:[#allocation38_spill] sm:$0xff] %v13934_v44 }
 0x1d5   :  { %16278 = vst [vmem:[#allocation31_spill] sm:$0xff] %v13903_v9  ;;  %16281 = vst [vmem:[#allocation34_spill] sm:$0xff] %v13920_v58  ;;  %v13927_v30 = vrot.slane %v237_v56, %v16034_v15  ;;  %v184_v56 = vld [vmem:[#allocation2 + $0x380] sm:$0xff]  ;;  %v191_v15 = vld [vmem:[#allocation2 + $0x3b8] sm:$0xff] }
 0x1d7   :  { %11598 = vmatpush1.bf16.msra.mxu0 %v13895_v53  ;;  %v168_v53 = vld [vmem:[#allocation2 + $0x300] sm:$0xff]  ;;  %16282 = vst [vmem:[#allocation35_spill] sm:$0xff] %v13927_v30 }
 0x1d8   :  { %11600 = vmatprep.subr.bf16.mxu0 %v13903_v9  ;;  %v13929_v29 = vpack.c.bf16 %v171_v55, %v168_v53  ;;  %v185_v53 = vld [vmem:[#allocation2 + $0x388] sm:$0xff] }
 0x1da   :  { %16283 = vst [vmem:[#allocation36_spill] sm:$0xff] %v13929_v29 }
 0x268   :  { %v694_v16 = vpop.f32.mrb[0].mxu1 }
 0x269   :  { %v780_v18 = vadd.f32 %v694_v16, %v13916_v35  ;;  %v696_v9 = vpop.f32.mrb[1].mxu1 }
 0x26a   :  { %v781_v19 = vadd.f32 %v696_v9, %v13920_v58  ;;  %v174_v9 = vld [vmem:[#allocation2 + $0x330] sm:$0xff] }
 0x26b   :  { %v786_v24 = vmax.f32 %v780_v18, 0.0  ;;  %v13942_v51 = vpack.c.bf16 %v177_v39, %v174_v9  ;;  %v188_v18 = vld [vmem:[#allocation2 + $0x3a0] sm:$0xff] }
 0x26c   :  { %v787_v33 = vmax.f32 %v781_v19, 0.0  ;;  %v700_v43 = vpop.f32.mrb[2].mxu1  ;;  %v181_v19 = vld [vmem:[#allocation2 + $0x368] sm:$0xff] }
 0x26d   :  { %v783_v16 = vadd.f32 %v700_v43, %v13916_v35  ;;  %v10805_v8 = vpop.f32.mrb[2].mxu0  ;;  %v702_v62 = vpop.f32.mrb[3].mxu1  ;;  %v182_v43 = vld [vmem:[#allocation2 + $0x370] sm:$0xff]  ;;  %16286 = vst [vmem:[#allocation39_spill] sm:$0xff] %v13942_v51  ;;  %v13946_v60 = vpack.c.bf16 %v184_v56, %v181_v19  ;;  %v13959_v19 = vpack.c.bf16 %v191_v15, %v188_v18  ;;  %v197_v15 = vld [vmem:[%s15974_s10 + $0x28] sm:$0xff]  ;;  %v195_v18 = vld [vmem:[%s15974_s10 + $0x18] sm:$0xff] }
 0x26e   :  { %v784_v40 = vadd.f32 %v702_v62, %v13920_v58  ;;  %v771_v22 = vpop.f32.mrb[3].mxu0  ;;  %863 = vmatprep.mubr.f32.mxu0 %v787_v33  ;;  %1017 = vmatprep.mubr.f32.mxu1 %v787_v33  ;;  %v187_v33 = vld [vmem:[#allocation2 + $0x398] sm:$0xff]  ;;  %v186_v56 = vld [vmem:[#allocation2 + $0x390] sm:$0xff] }
 0x26f   :  { %v13938_v55 = vadd.f32 %v771_v22, %v13927_v30  ;;  %864 = vmatmul.mubr.f32.vlgmr.msra.gmra.mrb[4].mxu0 %v786_v24  ;;  %1018 = vmatmul.mubr.f32.vlgmr.msra.gmra.mrb[4].mxu1 %v786_v24  ;;  %v789_v62 = vmax.f32 %v783_v16, 0.0  ;;  %16287 = vst [vmem:[#allocation40_spill] sm:$0xff] %v13946_v60  ;;  %v180_v22 = vld [vmem:[#allocation2 + $0x360] sm:$0xff]  ;;  %v13948_v24 = vpack.c.bf16 %v185_v53, %v182_v43  ;;  %16291 = vst [vmem:[#allocation44_spill] sm:$0xff] %v13959_v19  ;;  %v189_v43 = vld [vmem:[#allocation2 + $0x3a8] sm:$0xff]  ;;  %v16292_v53 = vmov 0.0  }
 0x270   :  { %v790_v1 = vmax.f32 %v784_v40, 0.0  ;;  %11602 = vmatpush1.bf16.msra.mxu0 %v13929_v29  ;;  %11650 = vmatpush3.bf16.msra.mxu1 %v13905_v37  ;;  %v190_v40 = vld [vmem:[#allocation2 + $0x3b0] sm:$0xff]  ;;  %v13953_v16 = vpack.c.bf16 %v183_v57, %v180_v22  ;;  %v13977_v22 = vpack.c.bf16 %v189_v43, %v186_v56  ;;  %v785_v57 = vadd.f32 %v10805_v8, %v13927_v30  ;;  %v199_v8 = vld [vmem:[%s15974_s10 + $0x38] sm:$0xff]  ;;  %v200_v43 = vld [vmem:[%s15974_s10 + $0x40] sm:$0xff] }
 0x271   :  { %11604 = vmatprep.subr.bf16.mxu0 %v13932_v50  ;;  %11652 = vmatprep.subr.bf16.mxu1 %v13934_v44  ;;  %16288 = vst [vmem:[#allocation41_spill] sm:$0xff] %v13948_v24  ;;  %v788_v39 = vmax.f32 %v13938_v55, 0.0  ;;  %v13957_v9 = vpack.c.bf16 %v190_v40, %v187_v33  ;;  %v193_v55 = vld [vmem:[%s15974_s10 + $0x8] sm:$0xff]  ;;  %v192_v40 = vld [vmem:[%s15974_s10] sm:$0xff]  ;;  %v202_v56 = vld [vmem:[%s15974_s10 + $0x50] sm:$0xff] }
 0x272   :  { %869 = vmatprep.mubr.f32.mxu0 %v790_v1  ;;  %1022 = vmatprep.mubr.f32.mxu1 %v790_v1  ;;  %16289 = vst [vmem:[#allocation42_spill] sm:$0xff] %v13953_v16  ;;  %v196_v1 = vld [vmem:[%s15974_s10 + $0x20] sm:$0xff]  ;;  %16293 = vst [vmem:[#allocation45_spill] sm:$0xff] %v13977_v22 }
 0x273   :  { %870 = vmatmul.mubr.f32.gmra.mrb[6].mxu0 %v789_v62  ;;  %1023 = vmatmul.mubr.f32.gmra.mrb[6].mxu1 %v789_v62  ;;  %16290 = vst [vmem:[#allocation43_spill] sm:$0xff] %v13957_v9  ;;  %v194_v62 = vld [vmem:[%s15974_s10 + $0x10] sm:$0xff]  ;;  %v13982_v33 = vpack.c.bf16 %v196_v1, %v193_v55  ;;  %v203_v55 = vld [vmem:[%s15974_s10 + $0x58] sm:$0xff]  ;;  %v14006_v1 = vpack.c.bf16 %v195_v18, %v192_v40  ;;  %v205_v40 = vld [vmem:[%s15974_s10 + $0x68] sm:$0xff] }
 0x274   :  { %11606 = vmatpush1.bf16.msra.mxu0 %v13942_v51  ;;  %11654 = vmatpush3.bf16.msra.mxu1 %v13934_v44  ;;  %v14024_v18 = vpack.c.bf16 %v203_v55, %v200_v43  ;;  %v207_v55 = vld [vmem:[%s15974_s10 + $0x78] sm:$0xff] }
 0x275   :  { %10822 = vmatprep.mubr.msk.f32.mxu1 %vm792_vm2, %v788_v39  ;;  %11608 = vmatprep.subr.bf16.mxu0 %v13946_v60  ;;  %16294 = vst [vmem:[#allocation46_spill] sm:$0xff] %v13982_v33  ;;  %16296 = vst [vmem:[#allocation48_spill] sm:$0xff] %v14006_v1 }
 0x276   :  { %11656 = vmatprep.subr.bf16.mxu1 %v13948_v24  ;;  %940 = vmatprep.mubr.f32.mxu0 %v16292_v53  ;;  %16298 = vst [vmem:[#allocation50_spill] sm:$0xff] %v14024_v18 }
 0x278   :  { %11610 = vmatpush1.bf16.msra.mxu0 %v13953_v16  ;;  %11658 = vmatpush3.bf16.msra.mxu1 %v13948_v24  ;;  %v13990_v16 = vpack.c.bf16 %v197_v15, %v194_v62  ;;  %v791_v62 = vmax.f32 %v785_v57, 0.0  ;;  %v14009_v15 = vpack.c.bf16 %v202_v56, %v199_v8  ;;  %v201_v24 = vld [vmem:[%s15974_s10 + $0x48] sm:$0xff]  ;;  %v208_v57 = vld [vmem:[%s15974_s10 + $0x80] sm:$0xff]  ;;  %v206_v8 = vld [vmem:[%s15974_s10 + $0x70] sm:$0xff] }
 0x279   :  { %11612 = vmatprep.subr.bf16.mxu0 %v13957_v9  ;;  %11660 = vmatprep.subr.bf16.mxu1 %v13959_v19  ;;  %v198_v9 = vld [vmem:[%s15974_s10 + $0x30] sm:$0xff]  ;;  %v209_v56 = vld [vmem:[%s15974_s10 + $0x88] sm:$0xff]  ;;  %v14039_v43 = vpack.c.bf16 %v208_v57, %v205_v40  ;;  %v212_v57 = vld [vmem:[%s15974_s10 + $0xa0] sm:$0xff] }
 0x27a   :  { %16295 = vst [vmem:[#allocation47_spill] sm:$0xff] %v13990_v16  ;;  %16297 = vst [vmem:[#allocation49_spill] sm:$0xff] %v14009_v15  ;;  %v14060_v40 = vpack.c.bf16 %v209_v56, %v206_v8  ;;  %v213_v56 = vld [vmem:[%s15974_s10 + $0xa8] sm:$0xff] }
 0x27b   :  { %16300 = vst [vmem:[#allocation52_spill] sm:$0xff] %v14039_v43 }
 0x27c   :  { %11614 = vmatpush1.bf16.msra.mxu0 %v13977_v22  ;;  %11662 = vmatpush3.bf16.msra.mxu1 %v13959_v19  ;;  %16301 = vst [vmem:[#allocation53_spill] sm:$0xff] %v14060_v40 }
 0x27d   :  { %11664 = vmatprep.subr.bf16.mxu0 %v13982_v33  ;;  %11684 = vmatprep.subr.bf16.mxu1 %v13990_v16  ;;  %v14036_v33 = vpack.c.bf16 %v201_v24, %v198_v9  ;;  %v211_v24 = vld [vmem:[%s15974_s10 + $0x98] sm:$0xff]  ;;  %v214_v9 = vld [vmem:[%s15974_s10 + $0xb0] sm:$0xff] }
 0x27e   :  { %v14076_v8 = vpack.c.bf16 %v214_v9, %v211_v24  ;;  %v218_v9 = vld [vmem:[%s15974_s10 + $0xd0] sm:$0xff] }
 0x27f   :  { %9798 = vmatmul.mubr.msk.f32.vlgmr.msra.gmra.mrb[4].mxu0 %vm792_vm2, %v788_v39  ;;  %10823 = vmatmul.mubr.msk.f32.vlgmr.msra.gmra.mrb[8].mxu1 %vm792_vm2, %v791_v62  ;;  %16299 = vst [vmem:[#allocation51_spill] sm:$0xff] %v14036_v33  ;;  %v204_v39 = vld [vmem:[%s15974_s10 + $0x60] sm:$0xff] }
 0x280   :  { %11666 = vmatpush1.bf16.msra.mxu0 %v14006_v1  ;;  %946 = vmatprep.mubr.f32.mxu0 %v16292_v53  ;;  %v14050_v1 = vld [vmem:[%s15967_s3] sm:$0xff]  ;;  %16303 = vst [vmem:[#allocation55_spill] sm:$0xff] %v14076_v8 }
 0x281   :  { %11668 = vmatprep.subr.bf16.mxu0 %v14009_v15  ;;  %11686 = vmatpush3.bf16.msra.mxu1 %v13990_v16  ;;  %v215_v15 = vld [vmem:[%s15974_s10 + $0xb8] sm:$0xff]  ;;  %v14072_v16 = vpack.c.bf16 %v207_v55, %v204_v39  ;;  %v217_v39 = vld [vmem:[%s15974_s10 + $0xc8] sm:$0xff]  ;;  %v220_v55 = vld [vmem:[%s15974_s10 + $0xe0] sm:$0xff] }
 0x282   :  { %11688 = vmatprep.subr.bf16.mxu1 %v14024_v18  ;;  %10845 = vmatprep.mubr.msk.f32.mxu1 %vm1103_vm3, %v14050_v1  ;;  %v14092_v24 = vpack.c.bf16 %v215_v15, %v212_v57  ;;  %v216_v15 = vld [vmem:[%s15974_s10 + $0xc0] sm:$0xff]  ;;  %v219_v57 = vld [vmem:[%s15974_s10 + $0xd8] sm:$0xff] }
 0x283   :  { %9799 = vmatmul.mubr.msk.f32.gmra.mrb[6].mxu0 %vm792_vm2, %v791_v62  ;;  %16302 = vst [vmem:[#allocation54_spill] sm:$0xff] %v14072_v16  ;;  %v210_v62 = vld [vmem:[%s15974_s10 + $0x90] sm:$0xff] }
 0x284   :  { %11670 = vmatpush1.bf16.msra.mxu0 %v14036_v33  ;;  %1174 = vmatprep.mubr.f32.mxu0 %v16292_v53  ;;  %16304 = vst [vmem:[#allocation56_spill] sm:$0xff] %v14092_v24  ;;  %v14101_v33 = vpack.c.bf16 %v213_v56, %v210_v62  ;;  %v14117_v62 = vpack.c.bf16 %v219_v57, %v216_v15  ;;  %v222_v56 = vld [vmem:[%s15976_s12] sm:$0xff]  ;;  %v225_v15 = vld [vmem:[%s15976_s12 + $0x18] sm:$0xff] }
 0x285   :  { %11672 = vmatprep.subr.bf16.mxu0 %v14039_v43  ;;  %11690 = vmatpush3.bf16.msra.mxu1 %v14024_v18  ;;  %v221_v43 = vld [vmem:[%s15974_s10 + $0xe8] sm:$0xff]  ;;  %v14104_v18 = vpack.c.bf16 %v220_v55, %v217_v39 }
 0x286   :  { %11692 = vmatprep.subr.bf16.mxu1 %v14060_v40  ;;  %16305 = vst [vmem:[#allocation57_spill] sm:$0xff] %v14101_v33  ;;  %v14114_v22 = vpack.c.bf16 %v221_v43, %v218_v9  ;;  %16308 = vst [vmem:[#allocation60_spill] sm:$0xff] %v14117_v62  ;;  %v14131_v43 = vld [vmem:[%s15967_s3 + $0x8] sm:$0xff]  ;;  %v224_v9 = vld [vmem:[%s15976_s12 + $0x10] sm:$0xff] }
 0x287   :  { %16306 = vst [vmem:[#allocation58_spill] sm:$0xff] %v14104_v18  ;;  %v223_v39 = vld [vmem:[%s15976_s12 + $0x8] sm:$0xff]  ;;  %v14158_v57 = vpack.c.bf16 %v225_v15, %v224_v9  ;;  %v229_v9 = vld [vmem:[%s15976_s12 + $0x38] sm:$0xff] }
 0x288   :  { %11674 = vmatpush1.bf16.msra.mxu0 %v14072_v16  ;;  %16307 = vst [vmem:[#allocation59_spill] sm:$0xff] %v14114_v22  ;;  %v14148_v55 = vpack.c.bf16 %v223_v39, %v222_v56  ;;  %v226_v56 = vld [vmem:[%s15976_s12 + $0x20] sm:$0xff]  ;;  %v227_v39 = vld [vmem:[%s15976_s12 + $0x28] sm:$0xff] }
 0x289   :  { %11676 = vmatprep.subr.bf16.mxu0 %v14076_v8  ;;  %11694 = vmatpush3.bf16.msra.mxu1 %v14060_v40  ;;  %16310 = vst [vmem:[#allocation62_spill] sm:$0xff] %v14158_v57 }
 0x28a   :  { %11696 = vmatprep.subr.bf16.mxu1 %v14092_v24  ;;  %16309 = vst [vmem:[#allocation61_spill] sm:$0xff] %v14148_v55 }
 0x28c   :  { %11678 = vmatpush1.bf16.msra.mxu0 %v14101_v33  ;;  %v16314_v33 = vsub.s32 2, %v13701_v28 }
 0x28d   :  { %11680 = vmatprep.subr.bf16.mxu0 %v14104_v18  ;;  %11698 = vmatpush3.bf16.msra.mxu1 %v14092_v24 }
 0x28e   :  { %11700 = vmatprep.subr.bf16.mxu1 %v14114_v22 }
 0x290   :  { %11682 = vmatpush1.bf16.msra.mxu0 %v14117_v62  ;;  %v231_v62 = vld [vmem:[%s15976_s12 + $0x48] sm:$0xff] }
 0x291   :  { %11702 = vmatpush3.bf16.msra.mxu1 %v14114_v22  ;;  %10889 = vmatprep.subr.msk.mxu0 %vm307_vm0, %v13718_v38 }
 0x292   :  { %11704 = vmatprep.subr.bf16.mxu1 %v14148_v55 }
 0x293   :  { %9802 = vmatmul.mubr.msk.f32.vlgmr.msra.gmra.mrb[4].mxu0 %vm1103_vm3, %v14050_v1 }
 0x294   :  { %1180 = vmatprep.mubr.f32.mxu0 %v16292_v53  ;;  %10846 = vmatmul.mubr.msk.f32.vlgmr.msra.gmra.mrb[10].mxu1 %vm1103_vm3, %v14131_v43 }
 0x295   :  { %10890 = vmatpush3.msk.msra.mxu0 %vm307_vm0, %v13718_v38  ;;  %11706 = vmatpush3.bf16.msra.mxu1 %v14148_v55  ;;  %v228_v38 = vld [vmem:[%s15976_s12 + $0x30] sm:$0xff]  ;;  %v14171_v55 = vpack.c.bf16 %v227_v39, %v226_v56  ;;  %v233_v39 = vld [vmem:[%s15978_s14 + $0x8] sm:$0xff] }
 0x296   :  { %10894 = vmatprep.subr.msk.mxu0 %vm307_vm0, %v13733_v45  ;;  %11708 = vmatprep.subr.bf16.mxu1 %v14158_v57  ;;  %v14176_v15 = vpack.c.bf16 %v229_v9, %v228_v38  ;;  %v232_v38 = vld [vmem:[%s15978_s14] sm:$0xff] }
 0x297   :  { %9803 = vmatmul.mubr.msk.f32.gmra.mrb[6].mxu0 %vm1103_vm3, %v14131_v43  ;;  %16311 = vst [vmem:[#allocation63_spill] sm:$0xff] %v14171_v55  ;;  %v14198_v9 = vpack.c.bf16 %v233_v39, %v232_v38 }
 0x298   :  { %16312 = vst [vmem:[#allocation64_spill] sm:$0xff] %v14176_v15 }
 0x299   :  { %11710 = vmatpush3.bf16.msra.mxu1 %v14158_v57  ;;  %v230_v57 = vld [vmem:[%s15976_s12 + $0x40] sm:$0xff] }
 0x29a   :  { %11712 = vmatprep.subr.bf16.mxu1 %v14171_v55  ;;  %v14187_v56 = vpack.c.bf16 %v231_v62, %v230_v57 }
 0x29c   :  { %16313 = vst [vmem:[#allocation65_spill] sm:$0xff] %v14187_v56 }
 0x29d   :  { %11714 = vmatpush3.bf16.msra.mxu1 %v14171_v55 }
 0x29e   :  { %11716 = vmatprep.subr.bf16.mxu1 %v14176_v15 }
 0x2a1   :  { %11718 = vmatpush3.bf16.msra.mxu1 %v14176_v15 }
 0x2a2   :  { %11720 = vmatprep.subr.bf16.mxu1 %v14187_v56 }
 0x2a5   :  { %11722 = vmatpush3.bf16.msra.mxu1 %v14187_v56  ;;  %v254_v56 = vld [vmem:[%s15973_s9] sm:$0x7] }
 0x2a6   :  { %11724 = vmatprep.subr.bf16.mxu1 %v14198_v9  ;;  %v14206_v24 = vrot.slane %v254_v56, %v16314_v33 }
 0x2a8   :  { %16315 = vst [vmem:[#allocation66_spill] sm:$0xff] %v14206_v24 }
 0x342   :  { %v10128_v62 = vpop.f32.mrb[4].mxu1 }
 0x343   :  { %v10129_v57 = vpop.f32.mrb[5].mxu1 }
 0x344   :  { %v10130_v55 = vadd.f32 %v10129_v57, %v10128_v62  ;;  %v16316_v62 = vsub.s32 0, %v13701_v28 }
 0x346   :  { %v10131_v15 = vpop.f32.mrb[6].mxu1  ;;  %v1020_v39 = vadd.f32 %v10130_v55, %v14206_v24  ;;  %v14212_v57 = vrot.slane %v254_v56, %v16316_v62 }
 0x347   :  { %v10132_v22 = vpop.f32.mrb[7].mxu1 }
 0x348   :  { %v10133_v18 = vadd.f32 %v10132_v22, %v10131_v15  ;;  %16317 = vst [vmem:[#allocation67_spill] sm:$0xff] %v14212_v57  ;;  %v16318_v22 = vsub.s32 1, %v13701_v28 }
 0x34a   :  { %v1025_v8 = vadd.f32 %v10133_v18, %v14206_v24  ;;  %v14216_v15 = vrot.slane %v254_v56, %v16318_v22 }
 0x34c   :  { %16319 = vst [vmem:[#allocation68_spill] sm:$0xff] %v14216_v15 }
 0x352   :  { %v10824_v38 = vpop.f32.mrb[8].mxu1 }
 0x353   :  { %v1100_v16 = vadd.f32 %v10824_v38, %v1025_v8  ;;  %v1094_v40 = vpop.f32.mrb[9].mxu1 }
 0x354   :  { %v1095_v19 = vadd.f32 %v1094_v40, %v1020_v39 }
 0x366   :  { %v1176_v60 = vpop.f32.mrb[4].mxu0 }
 0x367   :  { %v13103_v33 = vadd.f32 %v1176_v60, %v14212_v57  ;;  %v1178_v51 = vpop.f32.mrb[5].mxu0  ;;  %v10847_v44 = vpop.f32.mrb[10].mxu1 }
 0x368   :  { %v1253_v18 = vpop.f32.mrb[11].mxu1  ;;  %v13104_v55 = vadd.f32 %v1178_v51, %v14216_v15 }
 0x369   :  { %v9806_v50 = vmul.f32 -1.442695, %v13103_v33 }
 0x36a   :  { %v1182_v8 = vpop.f32.mrb[6].mxu0  ;;  %v9808_v28 = vmul.f32 -1.442695, %v13104_v55 }
 0x36b   :  { %13285 = vpow2.f32 %v9806_v50  ;;  %v13105_v40 = vadd.f32 %v1182_v8, %v14212_v57  ;;  %v1184_v38 = vpop.f32.mrb[7].mxu0  ;;  %v14225_v50 = vld [vmem:[%s15975_s11] ss:$0 sm:$0xff] }
 0x36c   :  { %v13106_v62 = vadd.f32 %v1184_v38, %v14216_v15  ;;  %v1290_v55 = vadd.f32 %v14225_v50, %v1253_v18 }
 0x36d   :  { %v9807_v39 = vmul.f32 -1.442695, %v13105_v40 }
 0x36e   :  { %v9809_v56 = vmul.f32 -1.442695, %v13106_v62  ;;  %v1291_v62 = vadd.f32 %v10847_v44, %v14225_v50 }
 0x36f   :  { %13287 = vpow2.f32 %v9807_v39 }
 0x370   :  { %13289 = vpow2.f32 %v9808_v28 }
 0x371   :  { %13291 = vpow2.f32 %v9809_v56 }
 0x375   :  { %v13286_v22 = vpop.eup %13285 }
 0x376   :  { %v1270_v60 = vadd.f32 1.0, %v13286_v22 }
 0x378   :  { %13293 = vrcp.f32 %v1270_v60 }
 0x379   :  { %v13288_v24 = vpop.eup %13287 }
 0x37a   :  { %v1271_v33 = vadd.f32 1.0, %v13288_v24  ;;  %v13290_v29 = vpop.eup %13289 }
 0x37b   :  { %v13292_v51 = vpop.eup %13291  ;;  %v1284_v8 = vadd.f32 1.0, %v13290_v29 }
 0x37c   :  { %13295 = vrcp.f32 %v1271_v33  ;;  %v1285_v38 = vadd.f32 1.0, %v13292_v51 }
 0x37d   :  { %13297 = vrcp.f32 %v1284_v8 }
 0x37e   :  { %13299 = vrcp.f32 %v1285_v38 }
 0x382   :  { %v13294_v40 = vpop.eup %13293 }
 0x383   :  { %v1292_v39 = vmul.f32 %v13294_v40, %v1290_v55 }
 0x385   :  { %v1294_v28 = vadd.f32 %v1292_v39, %v1095_v19 }
 0x386   :  { %v13296_v56 = vpop.eup %13295 }
 0x387   :  { %v1293_v24 = vmul.f32 %v13296_v56, %v1291_v62  ;;  %13301 = vtanh.f32 %v1294_v28  ;;  %v13298_v60 = vpop.eup %13297 }
 0x388   :  { %v13300_v33 = vpop.eup %13299  ;;  %v1298_v15 = vsub.f32 1.0, %v13298_v60  ;;  %v1302_v18 = vmul.f32 %v13298_v60, %v14050_v1  ;;  %v235_v1 = vld [vmem:[%s15978_s14 + $0x18] sm:$0xff] }
 0x389   :  { %v1295_v22 = vadd.f32 %v1293_v24, %v1100_v16  ;;  %v1299_v30 = vsub.f32 1.0, %v13300_v33  ;;  %v1303_v19 = vmul.f32 %v13300_v33, %v14131_v43  ;;  %v234_v16 = vld [vmem:[%s15978_s14 + $0x10] sm:$0xff]  ;;  %v14260_v43 = vld [vmem:[%s15968_s4] sm:$0x3] }
 0x38a   :  { %v14280_v24 = vld [vmem:[%s15979_s15] ss:$0 sm:$0xff] }
 0x38b   :  { %13303 = vtanh.f32 %v1295_v22 }
 0x391   :  { %v13302_v57 = vpop.eup %13301 }
 0x392   :  { %v1300_v29 = vmul.f32 %v13302_v57, %v1298_v15  ;;  %v14246_v57 = vpack.c.bf16 %v235_v1, %v234_v16  ;;  %v14267_v15 = vld [vmem:[%s15977_s13] ss:$0 sm:$0xff] }
 0x394   :  { %v14230_v51 = vadd.f32 %v1302_v18, %v1300_v29  ;;  %v1483_v29 = vpop.permute.xlu0 %1482 }
 0x395   :  { %v13304_v8 = vpop.eup %13303 }
 0x396   :  { %10868 = vmatprep.mubr.msk.f32.mxu1 %vm1103_vm3, %v14230_v51  ;;  %v1301_v44 = vmul.f32 %v13304_v8, %v1299_v30  ;;  %v14253_v30 = vld [vmem:[%s15978_s14 + $0x20] sm:$0xff] }
 0x398   :  { %v14235_v55 = vadd.f32 %v1303_v19, %v1301_v44  ;;  %v1487_v44 = vpop.permute.xlu1 %1486 }
 0x39a   :  { %10869 = vmatmul.mubr.msk.f32.vlgmr.msra.gmra.mrb[12].mxu1 %vm1103_vm3, %v14235_v55 }
 0x39b   :  { %11726 = vmatpush3.bf16.msra.mxu1 %v14198_v9 }
 0x39c   :  { %11728 = vmatprep.subr.bf16.mxu1 %v14246_v57  ;;  %v1473_v16 = vpop.permute.xlu1 %1472 }
 0x39f   :  { %11730 = vmatpush3.bf16.msra.mxu1 %v14246_v57 }
 0x3a0   :  { %10879 = vmatprep.subr.mxu1 %v14253_v30  ;;  %v1477_v1 = vpop.permute.xlu1 %1476 }
 0x3a3   :  { %10880 = vmatpush3.msra.mxu1 %v14253_v30 }
 0x3a4   :  { %10884 = vmatprep.subr.msk.mxu1 %vm307_vm0, %v14260_v43 }
 0x46d   :  { %v10870_v40 = vpop.f32.mrb[12].mxu1 }
 0x46e   :  { %v1384_v38 = vadd.f32 %v10870_v40, %v14267_v15  ;;  %v1378_v39 = vpop.f32.mrb[13].mxu1 }
 0x46f   :  { %v1379_v62 = vadd.f32 %v14267_v15, %v1378_v39 }
 0x470   :  { %v1388_v56 = vmax.f32 %v1384_v38, 0.0 }
 0x471   :  { %v1387_v28 = vmax.f32 %v1379_v62, 0.0 }
 0x473   :  { %10881 = vmatprep.mubr.msk.f32.mxu1 %vm1389_vm4, %v1387_v28 }
 0x474   :  { %10882 = vmatmul.mubr.msk.f32.vlgmr.msra.gmra.mrb[14].mxu1 %vm1389_vm4, %v1388_v56 }
 0x475   :  { %10885 = vmatpush3.msk.msra.mxu1 %vm307_vm0, %v14260_v43 }
 0x476   :  { %9819 = vmatprep.subr.msk.mxu1 %vm307_vm0, %v13711_v34 }
 0x547   :  { %v10883_v22 = vpop.f32.mrb[14].mxu1 }
 0x548   :  { %v1462_v60 = vpop.f32.mrb[15].mxu1  ;;  %v1468_v18 = vadd.f32 %v10883_v22, %v14280_v24 }
 0x549   :  { %v1463_v33 = vadd.f32 %v14280_v24, %v1462_v60 }
 0x54a   :  { %v1490_v19 = vmul.f32 %v1487_v44, %v1468_v18  ;;  %v1480_v62 = vmul.f32 %v1477_v1, %v1468_v18 }
 0x54b   :  { %v1489_v8 = vmul.f32 %v1483_v29, %v1463_v33  ;;  %v1479_v40 = vmul.f32 %v1473_v16, %v1463_v33 }
 0x54d   :  { %1493 = vrot.lane.b32.xlu1 %v1489_v8, %s13548_s30 }
 0x551   :  { %1495 = vrot.lane.b32.xlu1 %v1490_v19, %s13548_s30 }
 0x5bf   :  { %v1494_v38 = vpop.permute.xlu1 %1493 }
 0x5c0   :  { %v1499_v39 = vadd.f32 %v1494_v38, %v1479_v40 }
 0x5c2   :  { %1503 = vrot.lane.b32.xlu1 %v1499_v39, %s13549_s18  ;;  %v9815_v39 = vld [vmem:[%s16251_s20 + $0x18] sm:$0xff] }
 0x5c3   :  { %v1496_v28 = vpop.permute.xlu1 %1495 }
 0x5c4   :  { %v1500_v56 = vadd.f32 %v1496_v28, %v1480_v62  ;;  %v9814_v62 = vld [vmem:[%s16251_s20 + $0x10] sm:$0xff] }
 0x5c6   :  { %1505 = vrot.lane.b32.xlu1 %v1500_v56, %s13549_s18 }
 0x634   :  { %v1504_v22 = vpop.permute.xlu1 %1503 }
 0x635   :  { %v1509_v60 = vadd.f32 %v1504_v22, %v13686_v14 }
 0x637   :  { %v1605_v29 = vsub.f32 %v1509_v60, %v13686_v14  ;;  %1513 = vrot.lane.b32.xlu1 %v1509_v60, %s13548_s30 }
 0x638   :  { %v1506_v8 = vpop.permute.xlu1 %1505 }
 0x639   :  { %v1510_v33 = vadd.f32 %v13679_v13, %v1506_v8  ;;  %v1607_v44 = vmul.f32 %v1605_v29, %v1605_v29 }
 0x63b   :  { %v1606_v18 = vsub.f32 %v1510_v33, %v13679_v13  ;;  %1611 = vrot.lane.b32.xlu1 %v1607_v44, %s13548_s30  ;;  %1515 = vrot.lane.b32.xlu0 %v1510_v33, %s13548_s30 }
 0x63d   :  { %v1608_v19 = vmul.f32 %v1606_v18, %v1606_v18 }
 0x63f   :  { %1613 = vrot.lane.b32.xlu0 %v1608_v19, %s13548_s30 }
 0x6a9   :  { %v1514_v16 = vpop.permute.xlu1 %1513 }
 0x6aa   :  { %1519 = vst.msk [vmem:[%s15980_s16] sm:$0xff] %vm300_vm1, %v1514_v16  ;;  %10886 = vmatprep.mubr.msk.f32.mxu1 %vm300_vm1, %v1514_v16 }
 0x6ad   :  { %v1516_v14 = vpop.permute.xlu0 %1515  ;;  %v1612_v1 = vpop.permute.xlu1 %1611 }
 0x6ae   :  { %1520 = vst.msk [vmem:[%s15980_s16 + $0x8] sm:$0xff] %vm300_vm1, %v1516_v14  ;;  %10887 = vmatmul.mubr.msk.f32.vlgmr.msra.gmra.mrb[16].mxu1 %vm300_vm1, %v1516_v14  ;;  %v1617_v13 = vsel %vm300_vm1, %v1612_v1, 0.0 }
 0x6af   :  { %1618 = vadd.xlane.f32.xlu1 %v1617_v13  ;;  %9820 = vmatpush1.msk.msra.mxu1 %vm307_vm0, %v13707_v32 }
 0x6b0   :  { %1719 = vmatprep.mubr.f32.mxu1 %v16292_v53  ;;  %9826 = vmatprep.subr.msk.mxu1 %vm307_vm0, %v13737_v46 }
 0x6b1   :  { %v1614_v40 = vpop.permute.xlu0 %1613 }
 0x6b2   :  { %v1620_v38 = vsel %vm300_vm1, %v1614_v40, 0.0 }
 0x6b3   :  { %1621 = vadd.xlane.f32.xlu0 %v1620_v38 }
 0x73c   :  { %v1619_v1 = vpop.xlane.xlu1 %1618 }
 0x73d   :  { %v1623_v13 = vmax.f32 %v1619_v1, 1e-24  ;;  %v16326_v1 = vld [vmem:[#allocation11_spill] sm:$0xff] }
 0x740   :  { %v1622_v56 = vpop.xlane.xlu0 %1621 }
 0x741   :  { %v1624_v44 = vmax.f32 %v1622_v56, 1e-24 }
 0x743   :  { %13305 = vrsqrt.f32 %v1624_v44  ;;  %v16322_v44 = vmov 0  }
 0x744   :  { %13307 = vrsqrt.f32 %v1623_v13  ;;  %v16327_v13 = vld [vmem:[#allocation30_spill] sm:$0xff] }
 0x74d   :  { %v13306_v40 = vpop.eup %13305 }
 0x74e   :  { %v1628_v38 = vmul.f32 %v13306_v40, %v1606_v18  ;;  %v16328_v40 = vld [vmem:[#allocation12_spill] sm:$0xff] }
 0x781   :  { %v14319_v28 = vpop.f32.mrb[16].mxu1 }
 0x782   :  { %16320 = vst [vmem:[#allocation69_spill] sm:$0xff] %v14319_v28  ;;  %9852 = vst.msk [vmem:[%s15981_s17 + $0x18] sm:$0xff] %vm300_vm1, %v14319_v28  ;;  %v14326_v22 = vpop.f32.mrb[17].mxu1  ;;  %v1630_v60 = vsub.f32 %v9815_v39, %v14319_v28  ;;  %v13308_v39 = vpop.eup %13307 }
 0x783   :  { %16321 = vst [vmem:[#allocation70_spill] sm:$0xff] %v14326_v22  ;;  %9851 = vst.msk [vmem:[%s15981_s17 + $0x10] sm:$0xff] %vm300_vm1, %v14326_v22  ;;  %v1629_v8 = vsub.f32 %v9814_v62, %v14326_v22  ;;  %v1627_v28 = vmul.f32 %v13308_v39, %v1605_v29  ;;  %v16330_v39 = vld [vmem:[#allocation14_spill] sm:$0xff] }
 0x784   :  { %v1632_v33 = vmul.f32 %v1630_v60, %v1630_v60 }
 0x785   :  { %v1631_v19 = vmul.f32 %v1629_v8, %v1629_v8 }
 0x786   :  { %v1636_v16 = vsel %vm300_vm1, %v1632_v33, 0.0 }
 0x787   :  { %1637 = vadd.xlane.f32.xlu1 %v1636_v16  ;;  %v1633_v14 = vsel %vm300_vm1, %v1631_v19, 0.0 }
 0x788   :  { %1634 = vadd.xlane.f32.xlu0 %v1633_v14  ;;  %v16325_v14 = vld [vmem:[#allocation28_spill] sm:$0xff] }
 0x798   :  { %1649 = vrot.lane.b32.xlu1 %v1628_v38, %s13548_s30  ;;  %v16329_v38 = vld [vmem:[#allocation13_spill] sm:$0xff] }
 0x79e   :  { %1647 = vrot.lane.b32.xlu0 %v1627_v28, %s13548_s30 }
 0x814   :  { %v1638_v62 = vpop.xlane.xlu1 %1637 }
 0x815   :  { %v1640_v56 = vmax.f32 %v1638_v62, 1e-24  ;;  %v1635_v22 = vpop.xlane.xlu0 %1634  ;;  %v16331_v62 = vld [vmem:[#allocation15_spill] sm:$0xff] }
 0x816   :  { %v1639_v33 = vmax.f32 %v1635_v22, 1e-24 }
 0x817   :  { %13309 = vrsqrt.f32 %v1640_v56  ;;  %v16332_v56 = vld [vmem:[#allocation17_spill] sm:$0xff] }
 0x818   :  { %13311 = vrsqrt.f32 %v1639_v33  ;;  %v1650_v16 = vpop.permute.xlu1 %1649  ;;  %v16333_v33 = vld [vmem:[#allocation18_spill] sm:$0xff] }
 0x819   :  { %v1648_v19 = vpop.permute.xlu0 %1647 }
 0x81a   :  { %9821 = vmatmul.mubr.msk.f32.vlgmr.msra.gmra.mrb[18].mxu1 %vm300_vm1, %v1648_v19  ;;  %10891 = vmatprep.mubr.msk.f32.mxu0 %vm300_vm1, %v1648_v19  ;;  %v16334_v19 = vld [vmem:[#allocation19_spill] sm:$0xff] }
 0x81b   :  { %10892 = vmatmul.mubr.msk.f32.vlgmr.msra.gmra.mrb[8].mxu0 %vm300_vm1, %v1650_v16  ;;  %1725 = vmatprep.mubr.f32.mxu1 %v16292_v53 }
 0x81c   :  { %9827 = vmatpush1.msk.msra.mxu1 %vm307_vm0, %v13726_v42  ;;  %10895 = vmatpush3.msk.msra.mxu0 %vm307_vm0, %v13733_v45 }
 0x81d   :  { %11732 = vmatprep.subr.bf16.mxu0 %v13758_v59  ;;  %11812 = vmatprep.subr.bf16.mxu1 %v13781_v23 }
 0x81e   :  { %9822 = vmatmul.mubr.msk.f32.gmra.mrb[20].mxu1 %vm300_vm1, %v1650_v16  ;;  %v16335_v16 = vld [vmem:[#allocation20_spill] sm:$0xff] }
 0x81f   :  { %1877 = vmatprep.mubr.f32.mxu1 %v16292_v53 }
 0x821   :  { %v13310_v29 = vpop.eup %13309 }
 0x822   :  { %v13312_v18 = vpop.eup %13311  ;;  %v1644_v28 = vmul.f32 %v13310_v29, %v1630_v60  ;;  %v16323_v60 = vmov 1   ;;  %v16336_v29 = vld [vmem:[#allocation21_spill] sm:$0xff] }
 0x823   :  { %v1643_v22 = vmul.f32 %v13312_v18, %v1629_v8  ;;  %v16324_v8 = vld [vmem:[#allocation10_spill] sm:$0xff] }
 0x824   :  { %2662 = vperm.xlu0 %13256, %v1644_v28   ;;  %v16337_v18 = vld [vmem:[#allocation22_spill] sm:$0xff] }
 0x825   :  { %2658 = vperm.xlu1 %13259, %v1643_v22   ;;  %9828 = vmatmul.mubr.msk.f32.vlgmr.msra.gmra.mrb[18].mxu1 %vm300_vm1, %v1643_v22 }
 0x826   :  { %10896 = vmatprep.mubr.msk.f32.mxu0 %vm300_vm1, %v1643_v22  ;;  %1883 = vmatprep.mubr.f32.mxu1 %v16292_v53 }
 0x827   :  { %10897 = vmatmul.mubr.msk.f32.vlgmr.msra.gmra.mrb[8].mxu0 %vm300_vm1, %v1644_v28  ;;  %11814 = vmatpush3.bf16.msra.mxu1 %v13787_v31 }
 0x828   :  { %13261 = vset.pattern.permute.xlu0 %v16322_v44  ;;  %11734 = vmatpush1.bf16.msra.mxu0 %v13760_v63 }
 0x829   :  { %13260 = vset.pattern.permute.xlu1 %v16322_v44  ;;  %2652 = vperm.xlu0 %13261, %v1644_v28  }
 0x82a   :  { %9829 = vmatmul.mubr.msk.f32.gmra.mrb[20].mxu1 %vm300_vm1, %v1644_v28  ;;  %2648 = vperm.xlu1 %13260, %v1643_v22   ;;  %v16338_v28 = vld [vmem:[#allocation23_spill] sm:$0xff]  ;;  %v16339_v22 = vld [vmem:[#allocation24_spill] sm:$0xff] }
 0x82b   :  { %11736 = vmatprep.subr.bf16.mxu0 %v13762_v0  ;;  %11816 = vmatprep.subr.bf16.mxu1 %v13789_v36 }
 0x82c   :  { %11738 = vmatpush1.bf16.msra.mxu0 %v13766_v5  ;;  %11818 = vmatpush3.bf16.msra.mxu1 %v13795_v47 }
 0x82d   :  { %11740 = vmatprep.subr.bf16.mxu0 %v13769_v6  ;;  %11820 = vmatprep.subr.bf16.mxu1 %v13801_v54 }
 0x82e   :  { %13262 = vset.pattern.permute.xlu1 %v16323_v60 }
 0x830   :  { %11742 = vmatpush1.bf16.msra.mxu0 %v13773_v11  ;;  %11822 = vmatpush3.bf16.msra.mxu1 %v13807_v2 }
 0x831   :  { %11744 = vmatprep.subr.bf16.mxu0 %v13776_v12  ;;  %11824 = vmatprep.subr.bf16.mxu1 %v13813_v7 }
 0x834   :  { %11746 = vmatpush1.bf16.msra.mxu0 %v13779_v21  ;;  %11826 = vmatpush3.bf16.msra.mxu1 %v13819_v20 }
 0x835   :  { %11748 = vmatprep.subr.bf16.mxu0 %v13784_v25  ;;  %11828 = vmatprep.subr.bf16.mxu1 %v13825_v26 }
 0x838   :  { %11750 = vmatpush1.bf16.msra.mxu0 %v13792_v41  ;;  %11830 = vmatpush3.bf16.msra.mxu1 %v13831_v48 }
 0x839   :  { %11752 = vmatprep.subr.bf16.mxu0 %v13798_v49  ;;  %11832 = vmatprep.subr.bf16.mxu1 %v13837_v52 }
 0x83c   :  { %11754 = vmatpush1.bf16.msra.mxu0 %v13804_v61  ;;  %11834 = vmatpush3.bf16.msra.mxu1 %v13843_v4 }
 0x83d   :  { %11756 = vmatprep.subr.bf16.mxu0 %v13810_v3  ;;  %11836 = vmatprep.subr.bf16.mxu1 %v13849_v10 }
 0x840   :  { %11758 = vmatpush1.bf16.msra.mxu0 %v13816_v17  ;;  %11838 = vmatpush3.bf16.msra.mxu1 %v13855_v27 }
 0x841   :  { %11760 = vmatprep.subr.bf16.mxu0 %v16324_v8  ;;  %11840 = vmatprep.subr.bf16.mxu1 %v16325_v14  ;;  %v16347_v14 = vld [vmem:[#allocation37_spill] sm:$0xff] }
 0x844   :  { %11762 = vmatpush1.bf16.msra.mxu0 %v16326_v1  ;;  %11842 = vmatpush3.bf16.msra.mxu1 %v16327_v13 }
 0x845   :  { %11764 = vmatprep.subr.bf16.mxu0 %v16328_v40  ;;  %11844 = vmatprep.subr.bf16.mxu1 %v13905_v37 }
 0x848   :  { %11766 = vmatpush1.bf16.msra.mxu0 %v16329_v38  ;;  %v16340_v38 = vld [vmem:[#allocation25_spill] sm:$0xff] }
 0x849   :  { %11768 = vmatprep.subr.bf16.mxu0 %v16330_v39  ;;  %v16341_v39 = vld [vmem:[#allocation26_spill] sm:$0xff] }
 0x84c   :  { %11770 = vmatpush1.bf16.msra.mxu0 %v16331_v62  ;;  %v16342_v62 = vld [vmem:[#allocation27_spill] sm:$0xff] }
 0x84d   :  { %11772 = vmatprep.subr.bf16.mxu0 %v16332_v56  ;;  %v16343_v56 = vld [vmem:[#allocation29_spill] sm:$0xff] }
 0x850   :  { %11774 = vmatpush1.bf16.msra.mxu0 %v16333_v33  ;;  %v16344_v33 = vld [vmem:[#allocation31_spill] sm:$0xff] }
 0x851   :  { %11776 = vmatprep.subr.bf16.mxu0 %v16334_v19 }
 0x854   :  { %11778 = vmatpush1.bf16.msra.mxu0 %v16335_v16 }
 0x855   :  { %11780 = vmatprep.subr.bf16.mxu0 %v16336_v29 }
 0x858   :  { %11782 = vmatpush1.bf16.msra.mxu0 %v16337_v18 }
 0x859   :  { %11784 = vmatprep.subr.bf16.mxu0 %v16338_v28 }
 0x85c   :  { %11786 = vmatpush1.bf16.msra.mxu0 %v16339_v22 }
 0x85d   :  { %11788 = vmatprep.subr.bf16.mxu0 %v16340_v38 }
 0x860   :  { %11790 = vmatpush1.bf16.msra.mxu0 %v16341_v39 }
 0x861   :  { %11792 = vmatprep.subr.bf16.mxu0 %v16342_v62 }
 0x864   :  { %11794 = vmatpush1.bf16.msra.mxu0 %v16343_v56 }
 0x865   :  { %11796 = vmatprep.subr.bf16.mxu0 %v16344_v33  ;;  %v16345_v33 = vld [vmem:[#allocation35_spill] sm:$0xff] }
 0x8f8   :  { %v1879_v19 = vpop.f32.mrb[18].mxu1 }
 0x8f9   :  { %v1965_v16 = vadd.f32 %v1879_v19, %v13916_v35  ;;  %v1881_v29 = vpop.f32.mrb[19].mxu1  ;;  %v16346_v19 = vld [vmem:[#allocation36_spill] sm:$0xff] }
 0x8fa   :  { %v1966_v18 = vadd.f32 %v1881_v29, %v13920_v58  ;;  %v10898_v40 = vpop.f32.mrb[8].mxu0 }
 0x8fb   :  { %v1956_v28 = vpop.f32.mrb[9].mxu0  ;;  %v1971_v22 = vmax.f32 %v1965_v16, 0.0  ;;  %v16348_v16 = vld [vmem:[#allocation38_spill] sm:$0xff] }
 0x8fc   :  { %v1972_v13 = vmax.f32 %v1966_v18, 0.0  ;;  %v1967_v62 = vadd.f32 %v1956_v28, %v16345_v33  ;;  %v16351_v28 = vld [vmem:[#allocation41_spill] sm:$0xff] }
 0x8fd   :  { %v1885_v1 = vpop.f32.mrb[20].mxu1 }
 0x8fe   :  { %v1968_v38 = vadd.f32 %v1885_v1, %v13916_v35  ;;  %v1887_v39 = vpop.f32.mrb[21].mxu1  ;;  %2047 = vmatprep.mubr.f32.mxu0 %v1972_v13  ;;  %2201 = vmatprep.mubr.f32.mxu1 %v1972_v13  ;;  %v1973_v1 = vmax.f32 %v1967_v62, 0.0  ;;  %v16349_v13 = vld [vmem:[#allocation39_spill] sm:$0xff] }
 0x8ff   :  { %v1969_v56 = vadd.f32 %v1887_v39, %v13920_v58  ;;  %2048 = vmatmul.mubr.f32.vlgmr.msra.gmra.mrb[10].mxu0 %v1971_v22  ;;  %2202 = vmatmul.mubr.f32.vlgmr.msra.gmra.mrb[22].mxu1 %v1971_v22  ;;  %v16350_v39 = vld [vmem:[#allocation40_spill] sm:$0xff]  ;;  %v16353_v62 = vld [vmem:[#allocation43_spill] sm:$0xff] }
 0x900   :  { %11798 = vmatpush1.bf16.msra.mxu0 %v16346_v19  ;;  %11846 = vmatpush3.bf16.msra.mxu1 %v13905_v37  ;;  %v1974_v18 = vmax.f32 %v1968_v38, 0.0  ;;  %v1970_v38 = vadd.f32 %v10898_v40, %v16345_v33  ;;  %v16354_v22 = vld [vmem:[#allocation44_spill] sm:$0xff]  ;;  %v16359_v40 = vld [vmem:[#allocation49_spill] sm:$0xff]  ;;  %v16377_v19 = vld [vmem:[#allocation67_spill] sm:$0xff] }
 0x901   :  { %v1975_v29 = vmax.f32 %v1969_v56, 0.0  ;;  %11800 = vmatprep.subr.bf16.mxu0 %v16347_v14  ;;  %11848 = vmatprep.subr.bf16.mxu1 %v16348_v16  ;;  %v16352_v56 = vld [vmem:[#allocation42_spill] sm:$0xff]  ;;  %v16378_v37 = vld [vmem:[#allocation68_spill] sm:$0xff] }
 0x903   :  { %2053 = vmatprep.mubr.f32.mxu0 %v1975_v29  ;;  %2206 = vmatprep.mubr.f32.mxu1 %v1975_v29  ;;  %v16355_v29 = vld [vmem:[#allocation45_spill] sm:$0xff] }
 0x904   :  { %2054 = vmatmul.mubr.f32.gmra.mrb[12].mxu0 %v1974_v18  ;;  %2207 = vmatmul.mubr.f32.gmra.mrb[24].mxu1 %v1974_v18  ;;  %v1976_v18 = vmax.f32 %v1970_v38, 0.0  ;;  %v16360_v38 = vld [vmem:[#allocation50_spill] sm:$0xff] }
 0x905   :  { %11802 = vmatpush1.bf16.msra.mxu0 %v16349_v13  ;;  %11850 = vmatpush3.bf16.msra.mxu1 %v16348_v16  ;;  %v16357_v13 = vld [vmem:[#allocation47_spill] sm:$0xff] }
 0x906   :  { %10915 = vmatprep.mubr.msk.f32.mxu1 %vm792_vm2, %v1973_v1  ;;  %11804 = vmatprep.subr.bf16.mxu0 %v16350_v39  ;;  %v16356_v39 = vld [vmem:[#allocation46_spill] sm:$0xff] }
 0x907   :  { %11852 = vmatprep.subr.bf16.mxu1 %v16351_v28  ;;  %2124 = vmatprep.mubr.f32.mxu0 %v16292_v53 }
 0x909   :  { %11806 = vmatpush1.bf16.msra.mxu0 %v16352_v56  ;;  %11854 = vmatpush3.bf16.msra.mxu1 %v16351_v28  ;;  %v16358_v56 = vld [vmem:[#allocation48_spill] sm:$0xff] }
 0x90a   :  { %11808 = vmatprep.subr.bf16.mxu0 %v16353_v62  ;;  %11856 = vmatprep.subr.bf16.mxu1 %v16354_v22 }
 0x90d   :  { %11810 = vmatpush1.bf16.msra.mxu0 %v16355_v29  ;;  %11858 = vmatpush3.bf16.msra.mxu1 %v16354_v22  ;;  %v16365_v29 = vld [vmem:[#allocation55_spill] sm:$0xff]  ;;  %v16367_v22 = vld [vmem:[#allocation57_spill] sm:$0xff] }
 0x90e   :  { %11860 = vmatprep.subr.bf16.mxu0 %v16356_v39  ;;  %11880 = vmatprep.subr.bf16.mxu1 %v16357_v13  ;;  %v16361_v39 = vld [vmem:[#allocation51_spill] sm:$0xff] }
 0x910   :  { %9833 = vmatmul.mubr.msk.f32.vlgmr.msra.gmra.mrb[10].mxu0 %vm792_vm2, %v1973_v1  ;;  %10916 = vmatmul.mubr.msk.f32.vlgmr.msra.gmra.mrb[26].mxu1 %vm792_vm2, %v1976_v18  ;;  %v16362_v1 = vld [vmem:[#allocation52_spill] sm:$0xff] }
 0x911   :  { %11862 = vmatpush1.bf16.msra.mxu0 %v16358_v56  ;;  %11882 = vmatpush3.bf16.msra.mxu1 %v16357_v13  ;;  %v16363_v56 = vld [vmem:[#allocation53_spill] sm:$0xff]  ;;  %v16364_v13 = vld [vmem:[#allocation54_spill] sm:$0xff] }
 0x912   :  { %10938 = vmatprep.mubr.msk.f32.mxu1 %vm1103_vm3, %v14230_v51  ;;  %2130 = vmatprep.mubr.f32.mxu0 %v16292_v53 }
 0x913   :  { %11864 = vmatprep.subr.bf16.mxu0 %v16359_v40  ;;  %11884 = vmatprep.subr.bf16.mxu1 %v16360_v38  ;;  %v16366_v40 = vld [vmem:[#allocation56_spill] sm:$0xff] }
 0x914   :  { %9834 = vmatmul.mubr.msk.f32.gmra.mrb[12].mxu0 %vm792_vm2, %v1976_v18  ;;  %v16368_v18 = vld [vmem:[#allocation58_spill] sm:$0xff] }
 0x915   :  { %11866 = vmatpush1.bf16.msra.mxu0 %v16361_v39  ;;  %11886 = vmatpush3.bf16.msra.mxu1 %v16360_v38  ;;  %v16369_v39 = vld [vmem:[#allocation59_spill] sm:$0xff]  ;;  %v16371_v38 = vld [vmem:[#allocation61_spill] sm:$0xff] }
 0x916   :  { %11868 = vmatprep.subr.bf16.mxu0 %v16362_v1  ;;  %11888 = vmatprep.subr.bf16.mxu1 %v16363_v56  ;;  %v16370_v1 = vld [vmem:[#allocation60_spill] sm:$0xff] }
 0x917   :  { %2351 = vmatprep.mubr.f32.mxu0 %v16292_v53 }
 0x919   :  { %11870 = vmatpush1.bf16.msra.mxu0 %v16364_v13  ;;  %11890 = vmatpush3.bf16.msra.mxu1 %v16363_v56 }
 0x91a   :  { %11872 = vmatprep.subr.bf16.mxu0 %v16365_v29  ;;  %11892 = vmatprep.subr.bf16.mxu1 %v16366_v40  ;;  %v16376_v29 = vld [vmem:[#allocation66_spill] sm:$0xff] }
 0x91d   :  { %11874 = vmatpush1.bf16.msra.mxu0 %v16367_v22  ;;  %11894 = vmatpush3.bf16.msra.mxu1 %v16366_v40 }
 0x91e   :  { %11876 = vmatprep.subr.bf16.mxu0 %v16368_v18  ;;  %11896 = vmatprep.subr.bf16.mxu1 %v16369_v39  ;;  %v16372_v18 = vld [vmem:[#allocation62_spill] sm:$0xff] }
 0x921   :  { %11878 = vmatpush1.bf16.msra.mxu0 %v16370_v1  ;;  %11898 = vmatpush3.bf16.msra.mxu1 %v16369_v39  ;;  %v16375_v1 = vld [vmem:[#allocation65_spill] sm:$0xff] }
 0x922   :  { %11900 = vmatprep.subr.bf16.mxu1 %v16371_v38  ;;  %9858 = vmatprep.subr.msk.mxu0 %vm307_vm0, %v13711_v34  ;;  %v16373_v34 = vld [vmem:[#allocation63_spill] sm:$0xff] }
 0x924   :  { %9837 = vmatmul.mubr.msk.f32.vlgmr.msra.gmra.mrb[10].mxu0 %vm1103_vm3, %v14230_v51  ;;  %10939 = vmatmul.mubr.msk.f32.vlgmr.msra.gmra.mrb[28].mxu1 %vm1103_vm3, %v14235_v55 }
 0x925   :  { %2357 = vmatprep.mubr.f32.mxu0 %v16292_v53  ;;  %11902 = vmatpush3.bf16.msra.mxu1 %v16371_v38  ;;  %v16374_v38 = vld [vmem:[#allocation64_spill] sm:$0xff] }
 0x926   :  { %11904 = vmatprep.subr.bf16.mxu1 %v16372_v18  ;;  %9859 = vmatpush1.msk.msra.mxu0 %vm307_vm0, %v13707_v32 }
 0x927   :  { %9865 = vmatprep.subr.msk.mxu0 %vm307_vm0, %v13737_v46 }
 0x928   :  { %9838 = vmatmul.mubr.msk.f32.gmra.mrb[12].mxu0 %vm1103_vm3, %v14235_v55 }
 0x929   :  { %11906 = vmatpush3.bf16.msra.mxu1 %v16372_v18  ;;  %2897 = vmatprep.mubr.f32.mxu0 %v16292_v53 }
 0x92a   :  { %11908 = vmatprep.subr.bf16.mxu1 %v16373_v34 }
 0x92d   :  { %11910 = vmatpush3.bf16.msra.mxu1 %v16373_v34 }
 0x92e   :  { %11912 = vmatprep.subr.bf16.mxu1 %v16374_v38 }
 0x931   :  { %11914 = vmatpush3.bf16.msra.mxu1 %v16374_v38 }
 0x932   :  { %11916 = vmatprep.subr.bf16.mxu1 %v16375_v1 }
 0x935   :  { %11918 = vmatpush3.bf16.msra.mxu1 %v16375_v1 }
 0x936   :  { %11920 = vmatprep.subr.bf16.mxu1 %v14198_v9 }
 0x9d2   :  { %v10216_v46 = vpop.f32.mrb[22].mxu1 }
 0x9d3   :  { %v10217_v32 = vpop.f32.mrb[23].mxu1 }
 0x9d4   :  { %v10218_v39 = vadd.f32 %v10217_v32, %v10216_v46 }
 0x9d6   :  { %v2204_v34 = vadd.f32 %v10218_v39, %v16376_v29 }
 0x9d7   :  { %v10219_v18 = vpop.f32.mrb[24].mxu1 }
 0x9d8   :  { %v10220_v22 = vpop.f32.mrb[25].mxu1 }
 0x9d9   :  { %v10221_v40 = vadd.f32 %v10220_v22, %v10219_v18 }
 0x9db   :  { %v2209_v13 = vadd.f32 %v10221_v40, %v16376_v29 }
 0x9e3   :  { %v10917_v56 = vpop.f32.mrb[26].mxu1 }
 0x9e4   :  { %v2284_v62 = vadd.f32 %v10917_v56, %v2209_v13  ;;  %v2278_v28 = vpop.f32.mrb[27].mxu1 }
 0x9e5   :  { %v2279_v38 = vadd.f32 %v2278_v28, %v2204_v34 }
 0x9f7   :  { %v2353_v16 = vpop.f32.mrb[10].mxu0  ;;  %v10940_v14 = vpop.f32.mrb[28].mxu1 }
 0x9f8   :  { %v13107_v1 = vadd.f32 %v2353_v16, %v16377_v19  ;;  %v2355_v33 = vpop.f32.mrb[11].mxu0  ;;  %v2430_v58 = vpop.f32.mrb[29].mxu1 }
 0x9f9   :  { %v13108_v32 = vadd.f32 %v2355_v33, %v16378_v37 }
 0x9fa   :  { %v9841_v35 = vmul.f32 -1.442695, %v13107_v1 }
 0x9fb   :  { %v2359_v46 = vpop.f32.mrb[12].mxu0  ;;  %v9843_v13 = vmul.f32 -1.442695, %v13108_v32  ;;  %v2468_v32 = vadd.f32 %v10940_v14, %v14225_v50 }
 0x9fc   :  { %13313 = vpow2.f32 %v9841_v35  ;;  %v13109_v22 = vadd.f32 %v2359_v46, %v16377_v19  ;;  %v2361_v40 = vpop.f32.mrb[13].mxu0  ;;  %v2467_v46 = vadd.f32 %v14225_v50, %v2430_v58 }
 0x9fd   :  { %v13110_v39 = vadd.f32 %v2361_v40, %v16378_v37 }
 0x9fe   :  { %v9842_v18 = vmul.f32 -1.442695, %v13109_v22 }
 0x9ff   :  { %v9844_v34 = vmul.f32 -1.442695, %v13110_v39 }
 0xa00   :  { %13315 = vpow2.f32 %v9842_v18 }
 0xa01   :  { %13317 = vpow2.f32 %v9843_v13 }
 0xa02   :  { %13319 = vpow2.f32 %v9844_v34 }
 0xa06   :  { %v13314_v28 = vpop.eup %13313 }
 0xa07   :  { %v2447_v16 = vadd.f32 1.0, %v13314_v28 }
 0xa09   :  { %13321 = vrcp.f32 %v2447_v16 }
 0xa0a   :  { %v13316_v56 = vpop.eup %13315 }
 0xa0b   :  { %v2448_v1 = vadd.f32 1.0, %v13316_v56  ;;  %v13318_v29 = vpop.eup %13317 }
 0xa0c   :  { %v13320_v33 = vpop.eup %13319  ;;  %v2461_v35 = vadd.f32 1.0, %v13318_v29 }
 0xa0d   :  { %13323 = vrcp.f32 %v2448_v1  ;;  %v2462_v22 = vadd.f32 1.0, %v13320_v33 }
 0xa0e   :  { %13325 = vrcp.f32 %v2461_v35 }
 0xa0f   :  { %13327 = vrcp.f32 %v2462_v22  ;;  %v16379_v22 = vld [vmem:[#allocation7_spill] sm:$0xff] }
 0xa13   :  { %v13322_v19 = vpop.eup %13321 }
 0xa14   :  { %v2469_v40 = vmul.f32 %v13322_v19, %v2467_v46 }
 0xa16   :  { %v2471_v18 = vadd.f32 %v2469_v40, %v2279_v38 }
 0xa17   :  { %v13324_v39 = vpop.eup %13323 }
 0xa18   :  { %13329 = vtanh.f32 %v2471_v18  ;;  %v2470_v13 = vmul.f32 %v13324_v39, %v2468_v32  ;;  %v13326_v28 = vpop.eup %13325  ;;  %v2659_v18 = vpop.permute.xlu1 %2658 }
 0xa19   :  { %v13328_v16 = vpop.eup %13327  ;;  %v2475_v56 = vsub.f32 1.0, %v13326_v28  ;;  %v2479_v58 = vmul.f32 %v13326_v28, %v14230_v51 }
 0xa1a   :  { %v2472_v34 = vadd.f32 %v2470_v13, %v2284_v62  ;;  %v2476_v37 = vsub.f32 1.0, %v13328_v16  ;;  %v2480_v14 = vmul.f32 %v13328_v16, %v14235_v55  ;;  %v2663_v13 = vpop.permute.xlu0 %2662 }
 0xa1c   :  { %13331 = vtanh.f32 %v2472_v34  ;;  %v2649_v28 = vpop.permute.xlu1 %2648 }
 0xa22   :  { %v13330_v1 = vpop.eup %13329 }
 0xa23   :  { %v2477_v29 = vmul.f32 %v13330_v1, %v2475_v56  ;;  %v2653_v1 = vpop.permute.xlu0 %2652 }
 0xa25   :  { %v14490_v33 = vadd.f32 %v2479_v58, %v2477_v29 }
 0xa26   :  { %v13332_v19 = vpop.eup %13331 }
 0xa27   :  { %10961 = vmatprep.mubr.msk.f32.mxu1 %vm1103_vm3, %v14490_v33  ;;  %v2478_v50 = vmul.f32 %v13332_v19, %v2476_v37 }
 0xa29   :  { %v14495_v38 = vadd.f32 %v2480_v14, %v2478_v50  ;;  %v16380_v50 = vld [vmem:[#allocation70_spill] sm:$0xff] }
 0xa2b   :  { %10962 = vmatmul.mubr.msk.f32.vlgmr.msra.gmra.mrb[30].mxu1 %vm1103_vm3, %v14495_v38 }
 0xa2c   :  { %11922 = vmatpush3.bf16.msra.mxu1 %v14198_v9 }
 0xa2d   :  { %11924 = vmatprep.subr.bf16.mxu1 %v14246_v57 }
 0xa30   :  { %11926 = vmatpush3.bf16.msra.mxu1 %v14246_v57 }
 0xa31   :  { %10972 = vmatprep.subr.mxu1 %v14253_v30 }
 0xa34   :  { %10973 = vmatpush3.msra.mxu1 %v14253_v30 }
 0xa35   :  { %10977 = vmatprep.subr.msk.mxu1 %vm307_vm0, %v14260_v43 }
 0xafe   :  { %v10963_v37 = vpop.f32.mrb[30].mxu1 }
 0xaff   :  { %v2561_v51 = vadd.f32 %v10963_v37, %v14267_v15  ;;  %v2555_v55 = vpop.f32.mrb[31].mxu1 }
 0xb00   :  { %v2556_v62 = vadd.f32 %v14267_v15, %v2555_v55  ;;  %v16381_v55 = vld [vmem:[#allocation69_spill] sm:$0xff] }
 0xb01   :  { %v2565_v46 = vmax.f32 %v2561_v51, 0.0 }
 0xb02   :  { %v2564_v35 = vmax.f32 %v2556_v62, 0.0 }
 0xb04   :  { %10974 = vmatprep.mubr.msk.f32.mxu1 %vm1389_vm4, %v2564_v35 }
 0xb05   :  { %10975 = vmatmul.mubr.msk.f32.vlgmr.msra.gmra.mrb[32].mxu1 %vm1389_vm4, %v2565_v46 }
 0xb06   :  { %10978 = vmatpush3.msk.msra.mxu1 %vm307_vm0, %v14260_v43 }
 0xb07   :  { %10982 = vmatprep.subr.msk.mxu1 %vm307_vm0, %v16379_v22 }
 0xbd8   :  { %v10976_v30 = vpop.f32.mrb[32].mxu1 }
 0xbd9   :  { %v2638_v40 = vpop.f32.mrb[33].mxu1  ;;  %v2644_v39 = vadd.f32 %v10976_v30, %v14280_v24 }
 0xbda   :  { %v2639_v32 = vadd.f32 %v14280_v24, %v2638_v40 }
 0xbdb   :  { %v2666_v34 = vmul.f32 %v2663_v13, %v2644_v39  ;;  %v2656_v29 = vmul.f32 %v2653_v1, %v2644_v39  ;;  %v9853_v1 = vld [vmem:[%s16251_s20 + $0x20] sm:$0xff] }
 0xbdc   :  { %v2665_v15 = vmul.f32 %v2659_v18, %v2639_v32  ;;  %v2655_v16 = vmul.f32 %v2649_v28, %v2639_v32 }
 0xbde   :  { %2669 = vrot.lane.b32.xlu1 %v2665_v15, %s13548_s30 }
 0xbe2   :  { %2671 = vrot.lane.b32.xlu1 %v2666_v34, %s13548_s30 }
 0xc50   :  { %v2670_v43 = vpop.permute.xlu1 %2669 }
 0xc51   :  { %v2675_v56 = vadd.f32 %v2670_v43, %v2655_v16 }
 0xc53   :  { %2679 = vrot.lane.b32.xlu0 %v2675_v56, %s13549_s18  ;;  %v9854_v56 = vld [vmem:[%s16251_s20 + $0x28] sm:$0xff] }
 0xc54   :  { %v2672_v58 = vpop.permute.xlu1 %2671 }
 0xc55   :  { %v2676_v19 = vadd.f32 %v2672_v58, %v2656_v29 }
 0xc57   :  { %2681 = vrot.lane.b32.xlu1 %v2676_v19, %s13549_s18 }
 0xcc5   :  { %v2680_v24 = vpop.permute.xlu0 %2679 }
 0xcc6   :  { %v2685_v14 = vadd.f32 %v2680_v24, %v16380_v50 }
 0xcc8   :  { %v2783_v37 = vsub.f32 %v2685_v14, %v16380_v50  ;;  %2689 = vrot.lane.b32.xlu0 %v2685_v14, %s13548_s30 }
 0xcc9   :  { %v2682_v51 = vpop.permute.xlu1 %2681 }
 0xcca   :  { %v2686_v62 = vadd.f32 %v16381_v55, %v2682_v51  ;;  %v2785_v35 = vmul.f32 %v2783_v37, %v2783_v37 }
 0xccc   :  { %v2784_v46 = vsub.f32 %v2686_v62, %v16381_v55  ;;  %2789 = vrot.lane.b32.xlu0 %v2785_v35, %s13548_s30  ;;  %2691 = vrot.lane.b32.xlu1 %v2686_v62, %s13548_s30 }
 0xcce   :  { %v2786_v30 = vmul.f32 %v2784_v46, %v2784_v46 }
 0xcd0   :  { %2791 = vrot.lane.b32.xlu1 %v2786_v30, %s13548_s30 }
 0xd3a   :  { %v2690_v40 = vpop.permute.xlu0 %2689 }
 0xd3b   :  { %9849 = vst.msk [vmem:[%s15980_s16 + $0x10] sm:$0xff] %vm300_vm1, %v2690_v40  ;;  %10979 = vmatprep.mubr.msk.f32.mxu1 %vm300_vm1, %v2690_v40 }
 0xd3e   :  { %v2790_v32 = vpop.permute.xlu0 %2789  ;;  %v2692_v18 = vpop.permute.xlu1 %2691 }
 0xd3f   :  { %9850 = vst.msk [vmem:[%s15980_s16 + $0x18] sm:$0xff] %vm300_vm1, %v2692_v18  ;;  %10980 = vmatmul.mubr.msk.f32.vlgmr.msra.gmra.mrb[34].mxu1 %vm300_vm1, %v2692_v18  ;;  %v2795_v39 = vsel %vm300_vm1, %v2790_v32, 0.0 }
 0xd40   :  { %2796 = vadd.xlane.f32.xlu0 %v2795_v39  ;;  %10983 = vmatpush3.msk.msra.mxu1 %vm307_vm0, %v16379_v22 }
 0xd41   :  { %10987 = vmatprep.subr.msk.mxu1 %vm307_vm0, %v13733_v45 }
 0xd42   :  { %v2792_v15 = vpop.permute.xlu1 %2791 }
 0xd43   :  { %v2798_v13 = vsel %vm300_vm1, %v2792_v15, 0.0 }
 0xd44   :  { %2799 = vadd.xlane.f32.xlu1 %v2798_v13 }
 0xdcd   :  { %v2797_v34 = vpop.xlane.xlu0 %2796 }
 0xdce   :  { %v2801_v28 = vmax.f32 %v2797_v34, 1e-24 }
 0xdd0   :  { %13333 = vrsqrt.f32 %v2801_v28 }
 0xdd1   :  { %v2800_v55 = vpop.xlane.xlu1 %2799 }
 0xdd2   :  { %v2802_v62 = vmax.f32 %v2800_v55, 1e-24  ;;  %v16391_v55 = vld [vmem:[#allocation18_spill] sm:$0xff] }
 0xdd4   :  { %13335 = vrsqrt.f32 %v2802_v62  ;;  %v16392_v62 = vld [vmem:[#allocation19_spill] sm:$0xff] }
 0xdda   :  { %v13334_v16 = vpop.eup %13333 }
 0xddb   :  { %v2805_v43 = vmul.f32 %v13334_v16, %v2783_v37 }
 0xddd   :  { %2825 = vrot.lane.b32.xlu1 %v2805_v43, %s13548_s30  ;;  %v16382_v43 = vld [vmem:[#allocation28_spill] sm:$0xff] }
 0xdde   :  { %v13336_v35 = vpop.eup %13335 }
 0xddf   :  { %v2806_v30 = vmul.f32 %v13336_v35, %v2784_v46  ;;  %v16393_v35 = vld [vmem:[#allocation20_spill] sm:$0xff] }
 0xe12   :  { %v14551_v29 = vpop.f32.mrb[34].mxu1 }
 0xe13   :  { %9891 = vst.msk [vmem:[%s15981_s17 + $0x28] sm:$0xff] %vm300_vm1, %v14551_v29  ;;  %v14558_v58 = vpop.f32.mrb[35].mxu1  ;;  %v2808_v19 = vsub.f32 %v9854_v56, %v14551_v29  ;;  %v16383_v56 = vld [vmem:[#allocation11_spill] sm:$0xff] }
 0xe14   :  { %9890 = vst.msk [vmem:[%s15981_s17 + $0x20] sm:$0xff] %vm300_vm1, %v14558_v58  ;;  %v2807_v24 = vsub.f32 %v9853_v1, %v14558_v58  ;;  %v16384_v1 = vld [vmem:[#allocation30_spill] sm:$0xff] }
 0xe15   :  { %v2810_v50 = vmul.f32 %v2808_v19, %v2808_v19 }
 0xe16   :  { %v2809_v37 = vmul.f32 %v2807_v24, %v2807_v24 }
 0xe17   :  { %v2814_v14 = vsel %vm300_vm1, %v2810_v50, 0.0  ;;  %v16387_v50 = vld [vmem:[#allocation13_spill] sm:$0xff] }
 0xe18   :  { %2815 = vadd.xlane.f32.xlu0 %v2814_v14  ;;  %v2811_v51 = vsel %vm300_vm1, %v2809_v37, 0.0  ;;  %v16388_v14 = vld [vmem:[#allocation14_spill] sm:$0xff]  ;;  %v16389_v37 = vld [vmem:[#allocation15_spill] sm:$0xff] }
 0xe1c   :  { %2812 = vadd.xlane.f32.xlu0 %v2811_v51  ;;  %v16390_v51 = vld [vmem:[#allocation17_spill] sm:$0xff] }
 0xe32   :  { %2827 = vrot.lane.b32.xlu0 %v2806_v30, %s13548_s30  ;;  %v16394_v30 = vld [vmem:[#allocation21_spill] sm:$0xff] }
 0xe4f   :  { %v2826_v40 = vpop.permute.xlu1 %2825 }
 0xe50   :  { %9860 = vmatmul.mubr.msk.f32.vlgmr.msra.gmra.mrb[14].mxu0 %vm300_vm1, %v2826_v40  ;;  %10984 = vmatprep.mubr.msk.f32.mxu1 %vm300_vm1, %v2826_v40  ;;  %v16395_v40 = vld [vmem:[#allocation22_spill] sm:$0xff] }
 0xe51   :  { %2903 = vmatprep.mubr.f32.mxu0 %v16292_v53  ;;  %9866 = vmatpush1.msk.msra.mxu0 %vm307_vm0, %v13726_v42 }
 0xe52   :  { %12008 = vmatprep.subr.bf16.mxu0 %v13781_v23 }
 0xea5   :  { %v2816_v32 = vpop.xlane.xlu0 %2815 }
 0xea6   :  { %v2818_v18 = vmax.f32 %v2816_v32, 1e-24  ;;  %v16396_v32 = vld [vmem:[#allocation23_spill] sm:$0xff] }
 0xea8   :  { %13337 = vrsqrt.f32 %v2818_v18  ;;  %v16397_v18 = vld [vmem:[#allocation24_spill] sm:$0xff] }
 0xea9   :  { %v2813_v39 = vpop.xlane.xlu0 %2812 }
 0xeaa   :  { %v2817_v15 = vmax.f32 %v2813_v39, 1e-24  ;;  %v16398_v39 = vld [vmem:[#allocation25_spill] sm:$0xff] }
 0xeac   :  { %13339 = vrsqrt.f32 %v2817_v15  ;;  %v16399_v15 = vld [vmem:[#allocation26_spill] sm:$0xff] }
 0xead   :  { %v2828_v46 = vpop.permute.xlu0 %2827 }
 0xeae   :  { %9861 = vmatmul.mubr.msk.f32.gmra.mrb[16].mxu0 %vm300_vm1, %v2828_v46  ;;  %10985 = vmatmul.mubr.msk.f32.vlgmr.msra.gmra.mrb[36].mxu1 %vm300_vm1, %v2828_v46  ;;  %v16400_v46 = vld [vmem:[#allocation27_spill] sm:$0xff] }
 0xeaf   :  { %3055 = vmatprep.mubr.f32.mxu0 %v16292_v53  ;;  %10988 = vmatpush3.msk.msra.mxu1 %vm307_vm0, %v13733_v45 }
 0xeb0   :  { %11928 = vmatprep.subr.bf16.mxu1 %v13758_v59 }
 0xeb2   :  { %v13338_v13 = vpop.eup %13337 }
 0xeb3   :  { %v2822_v16 = vmul.f32 %v13338_v13, %v2808_v19  ;;  %v16385_v19 = vld [vmem:[#allocation12_spill] sm:$0xff]  ;;  %v16401_v13 = vld [vmem:[#allocation29_spill] sm:$0xff] }
 0xeb6   :  { %v13340_v34 = vpop.eup %13339 }
 0xeb7   :  { %v2821_v28 = vmul.f32 %v13340_v34, %v2807_v24  ;;  %v16386_v24 = vld [vmem:[#allocation32_spill] sm:$0xff]  ;;  %v16402_v34 = vld [vmem:[#allocation31_spill] sm:$0xff] }
 0xeb9   :  { %3836 = vperm.xlu1 %13262, %v2821_v28   ;;  %3826 = vperm.xlu0 %13261, %v2821_v28  }
 0xeba   :  { %9867 = vmatmul.mubr.msk.f32.vlgmr.msra.gmra.mrb[14].mxu0 %vm300_vm1, %v2821_v28  ;;  %10989 = vmatprep.mubr.msk.f32.mxu1 %vm300_vm1, %v2821_v28 }
 0xebb   :  { %10990 = vmatmul.mubr.msk.f32.vlgmr.msra.gmra.mrb[36].mxu1 %vm300_vm1, %v2822_v16  ;;  %3061 = vmatprep.mubr.f32.mxu0 %v16292_v53 }
 0xebc   :  { %11930 = vmatpush1.bf16.msra.mxu1 %v13760_v63  ;;  %12010 = vmatpush3.bf16.msra.mxu0 %v13787_v31 }
 0xebd   :  { %3840 = vperm.xlu1 %13262, %v2822_v16   ;;  %11932 = vmatprep.subr.bf16.mxu1 %v13762_v0 }
 0xebe   :  { %9868 = vmatmul.mubr.msk.f32.gmra.mrb[16].mxu0 %vm300_vm1, %v2822_v16  ;;  %12012 = vmatprep.subr.bf16.mxu0 %v13789_v36 }
 0xec0   :  { %11934 = vmatpush1.bf16.msra.mxu1 %v13766_v5  ;;  %12014 = vmatpush3.bf16.msra.mxu0 %v13795_v47 }
 0xec1   :  { %13263 = vset.pattern.permute.xlu1 %v16322_v44  ;;  %11936 = vmatprep.subr.bf16.mxu1 %v13769_v6 }
 0xec2   :  { %3830 = vperm.xlu1 %13263, %v2822_v16   ;;  %12016 = vmatprep.subr.bf16.mxu0 %v13801_v54  ;;  %v16403_v16 = vld [vmem:[#allocation33_spill] sm:$0xff] }
 0xec4   :  { %11938 = vmatpush1.bf16.msra.mxu1 %v13773_v11  ;;  %12018 = vmatpush3.bf16.msra.mxu0 %v13807_v2 }
 0xec5   :  { %11940 = vmatprep.subr.bf16.mxu1 %v13776_v12  ;;  %12020 = vmatprep.subr.bf16.mxu0 %v13813_v7 }
 0xec6   :  { %13264 = vset.pattern.permute.xlu1 %v16323_v60 }
 0xec8   :  { %11942 = vmatpush1.bf16.msra.mxu1 %v13779_v21  ;;  %12022 = vmatpush3.bf16.msra.mxu0 %v13819_v20 }
 0xec9   :  { %11944 = vmatprep.subr.bf16.mxu1 %v13784_v25  ;;  %12024 = vmatprep.subr.bf16.mxu0 %v13825_v26 }
 0xecc   :  { %11946 = vmatpush1.bf16.msra.mxu1 %v13792_v41  ;;  %12026 = vmatpush3.bf16.msra.mxu0 %v13831_v48 }
 0xecd   :  { %11948 = vmatprep.subr.bf16.mxu1 %v13798_v49  ;;  %12028 = vmatprep.subr.bf16.mxu0 %v13837_v52 }
 0xed0   :  { %11950 = vmatpush1.bf16.msra.mxu1 %v13804_v61  ;;  %12030 = vmatpush3.bf16.msra.mxu0 %v13843_v4 }
 0xed1   :  { %11952 = vmatprep.subr.bf16.mxu1 %v13810_v3  ;;  %12032 = vmatprep.subr.bf16.mxu0 %v13849_v10 }
 0xed4   :  { %11954 = vmatpush1.bf16.msra.mxu1 %v13816_v17  ;;  %12034 = vmatpush3.bf16.msra.mxu0 %v13855_v27 }
 0xed5   :  { %11956 = vmatprep.subr.bf16.mxu1 %v16324_v8  ;;  %12036 = vmatprep.subr.bf16.mxu0 %v16382_v43 }
 0xed8   :  { %11958 = vmatpush1.bf16.msra.mxu1 %v16383_v56  ;;  %12038 = vmatpush3.bf16.msra.mxu0 %v16384_v1  ;;  %v16441_v1 = vld [vmem:[#allocation68_spill] sm:$0xff] }
 0xed9   :  { %11960 = vmatprep.subr.bf16.mxu1 %v16385_v19  ;;  %12040 = vmatprep.subr.bf16.mxu0 %v16386_v24 }
 0xedc   :  { %11962 = vmatpush1.bf16.msra.mxu1 %v16387_v50 }
 0xedd   :  { %11964 = vmatprep.subr.bf16.mxu1 %v16388_v14  ;;  %v16406_v14 = vld [vmem:[#allocation36_spill] sm:$0xff] }
 0xee0   :  { %11966 = vmatpush1.bf16.msra.mxu1 %v16389_v37 }
 0xee1   :  { %11968 = vmatprep.subr.bf16.mxu1 %v16390_v51 }
 0xee4   :  { %11970 = vmatpush1.bf16.msra.mxu1 %v16391_v55 }
 0xee5   :  { %11972 = vmatprep.subr.bf16.mxu1 %v16392_v62 }
 0xee8   :  { %11974 = vmatpush1.bf16.msra.mxu1 %v16393_v35 }
 0xee9   :  { %11976 = vmatprep.subr.bf16.mxu1 %v16394_v30 }
 0xeec   :  { %11978 = vmatpush1.bf16.msra.mxu1 %v16395_v40  ;;  %v16404_v40 = vld [vmem:[#allocation34_spill] sm:$0xff] }
 0xeed   :  { %11980 = vmatprep.subr.bf16.mxu1 %v16396_v32 }
 0xef0   :  { %11982 = vmatpush1.bf16.msra.mxu1 %v16397_v18 }
 0xef1   :  { %11984 = vmatprep.subr.bf16.mxu1 %v16398_v39 }
 0xef4   :  { %11986 = vmatpush1.bf16.msra.mxu1 %v16399_v15 }
 0xef5   :  { %11988 = vmatprep.subr.bf16.mxu1 %v16400_v46 }
 0xef8   :  { %11990 = vmatpush1.bf16.msra.mxu1 %v16401_v13  ;;  %v16405_v13 = vld [vmem:[#allocation35_spill] sm:$0xff] }
 0xef9   :  { %11992 = vmatprep.subr.bf16.mxu1 %v16402_v34 }
 0xf8d   :  { %v3057_v28 = vpop.f32.mrb[14].mxu0 }
 0xf8e   :  { %v3143_v35 = vadd.f32 %v3057_v28, %v16403_v16  ;;  %v3059_v30 = vpop.f32.mrb[15].mxu0  ;;  %v10991_v62 = vpop.f32.mrb[36].mxu1 }
 0xf8f   :  { %v3144_v55 = vadd.f32 %v3059_v30, %v16404_v40  ;;  %v3134_v32 = vpop.f32.mrb[37].mxu1 }
 0xf90   :  { %v3149_v37 = vmax.f32 %v3143_v35, 0.0  ;;  %v3145_v34 = vadd.f32 %v3134_v32, %v16405_v13  ;;  %v16408_v35 = vld [vmem:[#allocation38_spill] sm:$0xff]  ;;  %v16411_v32 = vld [vmem:[#allocation41_spill] sm:$0xff] }
 0xf91   :  { %v3150_v51 = vmax.f32 %v3144_v55, 0.0  ;;  %v3063_v18 = vpop.f32.mrb[16].mxu0  ;;  %v16407_v55 = vld [vmem:[#allocation37_spill] sm:$0xff] }
 0xf92   :  { %v3146_v39 = vadd.f32 %v3063_v18, %v16403_v16  ;;  %v3065_v15 = vpop.f32.mrb[17].mxu0  ;;  %v3151_v18 = vmax.f32 %v3145_v34, 0.0  ;;  %v16414_v34 = vld [vmem:[#allocation44_spill] sm:$0xff]  ;;  %v16440_v16 = vld [vmem:[#allocation67_spill] sm:$0xff] }
 0xf93   :  { %v3147_v46 = vadd.f32 %v3065_v15, %v16404_v40  ;;  %3225 = vmatprep.mubr.f32.mxu1 %v3150_v51  ;;  %3379 = vmatprep.mubr.f32.mxu0 %v3150_v51  ;;  %v16409_v51 = vld [vmem:[#allocation39_spill] sm:$0xff]  ;;  %v3148_v15 = vadd.f32 %v10991_v62, %v16405_v13  ;;  %v16419_v62 = vld [vmem:[#allocation49_spill] sm:$0xff] }
 0xf94   :  { %3226 = vmatmul.mubr.f32.vlgmr.msra.gmra.mrb[38].mxu1 %v3149_v37  ;;  %3380 = vmatmul.mubr.f32.vlgmr.msra.gmra.mrb[18].mxu0 %v3149_v37  ;;  %v3152_v30 = vmax.f32 %v3146_v39, 0.0  ;;  %v16410_v37 = vld [vmem:[#allocation40_spill] sm:$0xff]  ;;  %v16412_v39 = vld [vmem:[#allocation42_spill] sm:$0xff] }
 0xf95   :  { %v3153_v28 = vmax.f32 %v3147_v46, 0.0  ;;  %11994 = vmatpush1.bf16.msra.mxu1 %v16406_v14  ;;  %12042 = vmatpush3.bf16.msra.mxu0 %v16386_v24  ;;  %v16413_v46 = vld [vmem:[#allocation43_spill] sm:$0xff] }
 0xf96   :  { %11996 = vmatprep.subr.bf16.mxu1 %v16407_v55  ;;  %12044 = vmatprep.subr.bf16.mxu0 %v16408_v35 }
 0xf97   :  { %3231 = vmatprep.mubr.f32.mxu1 %v3153_v28  ;;  %3384 = vmatprep.mubr.f32.mxu0 %v3153_v28  ;;  %v16415_v28 = vld [vmem:[#allocation45_spill] sm:$0xff] }
 0xf98   :  { %3232 = vmatmul.mubr.f32.gmra.mrb[40].mxu1 %v3152_v30  ;;  %3385 = vmatmul.mubr.f32.gmra.mrb[20].mxu0 %v3152_v30  ;;  %v3154_v30 = vmax.f32 %v3148_v15, 0.0  ;;  %v16420_v15 = vld [vmem:[#allocation50_spill] sm:$0xff] }
 0xf99   :  { %11998 = vmatpush1.bf16.msra.mxu1 %v16409_v51  ;;  %12046 = vmatpush3.bf16.msra.mxu0 %v16408_v35  ;;  %v16417_v51 = vld [vmem:[#allocation47_spill] sm:$0xff] }
 0xf9a   :  { %11008 = vmatprep.mubr.msk.f32.mxu0 %vm792_vm2, %v3151_v18  ;;  %12000 = vmatprep.subr.bf16.mxu1 %v16410_v37  ;;  %v16416_v37 = vld [vmem:[#allocation46_spill] sm:$0xff] }
 0xf9b   :  { %12048 = vmatprep.subr.bf16.mxu0 %v16411_v32  ;;  %3302 = vmatprep.mubr.f32.mxu1 %v16292_v53 }
 0xf9d   :  { %12002 = vmatpush1.bf16.msra.mxu1 %v16412_v39  ;;  %12050 = vmatpush3.bf16.msra.mxu0 %v16411_v32  ;;  %v16418_v39 = vld [vmem:[#allocation48_spill] sm:$0xff] }
 0xf9e   :  { %12004 = vmatprep.subr.bf16.mxu1 %v16413_v46  ;;  %12052 = vmatprep.subr.bf16.mxu0 %v16414_v34  ;;  %v16439_v46 = vld [vmem:[#allocation66_spill] sm:$0xff] }
 0xfa1   :  { %12006 = vmatpush1.bf16.msra.mxu1 %v16415_v28  ;;  %12054 = vmatpush3.bf16.msra.mxu0 %v16414_v34  ;;  %v16425_v28 = vld [vmem:[#allocation55_spill] sm:$0xff]  ;;  %v16427_v34 = vld [vmem:[#allocation57_spill] sm:$0xff] }
 0xfa2   :  { %12056 = vmatprep.subr.bf16.mxu1 %v16416_v37  ;;  %12076 = vmatprep.subr.bf16.mxu0 %v16417_v51  ;;  %v16421_v37 = vld [vmem:[#allocation51_spill] sm:$0xff] }
 0xfa4   :  { %9872 = vmatmul.mubr.msk.f32.vlgmr.msra.gmra.mrb[38].mxu1 %vm792_vm2, %v3151_v18  ;;  %11009 = vmatmul.mubr.msk.f32.vlgmr.msra.gmra.mrb[22].mxu0 %vm792_vm2, %v3154_v30  ;;  %v16422_v18 = vld [vmem:[#allocation52_spill] sm:$0xff] }
 0xfa5   :  { %12058 = vmatpush1.bf16.msra.mxu1 %v16418_v39  ;;  %12078 = vmatpush3.bf16.msra.mxu0 %v16417_v51  ;;  %v16423_v39 = vld [vmem:[#allocation53_spill] sm:$0xff]  ;;  %v16424_v51 = vld [vmem:[#allocation54_spill] sm:$0xff] }
 0xfa6   :  { %11031 = vmatprep.mubr.msk.f32.mxu0 %vm1103_vm3, %v14490_v33  ;;  %3308 = vmatprep.mubr.f32.mxu1 %v16292_v53 }
 0xfa7   :  { %12060 = vmatprep.subr.bf16.mxu1 %v16419_v62  ;;  %12080 = vmatprep.subr.bf16.mxu0 %v16420_v15  ;;  %v16426_v62 = vld [vmem:[#allocation56_spill] sm:$0xff] }
 0xfa8   :  { %9873 = vmatmul.mubr.msk.f32.gmra.mrb[40].mxu1 %vm792_vm2, %v3154_v30  ;;  %v16428_v30 = vld [vmem:[#allocation58_spill] sm:$0xff] }
 0xfa9   :  { %12062 = vmatpush1.bf16.msra.mxu1 %v16421_v37  ;;  %12082 = vmatpush3.bf16.msra.mxu0 %v16420_v15  ;;  %v16429_v37 = vld [vmem:[#allocation59_spill] sm:$0xff]  ;;  %v16431_v15 = vld [vmem:[#allocation61_spill] sm:$0xff] }
 0xfaa   :  { %12064 = vmatprep.subr.bf16.mxu1 %v16422_v18  ;;  %12084 = vmatprep.subr.bf16.mxu0 %v16423_v39  ;;  %v16430_v18 = vld [vmem:[#allocation60_spill] sm:$0xff] }
 0xfab   :  { %3529 = vmatprep.mubr.f32.mxu1 %v16292_v53 }
 0xfad   :  { %12066 = vmatpush1.bf16.msra.mxu1 %v16424_v51  ;;  %12086 = vmatpush3.bf16.msra.mxu0 %v16423_v39  ;;  %v16432_v51 = vld [vmem:[#allocation6_spill] sm:$0xff] }
 0xfae   :  { %12068 = vmatprep.subr.bf16.mxu1 %v16425_v28  ;;  %12088 = vmatprep.subr.bf16.mxu0 %v16426_v62 }
 0xfb1   :  { %12070 = vmatpush1.bf16.msra.mxu1 %v16427_v34  ;;  %12090 = vmatpush3.bf16.msra.mxu0 %v16426_v62  ;;  %v16438_v34 = vld [vmem:[#allocation65_spill] sm:$0xff] }
 0xfb2   :  { %12072 = vmatprep.subr.bf16.mxu1 %v16428_v30  ;;  %12092 = vmatprep.subr.bf16.mxu0 %v16429_v37  ;;  %v16433_v30 = vld [vmem:[#allocation62_spill] sm:$0xff] }
 0xfb5   :  { %12074 = vmatpush1.bf16.msra.mxu1 %v16430_v18  ;;  %12094 = vmatpush3.bf16.msra.mxu0 %v16429_v37  ;;  %v16434_v18 = vld [vmem:[#allocation5_spill] sm:$0xff]  ;;  %v16435_v37 = vld [vmem:[#allocation8_spill] sm:$0xff] }
 0xfb6   :  { %12096 = vmatprep.subr.bf16.mxu0 %v16431_v15  ;;  %9897 = vmatprep.subr.msk.mxu1 %vm307_vm0, %v16432_v51  ;;  %v16436_v51 = vld [vmem:[#allocation63_spill] sm:$0xff] }
 0xfb8   :  { %9876 = vmatmul.mubr.msk.f32.vlgmr.msra.gmra.mrb[38].mxu1 %vm1103_vm3, %v14490_v33  ;;  %11032 = vmatmul.mubr.msk.f32.vlgmr.msra.gmra.mrb[24].mxu0 %vm1103_vm3, %v14495_v38 }
 0xfb9   :  { %3535 = vmatprep.mubr.f32.mxu1 %v16292_v53  ;;  %12098 = vmatpush3.bf16.msra.mxu0 %v16431_v15  ;;  %v16437_v15 = vld [vmem:[#allocation64_spill] sm:$0xff] }
 0xfba   :  { %12100 = vmatprep.subr.bf16.mxu0 %v16433_v30  ;;  %9898 = vmatpush1.msk.msra.mxu1 %vm307_vm0, %v16434_v18 }
 0xfbb   :  { %9904 = vmatprep.subr.msk.mxu1 %vm307_vm0, %v16435_v37 }
 0xfbc   :  { %9877 = vmatmul.mubr.msk.f32.gmra.mrb[40].mxu1 %vm1103_vm3, %v14495_v38 }
 0xfbd   :  { %12102 = vmatpush3.bf16.msra.mxu0 %v16433_v30  ;;  %4075 = vmatprep.mubr.f32.mxu1 %v16292_v53 }
 0xfbe   :  { %12104 = vmatprep.subr.bf16.mxu0 %v16436_v51 }
 0xfc1   :  { %12106 = vmatpush3.bf16.msra.mxu0 %v16436_v51 }
 0xfc2   :  { %12108 = vmatprep.subr.bf16.mxu0 %v16437_v15 }
 0xfc5   :  { %12110 = vmatpush3.bf16.msra.mxu0 %v16437_v15 }
 0xfc6   :  { %12112 = vmatprep.subr.bf16.mxu0 %v16438_v34 }
 0xfc9   :  { %12114 = vmatpush3.bf16.msra.mxu0 %v16438_v34 }
 0xfca   :  { %12116 = vmatprep.subr.bf16.mxu0 %v14198_v9 }
0x1067   :  { %v10304_v37 = vpop.f32.mrb[18].mxu0 }
0x1068   :  { %v10305_v18 = vpop.f32.mrb[19].mxu0 }
0x1069   :  { %v10306_v62 = vadd.f32 %v10305_v18, %v10304_v37 }
0x106b   :  { %v10307_v30 = vpop.f32.mrb[20].mxu0  ;;  %v3382_v51 = vadd.f32 %v10306_v62, %v16439_v46 }
0x106c   :  { %v10308_v28 = vpop.f32.mrb[21].mxu0 }
0x106d   :  { %v10309_v39 = vadd.f32 %v10308_v28, %v10307_v30 }
0x106f   :  { %v3387_v32 = vadd.f32 %v10309_v39, %v16439_v46 }
0x1077   :  { %v11010_v35 = vpop.f32.mrb[22].mxu0 }
0x1078   :  { %v3462_v55 = vadd.f32 %v11010_v35, %v3387_v32  ;;  %v3456_v14 = vpop.f32.mrb[23].mxu0 }
0x1079   :  { %v3457_v15 = vadd.f32 %v3456_v14, %v3382_v51 }
0x108b   :  { %v3531_v13 = vpop.f32.mrb[38].mxu1  ;;  %v11033_v40 = vpop.f32.mrb[24].mxu0 }
0x108c   :  { %v13111_v34 = vadd.f32 %v3531_v13, %v16440_v16  ;;  %v3533_v50 = vpop.f32.mrb[39].mxu1  ;;  %v3608_v24 = vpop.f32.mrb[25].mxu0 }
0x108d   :  { %v13112_v37 = vadd.f32 %v3533_v50, %v16441_v1 }
0x108e   :  { %v9880_v19 = vmul.f32 -1.442695, %v13111_v34 }
0x108f   :  { %v3537_v18 = vpop.f32.mrb[40].mxu1  ;;  %v9882_v35 = vmul.f32 -1.442695, %v13112_v37 }
0x1090   :  { %13341 = vpow2.f32 %v9880_v19  ;;  %v13113_v28 = vadd.f32 %v3537_v18, %v16440_v16  ;;  %v3539_v39 = vpop.f32.mrb[41].mxu1  ;;  %v14720_v18 = vld [vmem:[%s15975_s11] ss:$0 sm:$0xff] }
0x1091   :  { %v13114_v62 = vadd.f32 %v3539_v39, %v16441_v1  ;;  %v3645_v37 = vadd.f32 %v14720_v18, %v3608_v24 }
0x1092   :  { %v9881_v30 = vmul.f32 -1.442695, %v13113_v28 }
0x1093   :  { %v9883_v14 = vmul.f32 -1.442695, %v13114_v62  ;;  %v3646_v62 = vadd.f32 %v14720_v18, %v11033_v40 }
0x1094   :  { %13343 = vpow2.f32 %v9881_v30 }
0x1095   :  { %13345 = vpow2.f32 %v9882_v35 }
0x1096   :  { %13347 = vpow2.f32 %v9883_v14 }
0x109a   :  { %v13342_v51 = vpop.eup %13341 }
0x109b   :  { %v3625_v13 = vadd.f32 1.0, %v13342_v51 }
0x109d   :  { %13349 = vrcp.f32 %v3625_v13 }
0x109e   :  { %v13344_v32 = vpop.eup %13343 }
0x109f   :  { %v3626_v34 = vadd.f32 1.0, %v13344_v32  ;;  %v13346_v46 = vpop.eup %13345 }
0x10a0   :  { %v13348_v50 = vpop.eup %13347  ;;  %v3639_v19 = vadd.f32 1.0, %v13346_v46 }
0x10a1   :  { %13351 = vrcp.f32 %v3626_v34  ;;  %v3640_v39 = vadd.f32 1.0, %v13348_v50 }
0x10a2   :  { %13353 = vrcp.f32 %v3639_v19 }
0x10a3   :  { %13355 = vrcp.f32 %v3640_v39 }
0x10a7   :  { %v13350_v28 = vpop.eup %13349 }
0x10a8   :  { %v3647_v30 = vmul.f32 %v13350_v28, %v3645_v37 }
0x10aa   :  { %v3649_v35 = vadd.f32 %v3647_v30, %v3457_v15 }
0x10ab   :  { %v13352_v14 = vpop.eup %13351 }
0x10ac   :  { %13357 = vtanh.f32 %v3649_v35  ;;  %v3648_v51 = vmul.f32 %v13352_v14, %v3646_v62  ;;  %v13354_v46 = vpop.eup %13353  ;;  %v3837_v62 = vpop.permute.xlu1 %3836  ;;  %v14767_v14 = vld [vmem:[%s15979_s15] ss:$0 sm:$0xff] }
0x10ad   :  { %v13356_v32 = vpop.eup %13355  ;;  %v3653_v34 = vsub.f32 1.0, %v13354_v46  ;;  %v3657_v24 = vmul.f32 %v13354_v46, %v14490_v33  ;;  %v14740_v33 = vld [vmem:[%s15978_s14 + $0x20] sm:$0xff] }
0x10ae   :  { %v3650_v13 = vadd.f32 %v3648_v51, %v3462_v55  ;;  %v3654_v56 = vsub.f32 1.0, %v13356_v32  ;;  %v3658_v15 = vmul.f32 %v13356_v32, %v14495_v38  ;;  %v14747_v38 = vld [vmem:[%s15968_s4] sm:$0x3] }
0x10b0   :  { %13359 = vtanh.f32 %v3650_v13  ;;  %v3841_v46 = vpop.permute.xlu1 %3840 }
0x10b6   :  { %v13358_v1 = vpop.eup %13357 }
0x10b7   :  { %v3655_v16 = vmul.f32 %v13358_v1, %v3653_v34  ;;  %v14754_v1 = vld [vmem:[%s15977_s13] ss:$0 sm:$0xff] }
0x10b9   :  { %v14725_v50 = vadd.f32 %v3657_v24, %v3655_v16 }
0x10ba   :  { %v13360_v19 = vpop.eup %13359 }
0x10bb   :  { %11054 = vmatprep.mubr.msk.f32.mxu0 %vm1103_vm3, %v14725_v50  ;;  %v3656_v40 = vmul.f32 %v13360_v19, %v3654_v56  ;;  %v3831_v19 = vpop.permute.xlu1 %3830 }
0x10bd   :  { %v14730_v37 = vadd.f32 %v3658_v15, %v3656_v40  ;;  %v3827_v40 = vpop.permute.xlu0 %3826 }
0x10bf   :  { %11055 = vmatmul.mubr.msk.f32.vlgmr.msra.gmra.mrb[26].mxu0 %vm1103_vm3, %v14730_v37 }
0x10c0   :  { %12118 = vmatpush3.bf16.msra.mxu0 %v14198_v9 }
0x10c1   :  { %12120 = vmatprep.subr.bf16.mxu0 %v14246_v57 }
0x10c4   :  { %12122 = vmatpush3.bf16.msra.mxu0 %v14246_v57 }
0x10c5   :  { %11065 = vmatprep.subr.mxu0 %v14740_v33 }
0x10c8   :  { %11066 = vmatpush3.msra.mxu0 %v14740_v33 }
0x10c9   :  { %11070 = vmatprep.subr.msk.mxu0 %vm307_vm0, %v14747_v38 }
0x1192   :  { %v11056_v56 = vpop.f32.mrb[26].mxu0 }
0x1193   :  { %v3739_v16 = vadd.f32 %v14754_v1, %v11056_v56  ;;  %v3733_v55 = vpop.f32.mrb[27].mxu0 }
0x1194   :  { %v3734_v28 = vadd.f32 %v14754_v1, %v3733_v55 }
0x1195   :  { %v3743_v30 = vmax.f32 %v3739_v16, 0.0 }
0x1196   :  { %v3742_v39 = vmax.f32 %v3734_v28, 0.0 }
0x1198   :  { %11067 = vmatprep.mubr.msk.f32.mxu0 %vm1389_vm4, %v3742_v39 }
0x1199   :  { %11068 = vmatmul.mubr.msk.f32.vlgmr.msra.gmra.mrb[28].mxu0 %vm1389_vm4, %v3743_v30 }
0x119a   :  { %11071 = vmatpush3.msk.msra.mxu0 %vm307_vm0, %v14747_v38 }
0x119b   :  { %11075 = vmatprep.subr.msk.mxu0 %vm307_vm0, %v16379_v22 }
0x126c   :  { %v11069_v35 = vpop.f32.mrb[28].mxu0 }
0x126d   :  { %v3822_v51 = vadd.f32 %v14767_v14, %v11069_v35  ;;  %v3816_v13 = vpop.f32.mrb[29].mxu0 }
0x126e   :  { %v3817_v32 = vadd.f32 %v14767_v14, %v3816_v13 }
0x126f   :  { %v3844_v34 = vmul.f32 %v3841_v46, %v3822_v51  ;;  %v3834_v15 = vmul.f32 %v3831_v19, %v3822_v51 }
0x1270   :  { %v3843_v24 = vmul.f32 %v3837_v62, %v3817_v32  ;;  %v3833_v16 = vmul.f32 %v3827_v40, %v3817_v32 }
0x1271   :  { %3849 = vrot.lane.b32.xlu1 %v3844_v34, %s13548_s30 }
0x1272   :  { %3847 = vrot.lane.b32.xlu0 %v3843_v24, %s13548_s30 }
0x12e3   :  { %v3850_v56 = vpop.permute.xlu1 %3849 }
0x12e4   :  { %v3854_v55 = vadd.f32 %v3850_v56, %v3834_v15  ;;  %v3848_v28 = vpop.permute.xlu0 %3847 }
0x12e5   :  { %v3853_v39 = vadd.f32 %v3848_v28, %v3833_v16 }
0x12e6   :  { %3859 = vrot.lane.b32.xlu1 %v3854_v55, %s13549_s18 }
0x12e7   :  { %3857 = vrot.lane.b32.xlu0 %v3853_v39, %s13549_s18  ;;  %v9893_v39 = vld [vmem:[%s16251_s20 + $0x38] sm:$0xff] }
0x1358   :  { %v3860_v30 = vpop.permute.xlu1 %3859 }
0x1359   :  { %v3864_v35 = vadd.f32 %v14551_v29, %v3860_v30  ;;  %v3858_v62 = vpop.permute.xlu0 %3857  ;;  %v9892_v30 = vld [vmem:[%s16251_s20 + $0x30] sm:$0xff] }
0x135a   :  { %v3863_v13 = vadd.f32 %v3858_v62, %v14558_v58 }
0x135b   :  { %v3962_v46 = vsub.f32 %v3864_v35, %v14551_v29  ;;  %3869 = vrot.lane.b32.xlu1 %v3864_v35, %s13548_s30 }
0x135c   :  { %v3961_v51 = vsub.f32 %v3863_v13, %v14558_v58  ;;  %3867 = vrot.lane.b32.xlu0 %v3863_v13, %s13548_s30 }
0x135d   :  { %v3964_v32 = vmul.f32 %v3962_v46, %v3962_v46 }
0x135e   :  { %v3963_v34 = vmul.f32 %v3961_v51, %v3961_v51 }
0x135f   :  { %3969 = vrot.lane.b32.xlu1 %v3964_v32, %s13548_s30 }
0x1360   :  { %3967 = vrot.lane.b32.xlu0 %v3963_v34, %s13548_s30 }
0x13cd   :  { %v3870_v24 = vpop.permute.xlu1 %3869 }
0x13ce   :  { %9889 = vst.msk [vmem:[%s15980_s16 + $0x28] sm:$0xff] %vm300_vm1, %v3870_v24  ;;  %v3868_v19 = vpop.permute.xlu0 %3867 }
0x13cf   :  { %9888 = vst.msk [vmem:[%s15980_s16 + $0x20] sm:$0xff] %vm300_vm1, %v3868_v19  ;;  %11072 = vmatprep.mubr.msk.f32.mxu0 %vm300_vm1, %v3868_v19 }
0x13d0   :  { %11073 = vmatmul.mubr.msk.f32.vlgmr.msra.gmra.mrb[30].mxu0 %vm300_vm1, %v3870_v24 }
0x13d1   :  { %v3970_v29 = vpop.permute.xlu1 %3969  ;;  %11076 = vmatpush3.msk.msra.mxu0 %vm307_vm0, %v16379_v22 }
0x13d2   :  { %v3968_v58 = vpop.permute.xlu0 %3967  ;;  %v3976_v40 = vsel %vm300_vm1, %v3970_v29, 0.0  ;;  %11080 = vmatprep.subr.msk.mxu0 %vm307_vm0, %v13733_v45 }
0x13d3   :  { %3977 = vadd.xlane.f32.xlu1 %v3976_v40  ;;  %v3973_v15 = vsel %vm300_vm1, %v3968_v58, 0.0 }
0x13d4   :  { %3974 = vadd.xlane.f32.xlu0 %v3973_v15 }
0x1460   :  { %v3978_v29 = vpop.xlane.xlu1 %3977 }
0x1461   :  { %v3975_v56 = vpop.xlane.xlu0 %3974  ;;  %v3980_v58 = vmax.f32 %v3978_v29, 1e-24  ;;  %v16445_v29 = vld [vmem:[#allocation32_spill] sm:$0xff] }
0x1462   :  { %v3979_v16 = vmax.f32 %v3975_v56, 1e-24 }
0x1464   :  { %13361 = vrsqrt.f32 %v3979_v16 }
0x1465   :  { %13363 = vrsqrt.f32 %v3980_v58  ;;  %v16446_v58 = vld [vmem:[#allocation13_spill] sm:$0xff] }
0x146e   :  { %v13362_v55 = vpop.eup %13361 }
0x146f   :  { %v3983_v28 = vmul.f32 %v13362_v55, %v3961_v51  ;;  %v13364_v40 = vpop.eup %13363 }
0x1470   :  { %v3984_v15 = vmul.f32 %v13364_v40, %v3962_v46  ;;  %v16447_v40 = vld [vmem:[#allocation14_spill] sm:$0xff] }
0x1471   :  { %4003 = vrot.lane.b32.xlu1 %v3983_v28, %s13548_s30 }
0x14a3   :  { %v14806_v35 = vpop.f32.mrb[30].mxu0 }
0x14a4   :  { %9930 = vst.msk [vmem:[%s15981_s17 + $0x38] sm:$0xff] %vm300_vm1, %v14806_v35  ;;  %v14813_v62 = vpop.f32.mrb[31].mxu0  ;;  %v3986_v13 = vsub.f32 %v9893_v39, %v14806_v35 }
0x14a5   :  { %9929 = vst.msk [vmem:[%s15981_s17 + $0x30] sm:$0xff] %vm300_vm1, %v14813_v62  ;;  %v3985_v51 = vsub.f32 %v9892_v30, %v14813_v62 }
0x14a6   :  { %v3988_v32 = vmul.f32 %v3986_v13, %v3986_v13 }
0x14a7   :  { %v3987_v24 = vmul.f32 %v3985_v51, %v3985_v51 }
0x14a8   :  { %v3992_v34 = vsel %vm300_vm1, %v3988_v32, 0.0 }
0x14a9   :  { %3993 = vadd.xlane.f32.xlu0 %v3992_v34  ;;  %v3989_v19 = vsel %vm300_vm1, %v3987_v24, 0.0 }
0x14ad   :  { %3990 = vadd.xlane.f32.xlu0 %v3989_v19  ;;  %v16444_v19 = vld [vmem:[#allocation12_spill] sm:$0xff] }
0x14c3   :  { %4005 = vrot.lane.b32.xlu0 %v3984_v15, %s13548_s30  ;;  %v16448_v15 = vld [vmem:[#allocation15_spill] sm:$0xff] }
0x14e3   :  { %v4004_v56 = vpop.permute.xlu1 %4003 }
0x14e4   :  { %9899 = vmatmul.mubr.msk.f32.vlgmr.msra.gmra.mrb[42].mxu1 %vm300_vm1, %v4004_v56  ;;  %11077 = vmatprep.mubr.msk.f32.mxu0 %vm300_vm1, %v4004_v56  ;;  %v16449_v56 = vld [vmem:[#allocation17_spill] sm:$0xff] }
0x14e5   :  { %4081 = vmatprep.mubr.f32.mxu1 %v16292_v53  ;;  %9905 = vmatpush1.msk.msra.mxu1 %vm307_vm0, %v13726_v42 }
0x14e6   :  { %12204 = vmatprep.subr.bf16.mxu1 %v13781_v23 }
0x1536   :  { %v3994_v16 = vpop.xlane.xlu0 %3993 }
0x1537   :  { %v3996_v55 = vmax.f32 %v3994_v16, 1e-24  ;;  %v16450_v16 = vld [vmem:[#allocation18_spill] sm:$0xff] }
0x1539   :  { %13365 = vrsqrt.f32 %v3996_v55  ;;  %v16451_v55 = vld [vmem:[#allocation19_spill] sm:$0xff] }
0x153a   :  { %v3991_v28 = vpop.xlane.xlu0 %3990 }
0x153b   :  { %v3995_v39 = vmax.f32 %v3991_v28, 1e-24  ;;  %v16452_v28 = vld [vmem:[#allocation20_spill] sm:$0xff] }
0x153d   :  { %13367 = vrsqrt.f32 %v3995_v39  ;;  %v16453_v39 = vld [vmem:[#allocation21_spill] sm:$0xff] }
0x153e   :  { %v4006_v46 = vpop.permute.xlu0 %4005 }
0x153f   :  { %9900 = vmatmul.mubr.msk.f32.gmra.mrb[44].mxu1 %vm300_vm1, %v4006_v46  ;;  %11078 = vmatmul.mubr.msk.f32.vlgmr.msra.gmra.mrb[32].mxu0 %vm300_vm1, %v4006_v46  ;;  %v16454_v46 = vld [vmem:[#allocation22_spill] sm:$0xff] }
0x1540   :  { %4233 = vmatprep.mubr.f32.mxu1 %v16292_v53  ;;  %11081 = vmatpush3.msk.msra.mxu0 %vm307_vm0, %v13733_v45 }
0x1541   :  { %12124 = vmatprep.subr.bf16.mxu0 %v13758_v59 }
0x1543   :  { %v13366_v30 = vpop.eup %13365 }
0x1544   :  { %v4000_v24 = vmul.f32 %v13366_v30, %v3986_v13  ;;  %v16442_v13 = vld [vmem:[#allocation11_spill] sm:$0xff] }
0x1545   :  { %v16455_v30 = vld [vmem:[#allocation23_spill] sm:$0xff] }
0x1547   :  { %v13368_v32 = vpop.eup %13367 }
0x1548   :  { %v3999_v34 = vmul.f32 %v13368_v32, %v3985_v51  ;;  %v16443_v51 = vld [vmem:[#allocation30_spill] sm:$0xff]  ;;  %v16456_v32 = vld [vmem:[#allocation24_spill] sm:$0xff] }
0x154a   :  { %5014 = vperm.xlu1 %13264, %v3999_v34   ;;  %5004 = vperm.xlu0 %13261, %v3999_v34  }
0x154b   :  { %9906 = vmatmul.mubr.msk.f32.vlgmr.msra.gmra.mrb[42].mxu1 %vm300_vm1, %v3999_v34  ;;  %11082 = vmatprep.mubr.msk.f32.mxu0 %vm300_vm1, %v3999_v34  ;;  %v16457_v34 = vld [vmem:[#allocation25_spill] sm:$0xff] }
0x154c   :  { %11083 = vmatmul.mubr.msk.f32.vlgmr.msra.gmra.mrb[32].mxu0 %vm300_vm1, %v4000_v24  ;;  %4239 = vmatprep.mubr.f32.mxu1 %v16292_v53 }
0x154d   :  { %12126 = vmatpush1.bf16.msra.mxu0 %v13760_v63  ;;  %12206 = vmatpush3.bf16.msra.mxu1 %v13787_v31 }
0x154e   :  { %5018 = vperm.xlu1 %13264, %v4000_v24   ;;  %12128 = vmatprep.subr.bf16.mxu0 %v13762_v0 }
0x154f   :  { %9907 = vmatmul.mubr.msk.f32.gmra.mrb[44].mxu1 %vm300_vm1, %v4000_v24  ;;  %12208 = vmatprep.subr.bf16.mxu1 %v13789_v36 }
0x1551   :  { %12130 = vmatpush1.bf16.msra.mxu0 %v13766_v5  ;;  %12210 = vmatpush3.bf16.msra.mxu1 %v13795_v47 }
0x1552   :  { %13265 = vset.pattern.permute.xlu1 %v16322_v44  ;;  %12132 = vmatprep.subr.bf16.mxu0 %v13769_v6 }
0x1553   :  { %5008 = vperm.xlu1 %13265, %v4000_v24   ;;  %12212 = vmatprep.subr.bf16.mxu1 %v13801_v54  ;;  %v16458_v24 = vld [vmem:[#allocation26_spill] sm:$0xff] }
0x1555   :  { %12134 = vmatpush1.bf16.msra.mxu0 %v13773_v11  ;;  %12214 = vmatpush3.bf16.msra.mxu1 %v13807_v2 }
0x1556   :  { %12136 = vmatprep.subr.bf16.mxu0 %v13776_v12  ;;  %12216 = vmatprep.subr.bf16.mxu1 %v13813_v7 }
0x1557   :  { %13266 = vset.pattern.permute.xlu1 %v16323_v60 }
0x1559   :  { %12138 = vmatpush1.bf16.msra.mxu0 %v13779_v21  ;;  %12218 = vmatpush3.bf16.msra.mxu1 %v13819_v20 }
0x155a   :  { %12140 = vmatprep.subr.bf16.mxu0 %v13784_v25  ;;  %12220 = vmatprep.subr.bf16.mxu1 %v13825_v26 }
0x155d   :  { %12142 = vmatpush1.bf16.msra.mxu0 %v13792_v41  ;;  %12222 = vmatpush3.bf16.msra.mxu1 %v13831_v48 }
0x155e   :  { %12144 = vmatprep.subr.bf16.mxu0 %v13798_v49  ;;  %12224 = vmatprep.subr.bf16.mxu1 %v13837_v52 }
0x1561   :  { %12146 = vmatpush1.bf16.msra.mxu0 %v13804_v61  ;;  %12226 = vmatpush3.bf16.msra.mxu1 %v13843_v4 }
0x1562   :  { %12148 = vmatprep.subr.bf16.mxu0 %v13810_v3  ;;  %12228 = vmatprep.subr.bf16.mxu1 %v13849_v10 }
0x1565   :  { %12150 = vmatpush1.bf16.msra.mxu0 %v13816_v17  ;;  %12230 = vmatpush3.bf16.msra.mxu1 %v13855_v27  ;;  %v16500_v17 = vld [vmem:[#allocation68_spill] sm:$0xff] }
0x1566   :  { %12152 = vmatprep.subr.bf16.mxu0 %v16324_v8  ;;  %12232 = vmatprep.subr.bf16.mxu1 %v16382_v43  ;;  %v16465_v43 = vld [vmem:[#allocation36_spill] sm:$0xff] }
0x1569   :  { %12154 = vmatpush1.bf16.msra.mxu0 %v16442_v13  ;;  %12234 = vmatpush3.bf16.msra.mxu1 %v16443_v51 }
0x156a   :  { %12156 = vmatprep.subr.bf16.mxu0 %v16444_v19  ;;  %12236 = vmatprep.subr.bf16.mxu1 %v16445_v29 }
0x156d   :  { %12158 = vmatpush1.bf16.msra.mxu0 %v16446_v58 }
0x156e   :  { %12160 = vmatprep.subr.bf16.mxu0 %v16447_v40 }
0x1571   :  { %12162 = vmatpush1.bf16.msra.mxu0 %v16448_v15  ;;  %v16459_v15 = vld [vmem:[#allocation27_spill] sm:$0xff] }
0x1572   :  { %12164 = vmatprep.subr.bf16.mxu0 %v16449_v56  ;;  %v16460_v56 = vld [vmem:[#allocation29_spill] sm:$0xff] }
0x1575   :  { %12166 = vmatpush1.bf16.msra.mxu0 %v16450_v16  ;;  %v16461_v16 = vld [vmem:[#allocation31_spill] sm:$0xff] }
0x1576   :  { %12168 = vmatprep.subr.bf16.mxu0 %v16451_v55 }
0x1579   :  { %12170 = vmatpush1.bf16.msra.mxu0 %v16452_v28  ;;  %v16462_v28 = vld [vmem:[#allocation33_spill] sm:$0xff] }
0x157a   :  { %12172 = vmatprep.subr.bf16.mxu0 %v16453_v39 }
0x157d   :  { %12174 = vmatpush1.bf16.msra.mxu0 %v16454_v46  ;;  %v16463_v46 = vld [vmem:[#allocation34_spill] sm:$0xff] }
0x157e   :  { %12176 = vmatprep.subr.bf16.mxu0 %v16455_v30 }
0x1581   :  { %12178 = vmatpush1.bf16.msra.mxu0 %v16456_v32 }
0x1582   :  { %12180 = vmatprep.subr.bf16.mxu0 %v16457_v34 }
0x1585   :  { %12182 = vmatpush1.bf16.msra.mxu0 %v16458_v24 }
0x1586   :  { %12184 = vmatprep.subr.bf16.mxu0 %v16459_v15 }
0x1589   :  { %12186 = vmatpush1.bf16.msra.mxu0 %v16460_v56  ;;  %v16464_v56 = vld [vmem:[#allocation35_spill] sm:$0xff] }
0x158a   :  { %12188 = vmatprep.subr.bf16.mxu0 %v16461_v16 }
0x161e   :  { %v4235_v55 = vpop.f32.mrb[42].mxu1 }
0x161f   :  { %v4321_v40 = vadd.f32 %v4235_v55, %v16462_v28  ;;  %v4237_v39 = vpop.f32.mrb[43].mxu1  ;;  %v11084_v58 = vpop.f32.mrb[32].mxu0 }
0x1620   :  { %v4322_v19 = vadd.f32 %v4237_v39, %v16463_v46  ;;  %v4312_v30 = vpop.f32.mrb[33].mxu0 }
0x1621   :  { %v4327_v13 = vmax.f32 %v4321_v40, 0.0  ;;  %v4323_v16 = vadd.f32 %v4312_v30, %v16464_v56  ;;  %v16467_v40 = vld [vmem:[#allocation38_spill] sm:$0xff] }
0x1622   :  { %v4328_v51 = vmax.f32 %v4322_v19, 0.0  ;;  %v4241_v32 = vpop.f32.mrb[44].mxu1  ;;  %v16466_v19 = vld [vmem:[#allocation37_spill] sm:$0xff]  ;;  %v16471_v30 = vld [vmem:[#allocation42_spill] sm:$0xff] }
0x1623   :  { %v4324_v34 = vadd.f32 %v4241_v32, %v16462_v28  ;;  %v4243_v24 = vpop.f32.mrb[45].mxu1  ;;  %v4329_v32 = vmax.f32 %v4323_v16, 0.0  ;;  %v4326_v16 = vadd.f32 %v11084_v58, %v16464_v56  ;;  %v16478_v58 = vld [vmem:[#allocation49_spill] sm:$0xff]  ;;  %v16499_v28 = vld [vmem:[#allocation67_spill] sm:$0xff] }
0x1624   :  { %v4325_v15 = vadd.f32 %v4243_v24, %v16463_v46  ;;  %4403 = vmatprep.mubr.f32.mxu0 %v4328_v51  ;;  %4557 = vmatprep.mubr.f32.mxu1 %v4328_v51  ;;  %v16468_v51 = vld [vmem:[#allocation39_spill] sm:$0xff]  ;;  %v16473_v24 = vld [vmem:[#allocation44_spill] sm:$0xff] }
0x1625   :  { %4404 = vmatmul.mubr.f32.vlgmr.msra.gmra.mrb[34].mxu0 %v4327_v13  ;;  %4558 = vmatmul.mubr.f32.vlgmr.msra.gmra.mrb[46].mxu1 %v4327_v13  ;;  %v4330_v39 = vmax.f32 %v4324_v34, 0.0  ;;  %v16469_v13 = vld [vmem:[#allocation40_spill] sm:$0xff]  ;;  %v16472_v34 = vld [vmem:[#allocation43_spill] sm:$0xff] }
0x1626   :  { %v4331_v55 = vmax.f32 %v4325_v15, 0.0  ;;  %12190 = vmatpush1.bf16.msra.mxu0 %v16465_v43  ;;  %12238 = vmatpush3.bf16.msra.mxu1 %v16445_v29  ;;  %v16470_v15 = vld [vmem:[#allocation41_spill] sm:$0xff] }
0x1627   :  { %12192 = vmatprep.subr.bf16.mxu0 %v16466_v19  ;;  %12240 = vmatprep.subr.bf16.mxu1 %v16467_v40 }
0x1628   :  { %4409 = vmatprep.mubr.f32.mxu0 %v4331_v55  ;;  %4562 = vmatprep.mubr.f32.mxu1 %v4331_v55  ;;  %v16474_v55 = vld [vmem:[#allocation45_spill] sm:$0xff] }
0x1629   :  { %4410 = vmatmul.mubr.f32.gmra.mrb[36].mxu0 %v4330_v39  ;;  %4563 = vmatmul.mubr.f32.gmra.mrb[48].mxu1 %v4330_v39  ;;  %v4332_v39 = vmax.f32 %v4326_v16, 0.0  ;;  %v16479_v16 = vld [vmem:[#allocation50_spill] sm:$0xff] }
0x162a   :  { %12194 = vmatpush1.bf16.msra.mxu0 %v16468_v51  ;;  %12242 = vmatpush3.bf16.msra.mxu1 %v16467_v40  ;;  %v16476_v51 = vld [vmem:[#allocation47_spill] sm:$0xff] }
0x162b   :  { %11101 = vmatprep.mubr.msk.f32.mxu1 %vm792_vm2, %v4329_v32  ;;  %12196 = vmatprep.subr.bf16.mxu0 %v16469_v13  ;;  %v16475_v13 = vld [vmem:[#allocation46_spill] sm:$0xff] }
0x162c   :  { %12244 = vmatprep.subr.bf16.mxu1 %v16470_v15  ;;  %4480 = vmatprep.mubr.f32.mxu0 %v16292_v53 }
0x162e   :  { %12198 = vmatpush1.bf16.msra.mxu0 %v16471_v30  ;;  %12246 = vmatpush3.bf16.msra.mxu1 %v16470_v15  ;;  %v16477_v30 = vld [vmem:[#allocation48_spill] sm:$0xff] }
0x162f   :  { %12200 = vmatprep.subr.bf16.mxu0 %v16472_v34  ;;  %12248 = vmatprep.subr.bf16.mxu1 %v16473_v24  ;;  %v16498_v34 = vld [vmem:[#allocation66_spill] sm:$0xff] }
0x1632   :  { %12202 = vmatpush1.bf16.msra.mxu0 %v16474_v55  ;;  %12250 = vmatpush3.bf16.msra.mxu1 %v16473_v24  ;;  %v16484_v55 = vld [vmem:[#allocation55_spill] sm:$0xff]  ;;  %v16486_v24 = vld [vmem:[#allocation57_spill] sm:$0xff] }
0x1633   :  { %12252 = vmatprep.subr.bf16.mxu0 %v16475_v13  ;;  %12272 = vmatprep.subr.bf16.mxu1 %v16476_v51  ;;  %v16480_v13 = vld [vmem:[#allocation51_spill] sm:$0xff] }
0x1635   :  { %9911 = vmatmul.mubr.msk.f32.vlgmr.msra.gmra.mrb[34].mxu0 %vm792_vm2, %v4329_v32  ;;  %11102 = vmatmul.mubr.msk.f32.vlgmr.msra.gmra.mrb[50].mxu1 %vm792_vm2, %v4332_v39  ;;  %v16481_v32 = vld [vmem:[#allocation52_spill] sm:$0xff] }
0x1636   :  { %12254 = vmatpush1.bf16.msra.mxu0 %v16477_v30  ;;  %12274 = vmatpush3.bf16.msra.mxu1 %v16476_v51  ;;  %v16482_v30 = vld [vmem:[#allocation53_spill] sm:$0xff]  ;;  %v16483_v51 = vld [vmem:[#allocation54_spill] sm:$0xff] }
0x1637   :  { %11124 = vmatprep.mubr.msk.f32.mxu1 %vm1103_vm3, %v14725_v50  ;;  %4486 = vmatprep.mubr.f32.mxu0 %v16292_v53 }
0x1638   :  { %12256 = vmatprep.subr.bf16.mxu0 %v16478_v58  ;;  %12276 = vmatprep.subr.bf16.mxu1 %v16479_v16  ;;  %v16485_v58 = vld [vmem:[#allocation56_spill] sm:$0xff] }
0x1639   :  { %9912 = vmatmul.mubr.msk.f32.gmra.mrb[36].mxu0 %vm792_vm2, %v4332_v39  ;;  %v16487_v39 = vld [vmem:[#allocation58_spill] sm:$0xff] }
0x163a   :  { %12258 = vmatpush1.bf16.msra.mxu0 %v16480_v13  ;;  %12278 = vmatpush3.bf16.msra.mxu1 %v16479_v16  ;;  %v16488_v13 = vld [vmem:[#allocation59_spill] sm:$0xff]  ;;  %v16490_v16 = vld [vmem:[#allocation61_spill] sm:$0xff] }
0x163b   :  { %12260 = vmatprep.subr.bf16.mxu0 %v16481_v32  ;;  %12280 = vmatprep.subr.bf16.mxu1 %v16482_v30  ;;  %v16489_v32 = vld [vmem:[#allocation60_spill] sm:$0xff] }
0x163c   :  { %4707 = vmatprep.mubr.f32.mxu0 %v16292_v53 }
0x163e   :  { %12262 = vmatpush1.bf16.msra.mxu0 %v16483_v51  ;;  %12282 = vmatpush3.bf16.msra.mxu1 %v16482_v30  ;;  %v16491_v51 = vld [vmem:[#allocation6_spill] sm:$0xff] }
0x163f   :  { %12264 = vmatprep.subr.bf16.mxu0 %v16484_v55  ;;  %12284 = vmatprep.subr.bf16.mxu1 %v16485_v58 }
0x1642   :  { %12266 = vmatpush1.bf16.msra.mxu0 %v16486_v24  ;;  %12286 = vmatpush3.bf16.msra.mxu1 %v16485_v58  ;;  %v16497_v24 = vld [vmem:[#allocation65_spill] sm:$0xff] }
0x1643   :  { %12268 = vmatprep.subr.bf16.mxu0 %v16487_v39  ;;  %12288 = vmatprep.subr.bf16.mxu1 %v16488_v13  ;;  %v16492_v39 = vld [vmem:[#allocation62_spill] sm:$0xff] }
0x1646   :  { %12270 = vmatpush1.bf16.msra.mxu0 %v16489_v32  ;;  %12290 = vmatpush3.bf16.msra.mxu1 %v16488_v13  ;;  %v16493_v32 = vld [vmem:[#allocation5_spill] sm:$0xff]  ;;  %v16494_v13 = vld [vmem:[#allocation8_spill] sm:$0xff] }
0x1647   :  { %12292 = vmatprep.subr.bf16.mxu1 %v16490_v16  ;;  %9936 = vmatprep.subr.msk.mxu0 %vm307_vm0, %v16491_v51  ;;  %v16495_v51 = vld [vmem:[#allocation63_spill] sm:$0xff] }
0x1649   :  { %9915 = vmatmul.mubr.msk.f32.vlgmr.msra.gmra.mrb[34].mxu0 %vm1103_vm3, %v14725_v50  ;;  %11125 = vmatmul.mubr.msk.f32.vlgmr.msra.gmra.mrb[52].mxu1 %vm1103_vm3, %v14730_v37 }
0x164a   :  { %4713 = vmatprep.mubr.f32.mxu0 %v16292_v53  ;;  %12294 = vmatpush3.bf16.msra.mxu1 %v16490_v16  ;;  %v16496_v16 = vld [vmem:[#allocation64_spill] sm:$0xff] }
0x164b   :  { %12296 = vmatprep.subr.bf16.mxu1 %v16492_v39  ;;  %9937 = vmatpush1.msk.msra.mxu0 %vm307_vm0, %v16493_v32 }
0x164c   :  { %9943 = vmatprep.subr.msk.mxu0 %vm307_vm0, %v16494_v13 }
0x164d   :  { %9916 = vmatmul.mubr.msk.f32.gmra.mrb[36].mxu0 %vm1103_vm3, %v14730_v37 }
0x164e   :  { %12298 = vmatpush3.bf16.msra.mxu1 %v16492_v39  ;;  %5253 = vmatprep.mubr.f32.mxu0 %v16292_v53 }
0x164f   :  { %12300 = vmatprep.subr.bf16.mxu1 %v16495_v51 }
0x1652   :  { %12302 = vmatpush3.bf16.msra.mxu1 %v16495_v51 }
0x1653   :  { %12304 = vmatprep.subr.bf16.mxu1 %v16496_v16 }
0x1656   :  { %12306 = vmatpush3.bf16.msra.mxu1 %v16496_v16 }
0x1657   :  { %12308 = vmatprep.subr.bf16.mxu1 %v16497_v24 }
0x165a   :  { %12310 = vmatpush3.bf16.msra.mxu1 %v16497_v24 }
0x165b   :  { %12312 = vmatprep.subr.bf16.mxu1 %v14198_v9 }
0x16f8   :  { %v10392_v13 = vpop.f32.mrb[46].mxu1 }
0x16f9   :  { %v10393_v32 = vpop.f32.mrb[47].mxu1 }
0x16fa   :  { %v10394_v58 = vadd.f32 %v10393_v32, %v10392_v13 }
0x16fc   :  { %v10395_v39 = vpop.f32.mrb[48].mxu1  ;;  %v4560_v51 = vadd.f32 %v10394_v58, %v16498_v34 }
0x16fd   :  { %v10396_v55 = vpop.f32.mrb[49].mxu1 }
0x16fe   :  { %v10397_v30 = vadd.f32 %v10396_v55, %v10395_v39 }
0x1700   :  { %v4565_v15 = vadd.f32 %v10397_v30, %v16498_v34 }
0x1708   :  { %v11103_v40 = vpop.f32.mrb[50].mxu1 }
0x1709   :  { %v4640_v19 = vadd.f32 %v11103_v40, %v4565_v15  ;;  %v4634_v43 = vpop.f32.mrb[51].mxu1 }
0x170a   :  { %v4635_v16 = vadd.f32 %v4634_v43, %v4560_v51 }
0x171c   :  { %v4709_v56 = vpop.f32.mrb[34].mxu0  ;;  %v11126_v46 = vpop.f32.mrb[52].mxu1 }
0x171d   :  { %v13115_v24 = vadd.f32 %v4709_v56, %v16499_v28  ;;  %v4711_v29 = vpop.f32.mrb[35].mxu0  ;;  %v4786_v8 = vpop.f32.mrb[53].mxu1 }
0x171e   :  { %v13116_v13 = vadd.f32 %v4711_v29, %v16500_v17 }
0x171f   :  { %v9919_v27 = vmul.f32 -1.442695, %v13115_v24 }
0x1720   :  { %v4715_v32 = vpop.f32.mrb[36].mxu0  ;;  %v9921_v40 = vmul.f32 -1.442695, %v13116_v13  ;;  %v4824_v13 = vadd.f32 %v14720_v18, %v11126_v46 }
0x1721   :  { %13369 = vpow2.f32 %v9919_v27  ;;  %v13117_v55 = vadd.f32 %v4715_v32, %v16499_v28  ;;  %v4717_v30 = vpop.f32.mrb[37].mxu0  ;;  %v4823_v32 = vadd.f32 %v14720_v18, %v4786_v8 }
0x1722   :  { %v13118_v58 = vadd.f32 %v4717_v30, %v16500_v17 }
0x1723   :  { %v9920_v39 = vmul.f32 -1.442695, %v13117_v55 }
0x1724   :  { %v9922_v43 = vmul.f32 -1.442695, %v13118_v58 }
0x1725   :  { %13371 = vpow2.f32 %v9920_v39 }
0x1726   :  { %13373 = vpow2.f32 %v9921_v40 }
0x1727   :  { %13375 = vpow2.f32 %v9922_v43 }
0x172b   :  { %v13370_v51 = vpop.eup %13369 }
0x172c   :  { %v4803_v56 = vadd.f32 1.0, %v13370_v51 }
0x172e   :  { %13377 = vrcp.f32 %v4803_v56 }
0x172f   :  { %v13372_v15 = vpop.eup %13371 }
0x1730   :  { %v4804_v24 = vadd.f32 1.0, %v13372_v15  ;;  %v13374_v34 = vpop.eup %13373 }
0x1731   :  { %v13376_v29 = vpop.eup %13375  ;;  %v4817_v27 = vadd.f32 1.0, %v13374_v34 }
0x1732   :  { %13379 = vrcp.f32 %v4804_v24  ;;  %v4818_v55 = vadd.f32 1.0, %v13376_v29 }
0x1733   :  { %13381 = vrcp.f32 %v4817_v27 }
0x1734   :  { %13383 = vrcp.f32 %v4818_v55 }
0x1738   :  { %v13378_v28 = vpop.eup %13377 }
0x1739   :  { %v4825_v30 = vmul.f32 %v13378_v28, %v4823_v32 }
0x173b   :  { %v4827_v39 = vadd.f32 %v4825_v30, %v4635_v16 }
0x173c   :  { %v13380_v58 = vpop.eup %13379 }
0x173d   :  { %13385 = vtanh.f32 %v4827_v39  ;;  %v4826_v40 = vmul.f32 %v13380_v58, %v4824_v13  ;;  %v13382_v51 = vpop.eup %13381 }
0x173e   :  { %v13384_v56 = vpop.eup %13383  ;;  %v4831_v15 = vsub.f32 1.0, %v13382_v51  ;;  %v4835_v8 = vmul.f32 %v13382_v51, %v14725_v50  ;;  %v5005_v51 = vpop.permute.xlu0 %5004 }
0x173f   :  { %v4828_v43 = vadd.f32 %v4826_v40, %v4640_v19  ;;  %v4832_v17 = vsub.f32 1.0, %v13384_v56  ;;  %v4836_v46 = vmul.f32 %v13384_v56, %v14730_v37 }
0x1741   :  { %13387 = vtanh.f32 %v4828_v43 }
0x1747   :  { %v13386_v24 = vpop.eup %13385 }
0x1748   :  { %v4833_v34 = vmul.f32 %v13386_v24, %v4831_v15 }
0x174a   :  { %v14975_v29 = vadd.f32 %v4835_v8, %v4833_v34 }
0x174b   :  { %v13388_v28 = vpop.eup %13387 }
0x174c   :  { %11147 = vmatprep.mubr.msk.f32.mxu1 %vm1103_vm3, %v14975_v29  ;;  %v4834_v18 = vmul.f32 %v13388_v28, %v4832_v17 }
0x174e   :  { %v14980_v16 = vadd.f32 %v4836_v46, %v4834_v18 }
0x1750   :  { %11148 = vmatmul.mubr.msk.f32.vlgmr.msra.gmra.mrb[54].mxu1 %vm1103_vm3, %v14980_v16 }
0x1751   :  { %12314 = vmatpush3.bf16.msra.mxu1 %v14198_v9 }
0x1752   :  { %12316 = vmatprep.subr.bf16.mxu1 %v14246_v57 }
0x1755   :  { %12318 = vmatpush3.bf16.msra.mxu1 %v14246_v57 }
0x1756   :  { %11158 = vmatprep.subr.mxu1 %v14740_v33 }
0x1759   :  { %11159 = vmatpush3.msra.mxu1 %v14740_v33  ;;  %v5015_v33 = vpop.permute.xlu1 %5014 }
0x175a   :  { %11163 = vmatprep.subr.msk.mxu1 %vm307_vm0, %v14747_v38 }
0x175d   :  { %v5019_v39 = vpop.permute.xlu1 %5018 }
0x1761   :  { %v5009_v43 = vpop.permute.xlu1 %5008 }
0x1823   :  { %v11149_v17 = vpop.f32.mrb[54].mxu1 }
0x1824   :  { %v4917_v50 = vadd.f32 %v14754_v1, %v11149_v17  ;;  %v4911_v37 = vpop.f32.mrb[55].mxu1 }
0x1825   :  { %v4912_v19 = vadd.f32 %v14754_v1, %v4911_v37 }
0x1826   :  { %v4921_v32 = vmax.f32 %v4917_v50, 0.0 }
0x1827   :  { %v4920_v27 = vmax.f32 %v4912_v19, 0.0 }
0x1829   :  { %11160 = vmatprep.mubr.msk.f32.mxu1 %vm1389_vm4, %v4920_v27 }
0x182a   :  { %11161 = vmatmul.mubr.msk.f32.vlgmr.msra.gmra.mrb[56].mxu1 %vm1389_vm4, %v4921_v32 }
0x182b   :  { %11164 = vmatpush3.msk.msra.mxu1 %vm307_vm0, %v14747_v38 }
0x182c   :  { %11168 = vmatprep.subr.msk.mxu1 %vm307_vm0, %v16379_v22 }
0x18fd   :  { %v11162_v55 = vpop.f32.mrb[56].mxu1 }
0x18fe   :  { %v5000_v30 = vadd.f32 %v14767_v14, %v11162_v55  ;;  %v4994_v13 = vpop.f32.mrb[57].mxu1 }
0x18ff   :  { %v4995_v1 = vadd.f32 %v14767_v14, %v4994_v13 }
0x1900   :  { %v5022_v58 = vmul.f32 %v5019_v39, %v5000_v30  ;;  %v5012_v38 = vmul.f32 %v5009_v43, %v5000_v30 }
0x1901   :  { %v5021_v40 = vmul.f32 %v5015_v33, %v4995_v1  ;;  %v5011_v15 = vmul.f32 %v5005_v51, %v4995_v1 }
0x1902   :  { %5027 = vrot.lane.b32.xlu1 %v5022_v58, %s13548_s30  ;;  %v9932_v58 = vld [vmem:[%s16251_s20 + $0x48] sm:$0xff] }
0x1903   :  { %5025 = vrot.lane.b32.xlu0 %v5021_v40, %s13548_s30  ;;  %v9931_v40 = vld [vmem:[%s16251_s20 + $0x40] sm:$0xff] }
0x1974   :  { %v5028_v56 = vpop.permute.xlu1 %5027 }
0x1975   :  { %v5032_v24 = vadd.f32 %v5028_v56, %v5012_v38  ;;  %v5026_v34 = vpop.permute.xlu0 %5025 }
0x1976   :  { %v5031_v8 = vadd.f32 %v5026_v34, %v5011_v15 }
0x1977   :  { %5037 = vrot.lane.b32.xlu1 %v5032_v24, %s13549_s18 }
0x1978   :  { %5035 = vrot.lane.b32.xlu0 %v5031_v8, %s13549_s18 }
0x19e9   :  { %v5038_v28 = vpop.permute.xlu1 %5037 }
0x19ea   :  { %v5042_v14 = vadd.f32 %v14806_v35, %v5038_v28  ;;  %v5036_v18 = vpop.permute.xlu0 %5035 }
0x19eb   :  { %v5041_v46 = vadd.f32 %v5036_v18, %v14813_v62 }
0x19ec   :  { %v5140_v17 = vsub.f32 %v5042_v14, %v14806_v35  ;;  %5047 = vrot.lane.b32.xlu1 %v5042_v14, %s13548_s30 }
0x19ed   :  { %v5139_v50 = vsub.f32 %v5041_v46, %v14813_v62  ;;  %5045 = vrot.lane.b32.xlu0 %v5041_v46, %s13548_s30 }
0x19ee   :  { %v5142_v37 = vmul.f32 %v5140_v17, %v5140_v17 }
0x19ef   :  { %v5141_v19 = vmul.f32 %v5139_v50, %v5139_v50 }
0x19f0   :  { %5147 = vrot.lane.b32.xlu1 %v5142_v37, %s13548_s30 }
0x19f1   :  { %5145 = vrot.lane.b32.xlu0 %v5141_v19, %s13548_s30 }
0x1a5e   :  { %v5048_v27 = vpop.permute.xlu1 %5047 }
0x1a5f   :  { %9928 = vst.msk [vmem:[%s15980_s16 + $0x38] sm:$0xff] %vm300_vm1, %v5048_v27  ;;  %v5046_v32 = vpop.permute.xlu0 %5045 }
0x1a60   :  { %9927 = vst.msk [vmem:[%s15980_s16 + $0x30] sm:$0xff] %vm300_vm1, %v5046_v32  ;;  %11165 = vmatprep.mubr.msk.f32.mxu1 %vm300_vm1, %v5046_v32 }
0x1a61   :  { %11166 = vmatmul.mubr.msk.f32.vlgmr.msra.gmra.mrb[58].mxu1 %vm300_vm1, %v5048_v27 }
0x1a62   :  { %v5148_v35 = vpop.permute.xlu1 %5147  ;;  %11169 = vmatpush3.msk.msra.mxu1 %vm307_vm0, %v16379_v22 }
0x1a63   :  { %v5146_v62 = vpop.permute.xlu0 %5145  ;;  %v5154_v33 = vsel %vm300_vm1, %v5148_v35, 0.0  ;;  %11173 = vmatprep.subr.msk.mxu1 %vm307_vm0, %v13733_v45 }
0x1a64   :  { %5155 = vadd.xlane.f32.xlu1 %v5154_v33  ;;  %v5151_v55 = vsel %vm300_vm1, %v5146_v62, 0.0 }
0x1a65   :  { %5152 = vadd.xlane.f32.xlu0 %v5151_v55 }
0x1af1   :  { %v5156_v28 = vpop.xlane.xlu1 %5155 }
0x1af2   :  { %v5153_v30 = vpop.xlane.xlu0 %5152  ;;  %v5158_v14 = vmax.f32 %v5156_v28, 1e-24  ;;  %v16513_v28 = vld [vmem:[#allocation18_spill] sm:$0xff] }
0x1af3   :  { %v5157_v13 = vmax.f32 %v5153_v30, 1e-24  ;;  %v16501_v30 = vld [vmem:[#allocation9_spill] sm:$0xff] }
0x1af5   :  { %13389 = vrsqrt.f32 %v5157_v13  ;;  %v16502_v13 = vld [vmem:[#allocation16_spill] sm:$0xff] }
0x1af6   :  { %13391 = vrsqrt.f32 %v5158_v14  ;;  %v16514_v14 = vld [vmem:[#allocation19_spill] sm:$0xff] }
0x1aff   :  { %v13390_v39 = vpop.eup %13389 }
0x1b00   :  { %v5161_v1 = vmul.f32 %v13390_v39, %v5139_v50  ;;  %v13392_v18 = vpop.eup %13391  ;;  %v16503_v39 = vld [vmem:[#allocation10_spill] sm:$0xff] }
0x1b01   :  { %v5162_v46 = vmul.f32 %v13392_v18, %v5140_v17  ;;  %v16515_v18 = vld [vmem:[#allocation20_spill] sm:$0xff] }
0x1b02   :  { %5181 = vrot.lane.b32.xlu1 %v5161_v1, %s13548_s30  ;;  %v16504_v1 = vld [vmem:[#allocation28_spill] sm:$0xff] }
0x1b34   :  { %v15036_v43 = vpop.f32.mrb[58].mxu1 }
0x1b35   :  { %9969 = vst.msk [vmem:[%s15981_s17 + $0x48] sm:$0xff] %vm300_vm1, %v15036_v43  ;;  %v15043_v51 = vpop.f32.mrb[59].mxu1  ;;  %v5164_v38 = vsub.f32 %v9932_v58, %v15036_v43  ;;  %v16505_v58 = vld [vmem:[#allocation11_spill] sm:$0xff] }
0x1b36   :  { %9968 = vst.msk [vmem:[%s15981_s17 + $0x40] sm:$0xff] %vm300_vm1, %v15043_v51  ;;  %v5163_v56 = vsub.f32 %v9931_v40, %v15043_v51  ;;  %v16506_v40 = vld [vmem:[#allocation30_spill] sm:$0xff] }
0x1b37   :  { %v5166_v15 = vmul.f32 %v5164_v38, %v5164_v38 }
0x1b38   :  { %v5165_v34 = vmul.f32 %v5163_v56, %v5163_v56 }
0x1b39   :  { %v5170_v24 = vsel %vm300_vm1, %v5166_v15, 0.0  ;;  %v16509_v15 = vld [vmem:[#allocation13_spill] sm:$0xff] }
0x1b3a   :  { %5171 = vadd.xlane.f32.xlu0 %v5170_v24  ;;  %v5167_v8 = vsel %vm300_vm1, %v5165_v34, 0.0  ;;  %v16510_v24 = vld [vmem:[#allocation14_spill] sm:$0xff]  ;;  %v16511_v34 = vld [vmem:[#allocation15_spill] sm:$0xff] }
0x1b3e   :  { %5168 = vadd.xlane.f32.xlu0 %v5167_v8  ;;  %v16512_v8 = vld [vmem:[#allocation17_spill] sm:$0xff] }
0x1b54   :  { %5183 = vrot.lane.b32.xlu0 %v5162_v46, %s13548_s30  ;;  %v16516_v46 = vld [vmem:[#allocation21_spill] sm:$0xff] }
0x1b74   :  { %v5182_v50 = vpop.permute.xlu1 %5181 }
0x1b75   :  { %9938 = vmatmul.mubr.msk.f32.vlgmr.msra.gmra.mrb[38].mxu0 %vm300_vm1, %v5182_v50  ;;  %11170 = vmatprep.mubr.msk.f32.mxu1 %vm300_vm1, %v5182_v50  ;;  %v16517_v50 = vld [vmem:[#allocation22_spill] sm:$0xff] }
0x1b76   :  { %5259 = vmatprep.mubr.f32.mxu0 %v16292_v53  ;;  %9944 = vmatpush1.msk.msra.mxu0 %vm307_vm0, %v13726_v42 }
0x1b77   :  { %12400 = vmatprep.subr.bf16.mxu0 %v13781_v23 }
0x1bc7   :  { %v5172_v37 = vpop.xlane.xlu0 %5171 }
0x1bc8   :  { %v5174_v19 = vmax.f32 %v5172_v37, 1e-24  ;;  %v16518_v37 = vld [vmem:[#allocation23_spill] sm:$0xff] }
0x1bca   :  { %13393 = vrsqrt.f32 %v5174_v19  ;;  %v16519_v19 = vld [vmem:[#allocation24_spill] sm:$0xff] }
0x1bcb   :  { %v5169_v27 = vpop.xlane.xlu0 %5168 }
0x1bcc   :  { %v5173_v32 = vmax.f32 %v5169_v27, 1e-24  ;;  %v16520_v27 = vld [vmem:[#allocation25_spill] sm:$0xff] }
0x1bce   :  { %13395 = vrsqrt.f32 %v5173_v32  ;;  %v16521_v32 = vld [vmem:[#allocation26_spill] sm:$0xff] }
0x1bcf   :  { %v5184_v17 = vpop.permute.xlu0 %5183 }
0x1bd0   :  { %9939 = vmatmul.mubr.msk.f32.gmra.mrb[40].mxu0 %vm300_vm1, %v5184_v17  ;;  %11171 = vmatmul.mubr.msk.f32.vlgmr.msra.gmra.mrb[60].mxu1 %vm300_vm1, %v5184_v17  ;;  %v16522_v17 = vld [vmem:[#allocation27_spill] sm:$0xff] }
0x1bd1   :  { %5411 = vmatprep.mubr.f32.mxu0 %v16292_v53  ;;  %11174 = vmatpush3.msk.msra.mxu1 %vm307_vm0, %v13733_v45 }
0x1bd2   :  { %12320 = vmatprep.subr.bf16.mxu1 %v13758_v59 }
0x1bd4   :  { %v13394_v35 = vpop.eup %13393 }
0x1bd5   :  { %v5178_v55 = vmul.f32 %v13394_v35, %v5164_v38  ;;  %v16507_v38 = vld [vmem:[#allocation12_spill] sm:$0xff]  ;;  %v16523_v35 = vld [vmem:[#allocation29_spill] sm:$0xff] }
0x1bd8   :  { %v13396_v62 = vpop.eup %13395 }
0x1bd9   :  { %v5177_v33 = vmul.f32 %v13396_v62, %v5163_v56  ;;  %v16508_v56 = vld [vmem:[#allocation32_spill] sm:$0xff]  ;;  %v16524_v62 = vld [vmem:[#allocation31_spill] sm:$0xff] }
0x1bdb   :  { %6192 = vperm.xlu1 %13266, %v5177_v33   ;;  %6182 = vperm.xlu0 %13261, %v5177_v33  }
0x1bdc   :  { %9945 = vmatmul.mubr.msk.f32.vlgmr.msra.gmra.mrb[38].mxu0 %vm300_vm1, %v5177_v33  ;;  %11175 = vmatprep.mubr.msk.f32.mxu1 %vm300_vm1, %v5177_v33 }
0x1bdd   :  { %11176 = vmatmul.mubr.msk.f32.vlgmr.msra.gmra.mrb[60].mxu1 %vm300_vm1, %v5178_v55  ;;  %5417 = vmatprep.mubr.f32.mxu0 %v16292_v53 }
0x1bde   :  { %12322 = vmatpush1.bf16.msra.mxu1 %v13760_v63  ;;  %12402 = vmatpush3.bf16.msra.mxu0 %v13787_v31 }
0x1bdf   :  { %6196 = vperm.xlu1 %13266, %v5178_v55   ;;  %12324 = vmatprep.subr.bf16.mxu1 %v13762_v0 }
0x1be0   :  { %9946 = vmatmul.mubr.msk.f32.gmra.mrb[40].mxu0 %vm300_vm1, %v5178_v55  ;;  %12404 = vmatprep.subr.bf16.mxu0 %v13789_v36 }
0x1be2   :  { %12326 = vmatpush1.bf16.msra.mxu1 %v13766_v5  ;;  %12406 = vmatpush3.bf16.msra.mxu0 %v13795_v47 }
0x1be3   :  { %13267 = vset.pattern.permute.xlu1 %v16322_v44  ;;  %12328 = vmatprep.subr.bf16.mxu1 %v13769_v6 }
0x1be4   :  { %6186 = vperm.xlu1 %13267, %v5178_v55   ;;  %12408 = vmatprep.subr.bf16.mxu0 %v13801_v54  ;;  %v16525_v55 = vld [vmem:[#allocation33_spill] sm:$0xff] }
0x1be6   :  { %12330 = vmatpush1.bf16.msra.mxu1 %v13773_v11  ;;  %12410 = vmatpush3.bf16.msra.mxu0 %v13807_v2 }
0x1be7   :  { %12332 = vmatprep.subr.bf16.mxu1 %v13776_v12  ;;  %12412 = vmatprep.subr.bf16.mxu0 %v13813_v7 }
0x1be8   :  { %13268 = vset.pattern.permute.xlu1 %v16323_v60 }
0x1bea   :  { %12334 = vmatpush1.bf16.msra.mxu1 %v13779_v21  ;;  %12414 = vmatpush3.bf16.msra.mxu0 %v13819_v20 }
0x1beb   :  { %12336 = vmatprep.subr.bf16.mxu1 %v13784_v25  ;;  %12416 = vmatprep.subr.bf16.mxu0 %v13825_v26 }
0x1bee   :  { %12338 = vmatpush1.bf16.msra.mxu1 %v13792_v41  ;;  %12418 = vmatpush3.bf16.msra.mxu0 %v13831_v48 }
0x1bef   :  { %12340 = vmatprep.subr.bf16.mxu1 %v13798_v49  ;;  %12420 = vmatprep.subr.bf16.mxu0 %v13837_v52 }
0x1bf2   :  { %12342 = vmatpush1.bf16.msra.mxu1 %v13804_v61  ;;  %12422 = vmatpush3.bf16.msra.mxu0 %v13843_v4 }
0x1bf3   :  { %12344 = vmatprep.subr.bf16.mxu1 %v13810_v3  ;;  %12424 = vmatprep.subr.bf16.mxu0 %v13849_v10 }
0x1bf6   :  { %12346 = vmatpush1.bf16.msra.mxu1 %v16501_v30  ;;  %12426 = vmatpush3.bf16.msra.mxu0 %v16502_v13 }
0x1bf7   :  { %12348 = vmatprep.subr.bf16.mxu1 %v16503_v39  ;;  %12428 = vmatprep.subr.bf16.mxu0 %v16504_v1 }
0x1bfa   :  { %12350 = vmatpush1.bf16.msra.mxu1 %v16505_v58  ;;  %12430 = vmatpush3.bf16.msra.mxu0 %v16506_v40  ;;  %v16563_v40 = vld [vmem:[#allocation68_spill] sm:$0xff] }
0x1bfb   :  { %12352 = vmatprep.subr.bf16.mxu1 %v16507_v38  ;;  %12432 = vmatprep.subr.bf16.mxu0 %v16508_v56 }
0x1bfe   :  { %12354 = vmatpush1.bf16.msra.mxu1 %v16509_v15 }
0x1bff   :  { %12356 = vmatprep.subr.bf16.mxu1 %v16510_v24  ;;  %v16528_v24 = vld [vmem:[#allocation36_spill] sm:$0xff] }
0x1c02   :  { %12358 = vmatpush1.bf16.msra.mxu1 %v16511_v34 }
0x1c03   :  { %12360 = vmatprep.subr.bf16.mxu1 %v16512_v8 }
0x1c06   :  { %12362 = vmatpush1.bf16.msra.mxu1 %v16513_v28 }
0x1c07   :  { %12364 = vmatprep.subr.bf16.mxu1 %v16514_v14 }
0x1c0a   :  { %12366 = vmatpush1.bf16.msra.mxu1 %v16515_v18 }
0x1c0b   :  { %12368 = vmatprep.subr.bf16.mxu1 %v16516_v46 }
0x1c0e   :  { %12370 = vmatpush1.bf16.msra.mxu1 %v16517_v50  ;;  %v16526_v50 = vld [vmem:[#allocation34_spill] sm:$0xff] }
0x1c0f   :  { %12372 = vmatprep.subr.bf16.mxu1 %v16518_v37 }
0x1c12   :  { %12374 = vmatpush1.bf16.msra.mxu1 %v16519_v19 }
0x1c13   :  { %12376 = vmatprep.subr.bf16.mxu1 %v16520_v27 }
0x1c16   :  { %12378 = vmatpush1.bf16.msra.mxu1 %v16521_v32 }
0x1c17   :  { %12380 = vmatprep.subr.bf16.mxu1 %v16522_v17 }
0x1c1a   :  { %12382 = vmatpush1.bf16.msra.mxu1 %v16523_v35  ;;  %v16527_v35 = vld [vmem:[#allocation35_spill] sm:$0xff] }
0x1c1b   :  { %12384 = vmatprep.subr.bf16.mxu1 %v16524_v62 }
0x1caf   :  { %v5413_v33 = vpop.f32.mrb[38].mxu0 }
0x1cb0   :  { %v5499_v18 = vadd.f32 %v5413_v33, %v16525_v55  ;;  %v5415_v46 = vpop.f32.mrb[39].mxu0  ;;  %v11177_v14 = vpop.f32.mrb[60].mxu1 }
0x1cb1   :  { %v5500_v28 = vadd.f32 %v5415_v46, %v16526_v50  ;;  %v5490_v37 = vpop.f32.mrb[61].mxu1 }
0x1cb2   :  { %v5505_v34 = vmax.f32 %v5499_v18, 0.0  ;;  %v5501_v62 = vadd.f32 %v5490_v37, %v16527_v35  ;;  %v16530_v18 = vld [vmem:[#allocation38_spill] sm:$0xff]  ;;  %v16533_v37 = vld [vmem:[#allocation41_spill] sm:$0xff] }
0x1cb3   :  { %v5506_v8 = vmax.f32 %v5500_v28, 0.0  ;;  %v5419_v19 = vpop.f32.mrb[40].mxu0  ;;  %v16529_v28 = vld [vmem:[#allocation37_spill] sm:$0xff] }
0x1cb4   :  { %v5502_v27 = vadd.f32 %v5419_v19, %v16525_v55  ;;  %v5421_v32 = vpop.f32.mrb[41].mxu0  ;;  %v5507_v19 = vmax.f32 %v5501_v62, 0.0  ;;  %v16536_v62 = vld [vmem:[#allocation44_spill] sm:$0xff]  ;;  %v16562_v55 = vld [vmem:[#allocation67_spill] sm:$0xff] }
0x1cb5   :  { %v5503_v17 = vadd.f32 %v5421_v32, %v16526_v50  ;;  %5581 = vmatprep.mubr.f32.mxu1 %v5506_v8  ;;  %5735 = vmatprep.mubr.f32.mxu0 %v5506_v8  ;;  %v16531_v8 = vld [vmem:[#allocation39_spill] sm:$0xff]  ;;  %v5504_v32 = vadd.f32 %v11177_v14, %v16527_v35  ;;  %v16541_v14 = vld [vmem:[#allocation49_spill] sm:$0xff] }
0x1cb6   :  { %5582 = vmatmul.mubr.f32.vlgmr.msra.gmra.mrb[62].mxu1 %v5505_v34  ;;  %5736 = vmatmul.mubr.f32.vlgmr.msra.gmra.mrb[42].mxu0 %v5505_v34  ;;  %v5508_v46 = vmax.f32 %v5502_v27, 0.0  ;;  %v16532_v34 = vld [vmem:[#allocation40_spill] sm:$0xff]  ;;  %v16534_v27 = vld [vmem:[#allocation42_spill] sm:$0xff] }
0x1cb7   :  { %v5509_v33 = vmax.f32 %v5503_v17, 0.0  ;;  %12386 = vmatpush1.bf16.msra.mxu1 %v16528_v24  ;;  %12434 = vmatpush3.bf16.msra.mxu0 %v16508_v56  ;;  %v16535_v17 = vld [vmem:[#allocation43_spill] sm:$0xff] }
0x1cb8   :  { %12388 = vmatprep.subr.bf16.mxu1 %v16529_v28  ;;  %12436 = vmatprep.subr.bf16.mxu0 %v16530_v18 }
0x1cb9   :  { %5587 = vmatprep.mubr.f32.mxu1 %v5509_v33  ;;  %5740 = vmatprep.mubr.f32.mxu0 %v5509_v33  ;;  %v16537_v33 = vld [vmem:[#allocation45_spill] sm:$0xff] }
0x1cba   :  { %5588 = vmatmul.mubr.f32.gmra.mrb[64].mxu1 %v5508_v46  ;;  %5741 = vmatmul.mubr.f32.gmra.mrb[44].mxu0 %v5508_v46  ;;  %v5510_v46 = vmax.f32 %v5504_v32, 0.0  ;;  %v16542_v32 = vld [vmem:[#allocation50_spill] sm:$0xff] }
0x1cbb   :  { %12390 = vmatpush1.bf16.msra.mxu1 %v16531_v8  ;;  %12438 = vmatpush3.bf16.msra.mxu0 %v16530_v18  ;;  %v16539_v8 = vld [vmem:[#allocation47_spill] sm:$0xff] }
0x1cbc   :  { %11194 = vmatprep.mubr.msk.f32.mxu0 %vm792_vm2, %v5507_v19  ;;  %12392 = vmatprep.subr.bf16.mxu1 %v16532_v34  ;;  %v16538_v34 = vld [vmem:[#allocation46_spill] sm:$0xff] }
0x1cbd   :  { %12440 = vmatprep.subr.bf16.mxu0 %v16533_v37  ;;  %5658 = vmatprep.mubr.f32.mxu1 %v16292_v53 }
0x1cbf   :  { %12394 = vmatpush1.bf16.msra.mxu1 %v16534_v27  ;;  %12442 = vmatpush3.bf16.msra.mxu0 %v16533_v37  ;;  %v16540_v27 = vld [vmem:[#allocation48_spill] sm:$0xff] }
0x1cc0   :  { %12396 = vmatprep.subr.bf16.mxu1 %v16535_v17  ;;  %12444 = vmatprep.subr.bf16.mxu0 %v16536_v62  ;;  %v16561_v17 = vld [vmem:[#allocation66_spill] sm:$0xff] }
0x1cc3   :  { %12398 = vmatpush1.bf16.msra.mxu1 %v16537_v33  ;;  %12446 = vmatpush3.bf16.msra.mxu0 %v16536_v62  ;;  %v16547_v33 = vld [vmem:[#allocation55_spill] sm:$0xff]  ;;  %v16549_v62 = vld [vmem:[#allocation57_spill] sm:$0xff] }
0x1cc4   :  { %12448 = vmatprep.subr.bf16.mxu1 %v16538_v34  ;;  %12468 = vmatprep.subr.bf16.mxu0 %v16539_v8  ;;  %v16543_v34 = vld [vmem:[#allocation51_spill] sm:$0xff] }
0x1cc6   :  { %9950 = vmatmul.mubr.msk.f32.vlgmr.msra.gmra.mrb[62].mxu1 %vm792_vm2, %v5507_v19  ;;  %11195 = vmatmul.mubr.msk.f32.vlgmr.msra.gmra.mrb[46].mxu0 %vm792_vm2, %v5510_v46  ;;  %v16544_v19 = vld [vmem:[#allocation52_spill] sm:$0xff] }
0x1cc7   :  { %12450 = vmatpush1.bf16.msra.mxu1 %v16540_v27  ;;  %12470 = vmatpush3.bf16.msra.mxu0 %v16539_v8  ;;  %v16545_v27 = vld [vmem:[#allocation53_spill] sm:$0xff]  ;;  %v16546_v8 = vld [vmem:[#allocation54_spill] sm:$0xff] }
0x1cc8   :  { %11217 = vmatprep.mubr.msk.f32.mxu0 %vm1103_vm3, %v14975_v29  ;;  %5664 = vmatprep.mubr.f32.mxu1 %v16292_v53 }
0x1cc9   :  { %12452 = vmatprep.subr.bf16.mxu1 %v16541_v14  ;;  %12472 = vmatprep.subr.bf16.mxu0 %v16542_v32  ;;  %v16548_v14 = vld [vmem:[#allocation56_spill] sm:$0xff] }
0x1cca   :  { %9951 = vmatmul.mubr.msk.f32.gmra.mrb[64].mxu1 %vm792_vm2, %v5510_v46  ;;  %v16550_v46 = vld [vmem:[#allocation58_spill] sm:$0xff] }
0x1ccb   :  { %12454 = vmatpush1.bf16.msra.mxu1 %v16543_v34  ;;  %12474 = vmatpush3.bf16.msra.mxu0 %v16542_v32  ;;  %v16551_v34 = vld [vmem:[#allocation59_spill] sm:$0xff]  ;;  %v16553_v32 = vld [vmem:[#allocation61_spill] sm:$0xff] }
0x1ccc   :  { %12456 = vmatprep.subr.bf16.mxu1 %v16544_v19  ;;  %12476 = vmatprep.subr.bf16.mxu0 %v16545_v27  ;;  %v16552_v19 = vld [vmem:[#allocation60_spill] sm:$0xff] }
0x1ccd   :  { %5885 = vmatprep.mubr.f32.mxu1 %v16292_v53 }
0x1ccf   :  { %12458 = vmatpush1.bf16.msra.mxu1 %v16546_v8  ;;  %12478 = vmatpush3.bf16.msra.mxu0 %v16545_v27  ;;  %v16554_v8 = vld [vmem:[#allocation6_spill] sm:$0xff] }
0x1cd0   :  { %12460 = vmatprep.subr.bf16.mxu1 %v16547_v33  ;;  %12480 = vmatprep.subr.bf16.mxu0 %v16548_v14 }
0x1cd3   :  { %12462 = vmatpush1.bf16.msra.mxu1 %v16549_v62  ;;  %12482 = vmatpush3.bf16.msra.mxu0 %v16548_v14  ;;  %v16560_v62 = vld [vmem:[#allocation65_spill] sm:$0xff] }
0x1cd4   :  { %12464 = vmatprep.subr.bf16.mxu1 %v16550_v46  ;;  %12484 = vmatprep.subr.bf16.mxu0 %v16551_v34  ;;  %v16555_v46 = vld [vmem:[#allocation62_spill] sm:$0xff] }
0x1cd7   :  { %12466 = vmatpush1.bf16.msra.mxu1 %v16552_v19  ;;  %12486 = vmatpush3.bf16.msra.mxu0 %v16551_v34  ;;  %v16556_v19 = vld [vmem:[#allocation5_spill] sm:$0xff]  ;;  %v16557_v34 = vld [vmem:[#allocation8_spill] sm:$0xff] }
0x1cd8   :  { %12488 = vmatprep.subr.bf16.mxu0 %v16553_v32  ;;  %9975 = vmatprep.subr.msk.mxu1 %vm307_vm0, %v16554_v8  ;;  %v16558_v8 = vld [vmem:[#allocation63_spill] sm:$0xff] }
0x1cda   :  { %9954 = vmatmul.mubr.msk.f32.vlgmr.msra.gmra.mrb[62].mxu1 %vm1103_vm3, %v14975_v29  ;;  %11218 = vmatmul.mubr.msk.f32.vlgmr.msra.gmra.mrb[48].mxu0 %vm1103_vm3, %v14980_v16 }
0x1cdb   :  { %5891 = vmatprep.mubr.f32.mxu1 %v16292_v53  ;;  %12490 = vmatpush3.bf16.msra.mxu0 %v16553_v32  ;;  %v16559_v32 = vld [vmem:[#allocation64_spill] sm:$0xff] }
0x1cdc   :  { %12492 = vmatprep.subr.bf16.mxu0 %v16555_v46  ;;  %9976 = vmatpush1.msk.msra.mxu1 %vm307_vm0, %v16556_v19 }
0x1cdd   :  { %9982 = vmatprep.subr.msk.mxu1 %vm307_vm0, %v16557_v34 }
0x1cde   :  { %9955 = vmatmul.mubr.msk.f32.gmra.mrb[64].mxu1 %vm1103_vm3, %v14980_v16 }
0x1cdf   :  { %12494 = vmatpush3.bf16.msra.mxu0 %v16555_v46  ;;  %6431 = vmatprep.mubr.f32.mxu1 %v16292_v53 }
0x1ce0   :  { %12496 = vmatprep.subr.bf16.mxu0 %v16558_v8 }
0x1ce3   :  { %12498 = vmatpush3.bf16.msra.mxu0 %v16558_v8 }
0x1ce4   :  { %12500 = vmatprep.subr.bf16.mxu0 %v16559_v32 }
0x1ce7   :  { %12502 = vmatpush3.bf16.msra.mxu0 %v16559_v32 }
0x1ce8   :  { %12504 = vmatprep.subr.bf16.mxu0 %v16560_v62 }
0x1ceb   :  { %12506 = vmatpush3.bf16.msra.mxu0 %v16560_v62 }
0x1cec   :  { %12508 = vmatprep.subr.bf16.mxu0 %v14198_v9 }
0x1d89   :  { %v10480_v34 = vpop.f32.mrb[42].mxu0 }
0x1d8a   :  { %v10481_v19 = vpop.f32.mrb[43].mxu0 }
0x1d8b   :  { %v10482_v14 = vadd.f32 %v10481_v19, %v10480_v34 }
0x1d8d   :  { %v10483_v46 = vpop.f32.mrb[44].mxu0  ;;  %v5738_v8 = vadd.f32 %v10482_v14, %v16561_v17 }
0x1d8e   :  { %v10484_v33 = vpop.f32.mrb[45].mxu0 }
0x1d8f   :  { %v10485_v27 = vadd.f32 %v10484_v33, %v10483_v46 }
0x1d91   :  { %v5743_v37 = vadd.f32 %v10485_v27, %v16561_v17 }
0x1d99   :  { %v11196_v18 = vpop.f32.mrb[46].mxu0 }
0x1d9a   :  { %v5818_v28 = vadd.f32 %v11196_v18, %v5743_v37  ;;  %v5812_v24 = vpop.f32.mrb[47].mxu0 }
0x1d9b   :  { %v5813_v32 = vadd.f32 %v5812_v24, %v5738_v8 }
0x1dad   :  { %v5887_v35 = vpop.f32.mrb[62].mxu1  ;;  %v11219_v50 = vpop.f32.mrb[48].mxu0 }
0x1dae   :  { %v13119_v62 = vadd.f32 %v5887_v35, %v16562_v55  ;;  %v5889_v15 = vpop.f32.mrb[63].mxu1  ;;  %v5964_v56 = vpop.f32.mrb[49].mxu0 }
0x1daf   :  { %v13120_v34 = vadd.f32 %v5889_v15, %v16563_v40 }
0x1db0   :  { %v9958_v38 = vmul.f32 -1.442695, %v13119_v62 }
0x1db1   :  { %v5893_v19 = vpop.f32.mrb[64].mxu1  ;;  %v9960_v18 = vmul.f32 -1.442695, %v13120_v34 }
0x1db2   :  { %13397 = vpow2.f32 %v9958_v38  ;;  %v13121_v33 = vadd.f32 %v5893_v19, %v16562_v55  ;;  %v5895_v27 = vpop.f32.mrb[65].mxu1  ;;  %v15205_v19 = vld [vmem:[%s15975_s11] ss:$0 sm:$0xff] }
0x1db3   :  { %v13122_v14 = vadd.f32 %v5895_v27, %v16563_v40  ;;  %v6001_v34 = vadd.f32 %v15205_v19, %v5964_v56 }
0x1db4   :  { %v9959_v46 = vmul.f32 -1.442695, %v13121_v33 }
0x1db5   :  { %v9961_v24 = vmul.f32 -1.442695, %v13122_v14  ;;  %v6002_v14 = vadd.f32 %v15205_v19, %v11219_v50 }
0x1db6   :  { %13399 = vpow2.f32 %v9959_v46 }
0x1db7   :  { %13401 = vpow2.f32 %v9960_v18 }
0x1db8   :  { %13403 = vpow2.f32 %v9961_v24 }
0x1dbc   :  { %v13398_v8 = vpop.eup %13397 }
0x1dbd   :  { %v5981_v35 = vadd.f32 1.0, %v13398_v8 }
0x1dbf   :  { %13405 = vrcp.f32 %v5981_v35 }
0x1dc0   :  { %v13400_v37 = vpop.eup %13399 }
0x1dc1   :  { %v5982_v62 = vadd.f32 1.0, %v13400_v37  ;;  %v13402_v17 = vpop.eup %13401 }
0x1dc2   :  { %v13404_v15 = vpop.eup %13403  ;;  %v5995_v38 = vadd.f32 1.0, %v13402_v17 }
0x1dc3   :  { %13407 = vrcp.f32 %v5982_v62  ;;  %v5996_v27 = vadd.f32 1.0, %v13404_v15 }
0x1dc4   :  { %13409 = vrcp.f32 %v5995_v38 }
0x1dc5   :  { %13411 = vrcp.f32 %v5996_v27 }
0x1dc9   :  { %v13406_v33 = vpop.eup %13405 }
0x1dca   :  { %v6003_v46 = vmul.f32 %v13406_v33, %v6001_v34 }
0x1dcc   :  { %v6005_v18 = vadd.f32 %v6003_v46, %v5813_v32 }
0x1dcd   :  { %v13408_v24 = vpop.eup %13407 }
0x1dce   :  { %13413 = vtanh.f32 %v6005_v18  ;;  %v6004_v8 = vmul.f32 %v13408_v24, %v6002_v14  ;;  %v13410_v17 = vpop.eup %13409  ;;  %v6193_v14 = vpop.permute.xlu1 %6192  ;;  %v15252_v24 = vld [vmem:[%s15979_s15] ss:$0 sm:$0xff] }
0x1dcf   :  { %v13412_v37 = vpop.eup %13411  ;;  %v6009_v62 = vsub.f32 1.0, %v13410_v17  ;;  %v6013_v56 = vmul.f32 %v13410_v17, %v14975_v29  ;;  %v15225_v29 = vld [vmem:[%s15978_s14 + $0x20] sm:$0xff] }
0x1dd0   :  { %v6006_v35 = vadd.f32 %v6004_v8, %v5818_v28  ;;  %v6010_v58 = vsub.f32 1.0, %v13412_v37  ;;  %v6014_v32 = vmul.f32 %v13412_v37, %v14980_v16  ;;  %v15232_v16 = vld [vmem:[%s15968_s4] sm:$0x3] }
0x1dd2   :  { %13415 = vtanh.f32 %v6006_v35  ;;  %v6197_v17 = vpop.permute.xlu1 %6196 }
0x1dd8   :  { %v13414_v40 = vpop.eup %13413 }
0x1dd9   :  { %v6011_v55 = vmul.f32 %v13414_v40, %v6009_v62  ;;  %v15239_v40 = vld [vmem:[%s15977_s13] ss:$0 sm:$0xff] }
0x1ddb   :  { %v15210_v15 = vadd.f32 %v6013_v56, %v6011_v55 }
0x1ddc   :  { %v13416_v38 = vpop.eup %13415 }
0x1ddd   :  { %11240 = vmatprep.mubr.msk.f32.mxu0 %vm1103_vm3, %v15210_v15  ;;  %v6012_v50 = vmul.f32 %v13416_v38, %v6010_v58  ;;  %v6187_v38 = vpop.permute.xlu1 %6186 }
0x1ddf   :  { %v15215_v34 = vadd.f32 %v6014_v32, %v6012_v50  ;;  %v6183_v50 = vpop.permute.xlu0 %6182 }
0x1de1   :  { %11241 = vmatmul.mubr.msk.f32.vlgmr.msra.gmra.mrb[50].mxu0 %vm1103_vm3, %v15215_v34 }
0x1de2   :  { %12510 = vmatpush3.bf16.msra.mxu0 %v14198_v9 }
0x1de3   :  { %12512 = vmatprep.subr.bf16.mxu0 %v14246_v57 }
0x1de6   :  { %12514 = vmatpush3.bf16.msra.mxu0 %v14246_v57 }
0x1de7   :  { %11251 = vmatprep.subr.mxu0 %v15225_v29 }
0x1dea   :  { %11252 = vmatpush3.msra.mxu0 %v15225_v29 }
0x1deb   :  { %11256 = vmatprep.subr.msk.mxu0 %vm307_vm0, %v15232_v16 }
0x1eb4   :  { %v11242_v58 = vpop.f32.mrb[50].mxu0 }
0x1eb5   :  { %v6095_v55 = vadd.f32 %v15239_v40, %v11242_v58  ;;  %v6089_v28 = vpop.f32.mrb[51].mxu0 }
0x1eb6   :  { %v6090_v33 = vadd.f32 %v15239_v40, %v6089_v28 }
0x1eb7   :  { %v6099_v46 = vmax.f32 %v6095_v55, 0.0 }
0x1eb8   :  { %v6098_v27 = vmax.f32 %v6090_v33, 0.0 }
0x1eba   :  { %11253 = vmatprep.mubr.msk.f32.mxu0 %vm1389_vm4, %v6098_v27 }
0x1ebb   :  { %11254 = vmatmul.mubr.msk.f32.vlgmr.msra.gmra.mrb[52].mxu0 %vm1389_vm4, %v6099_v46 }
0x1ebc   :  { %11257 = vmatpush3.msk.msra.mxu0 %vm307_vm0, %v15232_v16 }
0x1ebd   :  { %11261 = vmatprep.subr.msk.mxu0 %vm307_vm0, %v16379_v22 }
0x1f8e   :  { %v11255_v18 = vpop.f32.mrb[52].mxu0 }
0x1f8f   :  { %v6178_v8 = vadd.f32 %v15252_v24, %v11255_v18  ;;  %v6172_v35 = vpop.f32.mrb[53].mxu0 }
0x1f90   :  { %v6173_v37 = vadd.f32 %v15252_v24, %v6172_v35 }
0x1f91   :  { %v6200_v62 = vmul.f32 %v6197_v17, %v6178_v8  ;;  %v6190_v32 = vmul.f32 %v6187_v38, %v6178_v8 }
0x1f92   :  { %v6199_v56 = vmul.f32 %v6193_v14, %v6173_v37  ;;  %v6189_v55 = vmul.f32 %v6183_v50, %v6173_v37 }
0x1f93   :  { %6205 = vrot.lane.b32.xlu1 %v6200_v62, %s13548_s30 }
0x1f94   :  { %6203 = vrot.lane.b32.xlu0 %v6199_v56, %s13548_s30 }
0x2005   :  { %v6206_v58 = vpop.permute.xlu1 %6205 }
0x2006   :  { %v6210_v28 = vadd.f32 %v6206_v58, %v6190_v32  ;;  %v6204_v33 = vpop.permute.xlu0 %6203 }
0x2007   :  { %v6209_v27 = vadd.f32 %v6204_v33, %v6189_v55 }
0x2008   :  { %6215 = vrot.lane.b32.xlu1 %v6210_v28, %s13549_s18 }
0x2009   :  { %6213 = vrot.lane.b32.xlu0 %v6209_v27, %s13549_s18  ;;  %v9971_v27 = vld [vmem:[%s16251_s20 + $0x58] sm:$0xff] }
0x207a   :  { %v6216_v46 = vpop.permute.xlu1 %6215 }
0x207b   :  { %v6220_v18 = vadd.f32 %v15036_v43, %v6216_v46  ;;  %v6214_v14 = vpop.permute.xlu0 %6213  ;;  %v9970_v46 = vld [vmem:[%s16251_s20 + $0x50] sm:$0xff] }
0x207c   :  { %v6219_v35 = vadd.f32 %v6214_v14, %v15043_v51 }
0x207d   :  { %v6318_v17 = vsub.f32 %v6220_v18, %v15036_v43  ;;  %6225 = vrot.lane.b32.xlu1 %v6220_v18, %s13548_s30 }
0x207e   :  { %v6317_v8 = vsub.f32 %v6219_v35, %v15043_v51  ;;  %6223 = vrot.lane.b32.xlu0 %v6219_v35, %s13548_s30 }
0x207f   :  { %v6320_v37 = vmul.f32 %v6318_v17, %v6318_v17 }
0x2080   :  { %v6319_v62 = vmul.f32 %v6317_v8, %v6317_v8 }
0x2081   :  { %6325 = vrot.lane.b32.xlu1 %v6320_v37, %s13548_s30 }
0x2082   :  { %6323 = vrot.lane.b32.xlu0 %v6319_v62, %s13548_s30 }
0x20ef   :  { %v6226_v56 = vpop.permute.xlu1 %6225 }
0x20f0   :  { %9967 = vst.msk [vmem:[%s15980_s16 + $0x48] sm:$0xff] %vm300_vm1, %v6226_v56  ;;  %v6224_v38 = vpop.permute.xlu0 %6223 }
0x20f1   :  { %9966 = vst.msk [vmem:[%s15980_s16 + $0x40] sm:$0xff] %vm300_vm1, %v6224_v38  ;;  %11258 = vmatprep.mubr.msk.f32.mxu0 %vm300_vm1, %v6224_v38 }
0x20f2   :  { %11259 = vmatmul.mubr.msk.f32.vlgmr.msra.gmra.mrb[54].mxu0 %vm300_vm1, %v6226_v56 }
0x20f3   :  { %v6326_v43 = vpop.permute.xlu1 %6325  ;;  %11262 = vmatpush3.msk.msra.mxu0 %vm307_vm0, %v16379_v22 }
0x20f4   :  { %v6324_v51 = vpop.permute.xlu0 %6323  ;;  %v6332_v50 = vsel %vm300_vm1, %v6326_v43, 0.0  ;;  %11266 = vmatprep.subr.msk.mxu0 %vm307_vm0, %v13733_v45 }
0x20f5   :  { %6333 = vadd.xlane.f32.xlu1 %v6332_v50  ;;  %v6329_v32 = vsel %vm300_vm1, %v6324_v51, 0.0 }
0x20f6   :  { %6330 = vadd.xlane.f32.xlu0 %v6329_v32 }
0x2182   :  { %v6334_v43 = vpop.xlane.xlu1 %6333 }
0x2183   :  { %v6331_v58 = vpop.xlane.xlu0 %6330  ;;  %v6336_v51 = vmax.f32 %v6334_v43, 1e-24  ;;  %v16567_v43 = vld [vmem:[#allocation32_spill] sm:$0xff] }
0x2184   :  { %v6335_v55 = vmax.f32 %v6331_v58, 1e-24 }
0x2186   :  { %13417 = vrsqrt.f32 %v6335_v55 }
0x2187   :  { %13419 = vrsqrt.f32 %v6336_v51  ;;  %v16568_v51 = vld [vmem:[#allocation13_spill] sm:$0xff] }
0x2190   :  { %v13418_v28 = vpop.eup %13417 }
0x2191   :  { %v6339_v33 = vmul.f32 %v13418_v28, %v6317_v8  ;;  %v13420_v50 = vpop.eup %13419 }
0x2192   :  { %v6340_v32 = vmul.f32 %v13420_v50, %v6318_v17  ;;  %v16569_v50 = vld [vmem:[#allocation14_spill] sm:$0xff] }
0x2193   :  { %6359 = vrot.lane.b32.xlu1 %v6339_v33, %s13548_s30 }
0x21c5   :  { %v15291_v18 = vpop.f32.mrb[54].mxu0 }
0x21c6   :  { %10008 = vst.msk [vmem:[%s15981_s17 + $0x58] sm:$0xff] %vm300_vm1, %v15291_v18  ;;  %v15298_v14 = vpop.f32.mrb[55].mxu0  ;;  %v6342_v35 = vsub.f32 %v9971_v27, %v15291_v18 }
0x21c7   :  { %10007 = vst.msk [vmem:[%s15981_s17 + $0x50] sm:$0xff] %vm300_vm1, %v15298_v14  ;;  %v6341_v8 = vsub.f32 %v9970_v46, %v15298_v14 }
0x21c8   :  { %v6344_v37 = vmul.f32 %v6342_v35, %v6342_v35 }
0x21c9   :  { %v6343_v56 = vmul.f32 %v6341_v8, %v6341_v8 }
0x21ca   :  { %v6348_v62 = vsel %vm300_vm1, %v6344_v37, 0.0 }
0x21cb   :  { %6349 = vadd.xlane.f32.xlu0 %v6348_v62  ;;  %v6345_v38 = vsel %vm300_vm1, %v6343_v56, 0.0 }
0x21cf   :  { %6346 = vadd.xlane.f32.xlu0 %v6345_v38  ;;  %v16566_v38 = vld [vmem:[#allocation12_spill] sm:$0xff] }
0x21e5   :  { %6361 = vrot.lane.b32.xlu0 %v6340_v32, %s13548_s30  ;;  %v16570_v32 = vld [vmem:[#allocation15_spill] sm:$0xff] }
0x2205   :  { %v6360_v58 = vpop.permute.xlu1 %6359 }
0x2206   :  { %9977 = vmatmul.mubr.msk.f32.vlgmr.msra.gmra.mrb[66].mxu1 %vm300_vm1, %v6360_v58  ;;  %11263 = vmatprep.mubr.msk.f32.mxu0 %vm300_vm1, %v6360_v58  ;;  %v16571_v58 = vld [vmem:[#allocation17_spill] sm:$0xff] }
0x2207   :  { %6437 = vmatprep.mubr.f32.mxu1 %v16292_v53  ;;  %9983 = vmatpush1.msk.msra.mxu1 %vm307_vm0, %v13726_v42 }
0x2208   :  { %12596 = vmatprep.subr.bf16.mxu1 %v13781_v23 }
0x2258   :  { %v6350_v55 = vpop.xlane.xlu0 %6349 }
0x2259   :  { %v6352_v28 = vmax.f32 %v6350_v55, 1e-24  ;;  %v16572_v55 = vld [vmem:[#allocation18_spill] sm:$0xff] }
0x225b   :  { %13421 = vrsqrt.f32 %v6352_v28  ;;  %v16573_v28 = vld [vmem:[#allocation19_spill] sm:$0xff] }
0x225c   :  { %v6347_v33 = vpop.xlane.xlu0 %6346 }
0x225d   :  { %v6351_v27 = vmax.f32 %v6347_v33, 1e-24  ;;  %v16574_v33 = vld [vmem:[#allocation20_spill] sm:$0xff] }
0x225f   :  { %13423 = vrsqrt.f32 %v6351_v27  ;;  %v16575_v27 = vld [vmem:[#allocation21_spill] sm:$0xff] }
0x2260   :  { %v6362_v17 = vpop.permute.xlu0 %6361 }
0x2261   :  { %9978 = vmatmul.mubr.msk.f32.gmra.mrb[68].mxu1 %vm300_vm1, %v6362_v17  ;;  %11264 = vmatmul.mubr.msk.f32.vlgmr.msra.gmra.mrb[56].mxu0 %vm300_vm1, %v6362_v17  ;;  %v16576_v17 = vld [vmem:[#allocation22_spill] sm:$0xff] }
0x2262   :  { %6589 = vmatprep.mubr.f32.mxu1 %v16292_v53  ;;  %11267 = vmatpush3.msk.msra.mxu0 %vm307_vm0, %v13733_v45 }
0x2263   :  { %12516 = vmatprep.subr.bf16.mxu0 %v13758_v59 }
0x2265   :  { %v13422_v46 = vpop.eup %13421 }
0x2266   :  { %v6356_v56 = vmul.f32 %v13422_v46, %v6342_v35  ;;  %v16564_v35 = vld [vmem:[#allocation11_spill] sm:$0xff] }
0x2267   :  { %v16577_v46 = vld [vmem:[#allocation23_spill] sm:$0xff] }
0x2269   :  { %v13424_v37 = vpop.eup %13423 }
0x226a   :  { %v6355_v62 = vmul.f32 %v13424_v37, %v6341_v8  ;;  %v16565_v8 = vld [vmem:[#allocation30_spill] sm:$0xff]  ;;  %v16578_v37 = vld [vmem:[#allocation24_spill] sm:$0xff] }
0x226c   :  { %7370 = vperm.xlu1 %13268, %v6355_v62   ;;  %7360 = vperm.xlu0 %13261, %v6355_v62  }
0x226d   :  { %9984 = vmatmul.mubr.msk.f32.vlgmr.msra.gmra.mrb[66].mxu1 %vm300_vm1, %v6355_v62  ;;  %11268 = vmatprep.mubr.msk.f32.mxu0 %vm300_vm1, %v6355_v62  ;;  %v16579_v62 = vld [vmem:[#allocation25_spill] sm:$0xff] }
0x226e   :  { %11269 = vmatmul.mubr.msk.f32.vlgmr.msra.gmra.mrb[56].mxu0 %vm300_vm1, %v6356_v56  ;;  %6595 = vmatprep.mubr.f32.mxu1 %v16292_v53 }
0x226f   :  { %12518 = vmatpush1.bf16.msra.mxu0 %v13760_v63  ;;  %12598 = vmatpush3.bf16.msra.mxu1 %v13787_v31 }
0x2270   :  { %7374 = vperm.xlu1 %13268, %v6356_v56   ;;  %12520 = vmatprep.subr.bf16.mxu0 %v13762_v0 }
0x2271   :  { %9985 = vmatmul.mubr.msk.f32.gmra.mrb[68].mxu1 %vm300_vm1, %v6356_v56  ;;  %12600 = vmatprep.subr.bf16.mxu1 %v13789_v36 }
0x2273   :  { %12522 = vmatpush1.bf16.msra.mxu0 %v13766_v5  ;;  %12602 = vmatpush3.bf16.msra.mxu1 %v13795_v47 }
0x2274   :  { %13269 = vset.pattern.permute.xlu1 %v16322_v44  ;;  %12524 = vmatprep.subr.bf16.mxu0 %v13769_v6 }
0x2275   :  { %7364 = vperm.xlu1 %13269, %v6356_v56   ;;  %12604 = vmatprep.subr.bf16.mxu1 %v13801_v54  ;;  %v16580_v56 = vld [vmem:[#allocation26_spill] sm:$0xff] }
0x2277   :  { %12526 = vmatpush1.bf16.msra.mxu0 %v13773_v11  ;;  %12606 = vmatpush3.bf16.msra.mxu1 %v13807_v2 }
0x2278   :  { %12528 = vmatprep.subr.bf16.mxu0 %v13776_v12  ;;  %12608 = vmatprep.subr.bf16.mxu1 %v13813_v7 }
0x2279   :  { %13270 = vset.pattern.permute.xlu1 %v16323_v60 }
0x227b   :  { %12530 = vmatpush1.bf16.msra.mxu0 %v13779_v21  ;;  %12610 = vmatpush3.bf16.msra.mxu1 %v13819_v20 }
0x227c   :  { %12532 = vmatprep.subr.bf16.mxu0 %v13784_v25  ;;  %12612 = vmatprep.subr.bf16.mxu1 %v13825_v26 }
0x227f   :  { %12534 = vmatpush1.bf16.msra.mxu0 %v13792_v41  ;;  %12614 = vmatpush3.bf16.msra.mxu1 %v13831_v48 }
0x2280   :  { %12536 = vmatprep.subr.bf16.mxu0 %v13798_v49  ;;  %12616 = vmatprep.subr.bf16.mxu1 %v13837_v52 }
0x2283   :  { %12538 = vmatpush1.bf16.msra.mxu0 %v13804_v61  ;;  %12618 = vmatpush3.bf16.msra.mxu1 %v13843_v4 }
0x2284   :  { %12540 = vmatprep.subr.bf16.mxu0 %v13810_v3  ;;  %12620 = vmatprep.subr.bf16.mxu1 %v13849_v10 }
0x2287   :  { %12542 = vmatpush1.bf16.msra.mxu0 %v16501_v30  ;;  %12622 = vmatpush3.bf16.msra.mxu1 %v16502_v13  ;;  %v16622_v30 = vld [vmem:[#allocation68_spill] sm:$0xff] }
0x2288   :  { %12544 = vmatprep.subr.bf16.mxu0 %v16503_v39  ;;  %12624 = vmatprep.subr.bf16.mxu1 %v16504_v1  ;;  %v16587_v1 = vld [vmem:[#allocation36_spill] sm:$0xff] }
0x228b   :  { %12546 = vmatpush1.bf16.msra.mxu0 %v16564_v35  ;;  %12626 = vmatpush3.bf16.msra.mxu1 %v16565_v8 }
0x228c   :  { %12548 = vmatprep.subr.bf16.mxu0 %v16566_v38  ;;  %12628 = vmatprep.subr.bf16.mxu1 %v16567_v43 }
0x228f   :  { %12550 = vmatpush1.bf16.msra.mxu0 %v16568_v51 }
0x2290   :  { %12552 = vmatprep.subr.bf16.mxu0 %v16569_v50 }
0x2293   :  { %12554 = vmatpush1.bf16.msra.mxu0 %v16570_v32  ;;  %v16581_v32 = vld [vmem:[#allocation27_spill] sm:$0xff] }
0x2294   :  { %12556 = vmatprep.subr.bf16.mxu0 %v16571_v58  ;;  %v16582_v58 = vld [vmem:[#allocation29_spill] sm:$0xff] }
0x2297   :  { %12558 = vmatpush1.bf16.msra.mxu0 %v16572_v55  ;;  %v16583_v55 = vld [vmem:[#allocation31_spill] sm:$0xff] }
0x2298   :  { %12560 = vmatprep.subr.bf16.mxu0 %v16573_v28 }
0x229b   :  { %12562 = vmatpush1.bf16.msra.mxu0 %v16574_v33  ;;  %v16584_v33 = vld [vmem:[#allocation33_spill] sm:$0xff] }
0x229c   :  { %12564 = vmatprep.subr.bf16.mxu0 %v16575_v27 }
0x229f   :  { %12566 = vmatpush1.bf16.msra.mxu0 %v16576_v17  ;;  %v16585_v17 = vld [vmem:[#allocation34_spill] sm:$0xff] }
0x22a0   :  { %12568 = vmatprep.subr.bf16.mxu0 %v16577_v46 }
0x22a3   :  { %12570 = vmatpush1.bf16.msra.mxu0 %v16578_v37 }
0x22a4   :  { %12572 = vmatprep.subr.bf16.mxu0 %v16579_v62 }
0x22a7   :  { %12574 = vmatpush1.bf16.msra.mxu0 %v16580_v56 }
0x22a8   :  { %12576 = vmatprep.subr.bf16.mxu0 %v16581_v32 }
0x22ab   :  { %12578 = vmatpush1.bf16.msra.mxu0 %v16582_v58  ;;  %v16586_v58 = vld [vmem:[#allocation35_spill] sm:$0xff] }
0x22ac   :  { %12580 = vmatprep.subr.bf16.mxu0 %v16583_v55 }
0x2340   :  { %v6591_v28 = vpop.f32.mrb[66].mxu1 }
0x2341   :  { %v6677_v50 = vadd.f32 %v6591_v28, %v16584_v33  ;;  %v6593_v27 = vpop.f32.mrb[67].mxu1  ;;  %v11270_v51 = vpop.f32.mrb[56].mxu0 }
0x2342   :  { %v6678_v38 = vadd.f32 %v6593_v27, %v16585_v17  ;;  %v6668_v46 = vpop.f32.mrb[57].mxu0 }
0x2343   :  { %v6683_v35 = vmax.f32 %v6677_v50, 0.0  ;;  %v6679_v55 = vadd.f32 %v6668_v46, %v16586_v58  ;;  %v16589_v50 = vld [vmem:[#allocation38_spill] sm:$0xff] }
0x2344   :  { %v6684_v8 = vmax.f32 %v6678_v38, 0.0  ;;  %v6597_v37 = vpop.f32.mrb[68].mxu1  ;;  %v16588_v38 = vld [vmem:[#allocation37_spill] sm:$0xff]  ;;  %v16593_v46 = vld [vmem:[#allocation42_spill] sm:$0xff] }
0x2345   :  { %v6680_v62 = vadd.f32 %v6597_v37, %v16584_v33  ;;  %v6599_v56 = vpop.f32.mrb[69].mxu1  ;;  %v6685_v37 = vmax.f32 %v6679_v55, 0.0  ;;  %v6682_v55 = vadd.f32 %v11270_v51, %v16586_v58  ;;  %v16600_v51 = vld [vmem:[#allocation49_spill] sm:$0xff]  ;;  %v16621_v33 = vld [vmem:[#allocation67_spill] sm:$0xff] }
0x2346   :  { %v6681_v32 = vadd.f32 %v6599_v56, %v16585_v17  ;;  %6759 = vmatprep.mubr.f32.mxu0 %v6684_v8  ;;  %6913 = vmatprep.mubr.f32.mxu1 %v6684_v8  ;;  %v16590_v8 = vld [vmem:[#allocation39_spill] sm:$0xff]  ;;  %v16595_v56 = vld [vmem:[#allocation44_spill] sm:$0xff] }
0x2347   :  { %6760 = vmatmul.mubr.f32.vlgmr.msra.gmra.mrb[58].mxu0 %v6683_v35  ;;  %6914 = vmatmul.mubr.f32.vlgmr.msra.gmra.mrb[70].mxu1 %v6683_v35  ;;  %v6686_v27 = vmax.f32 %v6680_v62, 0.0  ;;  %v16591_v35 = vld [vmem:[#allocation40_spill] sm:$0xff]  ;;  %v16594_v62 = vld [vmem:[#allocation43_spill] sm:$0xff] }
0x2348   :  { %v6687_v28 = vmax.f32 %v6681_v32, 0.0  ;;  %12582 = vmatpush1.bf16.msra.mxu0 %v16587_v1  ;;  %12630 = vmatpush3.bf16.msra.mxu1 %v16567_v43  ;;  %v16592_v32 = vld [vmem:[#allocation41_spill] sm:$0xff] }
0x2349   :  { %12584 = vmatprep.subr.bf16.mxu0 %v16588_v38  ;;  %12632 = vmatprep.subr.bf16.mxu1 %v16589_v50 }
0x234a   :  { %6765 = vmatprep.mubr.f32.mxu0 %v6687_v28  ;;  %6918 = vmatprep.mubr.f32.mxu1 %v6687_v28  ;;  %v16596_v28 = vld [vmem:[#allocation45_spill] sm:$0xff] }
0x234b   :  { %6766 = vmatmul.mubr.f32.gmra.mrb[60].mxu0 %v6686_v27  ;;  %6919 = vmatmul.mubr.f32.gmra.mrb[72].mxu1 %v6686_v27  ;;  %v6688_v27 = vmax.f32 %v6682_v55, 0.0  ;;  %v16601_v55 = vld [vmem:[#allocation50_spill] sm:$0xff] }
0x234c   :  { %12586 = vmatpush1.bf16.msra.mxu0 %v16590_v8  ;;  %12634 = vmatpush3.bf16.msra.mxu1 %v16589_v50  ;;  %v16598_v8 = vld [vmem:[#allocation47_spill] sm:$0xff] }
0x234d   :  { %11287 = vmatprep.mubr.msk.f32.mxu1 %vm792_vm2, %v6685_v37  ;;  %12588 = vmatprep.subr.bf16.mxu0 %v16591_v35  ;;  %v16597_v35 = vld [vmem:[#allocation46_spill] sm:$0xff] }
0x234e   :  { %12636 = vmatprep.subr.bf16.mxu1 %v16592_v32  ;;  %6836 = vmatprep.mubr.f32.mxu0 %v16292_v53 }
0x2350   :  { %12590 = vmatpush1.bf16.msra.mxu0 %v16593_v46  ;;  %12638 = vmatpush3.bf16.msra.mxu1 %v16592_v32  ;;  %v16599_v46 = vld [vmem:[#allocation48_spill] sm:$0xff] }
0x2351   :  { %12592 = vmatprep.subr.bf16.mxu0 %v16594_v62  ;;  %12640 = vmatprep.subr.bf16.mxu1 %v16595_v56  ;;  %v16620_v62 = vld [vmem:[#allocation66_spill] sm:$0xff] }
0x2354   :  { %12594 = vmatpush1.bf16.msra.mxu0 %v16596_v28  ;;  %12642 = vmatpush3.bf16.msra.mxu1 %v16595_v56  ;;  %v16606_v28 = vld [vmem:[#allocation55_spill] sm:$0xff]  ;;  %v16608_v56 = vld [vmem:[#allocation57_spill] sm:$0xff] }
0x2355   :  { %12644 = vmatprep.subr.bf16.mxu0 %v16597_v35  ;;  %12664 = vmatprep.subr.bf16.mxu1 %v16598_v8  ;;  %v16602_v35 = vld [vmem:[#allocation51_spill] sm:$0xff] }
0x2357   :  { %9989 = vmatmul.mubr.msk.f32.vlgmr.msra.gmra.mrb[58].mxu0 %vm792_vm2, %v6685_v37  ;;  %11288 = vmatmul.mubr.msk.f32.vlgmr.msra.gmra.mrb[74].mxu1 %vm792_vm2, %v6688_v27  ;;  %v16603_v37 = vld [vmem:[#allocation52_spill] sm:$0xff] }
0x2358   :  { %12646 = vmatpush1.bf16.msra.mxu0 %v16599_v46  ;;  %12666 = vmatpush3.bf16.msra.mxu1 %v16598_v8  ;;  %v16604_v46 = vld [vmem:[#allocation53_spill] sm:$0xff]  ;;  %v16605_v8 = vld [vmem:[#allocation54_spill] sm:$0xff] }
0x2359   :  { %11310 = vmatprep.mubr.msk.f32.mxu1 %vm1103_vm3, %v15210_v15  ;;  %6842 = vmatprep.mubr.f32.mxu0 %v16292_v53 }
0x235a   :  { %12648 = vmatprep.subr.bf16.mxu0 %v16600_v51  ;;  %12668 = vmatprep.subr.bf16.mxu1 %v16601_v55  ;;  %v16607_v51 = vld [vmem:[#allocation56_spill] sm:$0xff] }
0x235b   :  { %9990 = vmatmul.mubr.msk.f32.gmra.mrb[60].mxu0 %vm792_vm2, %v6688_v27  ;;  %v16609_v27 = vld [vmem:[#allocation58_spill] sm:$0xff] }
0x235c   :  { %12650 = vmatpush1.bf16.msra.mxu0 %v16602_v35  ;;  %12670 = vmatpush3.bf16.msra.mxu1 %v16601_v55  ;;  %v16610_v35 = vld [vmem:[#allocation59_spill] sm:$0xff]  ;;  %v16612_v55 = vld [vmem:[#allocation61_spill] sm:$0xff] }
0x235d   :  { %12652 = vmatprep.subr.bf16.mxu0 %v16603_v37  ;;  %12672 = vmatprep.subr.bf16.mxu1 %v16604_v46  ;;  %v16611_v37 = vld [vmem:[#allocation60_spill] sm:$0xff] }
0x235e   :  { %7063 = vmatprep.mubr.f32.mxu0 %v16292_v53 }
0x2360   :  { %12654 = vmatpush1.bf16.msra.mxu0 %v16605_v8  ;;  %12674 = vmatpush3.bf16.msra.mxu1 %v16604_v46  ;;  %v16613_v8 = vld [vmem:[#allocation6_spill] sm:$0xff] }
0x2361   :  { %12656 = vmatprep.subr.bf16.mxu0 %v16606_v28  ;;  %12676 = vmatprep.subr.bf16.mxu1 %v16607_v51 }
0x2364   :  { %12658 = vmatpush1.bf16.msra.mxu0 %v16608_v56  ;;  %12678 = vmatpush3.bf16.msra.mxu1 %v16607_v51  ;;  %v16619_v56 = vld [vmem:[#allocation65_spill] sm:$0xff] }
0x2365   :  { %12660 = vmatprep.subr.bf16.mxu0 %v16609_v27  ;;  %12680 = vmatprep.subr.bf16.mxu1 %v16610_v35  ;;  %v16614_v27 = vld [vmem:[#allocation62_spill] sm:$0xff] }
0x2368   :  { %12662 = vmatpush1.bf16.msra.mxu0 %v16611_v37  ;;  %12682 = vmatpush3.bf16.msra.mxu1 %v16610_v35  ;;  %v16615_v37 = vld [vmem:[#allocation5_spill] sm:$0xff]  ;;  %v16616_v35 = vld [vmem:[#allocation8_spill] sm:$0xff] }
0x2369   :  { %12684 = vmatprep.subr.bf16.mxu1 %v16612_v55  ;;  %10014 = vmatprep.subr.msk.mxu0 %vm307_vm0, %v16613_v8  ;;  %v16617_v8 = vld [vmem:[#allocation63_spill] sm:$0xff] }
0x236b   :  { %9993 = vmatmul.mubr.msk.f32.vlgmr.msra.gmra.mrb[58].mxu0 %vm1103_vm3, %v15210_v15  ;;  %11311 = vmatmul.mubr.msk.f32.vlgmr.msra.gmra.mrb[76].mxu1 %vm1103_vm3, %v15215_v34 }
0x236c   :  { %7069 = vmatprep.mubr.f32.mxu0 %v16292_v53  ;;  %12686 = vmatpush3.bf16.msra.mxu1 %v16612_v55  ;;  %v16618_v55 = vld [vmem:[#allocation64_spill] sm:$0xff] }
0x236d   :  { %12688 = vmatprep.subr.bf16.mxu1 %v16614_v27  ;;  %10015 = vmatpush1.msk.msra.mxu0 %vm307_vm0, %v16615_v37 }
0x236e   :  { %10021 = vmatprep.subr.msk.mxu0 %vm307_vm0, %v16616_v35 }
0x236f   :  { %9994 = vmatmul.mubr.msk.f32.gmra.mrb[60].mxu0 %vm1103_vm3, %v15215_v34 }
0x2370   :  { %12690 = vmatpush3.bf16.msra.mxu1 %v16614_v27  ;;  %7609 = vmatprep.mubr.f32.mxu0 %v16292_v53 }
0x2371   :  { %12692 = vmatprep.subr.bf16.mxu1 %v16617_v8 }
0x2374   :  { %12694 = vmatpush3.bf16.msra.mxu1 %v16617_v8 }
0x2375   :  { %12696 = vmatprep.subr.bf16.mxu1 %v16618_v55 }
0x2378   :  { %12698 = vmatpush3.bf16.msra.mxu1 %v16618_v55 }
0x2379   :  { %12700 = vmatprep.subr.bf16.mxu1 %v16619_v56 }
0x237c   :  { %12702 = vmatpush3.bf16.msra.mxu1 %v16619_v56 }
0x237d   :  { %12704 = vmatprep.subr.bf16.mxu1 %v14198_v9 }
0x241a   :  { %v10568_v35 = vpop.f32.mrb[70].mxu1 }
0x241b   :  { %v10569_v37 = vpop.f32.mrb[71].mxu1 }
0x241c   :  { %v10570_v51 = vadd.f32 %v10569_v37, %v10568_v35 }
0x241e   :  { %v10571_v27 = vpop.f32.mrb[72].mxu1  ;;  %v6916_v8 = vadd.f32 %v10570_v51, %v16620_v62 }
0x241f   :  { %v10572_v28 = vpop.f32.mrb[73].mxu1 }
0x2420   :  { %v10573_v46 = vadd.f32 %v10572_v28, %v10571_v27 }
0x2422   :  { %v6921_v32 = vadd.f32 %v10573_v46, %v16620_v62 }
0x242a   :  { %v11289_v50 = vpop.f32.mrb[74].mxu1 }
0x242b   :  { %v6996_v38 = vadd.f32 %v11289_v50, %v6921_v32  ;;  %v6990_v1 = vpop.f32.mrb[75].mxu1 }
0x242c   :  { %v6991_v55 = vadd.f32 %v6990_v1, %v6916_v8 }
0x243e   :  { %v7065_v58 = vpop.f32.mrb[58].mxu0  ;;  %v11312_v17 = vpop.f32.mrb[76].mxu1 }
0x243f   :  { %v13123_v56 = vadd.f32 %v7065_v58, %v16621_v33  ;;  %v7067_v43 = vpop.f32.mrb[59].mxu0  ;;  %v7142_v39 = vpop.f32.mrb[77].mxu1 }
0x2440   :  { %v13124_v35 = vadd.f32 %v7067_v43, %v16622_v30 }
0x2441   :  { %v9997_v13 = vmul.f32 -1.442695, %v13123_v56 }
0x2442   :  { %v7071_v37 = vpop.f32.mrb[60].mxu0  ;;  %v9999_v50 = vmul.f32 -1.442695, %v13124_v35  ;;  %v7180_v35 = vadd.f32 %v15205_v19, %v11312_v17 }
0x2443   :  { %13425 = vpow2.f32 %v9997_v13  ;;  %v13125_v28 = vadd.f32 %v7071_v37, %v16621_v33  ;;  %v7073_v46 = vpop.f32.mrb[61].mxu0  ;;  %v7179_v37 = vadd.f32 %v15205_v19, %v7142_v39 }
0x2444   :  { %v13126_v51 = vadd.f32 %v7073_v46, %v16622_v30 }
0x2445   :  { %v9998_v27 = vmul.f32 -1.442695, %v13125_v28 }
0x2446   :  { %v10000_v1 = vmul.f32 -1.442695, %v13126_v51 }
0x2447   :  { %13427 = vpow2.f32 %v9998_v27 }
0x2448   :  { %13429 = vpow2.f32 %v9999_v50 }
0x2449   :  { %13431 = vpow2.f32 %v10000_v1 }
0x244d   :  { %v13426_v8 = vpop.eup %13425 }
0x244e   :  { %v7159_v58 = vadd.f32 1.0, %v13426_v8 }
0x2450   :  { %13433 = vrcp.f32 %v7159_v58 }
0x2451   :  { %v13428_v32 = vpop.eup %13427 }
0x2452   :  { %v7160_v56 = vadd.f32 1.0, %v13428_v32  ;;  %v13430_v62 = vpop.eup %13429 }
0x2453   :  { %v13432_v43 = vpop.eup %13431  ;;  %v7173_v13 = vadd.f32 1.0, %v13430_v62 }
0x2454   :  { %13435 = vrcp.f32 %v7160_v56  ;;  %v7174_v28 = vadd.f32 1.0, %v13432_v43 }
0x2455   :  { %13437 = vrcp.f32 %v7173_v13 }
0x2456   :  { %13439 = vrcp.f32 %v7174_v28 }
0x245a   :  { %v13434_v33 = vpop.eup %13433 }
0x245b   :  { %v7181_v46 = vmul.f32 %v13434_v33, %v7179_v37 }
0x245d   :  { %v7183_v27 = vadd.f32 %v7181_v46, %v6991_v55 }
0x245e   :  { %v13436_v51 = vpop.eup %13435 }
0x245f   :  { %13441 = vtanh.f32 %v7183_v27  ;;  %v7182_v50 = vmul.f32 %v13436_v51, %v7180_v35  ;;  %v13438_v8 = vpop.eup %13437 }
0x2460   :  { %v13440_v58 = vpop.eup %13439  ;;  %v7187_v32 = vsub.f32 1.0, %v13438_v8  ;;  %v7191_v39 = vmul.f32 %v13438_v8, %v15210_v15  ;;  %v7361_v8 = vpop.permute.xlu0 %7360 }
0x2461   :  { %v7184_v1 = vadd.f32 %v7182_v50, %v6996_v38  ;;  %v7188_v30 = vsub.f32 1.0, %v13440_v58  ;;  %v7192_v17 = vmul.f32 %v13440_v58, %v15215_v34 }
0x2463   :  { %13443 = vtanh.f32 %v7184_v1 }
0x2469   :  { %v13442_v56 = vpop.eup %13441 }
0x246a   :  { %v7189_v62 = vmul.f32 %v13442_v56, %v7187_v32 }
0x246c   :  { %v15460_v43 = vadd.f32 %v7191_v39, %v7189_v62 }
0x246d   :  { %v13444_v33 = vpop.eup %13443 }
0x246e   :  { %11333 = vmatprep.mubr.msk.f32.mxu1 %vm1103_vm3, %v15460_v43  ;;  %v7190_v19 = vmul.f32 %v13444_v33, %v7188_v30 }
0x2470   :  { %v15465_v55 = vadd.f32 %v7192_v17, %v7190_v19 }
0x2472   :  { %11334 = vmatmul.mubr.msk.f32.vlgmr.msra.gmra.mrb[78].mxu1 %vm1103_vm3, %v15465_v55 }
0x2473   :  { %12706 = vmatpush3.bf16.msra.mxu1 %v14198_v9 }
0x2474   :  { %12708 = vmatprep.subr.bf16.mxu1 %v14246_v57 }
0x2477   :  { %12710 = vmatpush3.bf16.msra.mxu1 %v14246_v57 }
0x2478   :  { %11344 = vmatprep.subr.mxu1 %v15225_v29 }
0x247b   :  { %11345 = vmatpush3.msra.mxu1 %v15225_v29  ;;  %v7371_v29 = vpop.permute.xlu1 %7370 }
0x247c   :  { %11349 = vmatprep.subr.msk.mxu1 %vm307_vm0, %v15232_v16 }
0x247f   :  { %v7375_v27 = vpop.permute.xlu1 %7374 }
0x2483   :  { %v7365_v1 = vpop.permute.xlu1 %7364 }
0x2545   :  { %v11335_v30 = vpop.f32.mrb[78].mxu1 }
0x2546   :  { %v7273_v15 = vadd.f32 %v15239_v40, %v11335_v30  ;;  %v7267_v34 = vpop.f32.mrb[79].mxu1 }
0x2547   :  { %v7268_v38 = vadd.f32 %v15239_v40, %v7267_v34 }
0x2548   :  { %v7277_v37 = vmax.f32 %v7273_v15, 0.0 }
0x2549   :  { %v7276_v13 = vmax.f32 %v7268_v38, 0.0 }
0x254b   :  { %11346 = vmatprep.mubr.msk.f32.mxu1 %vm1389_vm4, %v7276_v13 }
0x254c   :  { %11347 = vmatmul.mubr.msk.f32.vlgmr.msra.gmra.mrb[80].mxu1 %vm1389_vm4, %v7277_v37 }
0x254d   :  { %11350 = vmatpush3.msk.msra.mxu1 %vm307_vm0, %v15232_v16 }
0x254e   :  { %11354 = vmatprep.subr.msk.mxu1 %vm307_vm0, %v16379_v22 }
0x261f   :  { %v11348_v28 = vpop.f32.mrb[80].mxu1 }
0x2620   :  { %v7356_v46 = vadd.f32 %v15252_v24, %v11348_v28  ;;  %v7350_v35 = vpop.f32.mrb[81].mxu1 }
0x2621   :  { %v7351_v40 = vadd.f32 %v15252_v24, %v7350_v35 }
0x2622   :  { %v7378_v51 = vmul.f32 %v7375_v27, %v7356_v46  ;;  %v7368_v16 = vmul.f32 %v7365_v1, %v7356_v46 }
0x2623   :  { %v7377_v50 = vmul.f32 %v7371_v29, %v7351_v40  ;;  %v7367_v32 = vmul.f32 %v7361_v8, %v7351_v40 }
0x2624   :  { %7383 = vrot.lane.b32.xlu1 %v7378_v51, %s13548_s30  ;;  %v10010_v51 = vld [vmem:[%s16251_s20 + $0x68] sm:$0xff] }
0x2625   :  { %7381 = vrot.lane.b32.xlu0 %v7377_v50, %s13548_s30  ;;  %v10009_v50 = vld [vmem:[%s16251_s20 + $0x60] sm:$0xff] }
0x2696   :  { %v7384_v58 = vpop.permute.xlu1 %7383 }
0x2697   :  { %v7388_v56 = vadd.f32 %v7384_v58, %v7368_v16  ;;  %v7382_v62 = vpop.permute.xlu0 %7381 }
0x2698   :  { %v7387_v39 = vadd.f32 %v7382_v62, %v7367_v32 }
0x2699   :  { %7393 = vrot.lane.b32.xlu1 %v7388_v56, %s13549_s18 }
0x269a   :  { %7391 = vrot.lane.b32.xlu0 %v7387_v39, %s13549_s18 }
0x270b   :  { %v7394_v33 = vpop.permute.xlu1 %7393 }
0x270c   :  { %v7398_v24 = vadd.f32 %v15291_v18, %v7394_v33  ;;  %v7392_v19 = vpop.permute.xlu0 %7391 }
0x270d   :  { %v7397_v17 = vadd.f32 %v7392_v19, %v15298_v14 }
0x270e   :  { %v7496_v30 = vsub.f32 %v7398_v24, %v15291_v18  ;;  %7403 = vrot.lane.b32.xlu1 %v7398_v24, %s13548_s30 }
0x270f   :  { %v7495_v15 = vsub.f32 %v7397_v17, %v15298_v14  ;;  %7401 = vrot.lane.b32.xlu0 %v7397_v17, %s13548_s30 }
0x2710   :  { %v7498_v34 = vmul.f32 %v7496_v30, %v7496_v30 }
0x2711   :  { %v7497_v38 = vmul.f32 %v7495_v15, %v7495_v15 }
0x2712   :  { %7503 = vrot.lane.b32.xlu1 %v7498_v34, %s13548_s30 }
0x2713   :  { %7501 = vrot.lane.b32.xlu0 %v7497_v38, %s13548_s30 }
0x2780   :  { %v7404_v13 = vpop.permute.xlu1 %7403 }
0x2781   :  { %10006 = vst.msk [vmem:[%s15980_s16 + $0x58] sm:$0xff] %vm300_vm1, %v7404_v13  ;;  %v7402_v37 = vpop.permute.xlu0 %7401 }
0x2782   :  { %10005 = vst.msk [vmem:[%s15980_s16 + $0x50] sm:$0xff] %vm300_vm1, %v7402_v37  ;;  %11351 = vmatprep.mubr.msk.f32.mxu1 %vm300_vm1, %v7402_v37 }
0x2783   :  { %11352 = vmatmul.mubr.msk.f32.vlgmr.msra.gmra.mrb[82].mxu1 %vm300_vm1, %v7404_v13 }
0x2784   :  { %v7504_v18 = vpop.permute.xlu1 %7503  ;;  %11355 = vmatpush3.msk.msra.mxu1 %vm307_vm0, %v16379_v22 }
0x2785   :  { %v7510_v14 = vsel %vm300_vm1, %v7504_v18, 0.0  ;;  %v7502_v29 = vpop.permute.xlu0 %7501  ;;  %11359 = vmatprep.subr.msk.mxu1 %vm307_vm0, %v13733_v45 }
0x2786   :  { %v7507_v28 = vsel %vm300_vm1, %v7502_v29, 0.0  ;;  %7511 = vadd.xlane.f32.xlu1 %v7510_v14 }
0x2787   :  { %7508 = vadd.xlane.f32.xlu0 %v7507_v28 }
0x2813   :  { %v7512_v33 = vpop.xlane.xlu1 %7511 }
0x2814   :  { %v7509_v46 = vpop.xlane.xlu0 %7508  ;;  %v7514_v24 = vmax.f32 %v7512_v33, 1e-24  ;;  %v16635_v33 = vld [vmem:[#allocation18_spill] sm:$0xff] }
0x2815   :  { %v7513_v35 = vmax.f32 %v7509_v46, 1e-24  ;;  %v16623_v46 = vld [vmem:[#allocation9_spill] sm:$0xff] }
0x2817   :  { %13445 = vrsqrt.f32 %v7513_v35  ;;  %v16624_v35 = vld [vmem:[#allocation16_spill] sm:$0xff] }
0x2818   :  { %13447 = vrsqrt.f32 %v7514_v24  ;;  %v16636_v24 = vld [vmem:[#allocation19_spill] sm:$0xff] }
0x2821   :  { %v13446_v27 = vpop.eup %13445 }
0x2822   :  { %v7517_v40 = vmul.f32 %v13446_v27, %v7495_v15  ;;  %v13448_v19 = vpop.eup %13447  ;;  %v16625_v27 = vld [vmem:[#allocation10_spill] sm:$0xff] }
0x2823   :  { %v7518_v17 = vmul.f32 %v13448_v19, %v7496_v30  ;;  %v16637_v19 = vld [vmem:[#allocation20_spill] sm:$0xff] }
0x2824   :  { %7537 = vrot.lane.b32.xlu1 %v7517_v40, %s13548_s30  ;;  %v16626_v40 = vld [vmem:[#allocation28_spill] sm:$0xff] }
0x2856   :  { %v15521_v1 = vpop.f32.mrb[82].mxu1 }
0x2857   :  { %10047 = vst.msk [vmem:[%s15981_s17 + $0x68] sm:$0xff] %vm300_vm1, %v15521_v1  ;;  %v15528_v8 = vpop.f32.mrb[83].mxu1  ;;  %v7520_v16 = vsub.f32 %v10010_v51, %v15521_v1  ;;  %v16627_v51 = vld [vmem:[#allocation11_spill] sm:$0xff] }
0x2858   :  { %10046 = vst.msk [vmem:[%s15981_s17 + $0x60] sm:$0xff] %vm300_vm1, %v15528_v8  ;;  %v7519_v58 = vsub.f32 %v10009_v50, %v15528_v8  ;;  %v16628_v50 = vld [vmem:[#allocation30_spill] sm:$0xff] }
0x2859   :  { %v7522_v32 = vmul.f32 %v7520_v16, %v7520_v16 }
0x285a   :  { %v7521_v62 = vmul.f32 %v7519_v58, %v7519_v58 }
0x285b   :  { %v7526_v56 = vsel %vm300_vm1, %v7522_v32, 0.0  ;;  %v16631_v32 = vld [vmem:[#allocation13_spill] sm:$0xff] }
0x285c   :  { %7527 = vadd.xlane.f32.xlu0 %v7526_v56  ;;  %v7523_v39 = vsel %vm300_vm1, %v7521_v62, 0.0  ;;  %v16632_v56 = vld [vmem:[#allocation14_spill] sm:$0xff]  ;;  %v16633_v62 = vld [vmem:[#allocation15_spill] sm:$0xff] }
0x2860   :  { %7524 = vadd.xlane.f32.xlu0 %v7523_v39  ;;  %v16634_v39 = vld [vmem:[#allocation17_spill] sm:$0xff] }
0x2876   :  { %7539 = vrot.lane.b32.xlu0 %v7518_v17, %s13548_s30  ;;  %v16638_v17 = vld [vmem:[#allocation21_spill] sm:$0xff] }
0x2896   :  { %v7538_v15 = vpop.permute.xlu1 %7537 }
0x2897   :  { %10016 = vmatmul.mubr.msk.f32.vlgmr.msra.gmra.mrb[62].mxu0 %vm300_vm1, %v7538_v15  ;;  %11356 = vmatprep.mubr.msk.f32.mxu1 %vm300_vm1, %v7538_v15  ;;  %v16639_v15 = vld [vmem:[#allocation22_spill] sm:$0xff] }
0x2898   :  { %7615 = vmatprep.mubr.f32.mxu0 %v16292_v53  ;;  %10022 = vmatpush1.msk.msra.mxu0 %vm307_vm0, %v13726_v42 }
0x2899   :  { %12792 = vmatprep.subr.bf16.mxu0 %v13781_v23 }
0x28e9   :  { %v7528_v34 = vpop.xlane.xlu0 %7527 }
0x28ea   :  { %v7530_v38 = vmax.f32 %v7528_v34, 1e-24  ;;  %v16640_v34 = vld [vmem:[#allocation23_spill] sm:$0xff] }
0x28ec   :  { %13449 = vrsqrt.f32 %v7530_v38  ;;  %v16641_v38 = vld [vmem:[#allocation24_spill] sm:$0xff] }
0x28ed   :  { %v7525_v13 = vpop.xlane.xlu0 %7524 }
0x28ee   :  { %v7529_v37 = vmax.f32 %v7525_v13, 1e-24  ;;  %v16642_v13 = vld [vmem:[#allocation25_spill] sm:$0xff] }
0x28f0   :  { %13451 = vrsqrt.f32 %v7529_v37  ;;  %v16643_v37 = vld [vmem:[#allocation26_spill] sm:$0xff] }
0x28f1   :  { %v7540_v30 = vpop.permute.xlu0 %7539 }
0x28f2   :  { %10017 = vmatmul.mubr.msk.f32.gmra.mrb[64].mxu0 %vm300_vm1, %v7540_v30  ;;  %11357 = vmatmul.mubr.msk.f32.vlgmr.msra.gmra.mrb[84].mxu1 %vm300_vm1, %v7540_v30  ;;  %v16644_v30 = vld [vmem:[#allocation27_spill] sm:$0xff] }
0x28f3   :  { %7767 = vmatprep.mubr.f32.mxu0 %v16292_v53  ;;  %11360 = vmatpush3.msk.msra.mxu1 %vm307_vm0, %v13733_v45 }
0x28f4   :  { %12712 = vmatprep.subr.bf16.mxu1 %v13758_v59 }
0x28f6   :  { %v13450_v18 = vpop.eup %13449 }
0x28f7   :  { %v7534_v28 = vmul.f32 %v13450_v18, %v7520_v16  ;;  %v16629_v16 = vld [vmem:[#allocation12_spill] sm:$0xff]  ;;  %v16645_v18 = vld [vmem:[#allocation29_spill] sm:$0xff] }
0x28fa   :  { %v13452_v14 = vpop.eup %13451 }
0x28fb   :  { %v7533_v29 = vmul.f32 %v13452_v14, %v7519_v58  ;;  %v16630_v58 = vld [vmem:[#allocation32_spill] sm:$0xff]  ;;  %v16646_v14 = vld [vmem:[#allocation31_spill] sm:$0xff] }
0x28fd   :  { %8548 = vperm.xlu1 %13270, %v7533_v29   ;;  %8538 = vperm.xlu0 %13261, %v7533_v29  }
0x28fe   :  { %10023 = vmatmul.mubr.msk.f32.vlgmr.msra.gmra.mrb[62].mxu0 %vm300_vm1, %v7533_v29  ;;  %11361 = vmatprep.mubr.msk.f32.mxu1 %vm300_vm1, %v7533_v29 }
0x28ff   :  { %11362 = vmatmul.mubr.msk.f32.vlgmr.msra.gmra.mrb[84].mxu1 %vm300_vm1, %v7534_v28  ;;  %7773 = vmatprep.mubr.f32.mxu0 %v16292_v53 }
0x2900   :  { %12714 = vmatpush1.bf16.msra.mxu1 %v13760_v63  ;;  %12794 = vmatpush3.bf16.msra.mxu0 %v13787_v31 }
0x2901   :  { %8552 = vperm.xlu1 %13270, %v7534_v28   ;;  %12716 = vmatprep.subr.bf16.mxu1 %v13762_v0 }
0x2902   :  { %10024 = vmatmul.mubr.msk.f32.gmra.mrb[64].mxu0 %vm300_vm1, %v7534_v28  ;;  %12796 = vmatprep.subr.bf16.mxu0 %v13789_v36 }
0x2904   :  { %12718 = vmatpush1.bf16.msra.mxu1 %v13766_v5  ;;  %12798 = vmatpush3.bf16.msra.mxu0 %v13795_v47 }
0x2905   :  { %13271 = vset.pattern.permute.xlu1 %v16322_v44  ;;  %12720 = vmatprep.subr.bf16.mxu1 %v13769_v6 }
0x2906   :  { %8542 = vperm.xlu1 %13271, %v7534_v28   ;;  %12800 = vmatprep.subr.bf16.mxu0 %v13801_v54  ;;  %v16647_v28 = vld [vmem:[#allocation33_spill] sm:$0xff] }
0x2908   :  { %12722 = vmatpush1.bf16.msra.mxu1 %v13773_v11  ;;  %12802 = vmatpush3.bf16.msra.mxu0 %v13807_v2 }
0x2909   :  { %12724 = vmatprep.subr.bf16.mxu1 %v13776_v12  ;;  %12804 = vmatprep.subr.bf16.mxu0 %v13813_v7 }
0x290a   :  { %13272 = vset.pattern.permute.xlu1 %v16323_v60 }
0x290c   :  { %12726 = vmatpush1.bf16.msra.mxu1 %v13779_v21  ;;  %12806 = vmatpush3.bf16.msra.mxu0 %v13819_v20 }
0x290d   :  { %12728 = vmatprep.subr.bf16.mxu1 %v13784_v25  ;;  %12808 = vmatprep.subr.bf16.mxu0 %v13825_v26 }
0x2910   :  { %12730 = vmatpush1.bf16.msra.mxu1 %v13792_v41  ;;  %12810 = vmatpush3.bf16.msra.mxu0 %v13831_v48 }
0x2911   :  { %12732 = vmatprep.subr.bf16.mxu1 %v13798_v49  ;;  %12812 = vmatprep.subr.bf16.mxu0 %v13837_v52 }
0x2914   :  { %12734 = vmatpush1.bf16.msra.mxu1 %v13804_v61  ;;  %12814 = vmatpush3.bf16.msra.mxu0 %v13843_v4 }
0x2915   :  { %12736 = vmatprep.subr.bf16.mxu1 %v13810_v3  ;;  %12816 = vmatprep.subr.bf16.mxu0 %v13849_v10 }
0x2918   :  { %12738 = vmatpush1.bf16.msra.mxu1 %v16623_v46  ;;  %12818 = vmatpush3.bf16.msra.mxu0 %v16624_v35 }
0x2919   :  { %12740 = vmatprep.subr.bf16.mxu1 %v16625_v27  ;;  %12820 = vmatprep.subr.bf16.mxu0 %v16626_v40 }
0x291c   :  { %12742 = vmatpush1.bf16.msra.mxu1 %v16627_v51  ;;  %12822 = vmatpush3.bf16.msra.mxu0 %v16628_v50  ;;  %v16685_v50 = vld [vmem:[#allocation68_spill] sm:$0xff] }
0x291d   :  { %12744 = vmatprep.subr.bf16.mxu1 %v16629_v16  ;;  %12824 = vmatprep.subr.bf16.mxu0 %v16630_v58 }
0x2920   :  { %12746 = vmatpush1.bf16.msra.mxu1 %v16631_v32 }
0x2921   :  { %12748 = vmatprep.subr.bf16.mxu1 %v16632_v56  ;;  %v16650_v56 = vld [vmem:[#allocation36_spill] sm:$0xff] }
0x2924   :  { %12750 = vmatpush1.bf16.msra.mxu1 %v16633_v62 }
0x2925   :  { %12752 = vmatprep.subr.bf16.mxu1 %v16634_v39 }
0x2928   :  { %12754 = vmatpush1.bf16.msra.mxu1 %v16635_v33 }
0x2929   :  { %12756 = vmatprep.subr.bf16.mxu1 %v16636_v24 }
0x292c   :  { %12758 = vmatpush1.bf16.msra.mxu1 %v16637_v19 }
0x292d   :  { %12760 = vmatprep.subr.bf16.mxu1 %v16638_v17 }
0x2930   :  { %12762 = vmatpush1.bf16.msra.mxu1 %v16639_v15  ;;  %v16648_v15 = vld [vmem:[#allocation34_spill] sm:$0xff] }
0x2931   :  { %12764 = vmatprep.subr.bf16.mxu1 %v16640_v34 }
0x2934   :  { %12766 = vmatpush1.bf16.msra.mxu1 %v16641_v38 }
0x2935   :  { %12768 = vmatprep.subr.bf16.mxu1 %v16642_v13 }
0x2938   :  { %12770 = vmatpush1.bf16.msra.mxu1 %v16643_v37 }
0x2939   :  { %12772 = vmatprep.subr.bf16.mxu1 %v16644_v30 }
0x293c   :  { %12774 = vmatpush1.bf16.msra.mxu1 %v16645_v18  ;;  %v16649_v18 = vld [vmem:[#allocation35_spill] sm:$0xff] }
0x293d   :  { %12776 = vmatprep.subr.bf16.mxu1 %v16646_v14 }
0x29d1   :  { %v7769_v29 = vpop.f32.mrb[62].mxu0 }
0x29d2   :  { %v7855_v19 = vadd.f32 %v7769_v29, %v16647_v28  ;;  %v7771_v17 = vpop.f32.mrb[63].mxu0  ;;  %v11363_v24 = vpop.f32.mrb[84].mxu1 }
0x29d3   :  { %v7856_v33 = vadd.f32 %v7771_v17, %v16648_v15  ;;  %v7846_v34 = vpop.f32.mrb[85].mxu1 }
0x29d4   :  { %v7861_v62 = vmax.f32 %v7855_v19, 0.0  ;;  %v7857_v14 = vadd.f32 %v7846_v34, %v16649_v18  ;;  %v16652_v19 = vld [vmem:[#allocation38_spill] sm:$0xff]  ;;  %v16655_v34 = vld [vmem:[#allocation41_spill] sm:$0xff] }
0x29d5   :  { %v7862_v39 = vmax.f32 %v7856_v33, 0.0  ;;  %v7775_v38 = vpop.f32.mrb[64].mxu0  ;;  %v16651_v33 = vld [vmem:[#allocation37_spill] sm:$0xff] }
0x29d6   :  { %v7858_v13 = vadd.f32 %v7775_v38, %v16647_v28  ;;  %v7777_v37 = vpop.f32.mrb[65].mxu0  ;;  %v7863_v38 = vmax.f32 %v7857_v14, 0.0  ;;  %v16658_v14 = vld [vmem:[#allocation44_spill] sm:$0xff]  ;;  %v16684_v28 = vld [vmem:[#allocation67_spill] sm:$0xff] }
0x29d7   :  { %v7859_v30 = vadd.f32 %v7777_v37, %v16648_v15  ;;  %7937 = vmatprep.mubr.f32.mxu1 %v7862_v39  ;;  %8091 = vmatprep.mubr.f32.mxu0 %v7862_v39  ;;  %v16653_v39 = vld [vmem:[#allocation39_spill] sm:$0xff]  ;;  %v7860_v37 = vadd.f32 %v11363_v24, %v16649_v18  ;;  %v16663_v24 = vld [vmem:[#allocation49_spill] sm:$0xff] }
0x29d8   :  { %7938 = vmatmul.mubr.f32.vlgmr.msra.gmra.mrb[86].mxu1 %v7861_v62  ;;  %8092 = vmatmul.mubr.f32.vlgmr.msra.gmra.mrb[66].mxu0 %v7861_v62  ;;  %v7864_v17 = vmax.f32 %v7858_v13, 0.0  ;;  %v16654_v62 = vld [vmem:[#allocation40_spill] sm:$0xff]  ;;  %v16656_v13 = vld [vmem:[#allocation42_spill] sm:$0xff] }
0x29d9   :  { %v7865_v29 = vmax.f32 %v7859_v30, 0.0  ;;  %12778 = vmatpush1.bf16.msra.mxu1 %v16650_v56  ;;  %12826 = vmatpush3.bf16.msra.mxu0 %v16630_v58  ;;  %v16657_v30 = vld [vmem:[#allocation43_spill] sm:$0xff] }
0x29da   :  { %12780 = vmatprep.subr.bf16.mxu1 %v16651_v33  ;;  %12828 = vmatprep.subr.bf16.mxu0 %v16652_v19 }
0x29db   :  { %7943 = vmatprep.mubr.f32.mxu1 %v7865_v29  ;;  %8096 = vmatprep.mubr.f32.mxu0 %v7865_v29  ;;  %v16659_v29 = vld [vmem:[#allocation45_spill] sm:$0xff] }
0x29dc   :  { %7944 = vmatmul.mubr.f32.gmra.mrb[88].mxu1 %v7864_v17  ;;  %8097 = vmatmul.mubr.f32.gmra.mrb[68].mxu0 %v7864_v17  ;;  %v7866_v17 = vmax.f32 %v7860_v37, 0.0  ;;  %v16664_v37 = vld [vmem:[#allocation50_spill] sm:$0xff] }
0x29dd   :  { %12782 = vmatpush1.bf16.msra.mxu1 %v16653_v39  ;;  %12830 = vmatpush3.bf16.msra.mxu0 %v16652_v19  ;;  %v16661_v39 = vld [vmem:[#allocation47_spill] sm:$0xff] }
0x29de   :  { %11380 = vmatprep.mubr.msk.f32.mxu0 %vm792_vm2, %v7863_v38  ;;  %12784 = vmatprep.subr.bf16.mxu1 %v16654_v62  ;;  %v16660_v62 = vld [vmem:[#allocation46_spill] sm:$0xff] }
0x29df   :  { %12832 = vmatprep.subr.bf16.mxu0 %v16655_v34  ;;  %8014 = vmatprep.mubr.f32.mxu1 %v16292_v53 }
0x29e1   :  { %12786 = vmatpush1.bf16.msra.mxu1 %v16656_v13  ;;  %12834 = vmatpush3.bf16.msra.mxu0 %v16655_v34  ;;  %v16662_v13 = vld [vmem:[#allocation48_spill] sm:$0xff] }
0x29e2   :  { %12788 = vmatprep.subr.bf16.mxu1 %v16657_v30  ;;  %12836 = vmatprep.subr.bf16.mxu0 %v16658_v14  ;;  %v16683_v30 = vld [vmem:[#allocation66_spill] sm:$0xff] }
0x29e5   :  { %12790 = vmatpush1.bf16.msra.mxu1 %v16659_v29  ;;  %12838 = vmatpush3.bf16.msra.mxu0 %v16658_v14  ;;  %v16669_v29 = vld [vmem:[#allocation55_spill] sm:$0xff]  ;;  %v16671_v14 = vld [vmem:[#allocation57_spill] sm:$0xff] }
0x29e6   :  { %12840 = vmatprep.subr.bf16.mxu1 %v16660_v62  ;;  %12860 = vmatprep.subr.bf16.mxu0 %v16661_v39  ;;  %v16665_v62 = vld [vmem:[#allocation51_spill] sm:$0xff] }
0x29e8   :  { %10028 = vmatmul.mubr.msk.f32.vlgmr.msra.gmra.mrb[86].mxu1 %vm792_vm2, %v7863_v38  ;;  %11381 = vmatmul.mubr.msk.f32.vlgmr.msra.gmra.mrb[70].mxu0 %vm792_vm2, %v7866_v17  ;;  %v16666_v38 = vld [vmem:[#allocation52_spill] sm:$0xff] }
0x29e9   :  { %12842 = vmatpush1.bf16.msra.mxu1 %v16662_v13  ;;  %12862 = vmatpush3.bf16.msra.mxu0 %v16661_v39  ;;  %v16667_v13 = vld [vmem:[#allocation53_spill] sm:$0xff]  ;;  %v16668_v39 = vld [vmem:[#allocation54_spill] sm:$0xff] }
0x29ea   :  { %11403 = vmatprep.mubr.msk.f32.mxu0 %vm1103_vm3, %v15460_v43  ;;  %8020 = vmatprep.mubr.f32.mxu1 %v16292_v53 }
0x29eb   :  { %12844 = vmatprep.subr.bf16.mxu1 %v16663_v24  ;;  %12864 = vmatprep.subr.bf16.mxu0 %v16664_v37  ;;  %v16670_v24 = vld [vmem:[#allocation56_spill] sm:$0xff] }
0x29ec   :  { %10029 = vmatmul.mubr.msk.f32.gmra.mrb[88].mxu1 %vm792_vm2, %v7866_v17  ;;  %v16672_v17 = vld [vmem:[#allocation58_spill] sm:$0xff] }
0x29ed   :  { %12846 = vmatpush1.bf16.msra.mxu1 %v16665_v62  ;;  %12866 = vmatpush3.bf16.msra.mxu0 %v16664_v37  ;;  %v16673_v62 = vld [vmem:[#allocation59_spill] sm:$0xff]  ;;  %v16675_v37 = vld [vmem:[#allocation61_spill] sm:$0xff] }
0x29ee   :  { %12848 = vmatprep.subr.bf16.mxu1 %v16666_v38  ;;  %12868 = vmatprep.subr.bf16.mxu0 %v16667_v13  ;;  %v16674_v38 = vld [vmem:[#allocation60_spill] sm:$0xff] }
0x29ef   :  { %8241 = vmatprep.mubr.f32.mxu1 %v16292_v53 }
0x29f1   :  { %12850 = vmatpush1.bf16.msra.mxu1 %v16668_v39  ;;  %12870 = vmatpush3.bf16.msra.mxu0 %v16667_v13  ;;  %v16676_v39 = vld [vmem:[#allocation6_spill] sm:$0xff] }
0x29f2   :  { %12852 = vmatprep.subr.bf16.mxu1 %v16669_v29  ;;  %12872 = vmatprep.subr.bf16.mxu0 %v16670_v24 }
0x29f5   :  { %12854 = vmatpush1.bf16.msra.mxu1 %v16671_v14  ;;  %12874 = vmatpush3.bf16.msra.mxu0 %v16670_v24  ;;  %v16682_v14 = vld [vmem:[#allocation65_spill] sm:$0xff] }
0x29f6   :  { %12856 = vmatprep.subr.bf16.mxu1 %v16672_v17  ;;  %12876 = vmatprep.subr.bf16.mxu0 %v16673_v62  ;;  %v16677_v17 = vld [vmem:[#allocation62_spill] sm:$0xff] }
0x29f9   :  { %12858 = vmatpush1.bf16.msra.mxu1 %v16674_v38  ;;  %12878 = vmatpush3.bf16.msra.mxu0 %v16673_v62  ;;  %v16678_v38 = vld [vmem:[#allocation5_spill] sm:$0xff]  ;;  %v16679_v62 = vld [vmem:[#allocation8_spill] sm:$0xff] }
0x29fa   :  { %12880 = vmatprep.subr.bf16.mxu0 %v16675_v37  ;;  %10053 = vmatprep.subr.msk.mxu1 %vm307_vm0, %v16676_v39  ;;  %v16680_v39 = vld [vmem:[#allocation63_spill] sm:$0xff] }
0x29fc   :  { %10032 = vmatmul.mubr.msk.f32.vlgmr.msra.gmra.mrb[86].mxu1 %vm1103_vm3, %v15460_v43  ;;  %11404 = vmatmul.mubr.msk.f32.vlgmr.msra.gmra.mrb[72].mxu0 %vm1103_vm3, %v15465_v55 }
0x29fd   :  { %8247 = vmatprep.mubr.f32.mxu1 %v16292_v53  ;;  %12882 = vmatpush3.bf16.msra.mxu0 %v16675_v37  ;;  %v16681_v37 = vld [vmem:[#allocation64_spill] sm:$0xff] }
0x29fe   :  { %12884 = vmatprep.subr.bf16.mxu0 %v16677_v17  ;;  %10054 = vmatpush1.msk.msra.mxu1 %vm307_vm0, %v16678_v38 }
0x29ff   :  { %10060 = vmatprep.subr.msk.mxu1 %vm307_vm0, %v16679_v62 }
0x2a00   :  { %10033 = vmatmul.mubr.msk.f32.gmra.mrb[88].mxu1 %vm1103_vm3, %v15465_v55 }
0x2a01   :  { %12886 = vmatpush3.bf16.msra.mxu0 %v16677_v17  ;;  %8787 = vmatprep.mubr.f32.mxu1 %v16292_v53 }
0x2a02   :  { %12888 = vmatprep.subr.bf16.mxu0 %v16680_v39 }
0x2a05   :  { %12890 = vmatpush3.bf16.msra.mxu0 %v16680_v39 }
0x2a06   :  { %12892 = vmatprep.subr.bf16.mxu0 %v16681_v37 }
0x2a09   :  { %12894 = vmatpush3.bf16.msra.mxu0 %v16681_v37 }
0x2a0a   :  { %12896 = vmatprep.subr.bf16.mxu0 %v16682_v14 }
0x2a0d   :  { %12898 = vmatpush3.bf16.msra.mxu0 %v16682_v14 }
0x2a0e   :  { %12900 = vmatprep.subr.bf16.mxu0 %v14198_v9 }
0x2aab   :  { %v10656_v62 = vpop.f32.mrb[66].mxu0 }
0x2aac   :  { %v10657_v38 = vpop.f32.mrb[67].mxu0 }
0x2aad   :  { %v10658_v24 = vadd.f32 %v10657_v38, %v10656_v62 }
0x2aaf   :  { %v10659_v17 = vpop.f32.mrb[68].mxu0  ;;  %v8094_v39 = vadd.f32 %v10658_v24, %v16683_v30 }
0x2ab0   :  { %v10660_v29 = vpop.f32.mrb[69].mxu0 }
0x2ab1   :  { %v10661_v13 = vadd.f32 %v10660_v29, %v10659_v17 }
0x2ab3   :  { %v8099_v34 = vadd.f32 %v10661_v13, %v16683_v30 }
0x2abb   :  { %v11382_v19 = vpop.f32.mrb[70].mxu0 }
0x2abc   :  { %v8174_v33 = vadd.f32 %v11382_v19, %v8099_v34  ;;  %v8168_v56 = vpop.f32.mrb[71].mxu0 }
0x2abd   :  { %v8169_v37 = vadd.f32 %v8168_v56, %v8094_v39 }
0x2acf   :  { %v8243_v18 = vpop.f32.mrb[86].mxu1  ;;  %v11405_v15 = vpop.f32.mrb[72].mxu0 }
0x2ad0   :  { %v13127_v14 = vadd.f32 %v8243_v18, %v16684_v28  ;;  %v8245_v32 = vpop.f32.mrb[87].mxu1  ;;  %v8320_v58 = vpop.f32.mrb[73].mxu0 }
0x2ad1   :  { %v13128_v62 = vadd.f32 %v8245_v32, %v16685_v50 }
0x2ad2   :  { %v10036_v16 = vmul.f32 -1.442695, %v13127_v14 }
0x2ad3   :  { %v8249_v38 = vpop.f32.mrb[88].mxu1  ;;  %v10038_v19 = vmul.f32 -1.442695, %v13128_v62 }
0x2ad4   :  { %13453 = vpow2.f32 %v10036_v16  ;;  %v13129_v29 = vadd.f32 %v8249_v38, %v16684_v28  ;;  %v8251_v13 = vpop.f32.mrb[89].mxu1  ;;  %v15690_v38 = vld [vmem:[%s15975_s11] ss:$0 sm:$0xff] }
0x2ad5   :  { %v13130_v24 = vadd.f32 %v8251_v13, %v16685_v50  ;;  %v8357_v62 = vadd.f32 %v15690_v38, %v8320_v58 }
0x2ad6   :  { %v10037_v17 = vmul.f32 -1.442695, %v13129_v29 }
0x2ad7   :  { %v10039_v56 = vmul.f32 -1.442695, %v13130_v24  ;;  %v8358_v24 = vadd.f32 %v15690_v38, %v11405_v15 }
0x2ad8   :  { %13455 = vpow2.f32 %v10037_v17 }
0x2ad9   :  { %13457 = vpow2.f32 %v10038_v19 }
0x2ada   :  { %13459 = vpow2.f32 %v10039_v56 }
0x2ade   :  { %v13454_v34 = vpop.eup %13453 }
0x2adf   :  { %v8337_v18 = vadd.f32 1.0, %v13454_v34 }
0x2ae1   :  { %13461 = vrcp.f32 %v8337_v18 }
0x2ae2   :  { %v13456_v39 = vpop.eup %13455 }
0x2ae3   :  { %v8338_v14 = vadd.f32 1.0, %v13456_v39  ;;  %v13458_v30 = vpop.eup %13457 }
0x2ae4   :  { %v13460_v32 = vpop.eup %13459  ;;  %v8351_v16 = vadd.f32 1.0, %v13458_v30 }
0x2ae5   :  { %13463 = vrcp.f32 %v8338_v14  ;;  %v8352_v13 = vadd.f32 1.0, %v13460_v32 }
0x2ae6   :  { %13465 = vrcp.f32 %v8351_v16 }
0x2ae7   :  { %13467 = vrcp.f32 %v8352_v13 }
0x2aeb   :  { %v13462_v29 = vpop.eup %13461 }
0x2aec   :  { %v8359_v17 = vmul.f32 %v13462_v29, %v8357_v62 }
0x2aee   :  { %v8361_v19 = vadd.f32 %v8359_v17, %v8169_v37 }
0x2aef   :  { %v13464_v56 = vpop.eup %13463 }
0x2af0   :  { %13469 = vtanh.f32 %v8361_v19  ;;  %v8360_v34 = vmul.f32 %v13464_v56, %v8358_v24  ;;  %v13466_v30 = vpop.eup %13465  ;;  %v8549_v24 = vpop.permute.xlu1 %8548  ;;  %v15733_v56 = vld [vmem:[%s15979_s15] ss:$0 sm:$0xff] }
0x2af1   :  { %v13468_v39 = vpop.eup %13467  ;;  %v8365_v14 = vsub.f32 1.0, %v13466_v30  ;;  %v8369_v58 = vmul.f32 %v13466_v30, %v15460_v43  ;;  %v15710_v43 = vld [vmem:[%s15978_s14 + $0x20] sm:$0xff] }
0x2af2   :  { %v8362_v18 = vadd.f32 %v8360_v34, %v8174_v33  ;;  %v8366_v51 = vsub.f32 1.0, %v13468_v39  ;;  %v8370_v37 = vmul.f32 %v13468_v39, %v15465_v55  ;;  %v13514_v55 = vld [vmem:[%s15968_s4] sm:$0x3] }
0x2af4   :  { %13471 = vtanh.f32 %v8362_v18  ;;  %v8553_v30 = vpop.permute.xlu1 %8552 }
0x2afa   :  { %v13470_v50 = vpop.eup %13469 }
0x2afb   :  { %v8367_v28 = vmul.f32 %v13470_v50, %v8365_v14  ;;  %v15721_v50 = vld [vmem:[%s15977_s13] ss:$0 sm:$0xff] }
0x2afd   :  { %v15695_v32 = vadd.f32 %v8369_v58, %v8367_v28 }
0x2afe   :  { %v13472_v16 = vpop.eup %13471 }
0x2aff   :  { %11426 = vmatprep.mubr.msk.f32.mxu0 %vm1103_vm3, %v15695_v32  ;;  %v8368_v15 = vmul.f32 %v13472_v16, %v8366_v51  ;;  %v8543_v16 = vpop.permute.xlu1 %8542 }
0x2b01   :  { %v15700_v62 = vadd.f32 %v8370_v37, %v8368_v15  ;;  %v8539_v15 = vpop.permute.xlu0 %8538 }
0x2b03   :  { %11427 = vmatmul.mubr.msk.f32.vlgmr.msra.gmra.mrb[74].mxu0 %vm1103_vm3, %v15700_v62 }
0x2b04   :  { %12902 = vmatpush3.bf16.msra.mxu0 %v14198_v9 }
0x2b05   :  { %12904 = vmatprep.subr.bf16.mxu0 %v14246_v57 }
0x2b08   :  { %12906 = vmatpush3.bf16.msra.mxu0 %v14246_v57 }
0x2b09   :  { %11437 = vmatprep.subr.mxu0 %v15710_v43 }
0x2b0c   :  { %11438 = vmatpush3.msra.mxu0 %v15710_v43 }
0x2b0d   :  { %11442 = vmatprep.subr.msk.mxu0 %vm307_vm0, %v13514_v55 }
0x2bd6   :  { %v11428_v51 = vpop.f32.mrb[74].mxu0 }
0x2bd7   :  { %v8451_v28 = vadd.f32 %v15721_v50, %v11428_v51  ;;  %v8445_v33 = vpop.f32.mrb[75].mxu0 }
0x2bd8   :  { %v8446_v29 = vadd.f32 %v15721_v50, %v8445_v33 }
0x2bd9   :  { %v8455_v17 = vmax.f32 %v8451_v28, 0.0 }
0x2bda   :  { %v8454_v13 = vmax.f32 %v8446_v29, 0.0 }
0x2bdc   :  { %11439 = vmatprep.mubr.msk.f32.mxu0 %vm1389_vm4, %v8454_v13 }
0x2bdd   :  { %11440 = vmatmul.mubr.msk.f32.vlgmr.msra.gmra.mrb[76].mxu0 %vm1389_vm4, %v8455_v17 }
0x2bde   :  { %11443 = vmatpush3.msk.msra.mxu0 %vm307_vm0, %v13514_v55 }
0x2bdf   :  { %11447 = vmatprep.subr.msk.mxu0 %vm307_vm0, %v16379_v22 }
0x2cb0   :  { %v11441_v19 = vpop.f32.mrb[76].mxu0 }
0x2cb1   :  { %v8534_v34 = vadd.f32 %v15733_v56, %v11441_v19  ;;  %v8528_v18 = vpop.f32.mrb[77].mxu0 }
0x2cb2   :  { %v8529_v39 = vadd.f32 %v15733_v56, %v8528_v18 }
0x2cb3   :  { %v8556_v14 = vmul.f32 %v8553_v30, %v8534_v34  ;;  %v8546_v37 = vmul.f32 %v8543_v16, %v8534_v34 }
0x2cb4   :  { %v8555_v58 = vmul.f32 %v8549_v24, %v8529_v39  ;;  %v8545_v51 = vmul.f32 %v8539_v15, %v8529_v39 }
0x2cb5   :  { %8561 = vrot.lane.b32.xlu1 %v8556_v14, %s13548_s30 }
0x2cb6   :  { %8559 = vrot.lane.b32.xlu0 %v8555_v58, %s13548_s30 }
0x2d27   :  { %v8562_v55 = vpop.permute.xlu1 %8561 }
0x2d28   :  { %v8566_v28 = vadd.f32 %v8562_v55, %v8546_v37  ;;  %v8560_v33 = vpop.permute.xlu0 %8559 }
0x2d29   :  { %v8565_v29 = vadd.f32 %v8560_v33, %v8545_v51  ;;  %v10048_v33 = vld [vmem:[%s16251_s20 + $0x70] sm:$0xff] }
0x2d2a   :  { %8571 = vrot.lane.b32.xlu1 %v8566_v28, %s13549_s18 }
0x2d2b   :  { %8569 = vrot.lane.b32.xlu0 %v8565_v29, %s13549_s18 }
0x2d9c   :  { %v8572_v13 = vpop.permute.xlu1 %8571 }
0x2d9d   :  { %v8576_v17 = vadd.f32 %v15521_v1, %v8572_v13  ;;  %v8570_v24 = vpop.permute.xlu0 %8569 }
0x2d9e   :  { %v8575_v19 = vadd.f32 %v8570_v24, %v15528_v8 }
0x2d9f   :  { %v8674_v18 = vsub.f32 %v8576_v17, %v15521_v1  ;;  %8581 = vrot.lane.b32.xlu1 %v8576_v17, %s13548_s30 }
0x2da0   :  { %v8673_v34 = vsub.f32 %v8575_v19, %v15528_v8  ;;  %8579 = vrot.lane.b32.xlu0 %v8575_v19, %s13548_s30 }
0x2da1   :  { %v8676_v30 = vmul.f32 %v8674_v18, %v8674_v18 }
0x2da2   :  { %v8675_v39 = vmul.f32 %v8673_v34, %v8673_v34 }
0x2da3   :  { %8681 = vrot.lane.b32.xlu1 %v8676_v30, %s13548_s30 }
0x2da4   :  { %8679 = vrot.lane.b32.xlu0 %v8675_v39, %s13548_s30 }
0x2e11   :  { %v8582_v14 = vpop.permute.xlu1 %8581 }
0x2e12   :  { %10045 = vst.msk [vmem:[%s15980_s16 + $0x68] sm:$0xff] %vm300_vm1, %v8582_v14  ;;  %v8580_v58 = vpop.permute.xlu0 %8579 }
0x2e13   :  { %10044 = vst.msk [vmem:[%s15980_s16 + $0x60] sm:$0xff] %vm300_vm1, %v8580_v58  ;;  %11444 = vmatprep.mubr.msk.f32.mxu0 %vm300_vm1, %v8580_v58 }
0x2e14   :  { %11445 = vmatmul.mubr.msk.f32.vlgmr.msra.gmra.mrb[78].mxu0 %vm300_vm1, %v8582_v14 }
0x2e15   :  { %v8682_v1 = vpop.permute.xlu1 %8681  ;;  %11448 = vmatpush3.msk.msra.mxu0 %vm307_vm0, %v16379_v22  ;;  %v10049_v22 = vld [vmem:[%s16251_s20 + $0x78] sm:$0xff] }
0x2e16   :  { %v8688_v8 = vsel %vm300_vm1, %v8682_v1, 0.0  ;;  %v8680_v16 = vpop.permute.xlu0 %8679  ;;  %11452 = vmatprep.subr.msk.mxu0 %vm307_vm0, %v13733_v45 }
0x2e17   :  { %v8685_v15 = vsel %vm300_vm1, %v8680_v16, 0.0  ;;  %8689 = vadd.xlane.f32.xlu1 %v8688_v8 }
0x2e18   :  { %8686 = vadd.xlane.f32.xlu0 %v8685_v15 }
0x2ea4   :  { %v8690_v14 = vpop.xlane.xlu1 %8689 }
0x2ea5   :  { %v8687_v37 = vpop.xlane.xlu0 %8686  ;;  %v8692_v58 = vmax.f32 %v8690_v14, 1e-24  ;;  %v16710_v14 = vld [vmem:[#allocation37_spill] sm:$0xff] }
0x2ea6   :  { %v8691_v55 = vmax.f32 %v8687_v37, 1e-24 }
0x2ea8   :  { %13473 = vrsqrt.f32 %v8691_v55 }
0x2ea9   :  { %13475 = vrsqrt.f32 %v8692_v58  ;;  %v16711_v58 = vld [vmem:[#allocation38_spill] sm:$0xff] }
0x2eb2   :  { %v13474_v51 = vpop.eup %13473 }
0x2eb3   :  { %v8695_v28 = vmul.f32 %v13474_v51, %v8673_v34  ;;  %v13476_v1 = vpop.eup %13475 }
0x2eb4   :  { %v8696_v8 = vmul.f32 %v13476_v1, %v8674_v18 }
0x2eb5   :  { %8715 = vrot.lane.b32.xlu1 %v8695_v28, %s13548_s30 }
0x2ee7   :  { %v15772_v29 = vpop.f32.mrb[78].mxu0 }
0x2ee8   :  { %v8698_v13 = vsub.f32 %v10049_v22, %v15772_v29  ;;  %10086 = vst.msk [vmem:[%s15981_s17 + $0x78] sm:$0xff] %vm300_vm1, %v15772_v29  ;;  %v15780_v17 = vpop.f32.mrb[79].mxu0 }
0x2ee9   :  { %v8697_v24 = vsub.f32 %v10048_v33, %v15780_v17  ;;  %10085 = vst.msk [vmem:[%s15981_s17 + $0x70] sm:$0xff] %vm300_vm1, %v15780_v17 }
0x2eea   :  { %v8700_v19 = vmul.f32 %v8698_v13, %v8698_v13 }
0x2eeb   :  { %v8699_v30 = vmul.f32 %v8697_v24, %v8697_v24 }
0x2eec   :  { %v8704_v34 = vsel %vm300_vm1, %v8700_v19, 0.0 }
0x2eed   :  { %8705 = vadd.xlane.f32.xlu0 %v8704_v34  ;;  %v8701_v39 = vsel %vm300_vm1, %v8699_v30, 0.0  ;;  %v16709_v30 = vld [vmem:[#allocation36_spill] sm:$0xff] }
0x2ef1   :  { %8702 = vadd.xlane.f32.xlu0 %v8701_v39 }
0x2f07   :  { %8717 = vrot.lane.b32.xlu0 %v8696_v8, %s13548_s30  ;;  %v16712_v8 = vld [vmem:[#allocation39_spill] sm:$0xff] }
0x2f27   :  { %v8716_v16 = vpop.permute.xlu1 %8715 }
0x2f28   :  { %10055 = vmatmul.mubr.msk.f32.vlgmr.msra.gmra.mrb[90].mxu1 %vm300_vm1, %v8716_v16  ;;  %11449 = vmatprep.mubr.msk.f32.mxu0 %vm300_vm1, %v8716_v16  ;;  %v16713_v16 = vld [vmem:[#allocation40_spill] sm:$0xff] }
0x2f29   :  { %8793 = vmatprep.mubr.f32.mxu1 %v16292_v53  ;;  %10061 = vmatpush1.msk.msra.mxu1 %vm307_vm0, %v13726_v42 }
0x2f2a   :  { %12988 = vmatprep.subr.bf16.mxu1 %v13781_v23 }
0x2f7a   :  { %v8706_v15 = vpop.xlane.xlu0 %8705 }
0x2f7b   :  { %v8708_v37 = vmax.f32 %v8706_v15, 1e-24  ;;  %v16714_v15 = vld [vmem:[#allocation41_spill] sm:$0xff] }
0x2f7d   :  { %13477 = vrsqrt.f32 %v8708_v37  ;;  %v16715_v37 = vld [vmem:[#allocation42_spill] sm:$0xff] }
0x2f7e   :  { %v8703_v55 = vpop.xlane.xlu0 %8702 }
0x2f7f   :  { %v8707_v51 = vmax.f32 %v8703_v55, 1e-24 }
0x2f81   :  { %13479 = vrsqrt.f32 %v8707_v51  ;;  %v16716_v51 = vld [vmem:[#allocation43_spill] sm:$0xff] }
0x2f82   :  { %v8718_v18 = vpop.permute.xlu0 %8717 }
0x2f83   :  { %10056 = vmatmul.mubr.msk.f32.gmra.mrb[92].mxu1 %vm300_vm1, %v8718_v18  ;;  %11450 = vmatmul.mubr.msk.f32.vlgmr.msra.gmra.mrb[80].mxu0 %vm300_vm1, %v8718_v18  ;;  %v16717_v18 = vld [vmem:[#allocation44_spill] sm:$0xff] }
0x2f84   :  { %8945 = vmatprep.mubr.f32.mxu1 %v16292_v53  ;;  %11453 = vmatpush3.msk.msra.mxu0 %vm307_vm0, %v13733_v45  ;;  %v16686_v45 = vld [vmem:[#allocation11_spill] sm:$0xff] }
0x2f85   :  { %12908 = vmatprep.subr.bf16.mxu0 %v13758_v59  ;;  %v16687_v59 = vld [vmem:[#allocation30_spill] sm:$0xff] }
0x2f87   :  { %v13478_v42 = vpop.eup %13477 }
0x2f88   :  { %v8712_v22 = vmul.f32 %v13478_v42, %v8698_v13  ;;  %v16718_v42 = vld [vmem:[#allocation45_spill] sm:$0xff] }
0x2f8b   :  { %v13480_v23 = vpop.eup %13479 }
0x2f8c   :  { %v8711_v28 = vmul.f32 %v13480_v23, %v8697_v24  ;;  %v16708_v24 = vld [vmem:[#allocation35_spill] sm:$0xff] }
0x2f8e   :  { %9726 = vperm.xlu1 %13272, %v8711_v28   ;;  %9716 = vperm.xlu0 %13261, %v8711_v28  }
0x2f8f   :  { %10062 = vmatmul.mubr.msk.f32.vlgmr.msra.gmra.mrb[90].mxu1 %vm300_vm1, %v8711_v28  ;;  %11454 = vmatprep.mubr.msk.f32.mxu0 %vm300_vm1, %v8711_v28  ;;  %v16719_v28 = vld [vmem:[#allocation46_spill] sm:$0xff] }
0x2f90   :  { %11455 = vmatmul.mubr.msk.f32.vlgmr.msra.gmra.mrb[80].mxu0 %vm300_vm1, %v8712_v22  ;;  %8951 = vmatprep.mubr.f32.mxu1 %v16292_v53 }
0x2f91   :  { %12910 = vmatpush1.bf16.msra.mxu0 %v13760_v63  ;;  %12990 = vmatpush3.bf16.msra.mxu1 %v13787_v31  ;;  %v16688_v63 = vld [vmem:[#allocation12_spill] sm:$0xff] }
0x2f92   :  { %9730 = vperm.xlu1 %13272, %v8712_v22   ;;  %12912 = vmatprep.subr.bf16.mxu0 %v13762_v0  ;;  %v16689_v0 = vld [vmem:[#allocation32_spill] sm:$0xff] }
0x2f93   :  { %10063 = vmatmul.mubr.msk.f32.gmra.mrb[92].mxu1 %vm300_vm1, %v8712_v22  ;;  %12992 = vmatprep.subr.bf16.mxu1 %v13789_v36  ;;  %v16696_v31 = vld [vmem:[#allocation20_spill] sm:$0xff]  ;;  %v16697_v36 = vld [vmem:[#allocation21_spill] sm:$0xff] }
0x2f94   :  { %13274 = vset.pattern.permute.xlu0 %v16323_v60 }
0x2f95   :  { %12914 = vmatpush1.bf16.msra.mxu0 %v13766_v5  ;;  %12994 = vmatpush3.bf16.msra.mxu1 %v13795_v47  ;;  %v16690_v5 = vld [vmem:[#allocation13_spill] sm:$0xff]  ;;  %v16699_v47 = vld [vmem:[#allocation23_spill] sm:$0xff] }
0x2f96   :  { %13273 = vset.pattern.permute.xlu1 %v16322_v44  ;;  %12916 = vmatprep.subr.bf16.mxu0 %v13769_v6  ;;  %v16691_v6 = vld [vmem:[#allocation14_spill] sm:$0xff] }
0x2f97   :  { %9720 = vperm.xlu1 %13273, %v8712_v22   ;;  %12996 = vmatprep.subr.bf16.mxu1 %v13801_v54  ;;  %v16701_v54 = vld [vmem:[#allocation25_spill] sm:$0xff]  ;;  %v16720_v22 = vld [vmem:[#allocation47_spill] sm:$0xff] }
0x2f99   :  { %12918 = vmatpush1.bf16.msra.mxu0 %v13773_v11  ;;  %12998 = vmatpush3.bf16.msra.mxu1 %v13807_v2  ;;  %v16692_v11 = vld [vmem:[#allocation15_spill] sm:$0xff] }
0x2f9a   :  { %12920 = vmatprep.subr.bf16.mxu0 %v13776_v12  ;;  %13000 = vmatprep.subr.bf16.mxu1 %v13813_v7  ;;  %v16693_v12 = vld [vmem:[#allocation17_spill] sm:$0xff]  ;;  %v16703_v2 = vld [vmem:[#allocation27_spill] sm:$0xff] }
0x2f9b   :  { %v16705_v7 = vld [vmem:[#allocation31_spill] sm:$0xff] }
0x2f9d   :  { %12922 = vmatpush1.bf16.msra.mxu0 %v13779_v21  ;;  %13002 = vmatpush3.bf16.msra.mxu1 %v13819_v20  ;;  %v16694_v21 = vld [vmem:[#allocation18_spill] sm:$0xff] }
0x2f9e   :  { %12924 = vmatprep.subr.bf16.mxu0 %v13784_v25  ;;  %13004 = vmatprep.subr.bf16.mxu1 %v13825_v26  ;;  %v16695_v25 = vld [vmem:[#allocation19_spill] sm:$0xff]  ;;  %v16706_v26 = vld [vmem:[#allocation33_spill] sm:$0xff] }
0x2fa1   :  { %12926 = vmatpush1.bf16.msra.mxu0 %v13792_v41  ;;  %13006 = vmatpush3.bf16.msra.mxu1 %v13831_v48  ;;  %v16698_v41 = vld [vmem:[#allocation22_spill] sm:$0xff] }
0x2fa2   :  { %12928 = vmatprep.subr.bf16.mxu0 %v13798_v49  ;;  %13008 = vmatprep.subr.bf16.mxu1 %v13837_v52  ;;  %v16700_v49 = vld [vmem:[#allocation24_spill] sm:$0xff] }
0x2fa5   :  { %12930 = vmatpush1.bf16.msra.mxu0 %v13804_v61  ;;  %13010 = vmatpush3.bf16.msra.mxu1 %v13843_v4  ;;  %v16702_v61 = vld [vmem:[#allocation26_spill] sm:$0xff] }
0x2fa6   :  { %12932 = vmatprep.subr.bf16.mxu0 %v13810_v3  ;;  %13012 = vmatprep.subr.bf16.mxu1 %v13849_v10  ;;  %v16704_v3 = vld [vmem:[#allocation29_spill] sm:$0xff]  ;;  %v16707_v10 = vld [vmem:[#allocation34_spill] sm:$0xff] }
0x2fa9   :  { %12934 = vmatpush1.bf16.msra.mxu0 %v16623_v46  ;;  %13014 = vmatpush3.bf16.msra.mxu1 %v16624_v35 }
0x2faa   :  { %12936 = vmatprep.subr.bf16.mxu0 %v16625_v27  ;;  %13016 = vmatprep.subr.bf16.mxu1 %v16626_v40 }
0x2fad   :  { %12938 = vmatpush1.bf16.msra.mxu0 %v16686_v45  ;;  %13018 = vmatpush3.bf16.msra.mxu1 %v16687_v59  ;;  %v16721_v45 = vld [vmem:[#allocation48_spill] sm:$0xff]  ;;  %v16722_v59 = vld [vmem:[#allocation49_spill] sm:$0xff] }
0x2fae   :  { %12940 = vmatprep.subr.bf16.mxu0 %v16688_v63  ;;  %13020 = vmatprep.subr.bf16.mxu1 %v16689_v0  ;;  %v16723_v63 = vld [vmem:[#allocation50_spill] sm:$0xff] }
0x2fb1   :  { %12942 = vmatpush1.bf16.msra.mxu0 %v16690_v5  ;;  %v16725_v5 = vld [vmem:[#allocation52_spill] sm:$0xff] }
0x2fb2   :  { %12944 = vmatprep.subr.bf16.mxu0 %v16691_v6  ;;  %v16726_v6 = vld [vmem:[#allocation53_spill] sm:$0xff] }
0x2fb5   :  { %12946 = vmatpush1.bf16.msra.mxu0 %v16692_v11  ;;  %v16727_v11 = vld [vmem:[#allocation54_spill] sm:$0xff] }
0x2fb6   :  { %12948 = vmatprep.subr.bf16.mxu0 %v16693_v12  ;;  %v16728_v12 = vld [vmem:[#allocation55_spill] sm:$0xff] }
0x2fb9   :  { %12950 = vmatpush1.bf16.msra.mxu0 %v16694_v21  ;;  %v16729_v21 = vld [vmem:[#allocation56_spill] sm:$0xff] }
0x2fba   :  { %12952 = vmatprep.subr.bf16.mxu0 %v16695_v25  ;;  %v16730_v25 = vld [vmem:[#allocation57_spill] sm:$0xff] }
0x2fbd   :  { %12954 = vmatpush1.bf16.msra.mxu0 %v16696_v31  ;;  %v16731_v31 = vld [vmem:[#allocation58_spill] sm:$0xff] }
0x2fbe   :  { %12956 = vmatprep.subr.bf16.mxu0 %v16697_v36  ;;  %v16732_v36 = vld [vmem:[#allocation59_spill] sm:$0xff] }
0x2fc1   :  { %12958 = vmatpush1.bf16.msra.mxu0 %v16698_v41  ;;  %v16733_v41 = vld [vmem:[#allocation60_spill] sm:$0xff] }
0x2fc2   :  { %12960 = vmatprep.subr.bf16.mxu0 %v16699_v47  ;;  %v16734_v47 = vld [vmem:[#allocation61_spill] sm:$0xff] }
0x2fc5   :  { %12962 = vmatpush1.bf16.msra.mxu0 %v16700_v49  ;;  %v16735_v49 = vld [vmem:[#allocation62_spill] sm:$0xff] }
0x2fc6   :  { %12964 = vmatprep.subr.bf16.mxu0 %v16701_v54  ;;  %v16736_v54 = vld [vmem:[#allocation63_spill] sm:$0xff] }
0x2fc9   :  { %12966 = vmatpush1.bf16.msra.mxu0 %v16702_v61  ;;  %v16737_v61 = vld [vmem:[#allocation64_spill] sm:$0xff] }
0x2fca   :  { %12968 = vmatprep.subr.bf16.mxu0 %v16703_v2  ;;  %v16738_v2 = vld [vmem:[#allocation65_spill] sm:$0xff] }
0x2fcd   :  { %12970 = vmatpush1.bf16.msra.mxu0 %v16704_v3 }
0x2fce   :  { %12972 = vmatprep.subr.bf16.mxu0 %v16705_v7 }
0x3062   :  { %v8947_v20 = vpop.f32.mrb[90].mxu1 }
0x3063   :  { %v9033_v48 = vadd.f32 %v8947_v20, %v16706_v26  ;;  %v8949_v52 = vpop.f32.mrb[91].mxu1  ;;  %v11456_v4 = vpop.f32.mrb[80].mxu0 }
0x3064   :  { %v9034_v44 = vadd.f32 %v8949_v52, %v16707_v10  ;;  %v9024_v60 = vpop.f32.mrb[81].mxu0  ;;  %v9038_v55 = vadd.f32 %v11456_v4, %v16708_v24  ;;  %v16739_v52 = vld [vmem:[#allocation66_spill] sm:$0xff] }
0x3065   :  { %v9039_v27 = vmax.f32 %v9033_v48, 0.0  ;;  %v9035_v19 = vadd.f32 %v9024_v60, %v16708_v24 }
0x3066   :  { %v9040_v46 = vmax.f32 %v9034_v44, 0.0  ;;  %v8953_v35 = vpop.f32.mrb[92].mxu1  ;;  %v9044_v23 = vmax.f32 %v9038_v55, 0.0 }
0x3067   :  { %v9036_v40 = vadd.f32 %v8953_v35, %v16706_v26  ;;  %v8955_v33 = vpop.f32.mrb[93].mxu1  ;;  %v9041_v1 = vmax.f32 %v9035_v19, 0.0 }
0x3068   :  { %v9037_v13 = vadd.f32 %v8955_v33, %v16707_v10  ;;  %9115 = vmatprep.mubr.f32.mxu0 %v9040_v46  ;;  %9269 = vmatprep.mubr.f32.mxu1 %v9040_v46  ;;  %v16740_v33 = vld [vmem:[#allocation67_spill] sm:$0xff] }
0x3069   :  { %9116 = vmatmul.mubr.f32.vlgmr.msra.gmra.mrb[82].mxu0 %v9039_v27  ;;  %9270 = vmatmul.mubr.f32.vlgmr.msra.gmra.mrb[94].mxu1 %v9039_v27  ;;  %v9042_v39 = vmax.f32 %v9036_v40, 0.0 }
0x306a   :  { %v9043_v34 = vmax.f32 %v9037_v13, 0.0  ;;  %12974 = vmatpush1.bf16.msra.mxu0 %v16709_v30  ;;  %13022 = vmatpush3.bf16.msra.mxu1 %v16689_v0  ;;  %v16724_v0 = vld [vmem:[#allocation51_spill] sm:$0xff]  ;;  %v16741_v30 = vld [vmem:[#allocation68_spill] sm:$0xff] }
0x306b   :  { %12976 = vmatprep.subr.bf16.mxu0 %v16710_v14  ;;  %13024 = vmatprep.subr.bf16.mxu1 %v16711_v58 }
0x306c   :  { %9121 = vmatprep.mubr.f32.mxu0 %v9043_v34  ;;  %9274 = vmatprep.mubr.f32.mxu1 %v9043_v34 }
0x306d   :  { %9122 = vmatmul.mubr.f32.gmra.mrb[84].mxu0 %v9042_v39  ;;  %9275 = vmatmul.mubr.f32.gmra.mrb[96].mxu1 %v9042_v39 }
0x306e   :  { %12978 = vmatpush1.bf16.msra.mxu0 %v16712_v8  ;;  %13026 = vmatpush3.bf16.msra.mxu1 %v16711_v58 }
0x306f   :  { %11473 = vmatprep.mubr.msk.f32.mxu1 %vm792_vm2, %v9041_v1  ;;  %12980 = vmatprep.subr.bf16.mxu0 %v16713_v16 }
0x3070   :  { %13028 = vmatprep.subr.bf16.mxu1 %v16714_v15  ;;  %9192 = vmatprep.mubr.f32.mxu0 %v16292_v53 }
0x3072   :  { %12982 = vmatpush1.bf16.msra.mxu0 %v16715_v37  ;;  %13030 = vmatpush3.bf16.msra.mxu1 %v16714_v15 }
0x3073   :  { %12984 = vmatprep.subr.bf16.mxu0 %v16716_v51  ;;  %13032 = vmatprep.subr.bf16.mxu1 %v16717_v18 }
0x3076   :  { %12986 = vmatpush1.bf16.msra.mxu0 %v16718_v42  ;;  %13034 = vmatpush3.bf16.msra.mxu1 %v16717_v18 }
0x3077   :  { %13036 = vmatprep.subr.bf16.mxu0 %v16719_v28  ;;  %13056 = vmatprep.subr.bf16.mxu1 %v16720_v22 }
0x3079   :  { %10067 = vmatmul.mubr.msk.f32.vlgmr.msra.gmra.mrb[82].mxu0 %vm792_vm2, %v9041_v1  ;;  %11474 = vmatmul.mubr.msk.f32.vlgmr.msra.gmra.mrb[98].mxu1 %vm792_vm2, %v9044_v23 }
0x307a   :  { %13038 = vmatpush1.bf16.msra.mxu0 %v16721_v45  ;;  %13058 = vmatpush3.bf16.msra.mxu1 %v16720_v22 }
0x307b   :  { %11496 = vmatprep.mubr.msk.f32.mxu1 %vm1103_vm3, %v15695_v32  ;;  %9198 = vmatprep.mubr.f32.mxu0 %v16292_v53 }
0x307c   :  { %13040 = vmatprep.subr.bf16.mxu0 %v16722_v59  ;;  %13060 = vmatprep.subr.bf16.mxu1 %v16723_v63 }
0x307d   :  { %10068 = vmatmul.mubr.msk.f32.gmra.mrb[84].mxu0 %vm792_vm2, %v9044_v23 }
0x307e   :  { %13042 = vmatpush1.bf16.msra.mxu0 %v16724_v0  ;;  %13062 = vmatpush3.bf16.msra.mxu1 %v16723_v63 }
0x307f   :  { %13044 = vmatprep.subr.bf16.mxu0 %v16725_v5  ;;  %13064 = vmatprep.subr.bf16.mxu1 %v16726_v6 }
0x3080   :  { %9419 = vmatprep.mubr.f32.mxu0 %v16292_v53 }
0x3082   :  { %13046 = vmatpush1.bf16.msra.mxu0 %v16727_v11  ;;  %13066 = vmatpush3.bf16.msra.mxu1 %v16726_v6 }
0x3083   :  { %13048 = vmatprep.subr.bf16.mxu0 %v16728_v12  ;;  %13068 = vmatprep.subr.bf16.mxu1 %v16729_v21 }
0x3086   :  { %13050 = vmatpush1.bf16.msra.mxu0 %v16730_v25  ;;  %13070 = vmatpush3.bf16.msra.mxu1 %v16729_v21 }
0x3087   :  { %13052 = vmatprep.subr.bf16.mxu0 %v16731_v31  ;;  %13072 = vmatprep.subr.bf16.mxu1 %v16732_v36 }
0x308a   :  { %13054 = vmatpush1.bf16.msra.mxu0 %v16733_v41  ;;  %13074 = vmatpush3.bf16.msra.mxu1 %v16732_v36 }
0x308b   :  { %13076 = vmatprep.subr.bf16.mxu1 %v16734_v47 }
0x308d   :  { %10071 = vmatmul.mubr.msk.f32.vlgmr.msra.gmra.mrb[82].mxu0 %vm1103_vm3, %v15695_v32  ;;  %11497 = vmatmul.mubr.msk.f32.vlgmr.msra.gmra.mrb[100].mxu1 %vm1103_vm3, %v15700_v62 }
0x308e   :  { %9425 = vmatprep.mubr.f32.mxu0 %v16292_v53  ;;  %13078 = vmatpush3.bf16.msra.mxu1 %v16734_v47 }
0x308f   :  { %13080 = vmatprep.subr.bf16.mxu1 %v16735_v49 }
0x3091   :  { %10072 = vmatmul.mubr.msk.f32.gmra.mrb[84].mxu0 %vm1103_vm3, %v15700_v62 }
0x3092   :  { %13082 = vmatpush3.bf16.msra.mxu1 %v16735_v49 }
0x3093   :  { %13084 = vmatprep.subr.bf16.mxu1 %v16736_v54 }
0x3096   :  { %13086 = vmatpush3.bf16.msra.mxu1 %v16736_v54 }
0x3097   :  { %13088 = vmatprep.subr.bf16.mxu1 %v16737_v61 }
0x309a   :  { %13090 = vmatpush3.bf16.msra.mxu1 %v16737_v61 }
0x309b   :  { %13092 = vmatprep.subr.bf16.mxu1 %v16738_v2 }
0x309e   :  { %13094 = vmatpush3.bf16.msra.mxu1 %v16738_v2 }
0x309f   :  { %13096 = vmatprep.subr.bf16.mxu1 %v14198_v9 }
0x313c   :  { %v10744_v53 = vpop.f32.mrb[94].mxu1 }
0x313d   :  { %v10745_v3 = vpop.f32.mrb[95].mxu1 }
0x313e   :  { %v10746_v7 = vadd.f32 %v10745_v3, %v10744_v53 }
0x3140   :  { %v10747_v20 = vpop.f32.mrb[96].mxu1  ;;  %v9272_v44 = vadd.f32 %v10746_v7, %v16739_v52 }
0x3141   :  { %v10748_v26 = vpop.f32.mrb[97].mxu1 }
0x3142   :  { %v10749_v48 = vadd.f32 %v10748_v26, %v10747_v20 }
0x3144   :  { %v9277_v4 = vadd.f32 %v10749_v48, %v16739_v52 }
0x314c   :  { %v11475_v10 = vpop.f32.mrb[98].mxu1 }
0x314d   :  { %v9352_v60 = vadd.f32 %v11475_v10, %v9277_v4  ;;  %v9346_v46 = vpop.f32.mrb[99].mxu1 }
0x314e   :  { %v9347_v35 = vadd.f32 %v9346_v46, %v9272_v44  ;;  %v9717_v46 = vpop.permute.xlu0 %9716 }
0x3160   :  { %v9421_v27 = vpop.f32.mrb[82].mxu0  ;;  %v11498_v40 = vpop.f32.mrb[100].mxu1 }
0x3161   :  { %v13131_v13 = vadd.f32 %v9421_v27, %v16740_v33  ;;  %v9423_v24 = vpop.f32.mrb[83].mxu0  ;;  %v9498_v19 = vpop.f32.mrb[101].mxu1  ;;  %v9536_v5 = vadd.f32 %v15690_v38, %v11498_v40 }
0x3162   :  { %v13132_v39 = vadd.f32 %v9423_v24, %v16741_v30  ;;  %v9535_v45 = vadd.f32 %v15690_v38, %v9498_v19 }
0x3163   :  { %v10075_v34 = vmul.f32 -1.442695, %v13131_v13 }
0x3164   :  { %v9427_v14 = vpop.f32.mrb[84].mxu0  ;;  %v10077_v15 = vmul.f32 -1.442695, %v13132_v39 }
0x3165   :  { %13481 = vpow2.f32 %v10075_v34  ;;  %v13133_v58 = vadd.f32 %v9427_v14, %v16740_v33  ;;  %v9429_v1 = vpop.f32.mrb[85].mxu0 }
0x3166   :  { %v13134_v16 = vadd.f32 %v9429_v1, %v16741_v30 }
0x3167   :  { %v10076_v8 = vmul.f32 -1.442695, %v13133_v58 }
0x3168   :  { %v10078_v37 = vmul.f32 -1.442695, %v13134_v16 }
0x3169   :  { %13483 = vpow2.f32 %v10076_v8 }
0x316a   :  { %13485 = vpow2.f32 %v10077_v15 }
0x316b   :  { %13487 = vpow2.f32 %v10078_v37 }
0x316f   :  { %v13482_v55 = vpop.eup %13481 }
0x3170   :  { %v9515_v51 = vadd.f32 1.0, %v13482_v55 }
0x3172   :  { %13489 = vrcp.f32 %v9515_v51 }
0x3173   :  { %v13484_v18 = vpop.eup %13483 }
0x3174   :  { %v9516_v42 = vadd.f32 1.0, %v13484_v18  ;;  %v13486_v23 = vpop.eup %13485 }
0x3175   :  { %v13488_v28 = vpop.eup %13487  ;;  %v9529_v22 = vadd.f32 1.0, %v13486_v23 }
0x3176   :  { %13491 = vrcp.f32 %v9516_v42  ;;  %v9530_v63 = vadd.f32 1.0, %v13488_v28 }
0x3177   :  { %13493 = vrcp.f32 %v9529_v22 }
0x3178   :  { %13495 = vrcp.f32 %v9530_v63 }
0x317c   :  { %v13490_v59 = vpop.eup %13489 }
0x317d   :  { %v9537_v0 = vmul.f32 %v13490_v59, %v9535_v45 }
0x317f   :  { %v9539_v6 = vadd.f32 %v9537_v0, %v9347_v35 }
0x3180   :  { %v13492_v11 = vpop.eup %13491 }
0x3181   :  { %13497 = vtanh.f32 %v9539_v6  ;;  %v9538_v12 = vmul.f32 %v13492_v11, %v9536_v5  ;;  %v13494_v25 = vpop.eup %13493 }
0x3182   :  { %v13496_v31 = vpop.eup %13495  ;;  %v9543_v36 = vsub.f32 1.0, %v13494_v25  ;;  %v9547_v49 = vmul.f32 %v13494_v25, %v15695_v32 }
0x3183   :  { %v9540_v21 = vadd.f32 %v9538_v12, %v9352_v60  ;;  %v9544_v54 = vsub.f32 1.0, %v13496_v31  ;;  %v9548_v53 = vmul.f32 %v13496_v31, %v15700_v62 }
0x3185   :  { %13499 = vtanh.f32 %v9540_v21 }
0x318b   :  { %v13498_v41 = vpop.eup %13497 }
0x318c   :  { %v9545_v47 = vmul.f32 %v13498_v41, %v9543_v36 }
0x318e   :  { %v9549_v61 = vadd.f32 %v9547_v49, %v9545_v47 }
0x318f   :  { %v13500_v2 = vpop.eup %13499 }
0x3190   :  { %11519 = vmatprep.mubr.msk.f32.mxu1 %vm1103_vm3, %v9549_v61  ;;  %v9546_v38 = vmul.f32 %v13500_v2, %v9544_v54 }
0x3192   :  { %v9550_v3 = vadd.f32 %v9548_v53, %v9546_v38 }
0x3194   :  { %11520 = vmatmul.mubr.msk.f32.vlgmr.msra.gmra.mrb[102].mxu1 %vm1103_vm3, %v9550_v3 }
0x3195   :  { %13098 = vmatpush3.bf16.msra.mxu1 %v14198_v9  ;;  %v9727_v9 = vpop.permute.xlu1 %9726 }
0x3196   :  { %13100 = vmatprep.subr.bf16.mxu1 %v14246_v57 }
0x3199   :  { %13102 = vmatpush3.bf16.msra.mxu1 %v14246_v57  ;;  %v9731_v10 = vpop.permute.xlu1 %9730 }
0x319a   :  { %11530 = vmatprep.subr.mxu1 %v15710_v43 }
0x319d   :  { %11531 = vmatpush3.msra.mxu1 %v15710_v43 }
0x3267   :  { %v11521_v32 = vpop.f32.mrb[102].mxu1 }
0x3268   :  { %v9629_v7 = vadd.f32 %v15721_v50, %v11521_v32  ;;  %v9623_v20 = vpop.f32.mrb[103].mxu1 }
0x3269   :  { %v9624_v26 = vadd.f32 %v15721_v50, %v9623_v20  ;;  %v9721_v50 = vpop.permute.xlu1 %9720 }
0x326a   :  { %v9633_v48 = vmax.f32 %v9629_v7, 0.0 }
0x326b   :  { %v9632_v62 = vmax.f32 %v9624_v26, 0.0 }
0x326d   :  { %11532 = vmatprep.mubr.msk.f32.mxu1 %vm1389_vm4, %v9632_v62 }
0x326e   :  { %11533 = vmatmul.mubr.msk.f32.vlgmr.msra.gmra.mrb[104].mxu1 %vm1389_vm4, %v9633_v48 }
0x3341   :  { %v11534_v52 = vpop.f32.mrb[104].mxu1 }
0x3342   :  { %v9712_v57 = vadd.f32 %v15733_v56, %v11534_v52  ;;  %v9706_v4 = vpop.f32.mrb[105].mxu1 }
0x3343   :  { %v9707_v43 = vadd.f32 %v15733_v56, %v9706_v4 }
0x3344   :  { %v9734_v44 = vmul.f32 %v9731_v10, %v9712_v57  ;;  %v9724_v35 = vmul.f32 %v9721_v50, %v9712_v57 }
0x3345   :  { %v9733_v60 = vmul.f32 %v9727_v9, %v9707_v43  ;;  %v9723_v40 = vmul.f32 %v9717_v46, %v9707_v43 }
0x3346   :  { %9739 = vrot.lane.b32.xlu1 %v9734_v44, %s13548_s30 }
0x3347   :  { %9737 = vrot.lane.b32.xlu0 %v9733_v60, %s13548_s30 }
0x33b8   :  { %v9740_v27 = vpop.permute.xlu1 %9739 }
0x33b9   :  { %v9744_v33 = vadd.f32 %v9740_v27, %v9724_v35  ;;  %v9738_v13 = vpop.permute.xlu0 %9737 }
0x33ba   :  { %v9743_v24 = vadd.f32 %v9738_v13, %v9723_v40 }
0x33bb   :  { %9749 = vrot.lane.b32.xlu1 %v9744_v33, %s13549_s18 }
0x33bc   :  { %9747 = vrot.lane.b32.xlu0 %v9743_v24, %s13549_s18 }
0x342d   :  { %v9750_v19 = vpop.permute.xlu1 %9749 }
0x342e   :  { %v9754_v56 = vadd.f32 %v15772_v29, %v9750_v19  ;;  %v9748_v34 = vpop.permute.xlu0 %9747 }
0x342f   :  { %v9753_v30 = vadd.f32 %v9748_v34, %v15780_v17 }
0x3430   :  { %9759 = vrot.lane.b32.xlu1 %v9754_v56, %s13548_s30 }
0x3431   :  { %9757 = vrot.lane.b32.xlu0 %v9753_v30, %s13548_s30 }
0x34a2   :  { %v9760_v39 = vpop.permute.xlu1 %9759 }
0x34a3   :  { %10084 = vst.msk [vmem:[%s15980_s16 + $0x78] sm:$0xff] %vm300_vm1, %v9760_v39  ;;  %v9758_v14 = vpop.permute.xlu0 %9757 }
0x34a4   :  { %10083 = vst.msk [vmem:[%s15980_s16 + $0x70] sm:$0xff] %vm300_vm1, %v9758_v14 }
0x34a5   :  { %9777 = vsyncpa [#allocation3], 1 }

</bundles_post_ra>
